<compile_context>
chip_gen: v5e
topology: v5e:2x2
jax: 0.10.0
libtpu: 0.0.40
codegen_flags: <defaults>
</compile_context>

<pallas_src>
import functools
import math

import numpy as np
import jax
import jax.numpy as jnp
from jax.experimental import pallas as pl
from jax.experimental.pallas import tpu as pltpu

_LN_EPS = 1e-5
_BN_EPS = 1e-5


def _round_up(x, m):
    return (x + m - 1) // m * m


def _vmem_limit_bytes():
    # 64 MiB on 128-MiB parts (v5e/v6e), 32 MiB on v7x (64 MiB/TC).
    try:
        cap = int(pltpu.get_tpu_info().vmem_capacity_bytes)
    except Exception:
        cap = 128 * 1024 * 1024
    return int(min(64 * 1024 * 1024, cap // 2))


_VMEM_LIMIT = _vmem_limit_bytes()


def _choose_tm(M):
    # Aim for >=2 grid steps (v7x dual-TC + DMA/compute overlap) while keeping
    # tiles big enough to amortize per-step overhead.
    tm = _round_up(max(8, (M + 1) // 2), 8)
    return min(tm, 256)


def _choose_wb(B_, nW):
    # Windows per grid step: multiple of nW (so the constant bias+mask tile is
    # grid-invariant), >=2 grid steps whenever possible.
    wb = _round_up(max(1, (B_ + 1) // 2), nW)
    return min(wb, _round_up(B_, nW))


# ----------------------------- Pallas kernels --------------------------------

def _mm_kernel(*refs, act, fuse_in_ln, fuse_out_ln, fuse_head):
    refs = list(refs)
    o_ref = refs.pop()
    it = iter(refs)
    x_ref = next(it); w_ref = next(it); scale_ref = next(it); bias_ref = next(it)
    g_ref = b_ref = og_ref = ob_ref = w2_ref = b2_ref = None
    if fuse_in_ln:
        g_ref = next(it); b_ref = next(it)
    if fuse_out_ln:
        og_ref = next(it); ob_ref = next(it)
    if fuse_head:
        w2_ref = next(it); b2_ref = next(it)

    x = x_ref[...].astype(jnp.float32)
    if fuse_in_ln:  # fused pre-LayerNorm over K (feature) axis, f32 stats
        mu = jnp.mean(x, axis=-1, keepdims=True)
        var = jnp.mean((x - mu) ** 2, axis=-1, keepdims=True)
        x = (x - mu) * jax.lax.rsqrt(var + _LN_EPS) * g_ref[...] + b_ref[...]
    y = jnp.dot(x.astype(jnp.bfloat16), w_ref[...],
                preferred_element_type=jnp.float32)
    y = y * scale_ref[...] + bias_ref[...]
    if act == "relu":
        y = jnp.maximum(y, 0.0)
    elif act == "gelu":  # exact (erf) GELU, matching torch.nn.GELU default
        y = 0.5 * y * (1.0 + jax.lax.erf(y * 0.7071067811865476))
    if fuse_out_ln:  # fused post-LayerNorm over output features
        mu = jnp.mean(y, axis=-1, keepdims=True)
        var = jnp.mean((y - mu) ** 2, axis=-1, keepdims=True)
        y = (y - mu) * jax.lax.rsqrt(var + _LN_EPS) * og_ref[...] + ob_ref[...]
    if fuse_head:    # fused second matmul (e.g. final 1x1 conv)
        y = jnp.dot(y.astype(jnp.bfloat16), w2_ref[...],
                    preferred_element_type=jnp.float32) + b2_ref[...]
    o_ref[...] = y.astype(o_ref.dtype)


def pallas_matmul(x, w, bias=None, scale=None, act="none",
                  ln_gamma=None, ln_beta=None,
                  out_ln_gamma=None, out_ln_beta=None,
                  head_w=None, head_b=None,
                  out_dtype=jnp.bfloat16):
    """y = head?(out_LN?(act((in_LN?(x) @ w) * scale + bias)))."""
    M, K = x.shape
    Kw, N = w.shape
    assert K == Kw
    x = x.astype(jnp.bfloat16)             # bf16 on the wire
    w = w.astype(jnp.bfloat16)             # params are jit constants -> folded
    if bias is None:
        bias = jnp.zeros((N,), jnp.float32)
    if scale is None:
        scale = jnp.ones((N,), jnp.float32)
    bias = bias.reshape(1, N).astype(jnp.float32)
    scale = scale.reshape(1, N).astype(jnp.float32)

    tm = _choose_tm(M)
    Mp = _round_up(M, tm)
    xp = x if Mp == M else jnp.pad(x, ((0, Mp - M), (0, 0)))

    fuse_in_ln = ln_gamma is not None
    fuse_out_ln = out_ln_gamma is not None
    fuse_head = head_w is not None

    in_specs = [
        pl.BlockSpec((tm, K), lambda i: (i, 0)),
        pl.BlockSpec((K, N), lambda i: (0, 0)),
        pl.BlockSpec((1, N), lambda i: (0, 0)),
        pl.BlockSpec((1, N), lambda i: (0, 0)),
    ]
    args = [xp, w, scale, bias]
    if fuse_in_ln:
        in_specs += [pl.BlockSpec((1, K), lambda i: (0, 0))] * 2
        args += [ln_gamma.reshape(1, K).astype(jnp.float32),
                 ln_beta.reshape(1, K).astype(jnp.float32)]
    if fuse_out_ln:
        in_specs += [pl.BlockSpec((1, N), lambda i: (0, 0))] * 2
        args += [out_ln_gamma.reshape(1, N).astype(jnp.float32),
                 out_ln_beta.reshape(1, N).astype(jnp.float32)]
    N_out = N
    if fuse_head:
        N_out = head_w.shape[1]
        if head_b is None:
            head_b = jnp.zeros((N_out,), jnp.float32)
        in_specs += [pl.BlockSpec((N, N_out), lambda i: (0, 0)),
                     pl.BlockSpec((1, N_out), lambda i: (0, 0))]
        args += [head_w.astype(jnp.bfloat16),
                 head_b.reshape(1, N_out).astype(jnp.float32)]

    out = pl.pallas_call(
        functools.partial(_mm_kernel, act=act, fuse_in_ln=fuse_in_ln,
                          fuse_out_ln=fuse_out_ln, fuse_head=fuse_head),
        out_shape=jax.ShapeDtypeStruct((Mp, N_out), out_dtype),
        grid=(Mp // tm,),
        in_specs=in_specs,
        out_specs=pl.BlockSpec((tm, N_out), lambda i: (i, 0)),
        compiler_params=pltpu.CompilerParams(
            dimension_semantics=("parallel",),
            vmem_limit_bytes=_VMEM_LIMIT),
    )(*args)
    return out[:M]


def _ln_kernel(x_ref, g_ref, b_ref, o_ref):
    x = x_ref[...].astype(jnp.float32)
    mu = jnp.mean(x, axis=-1, keepdims=True)
    var = jnp.mean((x - mu) ** 2, axis=-1, keepdims=True)
    inv = jax.lax.rsqrt(var + _LN_EPS)
    o_ref[...] = ((x - mu) * inv * g_ref[...] + b_ref[...]).astype(o_ref.dtype)


def pallas_layernorm(x, gamma, beta):
    M, C = x.shape
    x = x.astype(jnp.bfloat16)
    g = gamma.reshape(1, C).astype(jnp.float32)
    b = beta.reshape(1, C).astype(jnp.float32)
    tm = _choose_tm(M)
    Mp = _round_up(M, tm)
    xp = x if Mp == M else jnp.pad(x, ((0, Mp - M), (0, 0)))
    out = pl.pallas_call(
        _ln_kernel,
        out_shape=jax.ShapeDtypeStruct((Mp, C), jnp.bfloat16),
        grid=(Mp // tm,),
        in_specs=[
            pl.BlockSpec((tm, C), lambda i: (i, 0)),
            pl.BlockSpec((1, C), lambda i: (0, 0)),
            pl.BlockSpec((1, C), lambda i: (0, 0)),
        ],
        out_specs=pl.BlockSpec((tm, C), lambda i: (i, 0)),
        compiler_params=pltpu.CompilerParams(
            dimension_semantics=("parallel",),
            vmem_limit_bytes=_VMEM_LIMIT),
    )(xp, g, b)
    return out[:M]


def _fused_attn_kernel(*refs, nH, fuse_ln):
    # Fused: (LN?) -> qkv matmul -> per-head softmax(QK^T + bias+mask) V -> proj.
    if fuse_ln:
        (x_ref, qkvw_ref, qkvb_ref, bm_ref, pw_ref, pb_ref,
         g_ref, b_ref, o_ref) = refs
    else:
        x_ref, qkvw_ref, qkvb_ref, bm_ref, pw_ref, pb_ref, o_ref = refs
        g_ref = b_ref = None
    WB, N, C = x_ref.shape
    Dh = C // nH

    x = x_ref[...].astype(jnp.float32)
    if fuse_ln:
        mu = jnp.mean(x, axis=-1, keepdims=True)
        var = jnp.mean((x - mu) ** 2, axis=-1, keepdims=True)
        x = (x - mu) * jax.lax.rsqrt(var + _LN_EPS) * g_ref[...] + b_ref[...]

    xb = x.astype(jnp.bfloat16).reshape(WB * N, C)
    qkv = jnp.dot(xb, qkvw_ref[...], preferred_element_type=jnp.float32)
    qkv = qkv + qkvb_ref[...]                        # (WB*N, 3C)
    qkv = qkv.reshape(WB, N, 3 * C)

    bm = bm_ref[...]                                  # (WB, nH, N, N) f32
    heads = []
    for h in range(nH):                               # nH is tiny & static
        q = qkv[:, :, h * Dh:(h + 1) * Dh].astype(jnp.bfloat16)
        k = qkv[:, :, C + h * Dh:C + (h + 1) * Dh].astype(jnp.bfloat16)
        v = qkv[:, :, 2 * C + h * Dh:2 * C + (h + 1) * Dh].astype(jnp.bfloat16)
        s = jnp.einsum("wnd,wmd->wnm", q, k,
                       preferred_element_type=jnp.float32)
        s = s + bm[:, h]                              # rel-pos bias (+ shift mask)
        s = s - jnp.max(s, axis=-1, keepdims=True)
        p = jnp.exp(s)
        inv = pl.reciprocal(jnp.sum(p, axis=-1, keepdims=True), approx=True)
        p = (p * inv).astype(jnp.bfloat16)
        heads.append(jnp.einsum("wnm,wmd->wnd", p, v,
                                preferred_element_type=jnp.float32))
    o = jnp.concatenate(heads, axis=-1)               # (WB, N, C) lane-dense
    o = o.astype(jnp.bfloat16).reshape(WB * N, C)
    o = jnp.dot(o, pw_ref[...], preferred_element_type=jnp.float32) + pb_ref[...]
    o_ref[...] = o.reshape(WB, N, C).astype(o_ref.dtype)


def pallas_fused_window_attention(xw, bm, p, num_heads, ln_params, wb):
    """xw: (B_, N, C) tokens; bm: (wb, nH, N, N) constant bias+mask tile."""
    B_, N, C = xw.shape
    nH = num_heads
    B_p = _round_up(B_, wb)
    xw = xw.astype(jnp.bfloat16)
    if B_p != B_:
        xw = jnp.pad(xw, ((0, B_p - B_), (0, 0), (0, 0)))

    fuse_ln = ln_params is not None
    args = [xw,
            p["qkv_w"].astype(jnp.bfloat16),
            p["qkv_b"].reshape(1, 3 * C).astype(jnp.float32),
            bm.astype(jnp.float32),
            p["proj_w"].astype(jnp.bfloat16),
            p["proj_b"].reshape(1, C).astype(jnp.float32)]
    in_specs = [
        pl.BlockSpec((wb, N, C), lambda b: (b, 0, 0)),
        pl.BlockSpec((C, 3 * C), lambda b: (0, 0)),
        pl.BlockSpec((1, 3 * C), lambda b: (0, 0)),
        pl.BlockSpec((wb, nH, N, N), lambda b: (0, 0, 0, 0)),
        pl.BlockSpec((C, C), lambda b: (0, 0)),
        pl.BlockSpec((1, C), lambda b: (0, 0)),
    ]
    if fuse_ln:
        g, bta = ln_params
        args += [g.reshape(1, C).astype(jnp.float32),
                 bta.reshape(1, C).astype(jnp.float32)]
        in_specs += [pl.BlockSpec((1, C), lambda b: (0, 0))] * 2

    out = pl.pallas_call(
        functools.partial(_fused_attn_kernel, nH=nH, fuse_ln=fuse_ln),
        out_shape=jax.ShapeDtypeStruct((B_p, N, C), jnp.bfloat16),
        grid=(B_p // wb,),
        in_specs=in_specs,
        out_specs=pl.BlockSpec((wb, N, C), lambda b: (b, 0, 0)),
        compiler_params=pltpu.CompilerParams(
            dimension_semantics=("parallel",),
            vmem_limit_bytes=_VMEM_LIMIT),
    )(*args)
    return out[:B_]


# ----------------------------- conv helpers (NHWC, im2col + Pallas matmul) ---

def conv2d_3x3(x, w, bias=None, bn_gamma=None, bn_beta=None, relu=False,
               head_w=None, head_b=None, out_dtype=jnp.bfloat16):
    # x: (B, H, W, Cin) NHWC; w: (Cout, Cin, 3, 3) torch layout.
    # TODO(synk): im2col materializes the 9x patch matrix in HBM; an in-kernel
    # halo gather would cut decoder bandwidth further.
    B, H, Wd, Cin = x.shape
    Cout = w.shape[0]
    xp = jnp.pad(x.astype(jnp.bfloat16), ((0, 0), (1, 1), (1, 1), (0, 0)))
    cols = [xp[:, dh:dh + H, dw:dw + Wd, :] for dh in range(3) for dw in range(3)]
    patches = jnp.concatenate(cols, axis=-1).reshape(B * H * Wd, 9 * Cin)
    wm = jnp.transpose(w, (2, 3, 1, 0)).reshape(9 * Cin, Cout)
    scale = None
    eff_bias = bias
    if bn_gamma is not None:  # fused eval BatchNorm (running mean=0, var=1)
        scale = bn_gamma / jnp.sqrt(1.0 + _BN_EPS)
        eff_bias = bn_beta if bias is None else bias * scale + bn_beta
    y = pallas_matmul(patches, wm, eff_bias, scale,
                      act="relu" if relu else "none",
                      head_w=head_w, head_b=head_b, out_dtype=out_dtype)
    Nout = head_w.shape[1] if head_w is not None else Cout
    return y.reshape(B, H, Wd, Nout)


def conv2d_1x1(x, w, bias=None):
    # x: (B, H, W, Cin) NHWC; w: (Cout, Cin, 1, 1).
    B, H, Wd, Cin = x.shape
    Cout = w.shape[0]
    y = pallas_matmul(x.reshape(B * H * Wd, Cin), w.reshape(Cout, Cin).T, bias)
    return y.reshape(B, H, Wd, Cout)


def conv_transpose_2x2(x, w, bias):
    # ConvTranspose2d(k=2, s=2): each input pixel produces its own 2x2 output tile.
    # x: (B, H, W, Cin) NHWC; w: (Cin, Cout, 2, 2).
    B, H, Wd, Cin = x.shape
    Cout = w.shape[1]
    y = pallas_matmul(x.reshape(B * H * Wd, Cin), w.reshape(Cin, Cout * 4),
                      jnp.repeat(bias, 4))
    y = y.reshape(B, H, Wd, Cout, 2, 2)
    return jnp.transpose(y, (0, 1, 4, 2, 5, 3)).reshape(B, 2 * H, 2 * Wd, Cout)


def patch_embed(x, w, bias, patch_size, ln_g, ln_b):
    # norm_embed fused as an output-LN epilogue of the patch-embed matmul.
    B, Cin, H, Wd = x.shape
    Cout = w.shape[0]
    ps = patch_size
    Ho, Wo = H // ps, Wd // ps
    xr = x.reshape(B, Cin, Ho, ps, Wo, ps)
    xr = jnp.transpose(xr, (0, 2, 4, 1, 3, 5)).reshape(B * Ho * Wo, Cin * ps * ps)
    wm = w.reshape(Cout, Cin * ps * ps).T
    y = pallas_matmul(xr, wm, bias, out_ln_gamma=ln_g, out_ln_beta=ln_b)
    return y.reshape(B, Ho * Wo, Cout), Ho, Wo


# ----------------------------- Swin pieces -----------------------------------

def relative_position_index(ws):
    coords = np.stack(np.meshgrid(np.arange(ws), np.arange(ws), indexing="ij"))
    cf = coords.reshape(2, -1)
    rel = (cf[:, :, None] - cf[:, None, :]).transpose(1, 2, 0).astype(np.int64)
    rel[:, :, 0] += ws - 1
    rel[:, :, 1] += ws - 1
    rel[:, :, 0] *= 2 * ws - 1
    return rel.sum(-1)                                    # (ws*ws, ws*ws)


def compute_attn_mask(H, W, ws, shift):
    Hp = int(np.ceil(H / ws)) * ws
    Wp = int(np.ceil(W / ws)) * ws
    img_mask = np.zeros((1, Hp, Wp, 1), np.float32)
    slices = (slice(0, -ws), slice(-ws, -shift), slice(-shift, None))
    cnt = 0
    for hs in slices:
        for wsl in slices:
            img_mask[:, hs, wsl, :] = cnt
            cnt += 1
    mw = img_mask.reshape(1, Hp // ws, ws, Wp // ws, ws, 1)
    mw = mw.transpose(0, 1, 3, 2, 4, 5).reshape(-1, ws * ws)
    am = mw[:, None, :] - mw[:, :, None]
    return jnp.asarray(np.where(am != 0, -100.0, 0.0).astype(np.float32))


def window_attention(x_windows, p, num_heads, mask, ln_params):
    """x_windows: (B_, N, C).  mask: (nW, N, N) layer constant or None."""
    B_, N, C = x_windows.shape
    bias = p["rpb_bias"]                                  # (nH, N, N), precomputed
    if mask is not None:
        nW = mask.shape[0]
        bm_nw = bias[None, :, :, :] + mask[:, None, :, :]  # (nW, nH, N, N)
    else:
        nW = 1
        bm_nw = bias[None, :, :, :]
    wb = _choose_wb(B_, nW)
    # Windows are laid out (batch, window-in-image); window j of a WB block maps
    # to mask index j % nW, so tiling the (nW,...) constant is grid-invariant.
    bm = jnp.tile(bm_nw, (wb // nW, 1, 1, 1))              # constant under jit
    return pallas_fused_window_attention(x_windows, bm, p, num_heads, ln_params, wb)


def swin_block(x, H, W, p, num_heads, ws, shift_size, mask):
    B, L, C = x.shape
    shortcut = x
    pad_b, pad_r = max(0, ws - H), max(0, ws - W)
    H_eff, W_eff = H + pad_b, W + pad_r
    if pad_b or pad_r:
        # Exact reference order: LN -> zero-pad -> shift -> partition.
        xn = pallas_layernorm(x.reshape(B * L, C), p["norm1_g"], p["norm1_b"])
        xs = jnp.pad(xn.reshape(B, H, W, C),
                     ((0, 0), (0, pad_b), (0, pad_r), (0, 0)))
        ln_params = None
    else:
        # LN is per-token -> commutes with roll/window-partition; fuse into qkv.
        xs = x.reshape(B, H, W, C)
        ln_params = (p["norm1_g"], p["norm1_b"])
    if shift_size > 0:
        xs = jnp.roll(xs, shift=(-shift_size, -shift_size), axis=(1, 2))
    xw = xs.reshape(B, H_eff // ws, ws, W_eff // ws, ws, C)
    xw = jnp.transpose(xw, (0, 1, 3, 2, 4, 5)).reshape(-1, ws * ws, C)
    # NOTE: reference passes the layer-level attn_mask to *every* block
    # (including shift=0 blocks); we reproduce that exactly.
    aw = window_attention(xw, p["attn"], num_heads, mask, ln_params)
    aw = aw.reshape(B, H_eff // ws, W_eff // ws, ws, ws, C)
    xr = jnp.transpose(aw, (0, 1, 3, 2, 4, 5)).reshape(B, H_eff, W_eff, C)
    if shift_size > 0:
        xr = jnp.roll(xr, shift=(shift_size, shift_size), axis=(1, 2))
    xr = xr[:, :H, :W, :].reshape(B, L, C)
    x = shortcut + xr
    # MLP with norm2 fused into fc1.
    h = pallas_matmul(x.reshape(B * L, C), p["fc1_w"], p["fc1_b"], act="gelu",
                      ln_gamma=p["norm2_g"], ln_beta=p["norm2_b"])
    h = pallas_matmul(h, p["fc2_w"], p["fc2_b"])
    return x + h.reshape(B, L, C)


def patch_merging(x, H, W, p):
    B, L, C = x.shape
    xs = x.reshape(B, H, W, C)
    Hp, Wp = H + (H % 2), W + (W % 2)
    if (Hp, Wp) != (H, W):
        xs = jnp.pad(xs, ((0, 0), (0, Hp - H), (0, Wp - W), (0, 0)))
    x0 = xs[:, 0::2, 0::2, :]
    x1 = xs[:, 1::2, 0::2, :]
    x2 = xs[:, 0::2, 1::2, :]
    x3 = xs[:, 1::2, 1::2, :]
    m = jnp.concatenate([x0, x1, x2, x3], -1).reshape(
        B * (Hp // 2) * (Wp // 2), 4 * C)
    # LayerNorm fused into the reduction matmul (reduction has no bias).
    out = pallas_matmul(m, p["red_w"], ln_gamma=p["norm_g"], ln_beta=p["norm_b"])
    return out.reshape(B, (Hp // 2) * (Wp // 2), 2 * C)


def decoder_block(x, skip, p):
    # NHWC throughout the decoder.
    xu = conv_transpose_2x2(x, p["up_w"], p["up_b"])
    if skip is not None and p["skip_w"] is not None:
        sp = conv2d_1x1(skip, p["skip_w"])
        # TODO(synk): F.interpolate bilinear resize on spatial mismatch is not
        # implemented (never hit at these shapes).
        xc = jnp.concatenate([xu, sp], axis=-1)
    else:
        xc = xu
    y = conv2d_3x3(xc, p["c1_w"], bn_gamma=p["bn1_g"], bn_beta=p["bn1_b"], relu=True)
    y = conv2d_3x3(y, p["c2_w"], bn_gamma=p["bn2_g"], bn_beta=p["bn2_b"], relu=True)
    return y


# ----------------------------- full forward ----------------------------------

def swin_unet_forward(x, params, cfg):
    B = x.shape[0]
    ws = cfg["window_size"]
    xseq, H, W = patch_embed(x, params["pe_w"], params["pe_b"], cfg["patch_size"],
                             params["ne_g"], params["ne_b"])
    skips = []
    num_layers = len(params["layers"])
    for lp in params["layers"]:
        shift = ws // 2
        mask = compute_attn_mask(H, W, ws, shift) if shift > 0 else None
        xb = xseq
        for j, bp in enumerate(lp["blocks"]):
            blk_shift = 0 if j % 2 == 0 else shift
            xb = swin_block(xb, H, W, bp, lp["num_heads"], ws, blk_shift, mask)
        skips.append(xb.reshape(B, H, W, lp["dim"]))        # NHWC skip
        if lp["down"] is not None:
            xseq = patch_merging(xb, H, W, lp["down"])
            H, W = (H + 1) // 2, (W + 1) // 2
        else:
            xseq = xb
    Cb = xseq.shape[-1]
    xd = xseq.reshape(B, H, W, Cb)                          # NHWC bottleneck
    for i, dp in enumerate(params["decoders"]):
        sidx = num_layers - 2 - i
        skip = skips[sidx] if 0 <= sidx < len(skips) else None
        xd = decoder_block(xd, skip, dp)
    # Final 3x3+BN+ReLU with the 1x1 (Cout=1) head fused as a second matmul.
    y = conv2d_3x3(xd, params["fconv1_w"], bias=params["fconv1_b"],
                   bn_gamma=params["fbn_g"], bn_beta=params["fbn_b"], relu=True,
                   head_w=params["fconv2_w"].reshape(1, 32).T,
                   head_b=params["fconv2_b"], out_dtype=jnp.float32)
    return jnp.transpose(y, (0, 3, 1, 2))                   # NCHW output


# ----------------------------- parameter init --------------------------------

class _Keys:
    def __init__(self, seed):
        self._key = jax.random.PRNGKey(seed)

    def __call__(self):
        self._key, k = jax.random.split(self._key)
        return k


def _trunc_normal(kg, shape, std=0.02):
    return std * jax.random.truncated_normal(kg(), -2.0, 2.0, shape, jnp.float32)


def _conv_kaiming(kg, shape):  # (Cout, Cin, kh, kw), fan_out mode
    fan_out = shape[0] * shape[2] * shape[3]
    return jax.random.normal(kg(), shape, jnp.float32) * math.sqrt(2.0 / fan_out)


def init_params(cfg, seed=0):
    kg = _Keys(seed)
    ed = cfg["embed_dim"]
    ws = cfg["window_size"]
    N = ws * ws
    rel_index = relative_position_index(ws)      # static (N, N) numpy
    params = {
        "pe_w": _conv_kaiming(kg, (ed, cfg["in_chans"], cfg["patch_size"], cfg["patch_size"])),
        "pe_b": jnp.zeros((ed,), jnp.float32),
        "ne_g": jnp.ones((ed,), jnp.float32),
        "ne_b": jnp.zeros((ed,), jnp.float32),
        "layers": [],
        "decoders": [],
    }
    num_layers = len(cfg["depths"])
    dim = ed
    for i in range(num_layers):
        nh = cfg["num_heads"][i]
        hidden = int(dim * cfg["mlp_ratio"])
        q_scale = (dim // nh) ** (-0.5)
        blocks = []
        for _ in range(cfg["depths"][i]):
            rpb_table = _trunc_normal(kg, ((2 * ws - 1) ** 2, nh))
            # Precompute the gathered (nH, N, N) bias once (constant per block).
            rpb_bias = rpb_table[jnp.asarray(rel_index.reshape(-1))]
            rpb_bias = jnp.transpose(rpb_bias.reshape(N, N, nh), (2, 0, 1))
            # Fold the attention scale Dh**-0.5 into the Q columns of qkv
            # (bias is zero at init so scaling it is a no-op).
            qkv_w = _trunc_normal(kg, (dim, 3 * dim))
            qkv_w = qkv_w.at[:, :dim].multiply(q_scale)
            blocks.append({
                "norm1_g": jnp.ones((dim,), jnp.float32),
                "norm1_b": jnp.zeros((dim,), jnp.float32),
                "attn": {
                    "rpb_bias": rpb_bias,
                    "qkv_w": qkv_w,
                    "qkv_b": jnp.zeros((3 * dim,), jnp.float32),
                    "proj_w": _trunc_normal(kg, (dim, dim)),
                    "proj_b": jnp.zeros((dim,), jnp.float32),
                },
                "norm2_g": jnp.ones((dim,), jnp.float32),
                "norm2_b": jnp.zeros((dim,), jnp.float32),
                "fc1_w": _trunc_normal(kg, (dim, hidden)),
                "fc1_b": jnp.zeros((hidden,), jnp.float32),
                "fc2_w": _trunc_normal(kg, (hidden, dim)),
                "fc2_b": jnp.zeros((dim,), jnp.float32),
            })
        layer = {"dim": dim, "num_heads": nh, "blocks": blocks, "down": None}
        if i < num_layers - 1:
            layer["down"] = {
                "norm_g": jnp.ones((4 * dim,), jnp.float32),
                "norm_b": jnp.zeros((4 * dim,), jnp.float32),
                "red_w": _trunc_normal(kg, (4 * dim, 2 * dim)),
            }
        params["layers"].append(layer)
        if i < num_layers - 1:
            dim *= 2
    dec_in = dim  # bottleneck dim
    for i, out_ch in enumerate(cfg["decoder_channels"]):
        up_ch = dec_in // 2
        skip_idx = num_layers - 2 - i
        skip_ch = int(ed * 2 ** skip_idx) if skip_idx >= 0 else None
        conv_in = up_ch + (up_ch if skip_ch else 0)
        params["decoders"].append({
            "up_w": jax.random.normal(kg(), (dec_in, up_ch, 2, 2), jnp.float32) * 0.05,
            "up_b": jnp.zeros((up_ch,), jnp.float32),
            "skip_w": _conv_kaiming(kg, (up_ch, skip_ch, 1, 1)) if skip_ch else None,
            "c1_w": _conv_kaiming(kg, (out_ch, conv_in, 3, 3)),
            "bn1_g": jnp.ones((out_ch,), jnp.float32),
            "bn1_b": jnp.zeros((out_ch,), jnp.float32),
            "c2_w": _conv_kaiming(kg, (out_ch, out_ch, 3, 3)),
            "bn2_g": jnp.ones((out_ch,), jnp.float32),
            "bn2_b": jnp.zeros((out_ch,), jnp.float32),
        })
        dec_in = out_ch
    params["fconv1_w"] = _conv_kaiming(kg, (32, cfg["decoder_channels"][-1], 3, 3))
    params["fconv1_b"] = jnp.zeros((32,), jnp.float32)
    params["fbn_g"] = jnp.ones((32,), jnp.float32)
    params["fbn_b"] = jnp.zeros((32,), jnp.float32)
    params["fconv2_w"] = _conv_kaiming(kg, (1, 32, 1, 1))
    params["fconv2_b"] = jnp.zeros((1,), jnp.float32)
    return params


# ----------------------------- main -------------------------------------------

if __name__ == "__main__":
    cfg = dict(
        patch_size=4, in_chans=3, embed_dim=32, depths=(2, 2), num_heads=(2, 4),
        window_size=4, mlp_ratio=4.0, drop_rate=0.0, attn_drop_rate=0.0,
        drop_path_rate=0.0, decoder_channels=(32, 16),
    )
    params = init_params(cfg, seed=0)
    x = jax.random.normal(jax.random.PRNGKey(0), (2, cfg["in_chans"], 32, 32), jnp.float32)

    fwd = jax.jit(lambda inp: swin_unet_forward(inp, params, cfg))
    y = jax.block_until_ready(fwd(x))

    assert y.shape == (2, 1, 16, 16), y.shape
    assert bool(jnp.all(jnp.isfinite(y)))
    print("KERNEL_OK")
</pallas_src>

<mosaic_0001>
module attributes {stable_mosaic.version = 11 : i64} {
  func.func @_mm_kernel(%arg0: i32, %arg1: memref<64x48xbf16, #tpu.memory_space<vmem>>, %arg2: memref<48x32xbf16, #tpu.memory_space<vmem>>, %arg3: memref<1x32xf32, #tpu.memory_space<vmem>>, %arg4: memref<1x32xf32, #tpu.memory_space<vmem>>, %arg5: memref<1x32xf32, #tpu.memory_space<vmem>>, %arg6: memref<1x32xf32, #tpu.memory_space<vmem>>, %arg7: memref<64x32xbf16, #tpu.memory_space<vmem>>) attributes {dimension_semantics = [#tpu.dimension_semantics<parallel>], iteration_bounds = array<i64: 2>, scalar_prefetch = 0 : i64, scratch_operands = 0 : i64, tpu.core_type = #tpu.core_type<tc>, window_params = [{transform_indices = @transform_0, window_bounds = array<i64: 64, 48>}, {pipeline_mode = #tpu.pipeline_mode<synchronous>, transform_indices = @transform_1, window_bounds = array<i64: 48, 32>}, {pipeline_mode = #tpu.pipeline_mode<synchronous>, transform_indices = @transform_2, window_bounds = array<i64: 1, 32>}, {pipeline_mode = #tpu.pipeline_mode<synchronous>, transform_indices = @transform_3, window_bounds = array<i64: 1, 32>}, {pipeline_mode = #tpu.pipeline_mode<synchronous>, transform_indices = @transform_4, window_bounds = array<i64: 1, 32>}, {pipeline_mode = #tpu.pipeline_mode<synchronous>, transform_indices = @transform_5, window_bounds = array<i64: 1, 32>}, {transform_indices = @transform_6, window_bounds = array<i64: 64, 32>}]} {
    %c0 = arith.constant 0 : index
    %c0_0 = arith.constant 0 : index
    %0 = vector.load %arg1[%c0, %c0_0] : memref<64x48xbf16, #tpu.memory_space<vmem>>, vector<64x48xbf16>
    %1 = arith.extf %0 : vector<64x48xbf16> to vector<64x48xf32>
    %2 = arith.truncf %1 : vector<64x48xf32> to vector<64x48xbf16>
    %c0_1 = arith.constant 0 : index
    %c0_2 = arith.constant 0 : index
    %3 = vector.load %arg2[%c0_1, %c0_2] : memref<48x32xbf16, #tpu.memory_space<vmem>>, vector<48x32xbf16>
    %cst = arith.constant dense<0.000000e+00> : vector<64x32xf32>
    %4 = tpu.matmul %2, %3, %cst {dimension_numbers = #tpu.dot_dimension_numbers<[1], [0], [0], [1], [0, 0, 1, 1], [], []>} : vector<64x48xbf16>, vector<48x32xbf16>, vector<64x32xf32> -> vector<64x32xf32>
    %c0_3 = arith.constant 0 : index
    %c0_4 = arith.constant 0 : index
    %5 = vector.load %arg3[%c0_3, %c0_4] : memref<1x32xf32, #tpu.memory_space<vmem>>, vector<1x32xf32>
    %6 = vector.broadcast %5 : vector<1x32xf32> to vector<64x32xf32>
    %7 = arith.mulf %4, %6 : vector<64x32xf32>
    %c0_5 = arith.constant 0 : index
    %c0_6 = arith.constant 0 : index
    %8 = vector.load %arg4[%c0_5, %c0_6] : memref<1x32xf32, #tpu.memory_space<vmem>>, vector<1x32xf32>
    %9 = vector.broadcast %8 : vector<1x32xf32> to vector<64x32xf32>
    %10 = arith.addf %7, %9 : vector<64x32xf32>
    %cst_7 = arith.constant dense<0.000000e+00> : vector<64xf32>
    %11 = vector.multi_reduction <add>, %10, %cst_7 [1] : vector<64x32xf32> to vector<64xf32>
    %12 = vector.shape_cast %11 : vector<64xf32> to vector<64x1xf32>
    %cst_8 = arith.constant 3.200000e+01 : f32
    %13 = vector.broadcast %cst_8 : f32 to vector<64x1xf32>
    %14 = arith.divf %12, %13 : vector<64x1xf32>
    %15 = vector.broadcast %14 : vector<64x1xf32> to vector<64x32xf32>
    %16 = arith.subf %10, %15 : vector<64x32xf32>
    %17 = arith.mulf %16, %16 : vector<64x32xf32>
    %cst_9 = arith.constant dense<0.000000e+00> : vector<64xf32>
    %18 = vector.multi_reduction <add>, %17, %cst_9 [1] : vector<64x32xf32> to vector<64xf32>
    %19 = vector.shape_cast %18 : vector<64xf32> to vector<64x1xf32>
    %cst_10 = arith.constant 3.200000e+01 : f32
    %20 = vector.broadcast %cst_10 : f32 to vector<64x1xf32>
    %21 = arith.divf %19, %20 : vector<64x1xf32>
    %22 = vector.broadcast %14 : vector<64x1xf32> to vector<64x32xf32>
    %23 = arith.subf %10, %22 : vector<64x32xf32>
    %cst_11 = arith.constant 9.99999974E-6 : f32
    %24 = vector.broadcast %cst_11 : f32 to vector<64x1xf32>
    %25 = arith.addf %21, %24 : vector<64x1xf32>
    %26 = math.rsqrt %25 : vector<64x1xf32>
    %27 = vector.broadcast %26 : vector<64x1xf32> to vector<64x32xf32>
    %28 = arith.mulf %23, %27 : vector<64x32xf32>
    %c0_12 = arith.constant 0 : index
    %c0_13 = arith.constant 0 : index
    %29 = vector.load %arg5[%c0_12, %c0_13] : memref<1x32xf32, #tpu.memory_space<vmem>>, vector<1x32xf32>
    %30 = vector.broadcast %29 : vector<1x32xf32> to vector<64x32xf32>
    %31 = arith.mulf %28, %30 : vector<64x32xf32>
    %c0_14 = arith.constant 0 : index
    %c0_15 = arith.constant 0 : index
    %32 = vector.load %arg6[%c0_14, %c0_15] : memref<1x32xf32, #tpu.memory_space<vmem>>, vector<1x32xf32>
    %33 = vector.broadcast %32 : vector<1x32xf32> to vector<64x32xf32>
    %34 = arith.addf %31, %33 : vector<64x32xf32>
    %35 = arith.truncf %34 : vector<64x32xf32> to vector<64x32xbf16>
    %c0_16 = arith.constant 0 : index
    %c0_17 = arith.constant 0 : index
    %36 = vector.load %arg7[%c0_16, %c0_17] : memref<64x32xbf16, #tpu.memory_space<vmem>>, vector<64x32xbf16>
    tpu.vector_store %arg7[%c0_16, %c0_17], %35 {strides = array<i32>} : memref<64x32xbf16, #tpu.memory_space<vmem>>, vector<64x32xbf16>,
    return
  }
  func.func @transform_0(%arg0: i32) -> (i32, i32) {
    %c0_i32 = arith.constant 0 : i32
    %c0_i32_0 = arith.constant 0 : i32
    return %arg0, %c0_i32 : i32, i32
  }
  func.func @transform_1(%arg0: i32) -> (i32, i32) {
    %c0_i32 = arith.constant 0 : i32
    %c0_i32_0 = arith.constant 0 : i32
    %c0_i32_1 = arith.constant 0 : i32
    return %c0_i32, %c0_i32_0 : i32, i32
  }
  func.func @transform_2(%arg0: i32) -> (i32, i32) {
    %c0_i32 = arith.constant 0 : i32
    %c0_i32_0 = arith.constant 0 : i32
    %c0_i32_1 = arith.constant 0 : i32
    return %c0_i32, %c0_i32_0 : i32, i32
  }
  func.func @transform_3(%arg0: i32) -> (i32, i32) {
    %c0_i32 = arith.constant 0 : i32
    %c0_i32_0 = arith.constant 0 : i32
    %c0_i32_1 = arith.constant 0 : i32
    return %c0_i32, %c0_i32_0 : i32, i32
  }
  func.func @transform_4(%arg0: i32) -> (i32, i32) {
    %c0_i32 = arith.constant 0 : i32
    %c0_i32_0 = arith.constant 0 : i32
    %c0_i32_1 = arith.constant 0 : i32
    return %c0_i32, %c0_i32_0 : i32, i32
  }
  func.func @transform_5(%arg0: i32) -> (i32, i32) {
    %c0_i32 = arith.constant 0 : i32
    %c0_i32_0 = arith.constant 0 : i32
    %c0_i32_1 = arith.constant 0 : i32
    return %c0_i32, %c0_i32_0 : i32, i32
  }
  func.func @transform_6(%arg0: i32) -> (i32, i32) {
    %c0_i32 = arith.constant 0 : i32
    %c0_i32_0 = arith.constant 0 : i32
    return %arg0, %c0_i32 : i32, i32
  }
}

module attributes {stable_mosaic.version = 11 : i64} {
  func.func @_fused_attn_kernel(%arg0: i32, %arg1: memref<4x16x32xbf16, #tpu.memory_space<vmem>>, %arg2: memref<32x96xbf16, #tpu.memory_space<vmem>>, %arg3: memref<1x96xf32, #tpu.memory_space<vmem>>, %arg4: memref<4x2x16x16xf32, #tpu.memory_space<vmem>>, %arg5: memref<32x32xbf16, #tpu.memory_space<vmem>>, %arg6: memref<1x32xf32, #tpu.memory_space<vmem>>, %arg7: memref<1x32xf32, #tpu.memory_space<vmem>>, %arg8: memref<1x32xf32, #tpu.memory_space<vmem>>, %arg9: memref<4x16x32xbf16, #tpu.memory_space<vmem>>) attributes {dimension_semantics = [#tpu.dimension_semantics<parallel>], iteration_bounds = array<i64: 2>, scalar_prefetch = 0 : i64, scratch_operands = 0 : i64, tpu.core_type = #tpu.core_type<tc>, window_params = [{transform_indices = @transform_0, window_bounds = array<i64: 4, 16, 32>}, {pipeline_mode = #tpu.pipeline_mode<synchronous>, transform_indices = @transform_1, window_bounds = array<i64: 32, 96>}, {pipeline_mode = #tpu.pipeline_mode<synchronous>, transform_indices = @transform_2, window_bounds = array<i64: 1, 96>}, {pipeline_mode = #tpu.pipeline_mode<synchronous>, transform_indices = @transform_3, window_bounds = array<i64: 4, 2, 16, 16>}, {pipeline_mode = #tpu.pipeline_mode<synchronous>, transform_indices = @transform_4, window_bounds = array<i64: 32, 32>}, {pipeline_mode = #tpu.pipeline_mode<synchronous>, transform_indices = @transform_5, window_bounds = array<i64: 1, 32>}, {pipeline_mode = #tpu.pipeline_mode<synchronous>, transform_indices = @transform_6, window_bounds = array<i64: 1, 32>}, {pipeline_mode = #tpu.pipeline_mode<synchronous>, transform_indices = @transform_7, window_bounds = array<i64: 1, 32>}, {transform_indices = @transform_8, window_bounds = array<i64: 4, 16, 32>}]} {
    %c0 = arith.constant 0 : index
    %c0_0 = arith.constant 0 : index
    %c0_1 = arith.constant 0 : index
    %0 = vector.load %arg1[%c0, %c0_0, %c0_1] : memref<4x16x32xbf16, #tpu.memory_space<vmem>>, vector<4x16x32xbf16>
    %1 = arith.extf %0 : vector<4x16x32xbf16> to vector<4x16x32xf32>
    %cst = arith.constant dense<0.000000e+00> : vector<4x16xf32>
    %2 = vector.multi_reduction <add>, %1, %cst [2] : vector<4x16x32xf32> to vector<4x16xf32>
    %3 = vector.shape_cast %2 : vector<4x16xf32> to vector<4x16x1xf32>
    %cst_2 = arith.constant 3.200000e+01 : f32
    %4 = vector.broadcast %cst_2 : f32 to vector<4x16x1xf32>
    %5 = arith.divf %3, %4 : vector<4x16x1xf32>
    %6 = vector.broadcast %5 : vector<4x16x1xf32> to vector<4x16x32xf32>
    %7 = arith.subf %1, %6 : vector<4x16x32xf32>
    %8 = arith.mulf %7, %7 : vector<4x16x32xf32>
    %cst_3 = arith.constant dense<0.000000e+00> : vector<4x16xf32>
    %9 = vector.multi_reduction <add>, %8, %cst_3 [2] : vector<4x16x32xf32> to vector<4x16xf32>
    %10 = vector.shape_cast %9 : vector<4x16xf32> to vector<4x16x1xf32>
    %cst_4 = arith.constant 3.200000e+01 : f32
    %11 = vector.broadcast %cst_4 : f32 to vector<4x16x1xf32>
    %12 = arith.divf %10, %11 : vector<4x16x1xf32>
    %13 = vector.broadcast %5 : vector<4x16x1xf32> to vector<4x16x32xf32>
    %14 = arith.subf %1, %13 : vector<4x16x32xf32>
    %cst_5 = arith.constant 9.99999974E-6 : f32
    %15 = vector.broadcast %cst_5 : f32 to vector<4x16x1xf32>
    %16 = arith.addf %12, %15 : vector<4x16x1xf32>
    %17 = math.rsqrt %16 : vector<4x16x1xf32>
    %18 = vector.broadcast %17 : vector<4x16x1xf32> to vector<4x16x32xf32>
    %19 = arith.mulf %14, %18 : vector<4x16x32xf32>
    %c0_6 = arith.constant 0 : index
    %c0_7 = arith.constant 0 : index
    %20 = vector.load %arg7[%c0_6, %c0_7] : memref<1x32xf32, #tpu.memory_space<vmem>>, vector<1x32xf32>
    %21 = vector.shape_cast %20 : vector<1x32xf32> to vector<1x1x32xf32>
    %22 = vector.broadcast %21 : vector<1x1x32xf32> to vector<4x16x32xf32>
    %23 = arith.mulf %19, %22 : vector<4x16x32xf32>
    %c0_8 = arith.constant 0 : index
    %c0_9 = arith.constant 0 : index
    %24 = vector.load %arg8[%c0_8, %c0_9] : memref<1x32xf32, #tpu.memory_space<vmem>>, vector<1x32xf32>
    %25 = vector.shape_cast %24 : vector<1x32xf32> to vector<1x1x32xf32>
    %26 = vector.broadcast %25 : vector<1x1x32xf32> to vector<4x16x32xf32>
    %27 = arith.addf %23, %26 : vector<4x16x32xf32>
    %28 = arith.truncf %27 : vector<4x16x32xf32> to vector<4x16x32xbf16>
    %29 = vector.shape_cast %28 : vector<4x16x32xbf16> to vector<64x32xbf16>
    %c0_10 = arith.constant 0 : index
    %c0_11 = arith.constant 0 : index
    %30 = vector.load %arg2[%c0_10, %c0_11] : memref<32x96xbf16, #tpu.memory_space<vmem>>, vector<32x96xbf16>
    %cst_12 = arith.constant dense<0.000000e+00> : vector<64x96xf32>
    %31 = tpu.matmul %29, %30, %cst_12 {dimension_numbers = #tpu.dot_dimension_numbers<[1], [0], [0], [1], [0, 0, 1, 1], [], []>} : vector<64x32xbf16>, vector<32x96xbf16>, vector<64x96xf32> -> vector<64x96xf32>
    %c0_13 = arith.constant 0 : index
    %c0_14 = arith.constant 0 : index
    %32 = vector.load %arg3[%c0_13, %c0_14] : memref<1x96xf32, #tpu.memory_space<vmem>>, vector<1x96xf32>
    %33 = vector.broadcast %32 : vector<1x96xf32> to vector<64x96xf32>
    %34 = arith.addf %31, %33 : vector<64x96xf32>
    %35 = vector.shape_cast %34 : vector<64x96xf32> to vector<4x16x96xf32>
    %c0_15 = arith.constant 0 : index
    %c0_16 = arith.constant 0 : index
    %c0_17 = arith.constant 0 : index
    %c0_18 = arith.constant 0 : index
    %36 = vector.load %arg4[%c0_15, %c0_16, %c0_17, %c0_18] : memref<4x2x16x16xf32, #tpu.memory_space<vmem>>, vector<4x2x16x16xf32>
    %37 = vector.extract_strided_slice %35 {offsets = [0, 0, 0], sizes = [4, 16, 16], strides = [1, 1, 1]} : vector<4x16x96xf32> to vector<4x16x16xf32>
    %38 = arith.truncf %37 : vector<4x16x16xf32> to vector<4x16x16xbf16>
    %39 = vector.extract_strided_slice %35 {offsets = [0, 0, 32], sizes = [4, 16, 16], strides = [1, 1, 1]} : vector<4x16x96xf32> to vector<4x16x16xf32>
    %40 = arith.truncf %39 : vector<4x16x16xf32> to vector<4x16x16xbf16>
    %41 = vector.extract_strided_slice %35 {offsets = [0, 0, 64], sizes = [4, 16, 16], strides = [1, 1, 1]} : vector<4x16x96xf32> to vector<4x16x16xf32>
    %42 = arith.truncf %41 : vector<4x16x16xf32> to vector<4x16x16xbf16>
    "tpu.trace_start"() <{level = 10 : i32, message = "wnd,wmd->wnm"}> : () -> ()
    %cst_19 = arith.constant dense<0.000000e+00> : vector<4x16x16xf32>
    %43 = tpu.matmul %38, %40, %cst_19 {dimension_numbers = #tpu.dot_dimension_numbers<[2], [2], [1], [1], [0, 0, 0, 1, 1, 1], [0], [0]>} : vector<4x16x16xbf16>, vector<4x16x16xbf16>, vector<4x16x16xf32> -> vector<4x16x16xf32>
    "tpu.trace_stop"() : () -> ()
    %44 = vector.extract_strided_slice %36 {offsets = [0, 0, 0, 0], sizes = [4, 1, 16, 16], strides = [1, 1, 1, 1]} : vector<4x2x16x16xf32> to vector<4x1x16x16xf32>
    %45 = vector.shape_cast %44 : vector<4x1x16x16xf32> to vector<4x16x16xf32>
    %46 = arith.addf %43, %45 : vector<4x16x16xf32>
    %cst_20 = arith.constant dense<0xFF800000> : vector<4x16xf32>
    %47 = vector.multi_reduction <maximumf>, %46, %cst_20 [2] : vector<4x16x16xf32> to vector<4x16xf32>
    %48 = vector.shape_cast %47 : vector<4x16xf32> to vector<4x16x1xf32>
    %49 = vector.broadcast %48 : vector<4x16x1xf32> to vector<4x16x16xf32>
    %50 = arith.subf %46, %49 : vector<4x16x16xf32>
    %51 = math.exp %50 : vector<4x16x16xf32>
    %cst_21 = arith.constant dense<0.000000e+00> : vector<4x16xf32>
    %52 = vector.multi_reduction <add>, %51, %cst_21 [2] : vector<4x16x16xf32> to vector<4x16xf32>
    %53 = vector.shape_cast %52 : vector<4x16xf32> to vector<4x16x1xf32>
    %54 = tpu.reciprocal %53 {approx = true} : vector<4x16x1xf32> -> vector<4x16x1xf32>
    %55 = vector.broadcast %54 : vector<4x16x1xf32> to vector<4x16x16xf32>
    %56 = arith.mulf %51, %55 : vector<4x16x16xf32>
    %57 = arith.truncf %56 : vector<4x16x16xf32> to vector<4x16x16xbf16>
    "tpu.trace_start"() <{level = 10 : i32, message = "wnm,wmd->wnd"}> : () -> ()
    %cst_22 = arith.constant dense<0.000000e+00> : vector<4x16x16xf32>
    %58 = tpu.matmul %57, %42, %cst_22 {dimension_numbers = #tpu.dot_dimension_numbers<[2], [1], [1], [2], [0, 0, 0, 1, 1, 2], [0], [0]>} : vector<4x16x16xbf16>, vector<4x16x16xbf16>, vector<4x16x16xf32> -> vector<4x16x16xf32>
    "tpu.trace_stop"() : () -> ()
    %59 = vector.extract_strided_slice %35 {offsets = [0, 0, 16], sizes = [4, 16, 16], strides = [1, 1, 1]} : vector<4x16x96xf32> to vector<4x16x16xf32>
    %60 = arith.truncf %59 : vector<4x16x16xf32> to vector<4x16x16xbf16>
    %61 = vector.extract_strided_slice %35 {offsets = [0, 0, 48], sizes = [4, 16, 16], strides = [1, 1, 1]} : vector<4x16x96xf32> to vector<4x16x16xf32>
    %62 = arith.truncf %61 : vector<4x16x16xf32> to vector<4x16x16xbf16>
    %63 = vector.extract_strided_slice %35 {offsets = [0, 0, 80], sizes = [4, 16, 16], strides = [1, 1, 1]} : vector<4x16x96xf32> to vector<4x16x16xf32>
    %64 = arith.truncf %63 : vector<4x16x16xf32> to vector<4x16x16xbf16>
    "tpu.trace_start"() <{level = 10 : i32, message = "wnd,wmd->wnm"}> : () -> ()
    %cst_23 = arith.constant dense<0.000000e+00> : vector<4x16x16xf32>
    %65 = tpu.matmul %60, %62, %cst_23 {dimension_numbers = #tpu.dot_dimension_numbers<[2], [2], [1], [1], [0, 0, 0, 1, 1, 1], [0], [0]>} : vector<4x16x16xbf16>, vector<4x16x16xbf16>, vector<4x16x16xf32> -> vector<4x16x16xf32>
    "tpu.trace_stop"() : () -> ()
    %66 = vector.extract_strided_slice %36 {offsets = [0, 1, 0, 0], sizes = [4, 1, 16, 16], strides = [1, 1, 1, 1]} : vector<4x2x16x16xf32> to vector<4x1x16x16xf32>
    %67 = vector.shape_cast %66 : vector<4x1x16x16xf32> to vector<4x16x16xf32>
    %68 = arith.addf %65, %67 : vector<4x16x16xf32>
    %cst_24 = arith.constant dense<0xFF800000> : vector<4x16xf32>
    %69 = vector.multi_reduction <maximumf>, %68, %cst_24 [2] : vector<4x16x16xf32> to vector<4x16xf32>
    %70 = vector.shape_cast %69 : vector<4x16xf32> to vector<4x16x1xf32>
    %71 = vector.broadcast %70 : vector<4x16x1xf32> to vector<4x16x16xf32>
    %72 = arith.subf %68, %71 : vector<4x16x16xf32>
    %73 = math.exp %72 : vector<4x16x16xf32>
    %cst_25 = arith.constant dense<0.000000e+00> : vector<4x16xf32>
    %74 = vector.multi_reduction <add>, %73, %cst_25 [2] : vector<4x16x16xf32> to vector<4x16xf32>
    %75 = vector.shape_cast %74 : vector<4x16xf32> to vector<4x16x1xf32>
    %76 = tpu.reciprocal %75 {approx = true} : vector<4x16x1xf32> -> vector<4x16x1xf32>
    %77 = vector.broadcast %76 : vector<4x16x1xf32> to vector<4x16x16xf32>
    %78 = arith.mulf %73, %77 : vector<4x16x16xf32>
    %79 = arith.truncf %78 : vector<4x16x16xf32> to vector<4x16x16xbf16>
    "tpu.trace_start"() <{level = 10 : i32, message = "wnm,wmd->wnd"}> : () -> ()
    %cst_26 = arith.constant dense<0.000000e+00> : vector<4x16x16xf32>
    %80 = tpu.matmul %79, %64, %cst_26 {dimension_numbers = #tpu.dot_dimension_numbers<[2], [1], [1], [2], [0, 0, 0, 1, 1, 2], [0], [0]>} : vector<4x16x16xbf16>, vector<4x16x16xbf16>, vector<4x16x16xf32> -> vector<4x16x16xf32>
    "tpu.trace_stop"() : () -> ()
    %81 = tpu.concatenate %58, %80 in 2 : vector<4x16x16xf32>, vector<4x16x16xf32> -> vector<4x16x32xf32>
    %82 = arith.truncf %81 : vector<4x16x32xf32> to vector<4x16x32xbf16>
    %83 = vector.shape_cast %82 : vector<4x16x32xbf16> to vector<64x32xbf16>
    %c0_27 = arith.constant 0 : index
    %c0_28 = arith.constant 0 : index
    %84 = vector.load %arg5[%c0_27, %c0_28] : memref<32x32xbf16, #tpu.memory_space<vmem>>, vector<32x32xbf16>
    %cst_29 = arith.constant dense<0.000000e+00> : vector<64x32xf32>
    %85 = tpu.matmul %83, %84, %cst_29 {dimension_numbers = #tpu.dot_dimension_numbers<[1], [0], [0], [1], [0, 0, 1, 1], [], []>} : vector<64x32xbf16>, vector<32x32xbf16>, vector<64x32xf32> -> vector<64x32xf32>
    %c0_30 = arith.constant 0 : index
    %c0_31 = arith.constant 0 : index
    %86 = vector.load %arg6[%c0_30, %c0_31] : memref<1x32xf32, #tpu.memory_space<vmem>>, vector<1x32xf32>
    %87 = vector.broadcast %86 : vector<1x32xf32> to vector<64x32xf32>
    %88 = arith.addf %85, %87 : vector<64x32xf32>
    %89 = vector.shape_cast %88 : vector<64x32xf32> to vector<4x16x32xf32>
    %90 = arith.truncf %89 : vector<4x16x32xf32> to vector<4x16x32xbf16>
    %c0_32 = arith.constant 0 : index
    %c0_33 = arith.constant 0 : index
    %c0_34 = arith.constant 0 : index
    %91 = vector.load %arg9[%c0_32, %c0_33, %c0_34] : memref<4x16x32xbf16, #tpu.memory_space<vmem>>, vector<4x16x32xbf16>
    tpu.vector_store %arg9[%c0_32, %c0_33, %c0_34], %90 {strides = array<i32>} : memref<4x16x32xbf16, #tpu.memory_space<vmem>>, vector<4x16x32xbf16>,
    return
  }
  func.func @transform_0(%arg0: i32) -> (i32, i32, i32) {
    %c0_i32 = arith.constant 0 : i32
    %c0_i32_0 = arith.constant 0 : i32
    %c0_i32_1 = arith.constant 0 : i32
    return %arg0, %c0_i32, %c0_i32_0 : i32, i32, i32
  }
  func.func @transform_1(%arg0: i32) -> (i32, i32) {
    %c0_i32 = arith.constant 0 : i32
    %c0_i32_0 = arith.constant 0 : i32
    %c0_i32_1 = arith.constant 0 : i32
    return %c0_i32, %c0_i32_0 : i32, i32
  }
  func.func @transform_2(%arg0: i32) -> (i32, i32) {
    %c0_i32 = arith.constant 0 : i32
    %c0_i32_0 = arith.constant 0 : i32
    %c0_i32_1 = arith.constant 0 : i32
    return %c0_i32, %c0_i32_0 : i32, i32
  }
  func.func @transform_3(%arg0: i32) -> (i32, i32, i32, i32) {
    %c0_i32 = arith.constant 0 : i32
    %c0_i32_0 = arith.constant 0 : i32
    %c0_i32_1 = arith.constant 0 : i32
    %c0_i32_2 = arith.constant 0 : i32
    %c0_i32_3 = arith.constant 0 : i32
    return %c0_i32, %c0_i32_0, %c0_i32_1, %c0_i32_2 : i32, i32, i32, i32
  }
  func.func @transform_4(%arg0: i32) -> (i32, i32) {
    %c0_i32 = arith.constant 0 : i32
    %c0_i32_0 = arith.constant 0 : i32
    %c0_i32_1 = arith.constant 0 : i32
    return %c0_i32, %c0_i32_0 : i32, i32
  }
  func.func @transform_5(%arg0: i32) -> (i32, i32) {
    %c0_i32 = arith.constant 0 : i32
    %c0_i32_0 = arith.constant 0 : i32
    %c0_i32_1 = arith.constant 0 : i32
    return %c0_i32, %c0_i32_0 : i32, i32
  }
  func.func @transform_6(%arg0: i32) -> (i32, i32) {
    %c0_i32 = arith.constant 0 : i32
    %c0_i32_0 = arith.constant 0 : i32
    %c0_i32_1 = arith.constant 0 : i32
    return %c0_i32, %c0_i32_0 : i32, i32
  }
  func.func @transform_7(%arg0: i32) -> (i32, i32) {
    %c0_i32 = arith.constant 0 : i32
    %c0_i32_0 = arith.constant 0 : i32
    %c0_i32_1 = arith.constant 0 : i32
    return %c0_i32, %c0_i32_0 : i32, i32
  }
  func.func @transform_8(%arg0: i32) -> (i32, i32, i32) {
    %c0_i32 = arith.constant 0 : i32
    %c0_i32_0 = arith.constant 0 : i32
    %c0_i32_1 = arith.constant 0 : i32
    return %arg0, %c0_i32, %c0_i32_0 : i32, i32, i32
  }
}

module attributes {stable_mosaic.version = 11 : i64} {
  func.func @_mm_kernel(%arg0: i32, %arg1: memref<64x128xbf16, #tpu.memory_space<vmem>>, %arg2: memref<128x32xbf16, #tpu.memory_space<vmem>>, %arg3: memref<1x32xf32, #tpu.memory_space<vmem>>, %arg4: memref<1x32xf32, #tpu.memory_space<vmem>>, %arg5: memref<64x32xbf16, #tpu.memory_space<vmem>>) attributes {dimension_semantics = [#tpu.dimension_semantics<parallel>], iteration_bounds = array<i64: 2>, scalar_prefetch = 0 : i64, scratch_operands = 0 : i64, tpu.core_type = #tpu.core_type<tc>, window_params = [{transform_indices = @transform_0, window_bounds = array<i64: 64, 128>}, {pipeline_mode = #tpu.pipeline_mode<synchronous>, transform_indices = @transform_1, window_bounds = array<i64: 128, 32>}, {pipeline_mode = #tpu.pipeline_mode<synchronous>, transform_indices = @transform_2, window_bounds = array<i64: 1, 32>}, {pipeline_mode = #tpu.pipeline_mode<synchronous>, transform_indices = @transform_3, window_bounds = array<i64: 1, 32>}, {transform_indices = @transform_4, window_bounds = array<i64: 64, 32>}]} {
    %c0 = arith.constant 0 : index
    %c0_0 = arith.constant 0 : index
    %0 = vector.load %arg1[%c0, %c0_0] : memref<64x128xbf16, #tpu.memory_space<vmem>>, vector<64x128xbf16>
    %1 = arith.extf %0 : vector<64x128xbf16> to vector<64x128xf32>
    %2 = arith.truncf %1 : vector<64x128xf32> to vector<64x128xbf16>
    %c0_1 = arith.constant 0 : index
    %c0_2 = arith.constant 0 : index
    %3 = vector.load %arg2[%c0_1, %c0_2] : memref<128x32xbf16, #tpu.memory_space<vmem>>, vector<128x32xbf16>
    %cst = arith.constant dense<0.000000e+00> : vector<64x32xf32>
    %4 = tpu.matmul %2, %3, %cst {dimension_numbers = #tpu.dot_dimension_numbers<[1], [0], [0], [1], [0, 0, 1, 1], [], []>} : vector<64x128xbf16>, vector<128x32xbf16>, vector<64x32xf32> -> vector<64x32xf32>
    %c0_3 = arith.constant 0 : index
    %c0_4 = arith.constant 0 : index
    %5 = vector.load %arg3[%c0_3, %c0_4] : memref<1x32xf32, #tpu.memory_space<vmem>>, vector<1x32xf32>
    %6 = vector.broadcast %5 : vector<1x32xf32> to vector<64x32xf32>
    %7 = arith.mulf %4, %6 : vector<64x32xf32>
    %c0_5 = arith.constant 0 : index
    %c0_6 = arith.constant 0 : index
    %8 = vector.load %arg4[%c0_5, %c0_6] : memref<1x32xf32, #tpu.memory_space<vmem>>, vector<1x32xf32>
    %9 = vector.broadcast %8 : vector<1x32xf32> to vector<64x32xf32>
    %10 = arith.addf %7, %9 : vector<64x32xf32>
    %11 = arith.truncf %10 : vector<64x32xf32> to vector<64x32xbf16>
    %c0_7 = arith.constant 0 : index
    %c0_8 = arith.constant 0 : index
    %12 = vector.load %arg5[%c0_7, %c0_8] : memref<64x32xbf16, #tpu.memory_space<vmem>>, vector<64x32xbf16>
    tpu.vector_store %arg5[%c0_7, %c0_8], %11 {strides = array<i32>} : memref<64x32xbf16, #tpu.memory_space<vmem>>, vector<64x32xbf16>,
    return
  }
  func.func @transform_0(%arg0: i32) -> (i32, i32) {
    %c0_i32 = arith.constant 0 : i32
    %c0_i32_0 = arith.constant 0 : i32
    return %arg0, %c0_i32 : i32, i32
  }
  func.func @transform_1(%arg0: i32) -> (i32, i32) {
    %c0_i32 = arith.constant 0 : i32
    %c0_i32_0 = arith.constant 0 : i32
    %c0_i32_1 = arith.constant 0 : i32
    return %c0_i32, %c0_i32_0 : i32, i32
  }
  func.func @transform_2(%arg0: i32) -> (i32, i32) {
    %c0_i32 = arith.constant 0 : i32
    %c0_i32_0 = arith.constant 0 : i32
    %c0_i32_1 = arith.constant 0 : i32
    return %c0_i32, %c0_i32_0 : i32, i32
  }
  func.func @transform_3(%arg0: i32) -> (i32, i32) {
    %c0_i32 = arith.constant 0 : i32
    %c0_i32_0 = arith.constant 0 : i32
    %c0_i32_1 = arith.constant 0 : i32
    return %c0_i32, %c0_i32_0 : i32, i32
  }
  func.func @transform_4(%arg0: i32) -> (i32, i32) {
    %c0_i32 = arith.constant 0 : i32
    %c0_i32_0 = arith.constant 0 : i32
    return %arg0, %c0_i32 : i32, i32
  }
}

module attributes {stable_mosaic.version = 11 : i64} {
  func.func @_mm_kernel(%arg0: i32, %arg1: memref<64x32xbf16, #tpu.memory_space<vmem>>, %arg2: memref<32x128xbf16, #tpu.memory_space<vmem>>, %arg3: memref<1x128xf32, #tpu.memory_space<vmem>>, %arg4: memref<1x128xf32, #tpu.memory_space<vmem>>, %arg5: memref<1x32xf32, #tpu.memory_space<vmem>>, %arg6: memref<1x32xf32, #tpu.memory_space<vmem>>, %arg7: memref<64x128xbf16, #tpu.memory_space<vmem>>) attributes {dimension_semantics = [#tpu.dimension_semantics<parallel>], iteration_bounds = array<i64: 2>, scalar_prefetch = 0 : i64, scratch_operands = 0 : i64, tpu.core_type = #tpu.core_type<tc>, window_params = [{transform_indices = @transform_0, window_bounds = array<i64: 64, 32>}, {pipeline_mode = #tpu.pipeline_mode<synchronous>, transform_indices = @transform_1, window_bounds = array<i64: 32, 128>}, {pipeline_mode = #tpu.pipeline_mode<synchronous>, transform_indices = @transform_2, window_bounds = array<i64: 1, 128>}, {pipeline_mode = #tpu.pipeline_mode<synchronous>, transform_indices = @transform_3, window_bounds = array<i64: 1, 128>}, {pipeline_mode = #tpu.pipeline_mode<synchronous>, transform_indices = @transform_4, window_bounds = array<i64: 1, 32>}, {pipeline_mode = #tpu.pipeline_mode<synchronous>, transform_indices = @transform_5, window_bounds = array<i64: 1, 32>}, {transform_indices = @transform_6, window_bounds = array<i64: 64, 128>}]} {
    %c0 = arith.constant 0 : index
    %c0_0 = arith.constant 0 : index
    %0 = vector.load %arg1[%c0, %c0_0] : memref<64x32xbf16, #tpu.memory_space<vmem>>, vector<64x32xbf16>
    %1 = arith.extf %0 : vector<64x32xbf16> to vector<64x32xf32>
    %cst = arith.constant dense<0.000000e+00> : vector<64xf32>
    %2 = vector.multi_reduction <add>, %1, %cst [1] : vector<64x32xf32> to vector<64xf32>
    %3 = vector.shape_cast %2 : vector<64xf32> to vector<64x1xf32>
    %cst_1 = arith.constant 3.200000e+01 : f32
    %4 = vector.broadcast %cst_1 : f32 to vector<64x1xf32>
    %5 = arith.divf %3, %4 : vector<64x1xf32>
    %6 = vector.broadcast %5 : vector<64x1xf32> to vector<64x32xf32>
    %7 = arith.subf %1, %6 : vector<64x32xf32>
    %8 = arith.mulf %7, %7 : vector<64x32xf32>
    %cst_2 = arith.constant dense<0.000000e+00> : vector<64xf32>
    %9 = vector.multi_reduction <add>, %8, %cst_2 [1] : vector<64x32xf32> to vector<64xf32>
    %10 = vector.shape_cast %9 : vector<64xf32> to vector<64x1xf32>
    %cst_3 = arith.constant 3.200000e+01 : f32
    %11 = vector.broadcast %cst_3 : f32 to vector<64x1xf32>
    %12 = arith.divf %10, %11 : vector<64x1xf32>
    %13 = vector.broadcast %5 : vector<64x1xf32> to vector<64x32xf32>
    %14 = arith.subf %1, %13 : vector<64x32xf32>
    %cst_4 = arith.constant 9.99999974E-6 : f32
    %15 = vector.broadcast %cst_4 : f32 to vector<64x1xf32>
    %16 = arith.addf %12, %15 : vector<64x1xf32>
    %17 = math.rsqrt %16 : vector<64x1xf32>
    %18 = vector.broadcast %17 : vector<64x1xf32> to vector<64x32xf32>
    %19 = arith.mulf %14, %18 : vector<64x32xf32>
    %c0_5 = arith.constant 0 : index
    %c0_6 = arith.constant 0 : index
    %20 = vector.load %arg5[%c0_5, %c0_6] : memref<1x32xf32, #tpu.memory_space<vmem>>, vector<1x32xf32>
    %21 = vector.broadcast %20 : vector<1x32xf32> to vector<64x32xf32>
    %22 = arith.mulf %19, %21 : vector<64x32xf32>
    %c0_7 = arith.constant 0 : index
    %c0_8 = arith.constant 0 : index
    %23 = vector.load %arg6[%c0_7, %c0_8] : memref<1x32xf32, #tpu.memory_space<vmem>>, vector<1x32xf32>
    %24 = vector.broadcast %23 : vector<1x32xf32> to vector<64x32xf32>
    %25 = arith.addf %22, %24 : vector<64x32xf32>
    %26 = arith.truncf %25 : vector<64x32xf32> to vector<64x32xbf16>
    %c0_9 = arith.constant 0 : index
    %c0_10 = arith.constant 0 : index
    %27 = vector.load %arg2[%c0_9, %c0_10] : memref<32x128xbf16, #tpu.memory_space<vmem>>, vector<32x128xbf16>
    %cst_11 = arith.constant dense<0.000000e+00> : vector<64x128xf32>
    %28 = tpu.matmul %26, %27, %cst_11 {dimension_numbers = #tpu.dot_dimension_numbers<[1], [0], [0], [1], [0, 0, 1, 1], [], []>} : vector<64x32xbf16>, vector<32x128xbf16>, vector<64x128xf32> -> vector<64x128xf32>
    %c0_12 = arith.constant 0 : index
    %c0_13 = arith.constant 0 : index
    %29 = vector.load %arg3[%c0_12, %c0_13] : memref<1x128xf32, #tpu.memory_space<vmem>>, vector<1x128xf32>
    %30 = vector.broadcast %29 : vector<1x128xf32> to vector<64x128xf32>
    %31 = arith.mulf %28, %30 : vector<64x128xf32>
    %c0_14 = arith.constant 0 : index
    %c0_15 = arith.constant 0 : index
    %32 = vector.load %arg4[%c0_14, %c0_15] : memref<1x128xf32, #tpu.memory_space<vmem>>, vector<1x128xf32>
    %33 = vector.broadcast %32 : vector<1x128xf32> to vector<64x128xf32>
    %34 = arith.addf %31, %33 : vector<64x128xf32>
    %cst_16 = arith.constant 5.000000e-01 : f32
    %35 = vector.broadcast %cst_16 : f32 to vector<64x128xf32>
    %36 = arith.mulf %35, %34 : vector<64x128xf32>
    %cst_17 = arith.constant 0.707106769 : f32
    %37 = vector.broadcast %cst_17 : f32 to vector<64x128xf32>
    %38 = arith.mulf %34, %37 : vector<64x128xf32>
    %39 = math.erf %38 : vector<64x128xf32>
    %cst_18 = arith.constant 1.000000e+00 : f32
    %40 = vector.broadcast %cst_18 : f32 to vector<64x128xf32>
    %41 = arith.addf %40, %39 : vector<64x128xf32>
    %42 = arith.mulf %36, %41 : vector<64x128xf32>
    %43 = arith.truncf %42 : vector<64x128xf32> to vector<64x128xbf16>
    %c0_19 = arith.constant 0 : index
    %c0_20 = arith.constant 0 : index
    %44 = vector.load %arg7[%c0_19, %c0_20] : memref<64x128xbf16, #tpu.memory_space<vmem>>, vector<64x128xbf16>
    tpu.vector_store %arg7[%c0_19, %c0_20], %43 {strides = array<i32>} : memref<64x128xbf16, #tpu.memory_space<vmem>>, vector<64x128xbf16>,
    return
  }
  func.func @transform_0(%arg0: i32) -> (i32, i32) {
    %c0_i32 = arith.constant 0 : i32
    %c0_i32_0 = arith.constant 0 : i32
    return %arg0, %c0_i32 : i32, i32
  }
  func.func @transform_1(%arg0: i32) -> (i32, i32) {
    %c0_i32 = arith.constant 0 : i32
    %c0_i32_0 = arith.constant 0 : i32
    %c0_i32_1 = arith.constant 0 : i32
    return %c0_i32, %c0_i32_0 : i32, i32
  }
  func.func @transform_2(%arg0: i32) -> (i32, i32) {
    %c0_i32 = arith.constant 0 : i32
    %c0_i32_0 = arith.constant 0 : i32
    %c0_i32_1 = arith.constant 0 : i32
    return %c0_i32, %c0_i32_0 : i32, i32
  }
  func.func @transform_3(%arg0: i32) -> (i32, i32) {
    %c0_i32 = arith.constant 0 : i32
    %c0_i32_0 = arith.constant 0 : i32
    %c0_i32_1 = arith.constant 0 : i32
    return %c0_i32, %c0_i32_0 : i32, i32
  }
  func.func @transform_4(%arg0: i32) -> (i32, i32) {
    %c0_i32 = arith.constant 0 : i32
    %c0_i32_0 = arith.constant 0 : i32
    %c0_i32_1 = arith.constant 0 : i32
    return %c0_i32, %c0_i32_0 : i32, i32
  }
  func.func @transform_5(%arg0: i32) -> (i32, i32) {
    %c0_i32 = arith.constant 0 : i32
    %c0_i32_0 = arith.constant 0 : i32
    %c0_i32_1 = arith.constant 0 : i32
    return %c0_i32, %c0_i32_0 : i32, i32
  }
  func.func @transform_6(%arg0: i32) -> (i32, i32) {
    %c0_i32 = arith.constant 0 : i32
    %c0_i32_0 = arith.constant 0 : i32
    return %arg0, %c0_i32 : i32, i32
  }
}

module attributes {stable_mosaic.version = 11 : i64} {
  func.func @_mm_kernel(%arg0: i32, %arg1: memref<64x32xbf16, #tpu.memory_space<vmem>>, %arg2: memref<32x32xbf16, #tpu.memory_space<vmem>>, %arg3: memref<1x32xf32, #tpu.memory_space<vmem>>, %arg4: memref<1x32xf32, #tpu.memory_space<vmem>>, %arg5: memref<64x32xbf16, #tpu.memory_space<vmem>>) attributes {dimension_semantics = [#tpu.dimension_semantics<parallel>], iteration_bounds = array<i64: 2>, scalar_prefetch = 0 : i64, scratch_operands = 0 : i64, tpu.core_type = #tpu.core_type<tc>, window_params = [{transform_indices = @transform_0, window_bounds = array<i64: 64, 32>}, {pipeline_mode = #tpu.pipeline_mode<synchronous>, transform_indices = @transform_1, window_bounds = array<i64: 32, 32>}, {pipeline_mode = #tpu.pipeline_mode<synchronous>, transform_indices = @transform_2, window_bounds = array<i64: 1, 32>}, {pipeline_mode = #tpu.pipeline_mode<synchronous>, transform_indices = @transform_3, window_bounds = array<i64: 1, 32>}, {transform_indices = @transform_4, window_bounds = array<i64: 64, 32>}]} {
    %c0 = arith.constant 0 : index
    %c0_0 = arith.constant 0 : index
    %0 = vector.load %arg1[%c0, %c0_0] : memref<64x32xbf16, #tpu.memory_space<vmem>>, vector<64x32xbf16>
    %1 = arith.extf %0 : vector<64x32xbf16> to vector<64x32xf32>
    %2 = arith.truncf %1 : vector<64x32xf32> to vector<64x32xbf16>
    %c0_1 = arith.constant 0 : index
    %c0_2 = arith.constant 0 : index
    %3 = vector.load %arg2[%c0_1, %c0_2] : memref<32x32xbf16, #tpu.memory_space<vmem>>, vector<32x32xbf16>
    %cst = arith.constant dense<0.000000e+00> : vector<64x32xf32>
    %4 = tpu.matmul %2, %3, %cst {dimension_numbers = #tpu.dot_dimension_numbers<[1], [0], [0], [1], [0, 0, 1, 1], [], []>} : vector<64x32xbf16>, vector<32x32xbf16>, vector<64x32xf32> -> vector<64x32xf32>
    %c0_3 = arith.constant 0 : index
    %c0_4 = arith.constant 0 : index
    %5 = vector.load %arg3[%c0_3, %c0_4] : memref<1x32xf32, #tpu.memory_space<vmem>>, vector<1x32xf32>
    %6 = vector.broadcast %5 : vector<1x32xf32> to vector<64x32xf32>
    %7 = arith.mulf %4, %6 : vector<64x32xf32>
    %c0_5 = arith.constant 0 : index
    %c0_6 = arith.constant 0 : index
    %8 = vector.load %arg4[%c0_5, %c0_6] : memref<1x32xf32, #tpu.memory_space<vmem>>, vector<1x32xf32>
    %9 = vector.broadcast %8 : vector<1x32xf32> to vector<64x32xf32>
    %10 = arith.addf %7, %9 : vector<64x32xf32>
    %11 = arith.truncf %10 : vector<64x32xf32> to vector<64x32xbf16>
    %c0_7 = arith.constant 0 : index
    %c0_8 = arith.constant 0 : index
    %12 = vector.load %arg5[%c0_7, %c0_8] : memref<64x32xbf16, #tpu.memory_space<vmem>>, vector<64x32xbf16>
    tpu.vector_store %arg5[%c0_7, %c0_8], %11 {strides = array<i32>} : memref<64x32xbf16, #tpu.memory_space<vmem>>, vector<64x32xbf16>,
    return
  }
  func.func @transform_0(%arg0: i32) -> (i32, i32) {
    %c0_i32 = arith.constant 0 : i32
    %c0_i32_0 = arith.constant 0 : i32
    return %arg0, %c0_i32 : i32, i32
  }
  func.func @transform_1(%arg0: i32) -> (i32, i32) {
    %c0_i32 = arith.constant 0 : i32
    %c0_i32_0 = arith.constant 0 : i32
    %c0_i32_1 = arith.constant 0 : i32
    return %c0_i32, %c0_i32_0 : i32, i32
  }
  func.func @transform_2(%arg0: i32) -> (i32, i32) {
    %c0_i32 = arith.constant 0 : i32
    %c0_i32_0 = arith.constant 0 : i32
    %c0_i32_1 = arith.constant 0 : i32
    return %c0_i32, %c0_i32_0 : i32, i32
  }
  func.func @transform_3(%arg0: i32) -> (i32, i32) {
    %c0_i32 = arith.constant 0 : i32
    %c0_i32_0 = arith.constant 0 : i32
    %c0_i32_1 = arith.constant 0 : i32
    return %c0_i32, %c0_i32_0 : i32, i32
  }
  func.func @transform_4(%arg0: i32) -> (i32, i32) {
    %c0_i32 = arith.constant 0 : i32
    %c0_i32_0 = arith.constant 0 : i32
    return %arg0, %c0_i32 : i32, i32
  }
}

module attributes {stable_mosaic.version = 11 : i64} {
  func.func @_fused_attn_kernel(%arg0: i32, %arg1: memref<1x16x64xbf16, #tpu.memory_space<vmem>>, %arg2: memref<64x192xbf16, #tpu.memory_space<vmem>>, %arg3: memref<1x192xf32, #tpu.memory_space<vmem>>, %arg4: memref<1x4x16x16xf32, #tpu.memory_space<vmem>>, %arg5: memref<64x64xbf16, #tpu.memory_space<vmem>>, %arg6: memref<1x64xf32, #tpu.memory_space<vmem>>, %arg7: memref<1x64xf32, #tpu.memory_space<vmem>>, %arg8: memref<1x64xf32, #tpu.memory_space<vmem>>, %arg9: memref<1x16x64xbf16, #tpu.memory_space<vmem>>) attributes {dimension_semantics = [#tpu.dimension_semantics<parallel>], iteration_bounds = array<i64: 2>, scalar_prefetch = 0 : i64, scratch_operands = 0 : i64, tpu.core_type = #tpu.core_type<tc>, window_params = [{transform_indices = @transform_0, window_bounds = array<i64: 1, 16, 64>}, {pipeline_mode = #tpu.pipeline_mode<synchronous>, transform_indices = @transform_1, window_bounds = array<i64: 64, 192>}, {pipeline_mode = #tpu.pipeline_mode<synchronous>, transform_indices = @transform_2, window_bounds = array<i64: 1, 192>}, {pipeline_mode = #tpu.pipeline_mode<synchronous>, transform_indices = @transform_3, window_bounds = array<i64: 1, 4, 16, 16>}, {pipeline_mode = #tpu.pipeline_mode<synchronous>, transform_indices = @transform_4, window_bounds = array<i64: 64, 64>}, {pipeline_mode = #tpu.pipeline_mode<synchronous>, transform_indices = @transform_5, window_bounds = array<i64: 1, 64>}, {pipeline_mode = #tpu.pipeline_mode<synchronous>, transform_indices = @transform_6, window_bounds = array<i64: 1, 64>}, {pipeline_mode = #tpu.pipeline_mode<synchronous>, transform_indices = @transform_7, window_bounds = array<i64: 1, 64>}, {transform_indices = @transform_8, window_bounds = array<i64: 1, 16, 64>}]} {
    %c0 = arith.constant 0 : index
    %c0_0 = arith.constant 0 : index
    %c0_1 = arith.constant 0 : index
    %0 = vector.load %arg1[%c0, %c0_0, %c0_1] : memref<1x16x64xbf16, #tpu.memory_space<vmem>>, vector<1x16x64xbf16>
    %1 = arith.extf %0 : vector<1x16x64xbf16> to vector<1x16x64xf32>
    %cst = arith.constant dense<0.000000e+00> : vector<1x16xf32>
    %2 = vector.multi_reduction <add>, %1, %cst [2] : vector<1x16x64xf32> to vector<1x16xf32>
    %3 = vector.shape_cast %2 : vector<1x16xf32> to vector<1x16x1xf32>
    %cst_2 = arith.constant 6.400000e+01 : f32
    %4 = vector.broadcast %cst_2 : f32 to vector<1x16x1xf32>
    %5 = arith.divf %3, %4 : vector<1x16x1xf32>
    %6 = vector.broadcast %5 : vector<1x16x1xf32> to vector<1x16x64xf32>
    %7 = arith.subf %1, %6 : vector<1x16x64xf32>
    %8 = arith.mulf %7, %7 : vector<1x16x64xf32>
    %cst_3 = arith.constant dense<0.000000e+00> : vector<1x16xf32>
    %9 = vector.multi_reduction <add>, %8, %cst_3 [2] : vector<1x16x64xf32> to vector<1x16xf32>
    %10 = vector.shape_cast %9 : vector<1x16xf32> to vector<1x16x1xf32>
    %cst_4 = arith.constant 6.400000e+01 : f32
    %11 = vector.broadcast %cst_4 : f32 to vector<1x16x1xf32>
    %12 = arith.divf %10, %11 : vector<1x16x1xf32>
    %13 = vector.broadcast %5 : vector<1x16x1xf32> to vector<1x16x64xf32>
    %14 = arith.subf %1, %13 : vector<1x16x64xf32>
    %cst_5 = arith.constant 9.99999974E-6 : f32
    %15 = vector.broadcast %cst_5 : f32 to vector<1x16x1xf32>
    %16 = arith.addf %12, %15 : vector<1x16x1xf32>
    %17 = math.rsqrt %16 : vector<1x16x1xf32>
    %18 = vector.broadcast %17 : vector<1x16x1xf32> to vector<1x16x64xf32>
    %19 = arith.mulf %14, %18 : vector<1x16x64xf32>
    %c0_6 = arith.constant 0 : index
    %c0_7 = arith.constant 0 : index
    %20 = vector.load %arg7[%c0_6, %c0_7] : memref<1x64xf32, #tpu.memory_space<vmem>>, vector<1x64xf32>
    %21 = vector.shape_cast %20 : vector<1x64xf32> to vector<1x1x64xf32>
    %22 = vector.broadcast %21 : vector<1x1x64xf32> to vector<1x16x64xf32>
    %23 = arith.mulf %19, %22 : vector<1x16x64xf32>
    %c0_8 = arith.constant 0 : index
    %c0_9 = arith.constant 0 : index
    %24 = vector.load %arg8[%c0_8, %c0_9] : memref<1x64xf32, #tpu.memory_space<vmem>>, vector<1x64xf32>
    %25 = vector.shape_cast %24 : vector<1x64xf32> to vector<1x1x64xf32>
    %26 = vector.broadcast %25 : vector<1x1x64xf32> to vector<1x16x64xf32>
    %27 = arith.addf %23, %26 : vector<1x16x64xf32>
    %28 = arith.truncf %27 : vector<1x16x64xf32> to vector<1x16x64xbf16>
    %29 = vector.shape_cast %28 : vector<1x16x64xbf16> to vector<16x64xbf16>
    %c0_10 = arith.constant 0 : index
    %c0_11 = arith.constant 0 : index
    %30 = vector.load %arg2[%c0_10, %c0_11] : memref<64x192xbf16, #tpu.memory_space<vmem>>, vector<64x192xbf16>
    %cst_12 = arith.constant dense<0.000000e+00> : vector<16x192xf32>
    %31 = tpu.matmul %29, %30, %cst_12 {dimension_numbers = #tpu.dot_dimension_numbers<[1], [0], [0], [1], [0, 0, 1, 1], [], []>} : vector<16x64xbf16>, vector<64x192xbf16>, vector<16x192xf32> -> vector<16x192xf32>
    %c0_13 = arith.constant 0 : index
    %c0_14 = arith.constant 0 : index
    %32 = vector.load %arg3[%c0_13, %c0_14] : memref<1x192xf32, #tpu.memory_space<vmem>>, vector<1x192xf32>
    %33 = vector.broadcast %32 : vector<1x192xf32> to vector<16x192xf32>
    %34 = arith.addf %31, %33 : vector<16x192xf32>
    %35 = vector.shape_cast %34 : vector<16x192xf32> to vector<1x16x192xf32>
    %c0_15 = arith.constant 0 : index
    %c0_16 = arith.constant 0 : index
    %c0_17 = arith.constant 0 : index
    %c0_18 = arith.constant 0 : index
    %36 = vector.load %arg4[%c0_15, %c0_16, %c0_17, %c0_18] : memref<1x4x16x16xf32, #tpu.memory_space<vmem>>, vector<1x4x16x16xf32>
    %37 = vector.extract_strided_slice %35 {offsets = [0, 0, 0], sizes = [1, 16, 16], strides = [1, 1, 1]} : vector<1x16x192xf32> to vector<1x16x16xf32>
    %38 = arith.truncf %37 : vector<1x16x16xf32> to vector<1x16x16xbf16>
    %39 = vector.extract_strided_slice %35 {offsets = [0, 0, 64], sizes = [1, 16, 16], strides = [1, 1, 1]} : vector<1x16x192xf32> to vector<1x16x16xf32>
    %40 = arith.truncf %39 : vector<1x16x16xf32> to vector<1x16x16xbf16>
    %41 = vector.extract_strided_slice %35 {offsets = [0, 0, 128], sizes = [1, 16, 16], strides = [1, 1, 1]} : vector<1x16x192xf32> to vector<1x16x16xf32>
    %42 = arith.truncf %41 : vector<1x16x16xf32> to vector<1x16x16xbf16>
    "tpu.trace_start"() <{level = 10 : i32, message = "wnd,wmd->wnm"}> : () -> ()
    %cst_19 = arith.constant dense<0.000000e+00> : vector<1x16x16xf32>
    %43 = tpu.matmul %38, %40, %cst_19 {dimension_numbers = #tpu.dot_dimension_numbers<[2], [2], [1], [1], [0, 0, 0, 1, 1, 1], [0], [0]>} : vector<1x16x16xbf16>, vector<1x16x16xbf16>, vector<1x16x16xf32> -> vector<1x16x16xf32>
    "tpu.trace_stop"() : () -> ()
    %44 = vector.extract_strided_slice %36 {offsets = [0, 0, 0, 0], sizes = [1, 1, 16, 16], strides = [1, 1, 1, 1]} : vector<1x4x16x16xf32> to vector<1x1x16x16xf32>
    %45 = vector.shape_cast %44 : vector<1x1x16x16xf32> to vector<1x16x16xf32>
    %46 = arith.addf %43, %45 : vector<1x16x16xf32>
    %cst_20 = arith.constant dense<0xFF800000> : vector<1x16xf32>
    %47 = vector.multi_reduction <maximumf>, %46, %cst_20 [2] : vector<1x16x16xf32> to vector<1x16xf32>
    %48 = vector.shape_cast %47 : vector<1x16xf32> to vector<1x16x1xf32>
    %49 = vector.broadcast %48 : vector<1x16x1xf32> to vector<1x16x16xf32>
    %50 = arith.subf %46, %49 : vector<1x16x16xf32>
    %51 = math.exp %50 : vector<1x16x16xf32>
    %cst_21 = arith.constant dense<0.000000e+00> : vector<1x16xf32>
    %52 = vector.multi_reduction <add>, %51, %cst_21 [2] : vector<1x16x16xf32> to vector<1x16xf32>
    %53 = vector.shape_cast %52 : vector<1x16xf32> to vector<1x16x1xf32>
    %54 = tpu.reciprocal %53 {approx = true} : vector<1x16x1xf32> -> vector<1x16x1xf32>
    %55 = vector.broadcast %54 : vector<1x16x1xf32> to vector<1x16x16xf32>
    %56 = arith.mulf %51, %55 : vector<1x16x16xf32>
    %57 = arith.truncf %56 : vector<1x16x16xf32> to vector<1x16x16xbf16>
    "tpu.trace_start"() <{level = 10 : i32, message = "wnm,wmd->wnd"}> : () -> ()
    %cst_22 = arith.constant dense<0.000000e+00> : vector<1x16x16xf32>
    %58 = tpu.matmul %57, %42, %cst_22 {dimension_numbers = #tpu.dot_dimension_numbers<[2], [1], [1], [2], [0, 0, 0, 1, 1, 2], [0], [0]>} : vector<1x16x16xbf16>, vector<1x16x16xbf16>, vector<1x16x16xf32> -> vector<1x16x16xf32>
    "tpu.trace_stop"() : () -> ()
    %59 = vector.extract_strided_slice %35 {offsets = [0, 0, 16], sizes = [1, 16, 16], strides = [1, 1, 1]} : vector<1x16x192xf32> to vector<1x16x16xf32>
    %60 = arith.truncf %59 : vector<1x16x16xf32> to vector<1x16x16xbf16>
    %61 = vector.extract_strided_slice %35 {offsets = [0, 0, 80], sizes = [1, 16, 16], strides = [1, 1, 1]} : vector<1x16x192xf32> to vector<1x16x16xf32>
    %62 = arith.truncf %61 : vector<1x16x16xf32> to vector<1x16x16xbf16>
    %63 = vector.extract_strided_slice %35 {offsets = [0, 0, 144], sizes = [1, 16, 16], strides = [1, 1, 1]} : vector<1x16x192xf32> to vector<1x16x16xf32>
    %64 = arith.truncf %63 : vector<1x16x16xf32> to vector<1x16x16xbf16>
    "tpu.trace_start"() <{level = 10 : i32, message = "wnd,wmd->wnm"}> : () -> ()
    %cst_23 = arith.constant dense<0.000000e+00> : vector<1x16x16xf32>
    %65 = tpu.matmul %60, %62, %cst_23 {dimension_numbers = #tpu.dot_dimension_numbers<[2], [2], [1], [1], [0, 0, 0, 1, 1, 1], [0], [0]>} : vector<1x16x16xbf16>, vector<1x16x16xbf16>, vector<1x16x16xf32> -> vector<1x16x16xf32>
    "tpu.trace_stop"() : () -> ()
    %66 = vector.extract_strided_slice %36 {offsets = [0, 1, 0, 0], sizes = [1, 1, 16, 16], strides = [1, 1, 1, 1]} : vector<1x4x16x16xf32> to vector<1x1x16x16xf32>
    %67 = vector.shape_cast %66 : vector<1x1x16x16xf32> to vector<1x16x16xf32>
    %68 = arith.addf %65, %67 : vector<1x16x16xf32>
    %cst_24 = arith.constant dense<0xFF800000> : vector<1x16xf32>
    %69 = vector.multi_reduction <maximumf>, %68, %cst_24 [2] : vector<1x16x16xf32> to vector<1x16xf32>
    %70 = vector.shape_cast %69 : vector<1x16xf32> to vector<1x16x1xf32>
    %71 = vector.broadcast %70 : vector<1x16x1xf32> to vector<1x16x16xf32>
    %72 = arith.subf %68, %71 : vector<1x16x16xf32>
    %73 = math.exp %72 : vector<1x16x16xf32>
    %cst_25 = arith.constant dense<0.000000e+00> : vector<1x16xf32>
    %74 = vector.multi_reduction <add>, %73, %cst_25 [2] : vector<1x16x16xf32> to vector<1x16xf32>
    %75 = vector.shape_cast %74 : vector<1x16xf32> to vector<1x16x1xf32>
    %76 = tpu.reciprocal %75 {approx = true} : vector<1x16x1xf32> -> vector<1x16x1xf32>
    %77 = vector.broadcast %76 : vector<1x16x1xf32> to vector<1x16x16xf32>
    %78 = arith.mulf %73, %77 : vector<1x16x16xf32>
    %79 = arith.truncf %78 : vector<1x16x16xf32> to vector<1x16x16xbf16>
    "tpu.trace_start"() <{level = 10 : i32, message = "wnm,wmd->wnd"}> : () -> ()
    %cst_26 = arith.constant dense<0.000000e+00> : vector<1x16x16xf32>
    %80 = tpu.matmul %79, %64, %cst_26 {dimension_numbers = #tpu.dot_dimension_numbers<[2], [1], [1], [2], [0, 0, 0, 1, 1, 2], [0], [0]>} : vector<1x16x16xbf16>, vector<1x16x16xbf16>, vector<1x16x16xf32> -> vector<1x16x16xf32>
    "tpu.trace_stop"() : () -> ()
    %81 = vector.extract_strided_slice %35 {offsets = [0, 0, 32], sizes = [1, 16, 16], strides = [1, 1, 1]} : vector<1x16x192xf32> to vector<1x16x16xf32>
    %82 = arith.truncf %81 : vector<1x16x16xf32> to vector<1x16x16xbf16>
    %83 = vector.extract_strided_slice %35 {offsets = [0, 0, 96], sizes = [1, 16, 16], strides = [1, 1, 1]} : vector<1x16x192xf32> to vector<1x16x16xf32>
    %84 = arith.truncf %83 : vector<1x16x16xf32> to vector<1x16x16xbf16>
    %85 = vector.extract_strided_slice %35 {offsets = [0, 0, 160], sizes = [1, 16, 16], strides = [1, 1, 1]} : vector<1x16x192xf32> to vector<1x16x16xf32>
    %86 = arith.truncf %85 : vector<1x16x16xf32> to vector<1x16x16xbf16>
    "tpu.trace_start"() <{level = 10 : i32, message = "wnd,wmd->wnm"}> : () -> ()
    %cst_27 = arith.constant dense<0.000000e+00> : vector<1x16x16xf32>
    %87 = tpu.matmul %82, %84, %cst_27 {dimension_numbers = #tpu.dot_dimension_numbers<[2], [2], [1], [1], [0, 0, 0, 1, 1, 1], [0], [0]>} : vector<1x16x16xbf16>, vector<1x16x16xbf16>, vector<1x16x16xf32> -> vector<1x16x16xf32>
    "tpu.trace_stop"() : () -> ()
    %88 = vector.extract_strided_slice %36 {offsets = [0, 2, 0, 0], sizes = [1, 1, 16, 16], strides = [1, 1, 1, 1]} : vector<1x4x16x16xf32> to vector<1x1x16x16xf32>
    %89 = vector.shape_cast %88 : vector<1x1x16x16xf32> to vector<1x16x16xf32>
    %90 = arith.addf %87, %89 : vector<1x16x16xf32>
    %cst_28 = arith.constant dense<0xFF800000> : vector<1x16xf32>
    %91 = vector.multi_reduction <maximumf>, %90, %cst_28 [2] : vector<1x16x16xf32> to vector<1x16xf32>
    %92 = vector.shape_cast %91 : vector<1x16xf32> to vector<1x16x1xf32>
    %93 = vector.broadcast %92 : vector<1x16x1xf32> to vector<1x16x16xf32>
    %94 = arith.subf %90, %93 : vector<1x16x16xf32>
    %95 = math.exp %94 : vector<1x16x16xf32>
    %cst_29 = arith.constant dense<0.000000e+00> : vector<1x16xf32>
    %96 = vector.multi_reduction <add>, %95, %cst_29 [2] : vector<1x16x16xf32> to vector<1x16xf32>
    %97 = vector.shape_cast %96 : vector<1x16xf32> to vector<1x16x1xf32>
    %98 = tpu.reciprocal %97 {approx = true} : vector<1x16x1xf32> -> vector<1x16x1xf32>
    %99 = vector.broadcast %98 : vector<1x16x1xf32> to vector<1x16x16xf32>
    %100 = arith.mulf %95, %99 : vector<1x16x16xf32>
    %101 = arith.truncf %100 : vector<1x16x16xf32> to vector<1x16x16xbf16>
    "tpu.trace_start"() <{level = 10 : i32, message = "wnm,wmd->wnd"}> : () -> ()
    %cst_30 = arith.constant dense<0.000000e+00> : vector<1x16x16xf32>
    %102 = tpu.matmul %101, %86, %cst_30 {dimension_numbers = #tpu.dot_dimension_numbers<[2], [1], [1], [2], [0, 0, 0, 1, 1, 2], [0], [0]>} : vector<1x16x16xbf16>, vector<1x16x16xbf16>, vector<1x16x16xf32> -> vector<1x16x16xf32>
    "tpu.trace_stop"() : () -> ()
    %103 = vector.extract_strided_slice %35 {offsets = [0, 0, 48], sizes = [1, 16, 16], strides = [1, 1, 1]} : vector<1x16x192xf32> to vector<1x16x16xf32>
    %104 = arith.truncf %103 : vector<1x16x16xf32> to vector<1x16x16xbf16>
    %105 = vector.extract_strided_slice %35 {offsets = [0, 0, 112], sizes = [1, 16, 16], strides = [1, 1, 1]} : vector<1x16x192xf32> to vector<1x16x16xf32>
    %106 = arith.truncf %105 : vector<1x16x16xf32> to vector<1x16x16xbf16>
    %107 = vector.extract_strided_slice %35 {offsets = [0, 0, 176], sizes = [1, 16, 16], strides = [1, 1, 1]} : vector<1x16x192xf32> to vector<1x16x16xf32>
    %108 = arith.truncf %107 : vector<1x16x16xf32> to vector<1x16x16xbf16>
    "tpu.trace_start"() <{level = 10 : i32, message = "wnd,wmd->wnm"}> : () -> ()
    %cst_31 = arith.constant dense<0.000000e+00> : vector<1x16x16xf32>
    %109 = tpu.matmul %104, %106, %cst_31 {dimension_numbers = #tpu.dot_dimension_numbers<[2], [2], [1], [1], [0, 0, 0, 1, 1, 1], [0], [0]>} : vector<1x16x16xbf16>, vector<1x16x16xbf16>, vector<1x16x16xf32> -> vector<1x16x16xf32>
    "tpu.trace_stop"() : () -> ()
    %110 = vector.extract_strided_slice %36 {offsets = [0, 3, 0, 0], sizes = [1, 1, 16, 16], strides = [1, 1, 1, 1]} : vector<1x4x16x16xf32> to vector<1x1x16x16xf32>
    %111 = vector.shape_cast %110 : vector<1x1x16x16xf32> to vector<1x16x16xf32>
    %112 = arith.addf %109, %111 : vector<1x16x16xf32>
    %cst_32 = arith.constant dense<0xFF800000> : vector<1x16xf32>
    %113 = vector.multi_reduction <maximumf>, %112, %cst_32 [2] : vector<1x16x16xf32> to vector<1x16xf32>
    %114 = vector.shape_cast %113 : vector<1x16xf32> to vector<1x16x1xf32>
    %115 = vector.broadcast %114 : vector<1x16x1xf32> to vector<1x16x16xf32>
    %116 = arith.subf %112, %115 : vector<1x16x16xf32>
    %117 = math.exp %116 : vector<1x16x16xf32>
    %cst_33 = arith.constant dense<0.000000e+00> : vector<1x16xf32>
    %118 = vector.multi_reduction <add>, %117, %cst_33 [2] : vector<1x16x16xf32> to vector<1x16xf32>
    %119 = vector.shape_cast %118 : vector<1x16xf32> to vector<1x16x1xf32>
    %120 = tpu.reciprocal %119 {approx = true} : vector<1x16x1xf32> -> vector<1x16x1xf32>
    %121 = vector.broadcast %120 : vector<1x16x1xf32> to vector<1x16x16xf32>
    %122 = arith.mulf %117, %121 : vector<1x16x16xf32>
    %123 = arith.truncf %122 : vector<1x16x16xf32> to vector<1x16x16xbf16>
    "tpu.trace_start"() <{level = 10 : i32, message = "wnm,wmd->wnd"}> : () -> ()
    %cst_34 = arith.constant dense<0.000000e+00> : vector<1x16x16xf32>
    %124 = tpu.matmul %123, %108, %cst_34 {dimension_numbers = #tpu.dot_dimension_numbers<[2], [1], [1], [2], [0, 0, 0, 1, 1, 2], [0], [0]>} : vector<1x16x16xbf16>, vector<1x16x16xbf16>, vector<1x16x16xf32> -> vector<1x16x16xf32>
    "tpu.trace_stop"() : () -> ()
    %125 = tpu.concatenate %58, %80, %102, %124 in 2 : vector<1x16x16xf32>, vector<1x16x16xf32>, vector<1x16x16xf32>, vector<1x16x16xf32> -> vector<1x16x64xf32>
    %126 = arith.truncf %125 : vector<1x16x64xf32> to vector<1x16x64xbf16>
    %127 = vector.shape_cast %126 : vector<1x16x64xbf16> to vector<16x64xbf16>
    %c0_35 = arith.constant 0 : index
    %c0_36 = arith.constant 0 : index
    %128 = vector.load %arg5[%c0_35, %c0_36] : memref<64x64xbf16, #tpu.memory_space<vmem>>, vector<64x64xbf16>
    %cst_37 = arith.constant dense<0.000000e+00> : vector<16x64xf32>
    %129 = tpu.matmul %127, %128, %cst_37 {dimension_numbers = #tpu.dot_dimension_numbers<[1], [0], [0], [1], [0, 0, 1, 1], [], []>} : vector<16x64xbf16>, vector<64x64xbf16>, vector<16x64xf32> -> vector<16x64xf32>
    %c0_38 = arith.constant 0 : index
    %c0_39 = arith.constant 0 : index
    %130 = vector.load %arg6[%c0_38, %c0_39] : memref<1x64xf32, #tpu.memory_space<vmem>>, vector<1x64xf32>
    %131 = vector.broadcast %130 : vector<1x64xf32> to vector<16x64xf32>
    %132 = arith.addf %129, %131 : vector<16x64xf32>
    %133 = vector.shape_cast %132 : vector<16x64xf32> to vector<1x16x64xf32>
    %134 = arith.truncf %133 : vector<1x16x64xf32> to vector<1x16x64xbf16>
    %c0_40 = arith.constant 0 : index
    %c0_41 = arith.constant 0 : index
    %c0_42 = arith.constant 0 : index
    %135 = vector.load %arg9[%c0_40, %c0_41, %c0_42] : memref<1x16x64xbf16, #tpu.memory_space<vmem>>, vector<1x16x64xbf16>
    tpu.vector_store %arg9[%c0_40, %c0_41, %c0_42], %134 {strides = array<i32>} : memref<1x16x64xbf16, #tpu.memory_space<vmem>>, vector<1x16x64xbf16>,
    return
  }
  func.func @transform_0(%arg0: i32) -> (i32, i32, i32) {
    %c0_i32 = arith.constant 0 : i32
    %c0_i32_0 = arith.constant 0 : i32
    %c0_i32_1 = arith.constant 0 : i32
    return %arg0, %c0_i32, %c0_i32_0 : i32, i32, i32
  }
  func.func @transform_1(%arg0: i32) -> (i32, i32) {
    %c0_i32 = arith.constant 0 : i32
    %c0_i32_0 = arith.constant 0 : i32
    %c0_i32_1 = arith.constant 0 : i32
    return %c0_i32, %c0_i32_0 : i32, i32
  }
  func.func @transform_2(%arg0: i32) -> (i32, i32) {
    %c0_i32 = arith.constant 0 : i32
    %c0_i32_0 = arith.constant 0 : i32
    %c0_i32_1 = arith.constant 0 : i32
    return %c0_i32, %c0_i32_0 : i32, i32
  }
  func.func @transform_3(%arg0: i32) -> (i32, i32, i32, i32) {
    %c0_i32 = arith.constant 0 : i32
    %c0_i32_0 = arith.constant 0 : i32
    %c0_i32_1 = arith.constant 0 : i32
    %c0_i32_2 = arith.constant 0 : i32
    %c0_i32_3 = arith.constant 0 : i32
    return %c0_i32, %c0_i32_0, %c0_i32_1, %c0_i32_2 : i32, i32, i32, i32
  }
  func.func @transform_4(%arg0: i32) -> (i32, i32) {
    %c0_i32 = arith.constant 0 : i32
    %c0_i32_0 = arith.constant 0 : i32
    %c0_i32_1 = arith.constant 0 : i32
    return %c0_i32, %c0_i32_0 : i32, i32
  }
  func.func @transform_5(%arg0: i32) -> (i32, i32) {
    %c0_i32 = arith.constant 0 : i32
    %c0_i32_0 = arith.constant 0 : i32
    %c0_i32_1 = arith.constant 0 : i32
    return %c0_i32, %c0_i32_0 : i32, i32
  }
  func.func @transform_6(%arg0: i32) -> (i32, i32) {
    %c0_i32 = arith.constant 0 : i32
    %c0_i32_0 = arith.constant 0 : i32
    %c0_i32_1 = arith.constant 0 : i32
    return %c0_i32, %c0_i32_0 : i32, i32
  }
  func.func @transform_7(%arg0: i32) -> (i32, i32) {
    %c0_i32 = arith.constant 0 : i32
    %c0_i32_0 = arith.constant 0 : i32
    %c0_i32_1 = arith.constant 0 : i32
    return %c0_i32, %c0_i32_0 : i32, i32
  }
  func.func @transform_8(%arg0: i32) -> (i32, i32, i32) {
    %c0_i32 = arith.constant 0 : i32
    %c0_i32_0 = arith.constant 0 : i32
    %c0_i32_1 = arith.constant 0 : i32
    return %arg0, %c0_i32, %c0_i32_0 : i32, i32, i32
  }
}

module attributes {stable_mosaic.version = 11 : i64} {
  func.func @_mm_kernel(%arg0: i32, %arg1: memref<16x64xbf16, #tpu.memory_space<vmem>>, %arg2: memref<64x256xbf16, #tpu.memory_space<vmem>>, %arg3: memref<1x256xf32, #tpu.memory_space<vmem>>, %arg4: memref<1x256xf32, #tpu.memory_space<vmem>>, %arg5: memref<1x64xf32, #tpu.memory_space<vmem>>, %arg6: memref<1x64xf32, #tpu.memory_space<vmem>>, %arg7: memref<16x256xbf16, #tpu.memory_space<vmem>>) attributes {dimension_semantics = [#tpu.dimension_semantics<parallel>], iteration_bounds = array<i64: 2>, scalar_prefetch = 0 : i64, scratch_operands = 0 : i64, tpu.core_type = #tpu.core_type<tc>, window_params = [{transform_indices = @transform_0, window_bounds = array<i64: 16, 64>}, {pipeline_mode = #tpu.pipeline_mode<synchronous>, transform_indices = @transform_1, window_bounds = array<i64: 64, 256>}, {pipeline_mode = #tpu.pipeline_mode<synchronous>, transform_indices = @transform_2, window_bounds = array<i64: 1, 256>}, {pipeline_mode = #tpu.pipeline_mode<synchronous>, transform_indices = @transform_3, window_bounds = array<i64: 1, 256>}, {pipeline_mode = #tpu.pipeline_mode<synchronous>, transform_indices = @transform_4, window_bounds = array<i64: 1, 64>}, {pipeline_mode = #tpu.pipeline_mode<synchronous>, transform_indices = @transform_5, window_bounds = array<i64: 1, 64>}, {transform_indices = @transform_6, window_bounds = array<i64: 16, 256>}]} {
    %c0 = arith.constant 0 : index
    %c0_0 = arith.constant 0 : index
    %0 = vector.load %arg1[%c0, %c0_0] : memref<16x64xbf16, #tpu.memory_space<vmem>>, vector<16x64xbf16>
    %1 = arith.extf %0 : vector<16x64xbf16> to vector<16x64xf32>
    %cst = arith.constant dense<0.000000e+00> : vector<16xf32>
    %2 = vector.multi_reduction <add>, %1, %cst [1] : vector<16x64xf32> to vector<16xf32>
    %3 = vector.shape_cast %2 : vector<16xf32> to vector<16x1xf32>
    %cst_1 = arith.constant 6.400000e+01 : f32
    %4 = vector.broadcast %cst_1 : f32 to vector<16x1xf32>
    %5 = arith.divf %3, %4 : vector<16x1xf32>
    %6 = vector.broadcast %5 : vector<16x1xf32> to vector<16x64xf32>
    %7 = arith.subf %1, %6 : vector<16x64xf32>
    %8 = arith.mulf %7, %7 : vector<16x64xf32>
    %cst_2 = arith.constant dense<0.000000e+00> : vector<16xf32>
    %9 = vector.multi_reduction <add>, %8, %cst_2 [1] : vector<16x64xf32> to vector<16xf32>
    %10 = vector.shape_cast %9 : vector<16xf32> to vector<16x1xf32>
    %cst_3 = arith.constant 6.400000e+01 : f32
    %11 = vector.broadcast %cst_3 : f32 to vector<16x1xf32>
    %12 = arith.divf %10, %11 : vector<16x1xf32>
    %13 = vector.broadcast %5 : vector<16x1xf32> to vector<16x64xf32>
    %14 = arith.subf %1, %13 : vector<16x64xf32>
    %cst_4 = arith.constant 9.99999974E-6 : f32
    %15 = vector.broadcast %cst_4 : f32 to vector<16x1xf32>
    %16 = arith.addf %12, %15 : vector<16x1xf32>
    %17 = math.rsqrt %16 : vector<16x1xf32>
    %18 = vector.broadcast %17 : vector<16x1xf32> to vector<16x64xf32>
    %19 = arith.mulf %14, %18 : vector<16x64xf32>
    %c0_5 = arith.constant 0 : index
    %c0_6 = arith.constant 0 : index
    %20 = vector.load %arg5[%c0_5, %c0_6] : memref<1x64xf32, #tpu.memory_space<vmem>>, vector<1x64xf32>
    %21 = vector.broadcast %20 : vector<1x64xf32> to vector<16x64xf32>
    %22 = arith.mulf %19, %21 : vector<16x64xf32>
    %c0_7 = arith.constant 0 : index
    %c0_8 = arith.constant 0 : index
    %23 = vector.load %arg6[%c0_7, %c0_8] : memref<1x64xf32, #tpu.memory_space<vmem>>, vector<1x64xf32>
    %24 = vector.broadcast %23 : vector<1x64xf32> to vector<16x64xf32>
    %25 = arith.addf %22, %24 : vector<16x64xf32>
    %26 = arith.truncf %25 : vector<16x64xf32> to vector<16x64xbf16>
    %c0_9 = arith.constant 0 : index
    %c0_10 = arith.constant 0 : index
    %27 = vector.load %arg2[%c0_9, %c0_10] : memref<64x256xbf16, #tpu.memory_space<vmem>>, vector<64x256xbf16>
    %cst_11 = arith.constant dense<0.000000e+00> : vector<16x256xf32>
    %28 = tpu.matmul %26, %27, %cst_11 {dimension_numbers = #tpu.dot_dimension_numbers<[1], [0], [0], [1], [0, 0, 1, 1], [], []>} : vector<16x64xbf16>, vector<64x256xbf16>, vector<16x256xf32> -> vector<16x256xf32>
    %c0_12 = arith.constant 0 : index
    %c0_13 = arith.constant 0 : index
    %29 = vector.load %arg3[%c0_12, %c0_13] : memref<1x256xf32, #tpu.memory_space<vmem>>, vector<1x256xf32>
    %30 = vector.broadcast %29 : vector<1x256xf32> to vector<16x256xf32>
    %31 = arith.mulf %28, %30 : vector<16x256xf32>
    %c0_14 = arith.constant 0 : index
    %c0_15 = arith.constant 0 : index
    %32 = vector.load %arg4[%c0_14, %c0_15] : memref<1x256xf32, #tpu.memory_space<vmem>>, vector<1x256xf32>
    %33 = vector.broadcast %32 : vector<1x256xf32> to vector<16x256xf32>
    %34 = arith.addf %31, %33 : vector<16x256xf32>
    %cst_16 = arith.constant 5.000000e-01 : f32
    %35 = vector.broadcast %cst_16 : f32 to vector<16x256xf32>
    %36 = arith.mulf %35, %34 : vector<16x256xf32>
    %cst_17 = arith.constant 0.707106769 : f32
    %37 = vector.broadcast %cst_17 : f32 to vector<16x256xf32>
    %38 = arith.mulf %34, %37 : vector<16x256xf32>
    %39 = math.erf %38 : vector<16x256xf32>
    %cst_18 = arith.constant 1.000000e+00 : f32
    %40 = vector.broadcast %cst_18 : f32 to vector<16x256xf32>
    %41 = arith.addf %40, %39 : vector<16x256xf32>
    %42 = arith.mulf %36, %41 : vector<16x256xf32>
    %43 = arith.truncf %42 : vector<16x256xf32> to vector<16x256xbf16>
    %c0_19 = arith.constant 0 : index
    %c0_20 = arith.constant 0 : index
    %44 = vector.load %arg7[%c0_19, %c0_20] : memref<16x256xbf16, #tpu.memory_space<vmem>>, vector<16x256xbf16>
    tpu.vector_store %arg7[%c0_19, %c0_20], %43 {strides = array<i32>} : memref<16x256xbf16, #tpu.memory_space<vmem>>, vector<16x256xbf16>,
    return
  }
  func.func @transform_0(%arg0: i32) -> (i32, i32) {
    %c0_i32 = arith.constant 0 : i32
    %c0_i32_0 = arith.constant 0 : i32
    return %arg0, %c0_i32 : i32, i32
  }
  func.func @transform_1(%arg0: i32) -> (i32, i32) {
    %c0_i32 = arith.constant 0 : i32
    %c0_i32_0 = arith.constant 0 : i32
    %c0_i32_1 = arith.constant 0 : i32
    return %c0_i32, %c0_i32_0 : i32, i32
  }
  func.func @transform_2(%arg0: i32) -> (i32, i32) {
    %c0_i32 = arith.constant 0 : i32
    %c0_i32_0 = arith.constant 0 : i32
    %c0_i32_1 = arith.constant 0 : i32
    return %c0_i32, %c0_i32_0 : i32, i32
  }
  func.func @transform_3(%arg0: i32) -> (i32, i32) {
    %c0_i32 = arith.constant 0 : i32
    %c0_i32_0 = arith.constant 0 : i32
    %c0_i32_1 = arith.constant 0 : i32
    return %c0_i32, %c0_i32_0 : i32, i32
  }
  func.func @transform_4(%arg0: i32) -> (i32, i32) {
    %c0_i32 = arith.constant 0 : i32
    %c0_i32_0 = arith.constant 0 : i32
    %c0_i32_1 = arith.constant 0 : i32
    return %c0_i32, %c0_i32_0 : i32, i32
  }
  func.func @transform_5(%arg0: i32) -> (i32, i32) {
    %c0_i32 = arith.constant 0 : i32
    %c0_i32_0 = arith.constant 0 : i32
    %c0_i32_1 = arith.constant 0 : i32
    return %c0_i32, %c0_i32_0 : i32, i32
  }
  func.func @transform_6(%arg0: i32) -> (i32, i32) {
    %c0_i32 = arith.constant 0 : i32
    %c0_i32_0 = arith.constant 0 : i32
    return %arg0, %c0_i32 : i32, i32
  }
}

module attributes {stable_mosaic.version = 11 : i64} {
  func.func @_mm_kernel(%arg0: i32, %arg1: memref<16x128xbf16, #tpu.memory_space<vmem>>, %arg2: memref<128x64xbf16, #tpu.memory_space<vmem>>, %arg3: memref<1x64xf32, #tpu.memory_space<vmem>>, %arg4: memref<1x64xf32, #tpu.memory_space<vmem>>, %arg5: memref<1x128xf32, #tpu.memory_space<vmem>>, %arg6: memref<1x128xf32, #tpu.memory_space<vmem>>, %arg7: memref<16x64xbf16, #tpu.memory_space<vmem>>) attributes {dimension_semantics = [#tpu.dimension_semantics<parallel>], iteration_bounds = array<i64: 2>, scalar_prefetch = 0 : i64, scratch_operands = 0 : i64, tpu.core_type = #tpu.core_type<tc>, window_params = [{transform_indices = @transform_0, window_bounds = array<i64: 16, 128>}, {pipeline_mode = #tpu.pipeline_mode<synchronous>, transform_indices = @transform_1, window_bounds = array<i64: 128, 64>}, {pipeline_mode = #tpu.pipeline_mode<synchronous>, transform_indices = @transform_2, window_bounds = array<i64: 1, 64>}, {pipeline_mode = #tpu.pipeline_mode<synchronous>, transform_indices = @transform_3, window_bounds = array<i64: 1, 64>}, {pipeline_mode = #tpu.pipeline_mode<synchronous>, transform_indices = @transform_4, window_bounds = array<i64: 1, 128>}, {pipeline_mode = #tpu.pipeline_mode<synchronous>, transform_indices = @transform_5, window_bounds = array<i64: 1, 128>}, {transform_indices = @transform_6, window_bounds = array<i64: 16, 64>}]} {
    %c0 = arith.constant 0 : index
    %c0_0 = arith.constant 0 : index
    %0 = vector.load %arg1[%c0, %c0_0] : memref<16x128xbf16, #tpu.memory_space<vmem>>, vector<16x128xbf16>
    %1 = arith.extf %0 : vector<16x128xbf16> to vector<16x128xf32>
    %cst = arith.constant dense<0.000000e+00> : vector<16xf32>
    %2 = vector.multi_reduction <add>, %1, %cst [1] : vector<16x128xf32> to vector<16xf32>
    %3 = vector.shape_cast %2 : vector<16xf32> to vector<16x1xf32>
    %cst_1 = arith.constant 1.280000e+02 : f32
    %4 = vector.broadcast %cst_1 : f32 to vector<16x1xf32>
    %5 = arith.divf %3, %4 : vector<16x1xf32>
    %6 = vector.broadcast %5 : vector<16x1xf32> to vector<16x128xf32>
    %7 = arith.subf %1, %6 : vector<16x128xf32>
    %8 = arith.mulf %7, %7 : vector<16x128xf32>
    %cst_2 = arith.constant dense<0.000000e+00> : vector<16xf32>
    %9 = vector.multi_reduction <add>, %8, %cst_2 [1] : vector<16x128xf32> to vector<16xf32>
    %10 = vector.shape_cast %9 : vector<16xf32> to vector<16x1xf32>
    %cst_3 = arith.constant 1.280000e+02 : f32
    %11 = vector.broadcast %cst_3 : f32 to vector<16x1xf32>
    %12 = arith.divf %10, %11 : vector<16x1xf32>
    %13 = vector.broadcast %5 : vector<16x1xf32> to vector<16x128xf32>
    %14 = arith.subf %1, %13 : vector<16x128xf32>
    %cst_4 = arith.constant 9.99999974E-6 : f32
    %15 = vector.broadcast %cst_4 : f32 to vector<16x1xf32>
    %16 = arith.addf %12, %15 : vector<16x1xf32>
    %17 = math.rsqrt %16 : vector<16x1xf32>
    %18 = vector.broadcast %17 : vector<16x1xf32> to vector<16x128xf32>
    %19 = arith.mulf %14, %18 : vector<16x128xf32>
    %c0_5 = arith.constant 0 : index
    %c0_6 = arith.constant 0 : index
    %20 = vector.load %arg5[%c0_5, %c0_6] : memref<1x128xf32, #tpu.memory_space<vmem>>, vector<1x128xf32>
    %21 = vector.broadcast %20 : vector<1x128xf32> to vector<16x128xf32>
    %22 = arith.mulf %19, %21 : vector<16x128xf32>
    %c0_7 = arith.constant 0 : index
    %c0_8 = arith.constant 0 : index
    %23 = vector.load %arg6[%c0_7, %c0_8] : memref<1x128xf32, #tpu.memory_space<vmem>>, vector<1x128xf32>
    %24 = vector.broadcast %23 : vector<1x128xf32> to vector<16x128xf32>
    %25 = arith.addf %22, %24 : vector<16x128xf32>
    %26 = arith.truncf %25 : vector<16x128xf32> to vector<16x128xbf16>
    %c0_9 = arith.constant 0 : index
    %c0_10 = arith.constant 0 : index
    %27 = vector.load %arg2[%c0_9, %c0_10] : memref<128x64xbf16, #tpu.memory_space<vmem>>, vector<128x64xbf16>
    %cst_11 = arith.constant dense<0.000000e+00> : vector<16x64xf32>
    %28 = tpu.matmul %26, %27, %cst_11 {dimension_numbers = #tpu.dot_dimension_numbers<[1], [0], [0], [1], [0, 0, 1, 1], [], []>} : vector<16x128xbf16>, vector<128x64xbf16>, vector<16x64xf32> -> vector<16x64xf32>
    %c0_12 = arith.constant 0 : index
    %c0_13 = arith.constant 0 : index
    %29 = vector.load %arg3[%c0_12, %c0_13] : memref<1x64xf32, #tpu.memory_space<vmem>>, vector<1x64xf32>
    %30 = vector.broadcast %29 : vector<1x64xf32> to vector<16x64xf32>
    %31 = arith.mulf %28, %30 : vector<16x64xf32>
    %c0_14 = arith.constant 0 : index
    %c0_15 = arith.constant 0 : index
    %32 = vector.load %arg4[%c0_14, %c0_15] : memref<1x64xf32, #tpu.memory_space<vmem>>, vector<1x64xf32>
    %33 = vector.broadcast %32 : vector<1x64xf32> to vector<16x64xf32>
    %34 = arith.addf %31, %33 : vector<16x64xf32>
    %35 = arith.truncf %34 : vector<16x64xf32> to vector<16x64xbf16>
    %c0_16 = arith.constant 0 : index
    %c0_17 = arith.constant 0 : index
    %36 = vector.load %arg7[%c0_16, %c0_17] : memref<16x64xbf16, #tpu.memory_space<vmem>>, vector<16x64xbf16>
    tpu.vector_store %arg7[%c0_16, %c0_17], %35 {strides = array<i32>} : memref<16x64xbf16, #tpu.memory_space<vmem>>, vector<16x64xbf16>,
    return
  }
  func.func @transform_0(%arg0: i32) -> (i32, i32) {
    %c0_i32 = arith.constant 0 : i32
    %c0_i32_0 = arith.constant 0 : i32
    return %arg0, %c0_i32 : i32, i32
  }
  func.func @transform_1(%arg0: i32) -> (i32, i32) {
    %c0_i32 = arith.constant 0 : i32
    %c0_i32_0 = arith.constant 0 : i32
    %c0_i32_1 = arith.constant 0 : i32
    return %c0_i32, %c0_i32_0 : i32, i32
  }
  func.func @transform_2(%arg0: i32) -> (i32, i32) {
    %c0_i32 = arith.constant 0 : i32
    %c0_i32_0 = arith.constant 0 : i32
    %c0_i32_1 = arith.constant 0 : i32
    return %c0_i32, %c0_i32_0 : i32, i32
  }
  func.func @transform_3(%arg0: i32) -> (i32, i32) {
    %c0_i32 = arith.constant 0 : i32
    %c0_i32_0 = arith.constant 0 : i32
    %c0_i32_1 = arith.constant 0 : i32
    return %c0_i32, %c0_i32_0 : i32, i32
  }
  func.func @transform_4(%arg0: i32) -> (i32, i32) {
    %c0_i32 = arith.constant 0 : i32
    %c0_i32_0 = arith.constant 0 : i32
    %c0_i32_1 = arith.constant 0 : i32
    return %c0_i32, %c0_i32_0 : i32, i32
  }
  func.func @transform_5(%arg0: i32) -> (i32, i32) {
    %c0_i32 = arith.constant 0 : i32
    %c0_i32_0 = arith.constant 0 : i32
    %c0_i32_1 = arith.constant 0 : i32
    return %c0_i32, %c0_i32_0 : i32, i32
  }
  func.func @transform_6(%arg0: i32) -> (i32, i32) {
    %c0_i32 = arith.constant 0 : i32
    %c0_i32_0 = arith.constant 0 : i32
    return %arg0, %c0_i32 : i32, i32
  }
}

module attributes {stable_mosaic.version = 11 : i64} {
  func.func @_mm_kernel(%arg0: i32, %arg1: memref<16x256xbf16, #tpu.memory_space<vmem>>, %arg2: memref<256x64xbf16, #tpu.memory_space<vmem>>, %arg3: memref<1x64xf32, #tpu.memory_space<vmem>>, %arg4: memref<1x64xf32, #tpu.memory_space<vmem>>, %arg5: memref<16x64xbf16, #tpu.memory_space<vmem>>) attributes {dimension_semantics = [#tpu.dimension_semantics<parallel>], iteration_bounds = array<i64: 2>, scalar_prefetch = 0 : i64, scratch_operands = 0 : i64, tpu.core_type = #tpu.core_type<tc>, window_params = [{transform_indices = @transform_0, window_bounds = array<i64: 16, 256>}, {pipeline_mode = #tpu.pipeline_mode<synchronous>, transform_indices = @transform_1, window_bounds = array<i64: 256, 64>}, {pipeline_mode = #tpu.pipeline_mode<synchronous>, transform_indices = @transform_2, window_bounds = array<i64: 1, 64>}, {pipeline_mode = #tpu.pipeline_mode<synchronous>, transform_indices = @transform_3, window_bounds = array<i64: 1, 64>}, {transform_indices = @transform_4, window_bounds = array<i64: 16, 64>}]} {
    %c0 = arith.constant 0 : index
    %c0_0 = arith.constant 0 : index
    %0 = vector.load %arg1[%c0, %c0_0] : memref<16x256xbf16, #tpu.memory_space<vmem>>, vector<16x256xbf16>
    %1 = arith.extf %0 : vector<16x256xbf16> to vector<16x256xf32>
    %2 = arith.truncf %1 : vector<16x256xf32> to vector<16x256xbf16>
    %c0_1 = arith.constant 0 : index
    %c0_2 = arith.constant 0 : index
    %3 = vector.load %arg2[%c0_1, %c0_2] : memref<256x64xbf16, #tpu.memory_space<vmem>>, vector<256x64xbf16>
    %cst = arith.constant dense<0.000000e+00> : vector<16x64xf32>
    %4 = tpu.matmul %2, %3, %cst {dimension_numbers = #tpu.dot_dimension_numbers<[1], [0], [0], [1], [0, 0, 1, 1], [], []>} : vector<16x256xbf16>, vector<256x64xbf16>, vector<16x64xf32> -> vector<16x64xf32>
    %c0_3 = arith.constant 0 : index
    %c0_4 = arith.constant 0 : index
    %5 = vector.load %arg3[%c0_3, %c0_4] : memref<1x64xf32, #tpu.memory_space<vmem>>, vector<1x64xf32>
    %6 = vector.broadcast %5 : vector<1x64xf32> to vector<16x64xf32>
    %7 = arith.mulf %4, %6 : vector<16x64xf32>
    %c0_5 = arith.constant 0 : index
    %c0_6 = arith.constant 0 : index
    %8 = vector.load %arg4[%c0_5, %c0_6] : memref<1x64xf32, #tpu.memory_space<vmem>>, vector<1x64xf32>
    %9 = vector.broadcast %8 : vector<1x64xf32> to vector<16x64xf32>
    %10 = arith.addf %7, %9 : vector<16x64xf32>
    %11 = arith.truncf %10 : vector<16x64xf32> to vector<16x64xbf16>
    %c0_7 = arith.constant 0 : index
    %c0_8 = arith.constant 0 : index
    %12 = vector.load %arg5[%c0_7, %c0_8] : memref<16x64xbf16, #tpu.memory_space<vmem>>, vector<16x64xbf16>
    tpu.vector_store %arg5[%c0_7, %c0_8], %11 {strides = array<i32>} : memref<16x64xbf16, #tpu.memory_space<vmem>>, vector<16x64xbf16>,
    return
  }
  func.func @transform_0(%arg0: i32) -> (i32, i32) {
    %c0_i32 = arith.constant 0 : i32
    %c0_i32_0 = arith.constant 0 : i32
    return %arg0, %c0_i32 : i32, i32
  }
  func.func @transform_1(%arg0: i32) -> (i32, i32) {
    %c0_i32 = arith.constant 0 : i32
    %c0_i32_0 = arith.constant 0 : i32
    %c0_i32_1 = arith.constant 0 : i32
    return %c0_i32, %c0_i32_0 : i32, i32
  }
  func.func @transform_2(%arg0: i32) -> (i32, i32) {
    %c0_i32 = arith.constant 0 : i32
    %c0_i32_0 = arith.constant 0 : i32
    %c0_i32_1 = arith.constant 0 : i32
    return %c0_i32, %c0_i32_0 : i32, i32
  }
  func.func @transform_3(%arg0: i32) -> (i32, i32) {
    %c0_i32 = arith.constant 0 : i32
    %c0_i32_0 = arith.constant 0 : i32
    %c0_i32_1 = arith.constant 0 : i32
    return %c0_i32, %c0_i32_0 : i32, i32
  }
  func.func @transform_4(%arg0: i32) -> (i32, i32) {
    %c0_i32 = arith.constant 0 : i32
    %c0_i32_0 = arith.constant 0 : i32
    return %arg0, %c0_i32 : i32, i32
  }
}

module attributes {stable_mosaic.version = 11 : i64} {
  func.func @_mm_kernel(%arg0: i32, %arg1: memref<16x64xbf16, #tpu.memory_space<vmem>>, %arg2: memref<64x128xbf16, #tpu.memory_space<vmem>>, %arg3: memref<1x128xf32, #tpu.memory_space<vmem>>, %arg4: memref<1x128xf32, #tpu.memory_space<vmem>>, %arg5: memref<16x128xbf16, #tpu.memory_space<vmem>>) attributes {dimension_semantics = [#tpu.dimension_semantics<parallel>], iteration_bounds = array<i64: 2>, scalar_prefetch = 0 : i64, scratch_operands = 0 : i64, tpu.core_type = #tpu.core_type<tc>, window_params = [{transform_indices = @transform_0, window_bounds = array<i64: 16, 64>}, {pipeline_mode = #tpu.pipeline_mode<synchronous>, transform_indices = @transform_1, window_bounds = array<i64: 64, 128>}, {pipeline_mode = #tpu.pipeline_mode<synchronous>, transform_indices = @transform_2, window_bounds = array<i64: 1, 128>}, {pipeline_mode = #tpu.pipeline_mode<synchronous>, transform_indices = @transform_3, window_bounds = array<i64: 1, 128>}, {transform_indices = @transform_4, window_bounds = array<i64: 16, 128>}]} {
    %c0 = arith.constant 0 : index
    %c0_0 = arith.constant 0 : index
    %0 = vector.load %arg1[%c0, %c0_0] : memref<16x64xbf16, #tpu.memory_space<vmem>>, vector<16x64xbf16>
    %1 = arith.extf %0 : vector<16x64xbf16> to vector<16x64xf32>
    %2 = arith.truncf %1 : vector<16x64xf32> to vector<16x64xbf16>
    %c0_1 = arith.constant 0 : index
    %c0_2 = arith.constant 0 : index
    %3 = vector.load %arg2[%c0_1, %c0_2] : memref<64x128xbf16, #tpu.memory_space<vmem>>, vector<64x128xbf16>
    %cst = arith.constant dense<0.000000e+00> : vector<16x128xf32>
    %4 = tpu.matmul %2, %3, %cst {dimension_numbers = #tpu.dot_dimension_numbers<[1], [0], [0], [1], [0, 0, 1, 1], [], []>} : vector<16x64xbf16>, vector<64x128xbf16>, vector<16x128xf32> -> vector<16x128xf32>
    %c0_3 = arith.constant 0 : index
    %c0_4 = arith.constant 0 : index
    %5 = vector.load %arg3[%c0_3, %c0_4] : memref<1x128xf32, #tpu.memory_space<vmem>>, vector<1x128xf32>
    %6 = vector.broadcast %5 : vector<1x128xf32> to vector<16x128xf32>
    %7 = arith.mulf %4, %6 : vector<16x128xf32>
    %c0_5 = arith.constant 0 : index
    %c0_6 = arith.constant 0 : index
    %8 = vector.load %arg4[%c0_5, %c0_6] : memref<1x128xf32, #tpu.memory_space<vmem>>, vector<1x128xf32>
    %9 = vector.broadcast %8 : vector<1x128xf32> to vector<16x128xf32>
    %10 = arith.addf %7, %9 : vector<16x128xf32>
    %11 = arith.truncf %10 : vector<16x128xf32> to vector<16x128xbf16>
    %c0_7 = arith.constant 0 : index
    %c0_8 = arith.constant 0 : index
    %12 = vector.load %arg5[%c0_7, %c0_8] : memref<16x128xbf16, #tpu.memory_space<vmem>>, vector<16x128xbf16>
    tpu.vector_store %arg5[%c0_7, %c0_8], %11 {strides = array<i32>} : memref<16x128xbf16, #tpu.memory_space<vmem>>, vector<16x128xbf16>,
    return
  }
  func.func @transform_0(%arg0: i32) -> (i32, i32) {
    %c0_i32 = arith.constant 0 : i32
    %c0_i32_0 = arith.constant 0 : i32
    return %arg0, %c0_i32 : i32, i32
  }
  func.func @transform_1(%arg0: i32) -> (i32, i32) {
    %c0_i32 = arith.constant 0 : i32
    %c0_i32_0 = arith.constant 0 : i32
    %c0_i32_1 = arith.constant 0 : i32
    return %c0_i32, %c0_i32_0 : i32, i32
  }
  func.func @transform_2(%arg0: i32) -> (i32, i32) {
    %c0_i32 = arith.constant 0 : i32
    %c0_i32_0 = arith.constant 0 : i32
    %c0_i32_1 = arith.constant 0 : i32
    return %c0_i32, %c0_i32_0 : i32, i32
  }
  func.func @transform_3(%arg0: i32) -> (i32, i32) {
    %c0_i32 = arith.constant 0 : i32
    %c0_i32_0 = arith.constant 0 : i32
    %c0_i32_1 = arith.constant 0 : i32
    return %c0_i32, %c0_i32_0 : i32, i32
  }
  func.func @transform_4(%arg0: i32) -> (i32, i32) {
    %c0_i32 = arith.constant 0 : i32
    %c0_i32_0 = arith.constant 0 : i32
    return %arg0, %c0_i32 : i32, i32
  }
}

module attributes {stable_mosaic.version = 11 : i64} {
  func.func @_mm_kernel(%arg0: i32, %arg1: memref<64x576xbf16, #tpu.memory_space<vmem>>, %arg2: memref<576x32xbf16, #tpu.memory_space<vmem>>, %arg3: memref<1x32xf32, #tpu.memory_space<vmem>>, %arg4: memref<1x32xf32, #tpu.memory_space<vmem>>, %arg5: memref<64x32xbf16, #tpu.memory_space<vmem>>) attributes {dimension_semantics = [#tpu.dimension_semantics<parallel>], iteration_bounds = array<i64: 2>, scalar_prefetch = 0 : i64, scratch_operands = 0 : i64, tpu.core_type = #tpu.core_type<tc>, window_params = [{transform_indices = @transform_0, window_bounds = array<i64: 64, 576>}, {pipeline_mode = #tpu.pipeline_mode<synchronous>, transform_indices = @transform_1, window_bounds = array<i64: 576, 32>}, {pipeline_mode = #tpu.pipeline_mode<synchronous>, transform_indices = @transform_2, window_bounds = array<i64: 1, 32>}, {pipeline_mode = #tpu.pipeline_mode<synchronous>, transform_indices = @transform_3, window_bounds = array<i64: 1, 32>}, {transform_indices = @transform_4, window_bounds = array<i64: 64, 32>}]} {
    %c0 = arith.constant 0 : index
    %c0_0 = arith.constant 0 : index
    %0 = vector.load %arg1[%c0, %c0_0] : memref<64x576xbf16, #tpu.memory_space<vmem>>, vector<64x576xbf16>
    %1 = arith.extf %0 : vector<64x576xbf16> to vector<64x576xf32>
    %2 = arith.truncf %1 : vector<64x576xf32> to vector<64x576xbf16>
    %c0_1 = arith.constant 0 : index
    %c0_2 = arith.constant 0 : index
    %3 = vector.load %arg2[%c0_1, %c0_2] : memref<576x32xbf16, #tpu.memory_space<vmem>>, vector<576x32xbf16>
    %cst = arith.constant dense<0.000000e+00> : vector<64x32xf32>
    %4 = tpu.matmul %2, %3, %cst {dimension_numbers = #tpu.dot_dimension_numbers<[1], [0], [0], [1], [0, 0, 1, 1], [], []>} : vector<64x576xbf16>, vector<576x32xbf16>, vector<64x32xf32> -> vector<64x32xf32>
    %c0_3 = arith.constant 0 : index
    %c0_4 = arith.constant 0 : index
    %5 = vector.load %arg3[%c0_3, %c0_4] : memref<1x32xf32, #tpu.memory_space<vmem>>, vector<1x32xf32>
    %6 = vector.broadcast %5 : vector<1x32xf32> to vector<64x32xf32>
    %7 = arith.mulf %4, %6 : vector<64x32xf32>
    %c0_5 = arith.constant 0 : index
    %c0_6 = arith.constant 0 : index
    %8 = vector.load %arg4[%c0_5, %c0_6] : memref<1x32xf32, #tpu.memory_space<vmem>>, vector<1x32xf32>
    %9 = vector.broadcast %8 : vector<1x32xf32> to vector<64x32xf32>
    %10 = arith.addf %7, %9 : vector<64x32xf32>
    %cst_7 = arith.constant 0.000000e+00 : f32
    %11 = vector.broadcast %cst_7 : f32 to vector<64x32xf32>
    %12 = arith.maximumf %10, %11 : vector<64x32xf32>
    %13 = arith.truncf %12 : vector<64x32xf32> to vector<64x32xbf16>
    %c0_8 = arith.constant 0 : index
    %c0_9 = arith.constant 0 : index
    %14 = vector.load %arg5[%c0_8, %c0_9] : memref<64x32xbf16, #tpu.memory_space<vmem>>, vector<64x32xbf16>
    tpu.vector_store %arg5[%c0_8, %c0_9], %13 {strides = array<i32>} : memref<64x32xbf16, #tpu.memory_space<vmem>>, vector<64x32xbf16>,
    return
  }
  func.func @transform_0(%arg0: i32) -> (i32, i32) {
    %c0_i32 = arith.constant 0 : i32
    %c0_i32_0 = arith.constant 0 : i32
    return %arg0, %c0_i32 : i32, i32
  }
  func.func @transform_1(%arg0: i32) -> (i32, i32) {
    %c0_i32 = arith.constant 0 : i32
    %c0_i32_0 = arith.constant 0 : i32
    %c0_i32_1 = arith.constant 0 : i32
    return %c0_i32, %c0_i32_0 : i32, i32
  }
  func.func @transform_2(%arg0: i32) -> (i32, i32) {
    %c0_i32 = arith.constant 0 : i32
    %c0_i32_0 = arith.constant 0 : i32
    %c0_i32_1 = arith.constant 0 : i32
    return %c0_i32, %c0_i32_0 : i32, i32
  }
  func.func @transform_3(%arg0: i32) -> (i32, i32) {
    %c0_i32 = arith.constant 0 : i32
    %c0_i32_0 = arith.constant 0 : i32
    %c0_i32_1 = arith.constant 0 : i32
    return %c0_i32, %c0_i32_0 : i32, i32
  }
  func.func @transform_4(%arg0: i32) -> (i32, i32) {
    %c0_i32 = arith.constant 0 : i32
    %c0_i32_0 = arith.constant 0 : i32
    return %arg0, %c0_i32 : i32, i32
  }
}

module attributes {stable_mosaic.version = 11 : i64} {
  func.func @_mm_kernel(%arg0: i32, %arg1: memref<64x288xbf16, #tpu.memory_space<vmem>>, %arg2: memref<288x32xbf16, #tpu.memory_space<vmem>>, %arg3: memref<1x32xf32, #tpu.memory_space<vmem>>, %arg4: memref<1x32xf32, #tpu.memory_space<vmem>>, %arg5: memref<64x32xbf16, #tpu.memory_space<vmem>>) attributes {dimension_semantics = [#tpu.dimension_semantics<parallel>], iteration_bounds = array<i64: 2>, scalar_prefetch = 0 : i64, scratch_operands = 0 : i64, tpu.core_type = #tpu.core_type<tc>, window_params = [{transform_indices = @transform_0, window_bounds = array<i64: 64, 288>}, {pipeline_mode = #tpu.pipeline_mode<synchronous>, transform_indices = @transform_1, window_bounds = array<i64: 288, 32>}, {pipeline_mode = #tpu.pipeline_mode<synchronous>, transform_indices = @transform_2, window_bounds = array<i64: 1, 32>}, {pipeline_mode = #tpu.pipeline_mode<synchronous>, transform_indices = @transform_3, window_bounds = array<i64: 1, 32>}, {transform_indices = @transform_4, window_bounds = array<i64: 64, 32>}]} {
    %c0 = arith.constant 0 : index
    %c0_0 = arith.constant 0 : index
    %0 = vector.load %arg1[%c0, %c0_0] : memref<64x288xbf16, #tpu.memory_space<vmem>>, vector<64x288xbf16>
    %1 = arith.extf %0 : vector<64x288xbf16> to vector<64x288xf32>
    %2 = arith.truncf %1 : vector<64x288xf32> to vector<64x288xbf16>
    %c0_1 = arith.constant 0 : index
    %c0_2 = arith.constant 0 : index
    %3 = vector.load %arg2[%c0_1, %c0_2] : memref<288x32xbf16, #tpu.memory_space<vmem>>, vector<288x32xbf16>
    %cst = arith.constant dense<0.000000e+00> : vector<64x32xf32>
    %4 = tpu.matmul %2, %3, %cst {dimension_numbers = #tpu.dot_dimension_numbers<[1], [0], [0], [1], [0, 0, 1, 1], [], []>} : vector<64x288xbf16>, vector<288x32xbf16>, vector<64x32xf32> -> vector<64x32xf32>
    %c0_3 = arith.constant 0 : index
    %c0_4 = arith.constant 0 : index
    %5 = vector.load %arg3[%c0_3, %c0_4] : memref<1x32xf32, #tpu.memory_space<vmem>>, vector<1x32xf32>
    %6 = vector.broadcast %5 : vector<1x32xf32> to vector<64x32xf32>
    %7 = arith.mulf %4, %6 : vector<64x32xf32>
    %c0_5 = arith.constant 0 : index
    %c0_6 = arith.constant 0 : index
    %8 = vector.load %arg4[%c0_5, %c0_6] : memref<1x32xf32, #tpu.memory_space<vmem>>, vector<1x32xf32>
    %9 = vector.broadcast %8 : vector<1x32xf32> to vector<64x32xf32>
    %10 = arith.addf %7, %9 : vector<64x32xf32>
    %cst_7 = arith.constant 0.000000e+00 : f32
    %11 = vector.broadcast %cst_7 : f32 to vector<64x32xf32>
    %12 = arith.maximumf %10, %11 : vector<64x32xf32>
    %13 = arith.truncf %12 : vector<64x32xf32> to vector<64x32xbf16>
    %c0_8 = arith.constant 0 : index
    %c0_9 = arith.constant 0 : index
    %14 = vector.load %arg5[%c0_8, %c0_9] : memref<64x32xbf16, #tpu.memory_space<vmem>>, vector<64x32xbf16>
    tpu.vector_store %arg5[%c0_8, %c0_9], %13 {strides = array<i32>} : memref<64x32xbf16, #tpu.memory_space<vmem>>, vector<64x32xbf16>,
    return
  }
  func.func @transform_0(%arg0: i32) -> (i32, i32) {
    %c0_i32 = arith.constant 0 : i32
    %c0_i32_0 = arith.constant 0 : i32
    return %arg0, %c0_i32 : i32, i32
  }
  func.func @transform_1(%arg0: i32) -> (i32, i32) {
    %c0_i32 = arith.constant 0 : i32
    %c0_i32_0 = arith.constant 0 : i32
    %c0_i32_1 = arith.constant 0 : i32
    return %c0_i32, %c0_i32_0 : i32, i32
  }
  func.func @transform_2(%arg0: i32) -> (i32, i32) {
    %c0_i32 = arith.constant 0 : i32
    %c0_i32_0 = arith.constant 0 : i32
    %c0_i32_1 = arith.constant 0 : i32
    return %c0_i32, %c0_i32_0 : i32, i32
  }
  func.func @transform_3(%arg0: i32) -> (i32, i32) {
    %c0_i32 = arith.constant 0 : i32
    %c0_i32_0 = arith.constant 0 : i32
    %c0_i32_1 = arith.constant 0 : i32
    return %c0_i32, %c0_i32_0 : i32, i32
  }
  func.func @transform_4(%arg0: i32) -> (i32, i32) {
    %c0_i32 = arith.constant 0 : i32
    %c0_i32_0 = arith.constant 0 : i32
    return %arg0, %c0_i32 : i32, i32
  }
}

module attributes {stable_mosaic.version = 11 : i64} {
  func.func @_mm_kernel(%arg0: i32, %arg1: memref<64x32xbf16, #tpu.memory_space<vmem>>, %arg2: memref<32x64xbf16, #tpu.memory_space<vmem>>, %arg3: memref<1x64xf32, #tpu.memory_space<vmem>>, %arg4: memref<1x64xf32, #tpu.memory_space<vmem>>, %arg5: memref<64x64xbf16, #tpu.memory_space<vmem>>) attributes {dimension_semantics = [#tpu.dimension_semantics<parallel>], iteration_bounds = array<i64: 2>, scalar_prefetch = 0 : i64, scratch_operands = 0 : i64, tpu.core_type = #tpu.core_type<tc>, window_params = [{transform_indices = @transform_0, window_bounds = array<i64: 64, 32>}, {pipeline_mode = #tpu.pipeline_mode<synchronous>, transform_indices = @transform_1, window_bounds = array<i64: 32, 64>}, {pipeline_mode = #tpu.pipeline_mode<synchronous>, transform_indices = @transform_2, window_bounds = array<i64: 1, 64>}, {pipeline_mode = #tpu.pipeline_mode<synchronous>, transform_indices = @transform_3, window_bounds = array<i64: 1, 64>}, {transform_indices = @transform_4, window_bounds = array<i64: 64, 64>}]} {
    %c0 = arith.constant 0 : index
    %c0_0 = arith.constant 0 : index
    %0 = vector.load %arg1[%c0, %c0_0] : memref<64x32xbf16, #tpu.memory_space<vmem>>, vector<64x32xbf16>
    %1 = arith.extf %0 : vector<64x32xbf16> to vector<64x32xf32>
    %2 = arith.truncf %1 : vector<64x32xf32> to vector<64x32xbf16>
    %c0_1 = arith.constant 0 : index
    %c0_2 = arith.constant 0 : index
    %3 = vector.load %arg2[%c0_1, %c0_2] : memref<32x64xbf16, #tpu.memory_space<vmem>>, vector<32x64xbf16>
    %cst = arith.constant dense<0.000000e+00> : vector<64x64xf32>
    %4 = tpu.matmul %2, %3, %cst {dimension_numbers = #tpu.dot_dimension_numbers<[1], [0], [0], [1], [0, 0, 1, 1], [], []>} : vector<64x32xbf16>, vector<32x64xbf16>, vector<64x64xf32> -> vector<64x64xf32>
    %c0_3 = arith.constant 0 : index
    %c0_4 = arith.constant 0 : index
    %5 = vector.load %arg3[%c0_3, %c0_4] : memref<1x64xf32, #tpu.memory_space<vmem>>, vector<1x64xf32>
    %6 = vector.broadcast %5 : vector<1x64xf32> to vector<64x64xf32>
    %7 = arith.mulf %4, %6 : vector<64x64xf32>
    %c0_5 = arith.constant 0 : index
    %c0_6 = arith.constant 0 : index
    %8 = vector.load %arg4[%c0_5, %c0_6] : memref<1x64xf32, #tpu.memory_space<vmem>>, vector<1x64xf32>
    %9 = vector.broadcast %8 : vector<1x64xf32> to vector<64x64xf32>
    %10 = arith.addf %7, %9 : vector<64x64xf32>
    %11 = arith.truncf %10 : vector<64x64xf32> to vector<64x64xbf16>
    %c0_7 = arith.constant 0 : index
    %c0_8 = arith.constant 0 : index
    %12 = vector.load %arg5[%c0_7, %c0_8] : memref<64x64xbf16, #tpu.memory_space<vmem>>, vector<64x64xbf16>
    tpu.vector_store %arg5[%c0_7, %c0_8], %11 {strides = array<i32>} : memref<64x64xbf16, #tpu.memory_space<vmem>>, vector<64x64xbf16>,
    return
  }
  func.func @transform_0(%arg0: i32) -> (i32, i32) {
    %c0_i32 = arith.constant 0 : i32
    %c0_i32_0 = arith.constant 0 : i32
    return %arg0, %c0_i32 : i32, i32
  }
  func.func @transform_1(%arg0: i32) -> (i32, i32) {
    %c0_i32 = arith.constant 0 : i32
    %c0_i32_0 = arith.constant 0 : i32
    %c0_i32_1 = arith.constant 0 : i32
    return %c0_i32, %c0_i32_0 : i32, i32
  }
  func.func @transform_2(%arg0: i32) -> (i32, i32) {
    %c0_i32 = arith.constant 0 : i32
    %c0_i32_0 = arith.constant 0 : i32
    %c0_i32_1 = arith.constant 0 : i32
    return %c0_i32, %c0_i32_0 : i32, i32
  }
  func.func @transform_3(%arg0: i32) -> (i32, i32) {
    %c0_i32 = arith.constant 0 : i32
    %c0_i32_0 = arith.constant 0 : i32
    %c0_i32_1 = arith.constant 0 : i32
    return %c0_i32, %c0_i32_0 : i32, i32
  }
  func.func @transform_4(%arg0: i32) -> (i32, i32) {
    %c0_i32 = arith.constant 0 : i32
    %c0_i32_0 = arith.constant 0 : i32
    return %arg0, %c0_i32 : i32, i32
  }
}

module attributes {stable_mosaic.version = 11 : i64} {
  func.func @_mm_kernel(%arg0: i32, %arg1: memref<256x144xbf16, #tpu.memory_space<vmem>>, %arg2: memref<144x16xbf16, #tpu.memory_space<vmem>>, %arg3: memref<1x16xf32, #tpu.memory_space<vmem>>, %arg4: memref<1x16xf32, #tpu.memory_space<vmem>>, %arg5: memref<256x16xbf16, #tpu.memory_space<vmem>>) attributes {dimension_semantics = [#tpu.dimension_semantics<parallel>], iteration_bounds = array<i64: 2>, scalar_prefetch = 0 : i64, scratch_operands = 0 : i64, tpu.core_type = #tpu.core_type<tc>, window_params = [{transform_indices = @transform_0, window_bounds = array<i64: 256, 144>}, {pipeline_mode = #tpu.pipeline_mode<synchronous>, transform_indices = @transform_1, window_bounds = array<i64: 144, 16>}, {pipeline_mode = #tpu.pipeline_mode<synchronous>, transform_indices = @transform_2, window_bounds = array<i64: 1, 16>}, {pipeline_mode = #tpu.pipeline_mode<synchronous>, transform_indices = @transform_3, window_bounds = array<i64: 1, 16>}, {transform_indices = @transform_4, window_bounds = array<i64: 256, 16>}]} {
    %c0 = arith.constant 0 : index
    %c0_0 = arith.constant 0 : index
    %0 = vector.load %arg1[%c0, %c0_0] : memref<256x144xbf16, #tpu.memory_space<vmem>>, vector<256x144xbf16>
    %1 = arith.extf %0 : vector<256x144xbf16> to vector<256x144xf32>
    %2 = arith.truncf %1 : vector<256x144xf32> to vector<256x144xbf16>
    %c0_1 = arith.constant 0 : index
    %c0_2 = arith.constant 0 : index
    %3 = vector.load %arg2[%c0_1, %c0_2] : memref<144x16xbf16, #tpu.memory_space<vmem>>, vector<144x16xbf16>
    %cst = arith.constant dense<0.000000e+00> : vector<256x16xf32>
    %4 = tpu.matmul %2, %3, %cst {dimension_numbers = #tpu.dot_dimension_numbers<[1], [0], [0], [1], [0, 0, 1, 1], [], []>} : vector<256x144xbf16>, vector<144x16xbf16>, vector<256x16xf32> -> vector<256x16xf32>
    %c0_3 = arith.constant 0 : index
    %c0_4 = arith.constant 0 : index
    %5 = vector.load %arg3[%c0_3, %c0_4] : memref<1x16xf32, #tpu.memory_space<vmem>>, vector<1x16xf32>
    %6 = vector.broadcast %5 : vector<1x16xf32> to vector<256x16xf32>
    %7 = arith.mulf %4, %6 : vector<256x16xf32>
    %c0_5 = arith.constant 0 : index
    %c0_6 = arith.constant 0 : index
    %8 = vector.load %arg4[%c0_5, %c0_6] : memref<1x16xf32, #tpu.memory_space<vmem>>, vector<1x16xf32>
    %9 = vector.broadcast %8 : vector<1x16xf32> to vector<256x16xf32>
    %10 = arith.addf %7, %9 : vector<256x16xf32>
    %cst_7 = arith.constant 0.000000e+00 : f32
    %11 = vector.broadcast %cst_7 : f32 to vector<256x16xf32>
    %12 = arith.maximumf %10, %11 : vector<256x16xf32>
    %13 = arith.truncf %12 : vector<256x16xf32> to vector<256x16xbf16>
    %c0_8 = arith.constant 0 : index
    %c0_9 = arith.constant 0 : index
    %14 = vector.load %arg5[%c0_8, %c0_9] : memref<256x16xbf16, #tpu.memory_space<vmem>>, vector<256x16xbf16>
    tpu.vector_store %arg5[%c0_8, %c0_9], %13 {strides = array<i32>} : memref<256x16xbf16, #tpu.memory_space<vmem>>, vector<256x16xbf16>,
    return
  }
  func.func @transform_0(%arg0: i32) -> (i32, i32) {
    %c0_i32 = arith.constant 0 : i32
    %c0_i32_0 = arith.constant 0 : i32
    return %arg0, %c0_i32 : i32, i32
  }
  func.func @transform_1(%arg0: i32) -> (i32, i32) {
    %c0_i32 = arith.constant 0 : i32
    %c0_i32_0 = arith.constant 0 : i32
    %c0_i32_1 = arith.constant 0 : i32
    return %c0_i32, %c0_i32_0 : i32, i32
  }
  func.func @transform_2(%arg0: i32) -> (i32, i32) {
    %c0_i32 = arith.constant 0 : i32
    %c0_i32_0 = arith.constant 0 : i32
    %c0_i32_1 = arith.constant 0 : i32
    return %c0_i32, %c0_i32_0 : i32, i32
  }
  func.func @transform_3(%arg0: i32) -> (i32, i32) {
    %c0_i32 = arith.constant 0 : i32
    %c0_i32_0 = arith.constant 0 : i32
    %c0_i32_1 = arith.constant 0 : i32
    return %c0_i32, %c0_i32_0 : i32, i32
  }
  func.func @transform_4(%arg0: i32) -> (i32, i32) {
    %c0_i32 = arith.constant 0 : i32
    %c0_i32_0 = arith.constant 0 : i32
    return %arg0, %c0_i32 : i32, i32
  }
}

module attributes {stable_mosaic.version = 11 : i64} {
  func.func @_mm_kernel(%arg0: i32, %arg1: memref<256x144xbf16, #tpu.memory_space<vmem>>, %arg2: memref<144x32xbf16, #tpu.memory_space<vmem>>, %arg3: memref<1x32xf32, #tpu.memory_space<vmem>>, %arg4: memref<1x32xf32, #tpu.memory_space<vmem>>, %arg5: memref<32x1xbf16, #tpu.memory_space<vmem>>, %arg6: memref<1x1xf32, #tpu.memory_space<vmem>>, %arg7: memref<256x1xf32, #tpu.memory_space<vmem>>) attributes {dimension_semantics = [#tpu.dimension_semantics<parallel>], iteration_bounds = array<i64: 2>, scalar_prefetch = 0 : i64, scratch_operands = 0 : i64, tpu.core_type = #tpu.core_type<tc>, window_params = [{transform_indices = @transform_0, window_bounds = array<i64: 256, 144>}, {pipeline_mode = #tpu.pipeline_mode<synchronous>, transform_indices = @transform_1, window_bounds = array<i64: 144, 32>}, {pipeline_mode = #tpu.pipeline_mode<synchronous>, transform_indices = @transform_2, window_bounds = array<i64: 1, 32>}, {pipeline_mode = #tpu.pipeline_mode<synchronous>, transform_indices = @transform_3, window_bounds = array<i64: 1, 32>}, {pipeline_mode = #tpu.pipeline_mode<synchronous>, transform_indices = @transform_4, window_bounds = array<i64: 32, 1>}, {pipeline_mode = #tpu.pipeline_mode<synchronous>, transform_indices = @transform_5, window_bounds = array<i64: 1, 1>}, {transform_indices = @transform_6, window_bounds = array<i64: 256, 1>}]} {
    %c0 = arith.constant 0 : index
    %c0_0 = arith.constant 0 : index
    %0 = vector.load %arg1[%c0, %c0_0] : memref<256x144xbf16, #tpu.memory_space<vmem>>, vector<256x144xbf16>
    %1 = arith.extf %0 : vector<256x144xbf16> to vector<256x144xf32>
    %2 = arith.truncf %1 : vector<256x144xf32> to vector<256x144xbf16>
    %c0_1 = arith.constant 0 : index
    %c0_2 = arith.constant 0 : index
    %3 = vector.load %arg2[%c0_1, %c0_2] : memref<144x32xbf16, #tpu.memory_space<vmem>>, vector<144x32xbf16>
    %cst = arith.constant dense<0.000000e+00> : vector<256x32xf32>
    %4 = tpu.matmul %2, %3, %cst {dimension_numbers = #tpu.dot_dimension_numbers<[1], [0], [0], [1], [0, 0, 1, 1], [], []>} : vector<256x144xbf16>, vector<144x32xbf16>, vector<256x32xf32> -> vector<256x32xf32>
    %c0_3 = arith.constant 0 : index
    %c0_4 = arith.constant 0 : index
    %5 = vector.load %arg3[%c0_3, %c0_4] : memref<1x32xf32, #tpu.memory_space<vmem>>, vector<1x32xf32>
    %6 = vector.broadcast %5 : vector<1x32xf32> to vector<256x32xf32>
    %7 = arith.mulf %4, %6 : vector<256x32xf32>
    %c0_5 = arith.constant 0 : index
    %c0_6 = arith.constant 0 : index
    %8 = vector.load %arg4[%c0_5, %c0_6] : memref<1x32xf32, #tpu.memory_space<vmem>>, vector<1x32xf32>
    %9 = vector.broadcast %8 : vector<1x32xf32> to vector<256x32xf32>
    %10 = arith.addf %7, %9 : vector<256x32xf32>
    %cst_7 = arith.constant 0.000000e+00 : f32
    %11 = vector.broadcast %cst_7 : f32 to vector<256x32xf32>
    %12 = arith.maximumf %10, %11 : vector<256x32xf32>
    %13 = arith.truncf %12 : vector<256x32xf32> to vector<256x32xbf16>
    %c0_8 = arith.constant 0 : index
    %c0_9 = arith.constant 0 : index
    %14 = vector.load %arg5[%c0_8, %c0_9] : memref<32x1xbf16, #tpu.memory_space<vmem>>, vector<32x1xbf16>
    %cst_10 = arith.constant dense<0.000000e+00> : vector<256x1xf32>
    %15 = tpu.matmul %13, %14, %cst_10 {dimension_numbers = #tpu.dot_dimension_numbers<[1], [0], [0], [1], [0, 0, 1, 1], [], []>} : vector<256x32xbf16>, vector<32x1xbf16>, vector<256x1xf32> -> vector<256x1xf32>
    %c0_11 = arith.constant 0 : index
    %c0_12 = arith.constant 0 : index
    %16 = vector.load %arg6[%c0_11, %c0_12] : memref<1x1xf32, #tpu.memory_space<vmem>>, vector<1x1xf32>
    %17 = vector.broadcast %16 : vector<1x1xf32> to vector<256x1xf32>
    %18 = arith.addf %15, %17 : vector<256x1xf32>
    %c0_13 = arith.constant 0 : index
    %c0_14 = arith.constant 0 : index
    %19 = vector.load %arg7[%c0_13, %c0_14] : memref<256x1xf32, #tpu.memory_space<vmem>>, vector<256x1xf32>
    tpu.vector_store %arg7[%c0_13, %c0_14], %18 {strides = array<i32>} : memref<256x1xf32, #tpu.memory_space<vmem>>, vector<256x1xf32>,
    return
  }
  func.func @transform_0(%arg0: i32) -> (i32, i32) {
    %c0_i32 = arith.constant 0 : i32
    %c0_i32_0 = arith.constant 0 : i32
    return %arg0, %c0_i32 : i32, i32
  }
  func.func @transform_1(%arg0: i32) -> (i32, i32) {
    %c0_i32 = arith.constant 0 : i32
    %c0_i32_0 = arith.constant 0 : i32
    %c0_i32_1 = arith.constant 0 : i32
    return %c0_i32, %c0_i32_0 : i32, i32
  }
  func.func @transform_2(%arg0: i32) -> (i32, i32) {
    %c0_i32 = arith.constant 0 : i32
    %c0_i32_0 = arith.constant 0 : i32
    %c0_i32_1 = arith.constant 0 : i32
    return %c0_i32, %c0_i32_0 : i32, i32
  }
  func.func @transform_3(%arg0: i32) -> (i32, i32) {
    %c0_i32 = arith.constant 0 : i32
    %c0_i32_0 = arith.constant 0 : i32
    %c0_i32_1 = arith.constant 0 : i32
    return %c0_i32, %c0_i32_0 : i32, i32
  }
  func.func @transform_4(%arg0: i32) -> (i32, i32) {
    %c0_i32 = arith.constant 0 : i32
    %c0_i32_0 = arith.constant 0 : i32
    %c0_i32_1 = arith.constant 0 : i32
    return %c0_i32, %c0_i32_0 : i32, i32
  }
  func.func @transform_5(%arg0: i32) -> (i32, i32) {
    %c0_i32 = arith.constant 0 : i32
    %c0_i32_0 = arith.constant 0 : i32
    %c0_i32_1 = arith.constant 0 : i32
    return %c0_i32, %c0_i32_0 : i32, i32
  }
  func.func @transform_6(%arg0: i32) -> (i32, i32) {
    %c0_i32 = arith.constant 0 : i32
    %c0_i32_0 = arith.constant 0 : i32
    return %arg0, %c0_i32 : i32, i32
  }
}

</mosaic_0001>

<bundles_post_ra>
// kernel: _lambda_.22
= control target key start
LH: loop header
LB: loop body
LE: loop exit
PB: predicated region body
PF: predicated region fallthrough
CT: control target
= control target key end

     0   :  { %s789_s21 = smov 0   ;;  %s977_s0 = inlined_call_operand.vmem [shape: bf16[128,48], index: 0, kind: input, shape index: {}]   ;;  %s978_s1 = inlined_call_operand.vmem [shape: bf16[48,32], index: 1, kind: input, shape index: {}]   ;;  %s979_s2 = inlined_call_operand.vmem [shape: f32[1,32], index: 2, kind: input, shape index: {}, may-alias: {2,4}]   ;;  %s980_s3 = inlined_call_operand.vmem [shape: f32[1,32], index: 3, kind: input, shape index: {}, may-alias: {3,5}]   ;;  %s981_s4 = inlined_call_operand.vmem [shape: f32[1,32], index: 4, kind: input, shape index: {}, may-alias: {2,4}]   ;;  %s982_s5 = inlined_call_operand.vmem [shape: f32[1,32], index: 5, kind: input, shape index: {}, may-alias: {3,5}]   ;;  %s983_s6 = inlined_call_operand.vmem [shape: bf16[128,32], index: 6, kind: output, shape index: {}]  }
   0x1 LB: > { %s655_s22 = sadd.s32 4294967295, %s751_s21   ;;  %p659_p0 = scmp.ge.s32.totalorder %s751_s21, 1  ;;  %s751_s21 = sphi %s789_s21, %s16_s21  }
   0x2   : > { %p213_p1 = scmp.lt.s32.totalorder %s751_s21, 3 }
   0x4   : > { %p214_p2 = pnand %p659_p0, %p213_p1 }
   0x5   : > { %s660_s25 = sshll.u32 (!%p214_p2), %s655_s22, 3 }
   0x6   : > { %217 = sbr.rel (%p214_p2) target bundleno = 447 (0x1bf), region = 44  ;;  %p244_p3 = scmp.lt.s32.totalorder (!%p214_p2), %s660_s25, 15 }
   0xb   : > { %v704_v0 = vld [vmem:[%s978_s1 + $0x10] sm:$0xff]  ;;  %v703_v1 = vld [vmem:[%s978_s1 + $0x8] sm:$0xff]  ;;  %s985_s25 = smov (!%p244_p3, %s660_s25), 15  ;;  %v702_v2 = vld [vmem:[%s978_s1] sm:$0xff]  ;;  %vm308_vm0 = vcmask 392192   ;;  %vm374_vm1 = vcmask 261120  }
   0xc   : > { %326 = vmatpush.bf16.msra.mxu0 %v704_v0  ;;  %705 = vmatpush.bf16.msra.mxu1 %v704_v0  ;;  %s661_s28 = sshll.u32 %s985_s25, 2  ;;  %v723_v7 = vld [vmem:[%s979_s2] ss:$0 sm:$0xff]  ;;  %v753_v41 = vmov 32.0   ;;  %vm590_vm9 = vcmask 257024  }
   0xd   : > { %706 = vmatpush.bf16.msra.mxu2 %v704_v0  ;;  %707 = vmatpush.bf16.msra.mxu3 %v704_v0  ;;  %s247_s9 = scalar_lea.vmem %s977_s0, %s661_s28  ;;  %v724_v8 = vld [vmem:[%s980_s3] ss:$0 sm:$0xff]  ;;  %727 = vrcp.f32 %v753_v41  ;;  %s926_s20 = scalar_lea.vmem %s983_s6, %s661_s28 }
   0xe   : > { %v698_v3 = vld [vmem:[%s247_s9] sm:$0xff]  ;;  %v699_v4 = vld [vmem:[%s247_s9 + $0x8] sm:$0xff]  ;;  %v700_v5 = vld [vmem:[%s247_s9 + $0x10] sm:$0xff] }
   0xf   : > { %v701_v6 = vld [vmem:[%s247_s9 + $0x18] sm:$0xff] }
  0x10   : > { %327 = vmatpush.bf16.msra.mxu0 %v703_v1  ;;  %708 = vmatpush.bf16.msra.mxu1 %v703_v1 }
  0x11   : > { %709 = vmatpush.bf16.msra.mxu2 %v703_v1  ;;  %710 = vmatpush.bf16.msra.mxu3 %v703_v1 }
  0x13   : > { %v728_v42 = vpop.eup %727 }
  0x14   : > { %328 = vmatpush.bf16.msra.mxu0 %v702_v2  ;;  %711 = vmatpush.bf16.msra.mxu1 %v702_v2  ;;  %v400_v43 = vmul.f32 32.0, %v728_v42  ;;  %vm404_vm2 = vweird.f32 %v728_v42 }
  0x15   : > { %712 = vmatpush.bf16.msra.mxu2 %v702_v2  ;;  %713 = vmatpush.bf16.msra.mxu3 %v702_v2 }
  0x16   : > { %v401_v44 = vsub.f32 1.0, %v400_v43 }
  0x17   : > { %692 = vmatmul.msk.bf16.vlgmr.msra.gmra.mxu0 %vm308_vm0, %v698_v3  ;;  %693 = vmatmul.msk.bf16.vlgmr.msra.gmra.mxu1 %vm308_vm0, %v699_v4 }
  0x18   : > { %694 = vmatmul.msk.bf16.vlgmr.msra.gmra.mxu2 %vm308_vm0, %v700_v5  ;;  %695 = vmatmul.msk.bf16.vlgmr.msra.gmra.mxu3 %vm308_vm0, %v701_v6  ;;  %v402_v45 = vmul.f32 %v728_v42, %v401_v44 }
  0x1a   : > { %v403_v46 = vadd.f32 %v728_v42, %v402_v45 }
  0x1c   : > { %v828_v47 = vsel %vm404_vm2, %v728_v42, %v403_v46 }
  0x94   : > { %v330_v9 = vpop.f32.mrf.mxu0  ;;  %v335_v10 = vpop.f32.mrf.mxu1 }
  0x95   : > { %v354_v11 = vmul.f32 %v723_v7, %v330_v9  ;;  %v356_v12 = vmul.f32 %v723_v7, %v335_v10 }
  0x97   : > { %v368_v13 = vadd.f32 %v724_v8, %v356_v12  ;;  %v366_v14 = vadd.f32 %v724_v8, %v354_v11 }
  0x99   : > { %v381_v15 = vsel %vm374_vm1, %v368_v13, 0.0  ;;  %v375_v16 = vsel %vm374_vm1, %v366_v14, 0.0 }
  0x9a   : > { %382 = vadd.xlane.f32.xlu1 %v381_v15  ;;  %376 = vadd.xlane.f32.xlu0 %v375_v16 }
  0x9b   : > { %v340_v17 = vpop.f32.mrf.mxu2  ;;  %v345_v18 = vpop.f32.mrf.mxu3 }
  0x9c   : > { %v358_v19 = vmul.f32 %v723_v7, %v340_v17  ;;  %v332_v20 = vpop.f32.mrf.mxu0  ;;  %v337_v21 = vpop.f32.mrf.mxu1  ;;  %v360_v28 = vmul.f32 %v723_v7, %v345_v18 }
  0x9d   : > { %v355_v22 = vmul.f32 %v723_v7, %v332_v20  ;;  %v357_v23 = vmul.f32 %v723_v7, %v337_v21 }
  0x9e   : > { %v370_v24 = vadd.f32 %v724_v8, %v358_v19  ;;  %v372_v35 = vadd.f32 %v724_v8, %v360_v28 }
  0x9f   : > { %v369_v25 = vadd.f32 %v724_v8, %v357_v23  ;;  %v367_v26 = vadd.f32 %v724_v8, %v355_v22 }
  0xa0   : > { %v387_v27 = vsel %vm374_vm1, %v370_v24, 0.0  ;;  %v393_v40 = vsel %vm374_vm1, %v372_v35, 0.0 }
  0xa1   : > { %388 = vadd.xlane.f32.xlu2 %v387_v27  ;;  %v384_v29 = vsel %vm374_vm1, %v369_v25, 0.0  ;;  %v378_v30 = vsel %vm374_vm1, %v367_v26, 0.0 }
  0xa2   : > { %385 = vadd.xlane.f32.xlu1 %v384_v29  ;;  %379 = vadd.xlane.f32.xlu0 %v378_v30 }
  0xa3   : > { %v342_v31 = vpop.f32.mrf.mxu2  ;;  %v347_v32 = vpop.f32.mrf.mxu3 }
  0xa4   : > { %v359_v33 = vmul.f32 %v723_v7, %v342_v31  ;;  %v361_v34 = vmul.f32 %v723_v7, %v347_v32 }
  0xa6   : > { %v371_v36 = vadd.f32 %v724_v8, %v359_v33  ;;  %v373_v37 = vadd.f32 %v724_v8, %v361_v34 }
  0xa8   : > { %v390_v38 = vsel %vm374_vm1, %v371_v36, 0.0  ;;  %v396_v39 = vsel %vm374_vm1, %v373_v37, 0.0 }
  0xa9   : > { %391 = vadd.xlane.f32.xlu2 %v390_v38 }
  0xaa   : > { %397 = vadd.xlane.f32.xlu1 %v396_v39  ;;  %394 = vadd.xlane.f32.xlu0 %v393_v40 }
 0x10d   : > { %v383_v48 = vpop.xlane.xlu1 %382  ;;  %v377_v49 = vpop.xlane.xlu0 %376 }
 0x10e   : > { %v408_v50 = vmul.f32 %v828_v47, %v383_v48  ;;  %v406_v51 = vmul.f32 %v828_v47, %v377_v49 }
 0x110   : > { %v832_v52 = vsub.f32 %v368_v13, %v408_v50  ;;  %v834_v53 = vsub.f32 %v366_v14, %v406_v51 }
 0x112   : > { %v424_v54 = vmul.f32 %v832_v52, %v832_v52  ;;  %v422_v55 = vmul.f32 %v834_v53, %v834_v53 }
 0x114   : > { %v389_v56 = vpop.xlane.xlu2 %388  ;;  %v436_v57 = vsel %vm374_vm1, %v424_v54, 0.0  ;;  %v430_v58 = vsel %vm374_vm1, %v422_v55, 0.0 }
 0x115   : > { %v410_v59 = vmul.f32 %v828_v47, %v389_v56  ;;  %437 = vadd.xlane.f32.xlu1 %v436_v57  ;;  %v386_v60 = vpop.xlane.xlu1 %385  ;;  %431 = vadd.xlane.f32.xlu2 %v430_v58  ;;  %v380_v61 = vpop.xlane.xlu0 %379 }
 0x116   : > { %v409_v62 = vmul.f32 %v828_v47, %v386_v60  ;;  %v407_v0 = vmul.f32 %v828_v47, %v380_v61 }
 0x117   : > { %v844_v63 = vsub.f32 %v370_v24, %v410_v59 }
 0x118   : > { %v847_v1 = vsub.f32 %v369_v25, %v409_v62  ;;  %v853_v4 = vsub.f32 %v367_v26, %v407_v0  ;;  %v903_v0 = vld [vmem:[%s981_s4] ss:$0 sm:$0xff] }
 0x119   : > { %v426_v2 = vmul.f32 %v844_v63, %v844_v63 }
 0x11a   : > { %v425_v3 = vmul.f32 %v847_v1, %v847_v1  ;;  %v423_v14 = vmul.f32 %v853_v4, %v853_v4 }
 0x11b   : > { %v442_v5 = vsel %vm374_vm1, %v426_v2, 0.0 }
 0x11c   : > { %v392_v6 = vpop.xlane.xlu2 %391  ;;  %443 = vadd.xlane.f32.xlu0 %v442_v5  ;;  %v439_v7 = vsel %vm374_vm1, %v425_v3, 0.0  ;;  %v433_v20 = vsel %vm374_vm1, %v423_v14, 0.0 }
 0x11d   : > { %v411_v8 = vmul.f32 %v828_v47, %v392_v6  ;;  %v398_v9 = vpop.xlane.xlu1 %397  ;;  %440 = vadd.xlane.f32.xlu2 %v439_v7  ;;  %v395_v10 = vpop.xlane.xlu0 %394  ;;  %v910_v7 = vld [vmem:[%s982_s5] ss:$0 sm:$0xff] }
 0x11e   : > { %v412_v11 = vmul.f32 %v828_v47, %v395_v10  ;;  %v413_v13 = vmul.f32 %v828_v47, %v398_v9 }
 0x11f   : > { %v859_v12 = vsub.f32 %v371_v36, %v411_v8 }
 0x120   : > { %v864_v15 = vsub.f32 %v372_v35, %v412_v11  ;;  %v870_v18 = vsub.f32 %v373_v37, %v413_v13 }
 0x121   : > { %v427_v16 = vmul.f32 %v859_v12, %v859_v12 }
 0x122   : > { %v428_v17 = vmul.f32 %v864_v15, %v864_v15  ;;  %v429_v22 = vmul.f32 %v870_v18, %v870_v18 }
 0x123   : > { %v445_v19 = vsel %vm374_vm1, %v427_v16, 0.0 }
 0x124   : > { %446 = vadd.xlane.f32.xlu1 %v445_v19  ;;  %434 = vadd.xlane.f32.xlu0 %v433_v20  ;;  %v448_v21 = vsel %vm374_vm1, %v428_v17, 0.0  ;;  %v451_v23 = vsel %vm374_vm1, %v429_v22, 0.0 }
 0x125   : > { %449 = vadd.xlane.f32.xlu2 %v448_v21 }
 0x12c   : > { %452 = vadd.xlane.f32.xlu0 %v451_v23 }
 0x188   : > { %v438_v24 = vpop.xlane.xlu1 %437  ;;  %v432_v25 = vpop.xlane.xlu2 %431 }
 0x189   : > { %v456_v26 = vmul.f32 %v438_v24, %v828_v47  ;;  %v454_v27 = vmul.f32 %v432_v25, %v828_v47 }
 0x18b   : > { %v464_v28 = vadd.f32 1e-05, %v456_v26  ;;  %v462_v29 = vadd.f32 1e-05, %v454_v27 }
 0x18d   : > { %729 = vrsqrt.f32 %v464_v28  ;;  %vm496_vm5 = vweird.f32 %v464_v28  ;;  %vm476_vm7 = vweird.f32 %v462_v29 }
 0x18e   : > { %731 = vrsqrt.f32 %v462_v29 }
 0x18f   : > { %v444_v30 = vpop.xlane.xlu0 %443 }
 0x190   : > { %v458_v31 = vmul.f32 %v444_v30, %v828_v47  ;;  %v441_v32 = vpop.xlane.xlu2 %440 }
 0x191   : > { %v457_v33 = vmul.f32 %v441_v32, %v828_v47 }
 0x192   : > { %v882_v34 = vadd.f32 1e-05, %v458_v31 }
 0x193   : > { %v730_v35 = vpop.eup %729  ;;  %v884_v36 = vadd.f32 1e-05, %v457_v33 }
 0x194   : > { %v732_v37 = vpop.eup %731  ;;  %v491_v38 = vmul.f32 %v730_v35, %v464_v28  ;;  %733 = vrsqrt.f32 %v882_v34  ;;  %vm497_vm3 = vweird.f32 %v730_v35  ;;  %vm516_vm11 = vweird.f32 %v882_v34 }
 0x195   : > { %v471_v39 = vmul.f32 %v732_v37, %v462_v29  ;;  %735 = vrsqrt.f32 %v884_v36  ;;  %vm477_vm4 = vweird.f32 %v732_v37  ;;  %vm498_vm6 = vmor %vm496_vm5, %vm497_vm3  ;;  %vm506_vm13 = vweird.f32 %v884_v36 }
 0x196   : > { %v492_v40 = vmul.f32 %v730_v35, %v491_v38  ;;  %vm478_vm8 = vmor %vm476_vm7, %vm477_vm4 }
 0x197   : > { %v472_v41 = vmul.f32 %v732_v37, %v471_v39  ;;  %v447_v42 = vpop.xlane.xlu1 %446  ;;  %v435_v43 = vpop.xlane.xlu0 %434 }
 0x198   : > { %v493_v44 = vmul.f32 0.5, %v492_v40  ;;  %v459_v45 = vmul.f32 %v447_v42, %v828_v47  ;;  %v455_v46 = vmul.f32 %v435_v43, %v828_v47  ;;  %v450_v48 = vpop.xlane.xlu2 %449 }
 0x199   : > { %v473_v49 = vmul.f32 0.5, %v472_v41  ;;  %v460_v50 = vmul.f32 %v450_v48, %v828_v47 }
 0x19a   : > { %v734_v51 = vpop.eup %733  ;;  %v494_v54 = vsub.f32 1.5, %v493_v44  ;;  %v891_v55 = vadd.f32 1e-05, %v459_v45  ;;  %v893_v56 = vadd.f32 1e-05, %v455_v46 }
 0x19b   : > { %v736_v57 = vpop.eup %735  ;;  %v474_v58 = vsub.f32 1.5, %v473_v49  ;;  %v511_v59 = vmul.f32 %v734_v51, %v882_v34  ;;  %v896_v60 = vadd.f32 1e-05, %v460_v50  ;;  %vm517_vm10 = vweird.f32 %v734_v51 }
 0x19c   : > { %v495_v61 = vmul.f32 %v730_v35, %v494_v54  ;;  %v501_v62 = vmul.f32 %v736_v57, %v884_v36  ;;  %737 = vrsqrt.f32 %v891_v55  ;;  %vm507_vm12 = vweird.f32 %v736_v57  ;;  %vm518_vm14 = vmor %vm516_vm11, %vm517_vm10 }
 0x19d   : > { %v475_v2 = vmul.f32 %v732_v37, %v474_v58  ;;  %v512_v3 = vmul.f32 %v734_v51, %v511_v59  ;;  %739 = vrsqrt.f32 %v893_v56  ;;  %vm508_vm15 = vmor %vm506_vm13, %vm507_vm12  ;;  %vm526_vm1 = vweird.f32 %v891_v55 }
 0x19e   : > { %v499_v5 = vsel %vm498_vm6, %v730_v35, %v495_v61  ;;  %v502_v6 = vmul.f32 %v736_v57, %v501_v62  ;;  %741 = vrsqrt.f32 %v896_v60  ;;  %vm486_vm5 = vweird.f32 %v893_v56 }
 0x19f   : > { %v552_v8 = vmul.f32 %v499_v5, %v832_v52  ;;  %v479_v9 = vsel %vm478_vm8, %v732_v37, %v475_v2  ;;  %v513_v10 = vmul.f32 0.5, %v512_v3  ;;  %v453_v11 = vpop.xlane.xlu0 %452  ;;  %vm536_vm7 = vweird.f32 %v896_v60 }
 0x1a0   : > { %v550_v13 = vmul.f32 %v479_v9, %v834_v53  ;;  %v503_v14 = vmul.f32 0.5, %v502_v6  ;;  %v461_v16 = vmul.f32 %v453_v11, %v828_v47 }
 0x1a1   : > { %v564_v17 = vmul.f32 %v903_v0, %v552_v8  ;;  %v514_v19 = vsub.f32 1.5, %v513_v10 }
 0x1a2   : > { %v738_v20 = vpop.eup %737  ;;  %v562_v21 = vmul.f32 %v903_v0, %v550_v13  ;;  %v504_v52 = vsub.f32 1.5, %v503_v14  ;;  %v930_v28 = vadd.f32 1e-05, %v461_v16 }
 0x1a3   : > { %v740_v22 = vpop.eup %739  ;;  %v576_v23 = vadd.f32 %v910_v7, %v564_v17  ;;  %v515_v53 = vmul.f32 %v734_v51, %v514_v19  ;;  %v521_v47 = vmul.f32 %v738_v20, %v891_v55  ;;  %vm527_vm0 = vweird.f32 %v738_v20 }
 0x1a4   : > { %v742_v24 = vpop.eup %741  ;;  %v574_v25 = vadd.f32 %v910_v7, %v562_v21  ;;  %v505_v26 = vmul.f32 %v736_v57, %v504_v52  ;;  %v481_v27 = vmul.f32 %v740_v22, %v893_v56  ;;  %743 = vrsqrt.f32 %v930_v28  ;;  %vm528_vm4 = vmor %vm526_vm1, %vm527_vm0 }
 0x1a5   : > { %v584_v29 = vpack.c.bf16 %v576_v23, %v576_v23  ;;  %v519_v30 = vsel %vm518_vm14, %v734_v51, %v515_v53  ;;  %v522_v31 = vmul.f32 %v738_v20, %v521_v47  ;;  %v531_v32 = vmul.f32 %v742_v24, %v896_v60 }
 0x1a6   : > { %v582_v33 = vpack.c.bf16 %v574_v25, %v574_v25  ;;  %v554_v34 = vmul.f32 %v519_v30, %v844_v63  ;;  %v509_v35 = vsel %vm508_vm15, %v736_v57, %v505_v26  ;;  %v482_v36 = vmul.f32 %v740_v22, %v481_v27 }
 0x1a7   : > { %593 = vst.msk [vmem:[%s926_s20 + $0x8] sm:$0xf] %vm590_vm9, %v584_v29  ;;  %v553_v37 = vmul.f32 %v509_v35, %v847_v1  ;;  %v523_v38 = vmul.f32 0.5, %v522_v31  ;;  %v532_v39 = vmul.f32 %v742_v24, %v531_v32  ;;  %vm487_vm2 = vweird.f32 %v740_v22 }
 0x1a8   : > { %591 = vst.msk [vmem:[%s926_s20] sm:$0xf] %vm590_vm9, %v582_v33  ;;  %v566_v40 = vmul.f32 %v903_v0, %v554_v34  ;;  %v483_v41 = vmul.f32 0.5, %v482_v36  ;;  %vm537_vm3 = vweird.f32 %v742_v24  ;;  %vm488_vm6 = vmor %vm486_vm5, %vm487_vm2  ;;  %vm546_vm11 = vweird.f32 %v930_v28 }
 0x1a9   : > { %v565_v42 = vmul.f32 %v903_v0, %v553_v37  ;;  %v524_v43 = vsub.f32 1.5, %v523_v38  ;;  %v533_v63 = vmul.f32 0.5, %v532_v39  ;;  %vm538_vm8 = vmor %vm536_vm7, %vm537_vm3 }
 0x1aa   : > { %v578_v44 = vadd.f32 %v910_v7, %v566_v40  ;;  %v484_v45 = vsub.f32 1.5, %v483_v41  ;;  %v744_v55 = vpop.eup %743 }
 0x1ab   : > { %v577_v1 = vadd.f32 %v910_v7, %v565_v42  ;;  %v525_v46 = vmul.f32 %v738_v20, %v524_v43  ;;  %v534_v48 = vsub.f32 1.5, %v533_v63  ;;  %v541_v56 = vmul.f32 %v744_v55, %v930_v28 }
 0x1ac   : > { %v586_v49 = vpack.c.bf16 %v578_v44, %v578_v44  ;;  %v485_v50 = vmul.f32 %v740_v22, %v484_v45  ;;  %vm547_vm10 = vweird.f32 %v744_v55 }
 0x1ad   : > { %v585_v51 = vpack.c.bf16 %v577_v1, %v577_v1  ;;  %v529_v54 = vsel %vm528_vm4, %v738_v20, %v525_v46  ;;  %v535_v57 = vmul.f32 %v742_v24, %v534_v48  ;;  %v542_v5 = vmul.f32 %v744_v55, %v541_v56  ;;  %vm548_vm12 = vmor %vm546_vm11, %vm547_vm10 }
 0x1ae   : > { %595 = vst.msk [vmem:[%s926_s20 + $0x10] sm:$0xf] %vm590_vm9, %v586_v49  ;;  %v555_v58 = vmul.f32 %v529_v54, %v859_v12  ;;  %v489_v59 = vsel %vm488_vm6, %v740_v22, %v485_v50 }
 0x1af   : > { %594 = vst.msk [vmem:[%s926_s20 + $0xc] sm:$0xf] %vm590_vm9, %v585_v51  ;;  %v551_v61 = vmul.f32 %v489_v59, %v853_v4  ;;  %v539_v62 = vsel %vm538_vm8, %v742_v24, %v535_v57  ;;  %v543_v4 = vmul.f32 0.5, %v542_v5 }
 0x1b0   : > { %v567_v2 = vmul.f32 %v903_v0, %v555_v58  ;;  %v556_v60 = vmul.f32 %v539_v62, %v864_v15 }
 0x1b1   : > { %v563_v3 = vmul.f32 %v903_v0, %v551_v61  ;;  %v544_v13 = vsub.f32 1.5, %v543_v4 }
 0x1b2   : > { %v579_v12 = vadd.f32 %v910_v7, %v567_v2  ;;  %v568_v6 = vmul.f32 %v903_v0, %v556_v60 }
 0x1b3   : > { %v575_v8 = vadd.f32 %v910_v7, %v563_v3  ;;  %v545_v14 = vmul.f32 %v744_v55, %v544_v13 }
 0x1b4   : > { %v587_v9 = vpack.c.bf16 %v579_v12, %v579_v12  ;;  %v580_v10 = vadd.f32 %v910_v7, %v568_v6 }
 0x1b5   : > { %v583_v11 = vpack.c.bf16 %v575_v8, %v575_v8  ;;  %v549_v16 = vsel %vm548_vm12, %v744_v55, %v545_v14 }
 0x1b6   : > { %596 = vst.msk [vmem:[%s926_s20 + $0x14] sm:$0xf] %vm590_vm9, %v587_v9  ;;  %v588_v15 = vpack.c.bf16 %v580_v10, %v580_v10  ;;  %v557_v17 = vmul.f32 %v549_v16, %v870_v18 }
 0x1b7   : > { %592 = vst.msk [vmem:[%s926_s20 + $0x4] sm:$0xf] %vm590_vm9, %v583_v11 }
 0x1b8   : > { %597 = vst.msk [vmem:[%s926_s20 + $0x18] sm:$0xf] %vm590_vm9, %v588_v15  ;;  %v569_v19 = vmul.f32 %v903_v0, %v557_v17 }
 0x1ba   : > { %v581_v20 = vadd.f32 %v910_v7, %v569_v19 }
 0x1bc   : > { %v589_v21 = vpack.c.bf16 %v581_v20, %v581_v20 }
 0x1be   : > { %598 = vst.msk [vmem:[%s926_s20 + $0x1c] sm:$0xf] %vm590_vm9, %v589_v21 }
 0x1bf PF: > { %s16_s21 = sadd.s32 1, %s751_s21  }
 0x1c0   : > { %p13_p4 = scmp.ge.s32.totalorder %s16_s21, 4  }
 0x1c2   :  { %15 = sbr.rel (!%p13_p4) target bundleno = 1 (0x1), region = 74 }

// kernel: _lambda_.23
= control target key start
LH: loop header
LB: loop body
LE: loop exit
PB: predicated region body
PF: predicated region fallthrough
CT: control target
= control target key end

     0   :  { %s1718_s27 = smov 0   ;;  %s2159_s0 = inlined_call_operand.vmem [shape: bf16[8,16,32], index: 0, kind: input, shape index: {}]   ;;  %s2160_s1 = inlined_call_operand.vmem [shape: bf16[32,96], index: 1, kind: input, shape index: {}]   ;;  %s2161_s2 = inlined_call_operand.vmem [shape: f32[1,96], index: 2, kind: input, shape index: {}]   ;;  %s2162_s3 = inlined_call_operand.vmem [shape: f32[4,2,16,16], index: 3, kind: input, shape index: {}]   ;;  %s2163_s4 = inlined_call_operand.vmem [shape: bf16[32,32], index: 4, kind: input, shape index: {}]   ;;  %s2164_s5 = inlined_call_operand.vmem [shape: f32[1,32], index: 5, kind: input, shape index: {}, may-alias: {5,7}]   ;;  %s2165_s6 = inlined_call_operand.vmem [shape: f32[1,32], index: 6, kind: input, shape index: {}]   ;;  %s2166_s7 = inlined_call_operand.vmem [shape: f32[1,32], index: 7, kind: input, shape index: {}, may-alias: {5,7}]   ;;  %s2167_s8 = inlined_call_operand.vmem [shape: bf16[8,16,32], index: 8, kind: output, shape index: {}]  }
   0x1 LB: > { %s1453_s28 = sadd.s32 4294967295, %s1664_s27   ;;  %p1457_p0 = scmp.ge.s32.totalorder %s1664_s27, 1  ;;  %s1664_s27 = sphi %s1718_s27, %s18_s27  }
   0x2   : > { %p264_p1 = scmp.lt.s32.totalorder %s1664_s27, 3 }
   0x4   : > { %p265_p2 = pnand %p1457_p0, %p264_p1 }
   0x5   : > { %s1458_s29 = sshll.u32 (!%p265_p2), %s1453_s28, 2  ;;  %s1667_s22 = smov (!%p265_p2), 96  }
   0x6   : > { %268 = sbr.rel (%p265_p2) target bundleno = 1882 (0x75a), region = 52  ;;  %p301_p3 = scmp.lt.s32.totalorder (!%p265_p2), %s1458_s29, 7 }
   0x7   : > { %s1668_s20 = smov (!%p265_p2), 64   ;;  %s1669_s21 = smov (!%p265_p2), 80  }
   0x8   : > { %s1671_s16 = smov (!%p265_p2), 48  }
   0xb   : > { %s2171_s29 = smov (!%p301_p3, %s1458_s29), 7  ;;  %vm331_vm0 = vcmask 261120   ;;  %v1666_v20 = vmov 32.0  }
   0xc   : > { %s1506_s30 = sshll.u32 %s2171_s29, 3  ;;  %1576 = vrcp.f32 %v1666_v20 }
   0xd   : > { %s305_s11 = scalar_lea.vmem %s2159_s0, %s1506_s30 }
   0xe   : > { %v1734_v0 = vld [vmem:[%s305_s11 + $0x10] sm:$0xff]   ;;  %v1528_v1 = vld [vmem:[%s305_s11 + $0x8] sm:$0xff]   ;;  %v1513_v2 = vld [vmem:[%s305_s11] sm:$0xff]  }
   0xf   : > { %v1522_v3 = vunpack.c.l.bf16 %v1734_v0  ;;  %v1518_v4 = vunpack.c.l.bf16 %v1528_v1  ;;  %v1514_v5 = vunpack.c.l.bf16 %v1513_v2  ;;  %v1523_v9 = vunpack.c.h.bf16 %v1734_v0  ;;  %v1530_v15 = vld [vmem:[%s305_s11 + $0x18] sm:$0xff]   ;;  %s2138_s11 = scalar_lea.vmem %s2167_s8, %s1506_s30 }
  0x10   : > { %v1519_v10 = vunpack.c.h.bf16 %v1528_v1  ;;  %v1515_v11 = vunpack.c.h.bf16 %v1513_v2  ;;  %v1526_v16 = vunpack.c.l.bf16 %v1530_v15  ;;  %v1527_v17 = vunpack.c.h.bf16 %v1530_v15 }
  0x11   : > { %v344_v6 = vsel %vm331_vm0, %v1522_v3, 0.0  ;;  %v338_v7 = vsel %vm331_vm0, %v1518_v4, 0.0  ;;  %v332_v8 = vsel %vm331_vm0, %v1514_v5, 0.0  ;;  %v347_v12 = vsel %vm331_vm0, %v1523_v9, 0.0 }
  0x12   : > { %345 = vadd.xlane.f32.xlu2 %v344_v6  ;;  %339 = vadd.xlane.f32.xlu0 %v338_v7  ;;  %v341_v13 = vsel %vm331_vm0, %v1519_v10, 0.0  ;;  %v335_v14 = vsel %vm331_vm0, %v1515_v11, 0.0  ;;  %v350_v18 = vsel %vm331_vm0, %v1526_v16, 0.0  ;;  %v353_v19 = vsel %vm331_vm0, %v1527_v17, 0.0  ;;  %v1577_v21 = vpop.eup %1576 }
  0x13   : > { %333 = vadd.xlane.f32.xlu1 %v332_v8  ;;  %v357_v22 = vmul.f32 32.0, %v1577_v21  ;;  %vm361_vm1 = vweird.f32 %v1577_v21 }
  0x15   : > { %v358_v23 = vsub.f32 1.0, %v357_v22 }
  0x17   : > { %v359_v24 = vmul.f32 %v1577_v21, %v358_v23 }
  0x19   : > { %v360_v25 = vadd.f32 %v1577_v21, %v359_v24 }
  0x1a   : > { %348 = vadd.xlane.f32.xlu2 %v347_v12  ;;  %342 = vadd.xlane.f32.xlu0 %v341_v13 }
  0x1b   : > { %336 = vadd.xlane.f32.xlu1 %v335_v14  ;;  %v1746_v26 = vsel %vm361_vm1, %v1577_v21, %v360_v25  ;;  %v1508_v14 = vld [vmem:[%s2160_s1] sm:$0xff] }
  0x22   : > { %351 = vadd.xlane.f32.xlu0 %v350_v18 }
  0x23   : > { %354 = vadd.xlane.f32.xlu1 %v353_v19 }
  0x85   : > { %v346_v27 = vpop.xlane.xlu2 %345  ;;  %v340_v28 = vpop.xlane.xlu0 %339 }
  0x86   : > { %v365_v29 = vmul.f32 %v1746_v26, %v340_v28  ;;  %v334_v30 = vpop.xlane.xlu1 %333  ;;  %v367_v44 = vmul.f32 %v1746_v26, %v346_v27 }
  0x87   : > { %v363_v31 = vmul.f32 %v1746_v26, %v334_v30 }
  0x88   : > { %v1750_v32 = vsub.f32 %v1518_v4, %v365_v29  ;;  %v1776_v51 = vsub.f32 %v1522_v3, %v367_v44 }
  0x89   : > { %v1752_v33 = vsub.f32 %v1514_v5, %v363_v31 }
  0x8a   : > { %v381_v34 = vmul.f32 %v1750_v32, %v1750_v32  ;;  %v383_v60 = vmul.f32 %v1776_v51, %v1776_v51 }
  0x8b   : > { %v379_v35 = vmul.f32 %v1752_v33, %v1752_v33 }
  0x8c   : > { %v393_v36 = vsel %vm331_vm0, %v381_v34, 0.0  ;;  %v399_v63 = vsel %vm331_vm0, %v383_v60, 0.0 }
  0x8d   : > { %v349_v37 = vpop.xlane.xlu2 %348  ;;  %394 = vadd.xlane.f32.xlu2 %v393_v36  ;;  %v343_v38 = vpop.xlane.xlu0 %342  ;;  %v387_v39 = vsel %vm331_vm0, %v379_v35, 0.0 }
  0x8e   : > { %v368_v40 = vmul.f32 %v1746_v26, %v349_v37  ;;  %v366_v41 = vmul.f32 %v1746_v26, %v343_v38  ;;  %388 = vadd.xlane.f32.xlu1 %v387_v39  ;;  %v337_v42 = vpop.xlane.xlu1 %336 }
  0x8f   : > { %v364_v43 = vmul.f32 %v1746_v26, %v337_v42 }
  0x90   : > { %v1764_v45 = vsub.f32 %v1523_v9, %v368_v40  ;;  %v1766_v46 = vsub.f32 %v1519_v10, %v366_v41  ;;  %v1509_v9 = vld [vmem:[%s2160_s1 + $0x8] sm:$0xff] }
  0x91   : > { %v1768_v47 = vsub.f32 %v1515_v11, %v364_v43  ;;  %605 = vmatpush.bf16.msra.mxu0 %v1509_v9  ;;  %1531 = vmatpush.bf16.msra.mxu1 %v1509_v9 }
  0x92   : > { %v382_v48 = vmul.f32 %v1766_v46, %v1766_v46  ;;  %v384_v49 = vmul.f32 %v1764_v45, %v1764_v45  ;;  %1532 = vmatpush.bf16.msra.mxu2 %v1509_v9  ;;  %1533 = vmatpush.bf16.msra.mxu3 %v1509_v9 }
  0x93   : > { %v380_v50 = vmul.f32 %v1768_v47, %v1768_v47 }
  0x94   : > { %v396_v52 = vsel %vm331_vm0, %v382_v48, 0.0  ;;  %v402_v53 = vsel %vm331_vm0, %v384_v49, 0.0 }
  0x95   : > { %397 = vadd.xlane.f32.xlu0 %v396_v52  ;;  %v352_v54 = vpop.xlane.xlu0 %351  ;;  %v390_v55 = vsel %vm331_vm0, %v380_v50, 0.0  ;;  %606 = vmatpush.bf16.msra.mxu0 %v1508_v14 }
  0x96   : > { %v369_v56 = vmul.f32 %v1746_v26, %v352_v54  ;;  %403 = vadd.xlane.f32.xlu1 %v402_v53  ;;  %391 = vadd.xlane.f32.xlu2 %v390_v55  ;;  %v355_v57 = vpop.xlane.xlu1 %354  ;;  %v1825_v53 = vld [vmem:[%s2165_s6] ss:$0 sm:$0xff] }
  0x97   : > { %v370_v58 = vmul.f32 %v1746_v26, %v355_v57  ;;  %1534 = vmatpush.bf16.msra.mxu1 %v1508_v14  ;;  %1535 = vmatpush.bf16.msra.mxu2 %v1508_v14 }
  0x98   : > { %v1783_v59 = vsub.f32 %v1526_v16, %v369_v56  ;;  %1536 = vmatpush.bf16.msra.mxu3 %v1508_v14 }
  0x99   : > { %v1789_v62 = vsub.f32 %v1527_v17, %v370_v58 }
  0x9a   : > { %v385_v61 = vmul.f32 %v1783_v59, %v1783_v59 }
  0x9b   : > { %v386_v1 = vmul.f32 %v1789_v62, %v1789_v62 }
  0x9c   : > { %v405_v0 = vsel %vm331_vm0, %v385_v61, 0.0 }
  0x9d   : > { %400 = vadd.xlane.f32.xlu0 %v399_v63  ;;  %v408_v2 = vsel %vm331_vm0, %v386_v1, 0.0 }
  0x9e   : > { %406 = vadd.xlane.f32.xlu2 %v405_v0 }
  0xa5   : > { %409 = vadd.xlane.f32.xlu0 %v408_v2 }
 0x100   : > { %v395_v3 = vpop.xlane.xlu2 %394 }
 0x101   : > { %v413_v4 = vmul.f32 %v395_v3, %v1746_v26  ;;  %v389_v5 = vpop.xlane.xlu1 %388 }
 0x102   : > { %v411_v6 = vmul.f32 %v389_v5, %v1746_v26 }
 0x103   : > { %v421_v7 = vadd.f32 1e-05, %v413_v4 }
 0x104   : > { %v419_v8 = vadd.f32 1e-05, %v411_v6 }
 0x105   : > { %1578 = vrsqrt.f32 %v421_v7  ;;  %vm453_vm5 = vweird.f32 %v421_v7 }
 0x106   : > { %1580 = vrsqrt.f32 %v419_v8  ;;  %vm433_vm3 = vweird.f32 %v419_v8 }
 0x108   : > { %v398_v10 = vpop.xlane.xlu0 %397 }
 0x109   : > { %v414_v11 = vmul.f32 %v398_v10, %v1746_v26  ;;  %v392_v12 = vpop.xlane.xlu2 %391  ;;  %v404_v13 = vpop.xlane.xlu1 %403 }
 0x10a   : > { %v412_v15 = vmul.f32 %v392_v12, %v1746_v26  ;;  %v416_v16 = vmul.f32 %v404_v13, %v1746_v26 }
 0x10b   : > { %v1579_v17 = vpop.eup %1578  ;;  %v1807_v18 = vadd.f32 1e-05, %v414_v11 }
 0x10c   : > { %v1581_v19 = vpop.eup %1580  ;;  %v448_v20 = vmul.f32 %v1579_v17, %v421_v7  ;;  %v420_v21 = vadd.f32 1e-05, %v412_v15  ;;  %v1809_v22 = vadd.f32 1e-05, %v416_v16  ;;  %vm454_vm2 = vweird.f32 %v1579_v17 }
 0x10d   : > { %v428_v23 = vmul.f32 %v1581_v19, %v419_v8  ;;  %1582 = vrsqrt.f32 %v1807_v18  ;;  %vm434_vm4 = vweird.f32 %v1581_v19  ;;  %vm455_vm6 = vmor %vm453_vm5, %vm454_vm2  ;;  %vm463_vm8 = vweird.f32 %v1807_v18 }
 0x10e   : > { %v449_v24 = vmul.f32 %v1579_v17, %v448_v20  ;;  %1584 = vrsqrt.f32 %v420_v21  ;;  %vm435_vm7 = vmor %vm433_vm3, %vm434_vm4  ;;  %vm443_vm9 = vweird.f32 %v420_v21  ;;  %vm483_vm12 = vweird.f32 %v1809_v22 }
 0x10f   : > { %v429_v25 = vmul.f32 %v1581_v19, %v428_v23  ;;  %1586 = vrsqrt.f32 %v1809_v22 }
 0x110   : > { %v450_v27 = vmul.f32 0.5, %v449_v24  ;;  %v401_v28 = vpop.xlane.xlu0 %400 }
 0x111   : > { %v430_v29 = vmul.f32 0.5, %v429_v25  ;;  %v415_v30 = vmul.f32 %v401_v28, %v1746_v26  ;;  %v407_v31 = vpop.xlane.xlu2 %406 }
 0x112   : > { %v451_v34 = vsub.f32 1.5, %v450_v27  ;;  %v417_v35 = vmul.f32 %v407_v31, %v1746_v26 }
 0x113   : > { %v1583_v36 = vpop.eup %1582  ;;  %v431_v37 = vsub.f32 1.5, %v430_v29  ;;  %v1815_v38 = vadd.f32 1e-05, %v415_v30 }
 0x114   : > { %v1585_v39 = vpop.eup %1584  ;;  %v452_v40 = vmul.f32 %v1579_v17, %v451_v34  ;;  %v458_v41 = vmul.f32 %v1583_v36, %v1807_v18  ;;  %v1818_v42 = vadd.f32 1e-05, %v417_v35  ;;  %vm464_vm11 = vweird.f32 %v1583_v36 }
 0x115   : > { %v1587_v43 = vpop.eup %1586  ;;  %v432_v44 = vmul.f32 %v1581_v19, %v431_v37  ;;  %v438_v48 = vmul.f32 %v1585_v39, %v420_v21  ;;  %1588 = vrsqrt.f32 %v1815_v38  ;;  %vm444_vm10 = vweird.f32 %v1585_v39  ;;  %vm465_vm15 = vmor %vm463_vm8, %vm464_vm11 }
 0x116   : > { %v456_v49 = vsel %vm455_vm6, %v1579_v17, %v452_v40  ;;  %v459_v50 = vmul.f32 %v1583_v36, %v458_v41  ;;  %v478_v52 = vmul.f32 %v1587_v43, %v1809_v22  ;;  %1590 = vrsqrt.f32 %v1818_v42  ;;  %vm1841_vm14 = vmor %vm443_vm9, %vm444_vm10 }
 0x117   : > { %v509_v54 = vmul.f32 %v456_v49, %v1750_v32  ;;  %v436_v55 = vsel %vm435_vm7, %v1581_v19, %v432_v44  ;;  %v439_v56 = vmul.f32 %v1585_v39, %v438_v48  ;;  %v1835_v32 = vld [vmem:[%s2166_s7] ss:$0 sm:$0xff]  ;;  %vm484_vm13 = vweird.f32 %v1587_v43 }
 0x118   : > { %v507_v57 = vmul.f32 %v436_v55, %v1752_v33  ;;  %v460_v58 = vmul.f32 0.5, %v459_v50  ;;  %v479_v60 = vmul.f32 %v1587_v43, %v478_v52  ;;  %v410_v61 = vpop.xlane.xlu0 %409  ;;  %vm485_vm1 = vmor %vm483_vm12, %vm484_vm13  ;;  %vm473_vm2 = vweird.f32 %v1815_v38 }
 0x119   : > { %v440_v63 = vmul.f32 0.5, %v439_v56  ;;  %v418_v0 = vmul.f32 %v410_v61, %v1746_v26  ;;  %v521_v33 = vmul.f32 %v1825_v53, %v509_v54  ;;  %vm493_vm3 = vweird.f32 %v1818_v42 }
 0x11a   : > { %v461_v1 = vsub.f32 1.5, %v460_v58  ;;  %v480_v2 = vmul.f32 0.5, %v479_v60  ;;  %v519_v9 = vmul.f32 %v1825_v53, %v507_v57  ;;  %vm659_vm11 = vcmask 130048  }
 0x11b   : > { %v1589_v3 = vpop.eup %1588  ;;  %v441_v4 = vsub.f32 1.5, %v440_v63  ;;  %v1839_v5 = vadd.f32 1e-05, %v418_v0  ;;  %v533_v15 = vadd.f32 %v1835_v32, %v521_v33  ;;  %vm1386_vm12 = vcmask 257024  }
 0x11c   : > { %v462_v6 = vmul.f32 %v1583_v36, %v461_v1  ;;  %v481_v7 = vsub.f32 1.5, %v480_v2  ;;  %v468_v8 = vmul.f32 %v1589_v3, %v1815_v38  ;;  %v1591_v11 = vpop.eup %1590  ;;  %v531_v23 = vadd.f32 %v1835_v32, %v519_v9 }
 0x11d   : > { %v442_v10 = vmul.f32 %v1585_v39, %v441_v4  ;;  %1592 = vrsqrt.f32 %v1839_v5  ;;  %v488_v18 = vmul.f32 %v1591_v11, %v1818_v42  ;;  %vm474_vm4 = vweird.f32 %v1589_v3 }
 0x11e   : > { %v466_v12 = vsel %vm465_vm15, %v1583_v36, %v462_v6  ;;  %v482_v13 = vmul.f32 %v1587_v43, %v481_v7  ;;  %v469_v14 = vmul.f32 %v1589_v3, %v468_v8  ;;  %v541_v28 = vpack.c.bf16 %v533_v15, %v533_v15  ;;  %vm475_vm6 = vmor %vm473_vm2, %vm474_vm4 }
 0x11f   : > { %v510_v16 = vmul.f32 %v466_v12, %v1766_v46  ;;  %v446_v17 = vsel %vm1841_vm14, %v1585_v39, %v442_v10  ;;  %v489_v46 = vmul.f32 %v1591_v11, %v488_v18  ;;  %vm494_vm5 = vweird.f32 %v1591_v11 }
 0x120   : > { %v508_v19 = vmul.f32 %v446_v17, %v1768_v47  ;;  %v486_v20 = vsel %vm485_vm1, %v1587_v43, %v482_v13  ;;  %v470_v21 = vmul.f32 0.5, %v469_v14  ;;  %v539_v36 = vpack.c.bf16 %v531_v23, %v531_v23  ;;  %vm495_vm8 = vmor %vm493_vm3, %vm494_vm5 }
 0x121   : > { %v512_v24 = vmul.f32 %v486_v20, %v1764_v45  ;;  %v522_v25 = vmul.f32 %v1825_v53, %v510_v16  ;;  %v490_v30 = vmul.f32 0.5, %v489_v46  ;;  %vm503_vm7 = vweird.f32 %v1839_v5 }
 0x122   : > { %v471_v27 = vsub.f32 1.5, %v470_v21  ;;  %v520_v22 = vmul.f32 %v1825_v53, %v508_v19  ;;  %v565_v44 = vunpack.c.l.b16 %v541_v28  ;;  %v563_v38 = vunpack.c.l.b16 %v539_v36 }
 0x123   : > { %v1593_v29 = vpop.eup %1592  ;;  %v534_v47 = vadd.f32 %v1835_v32, %v522_v25  ;;  %v524_v31 = vmul.f32 %v1825_v53, %v512_v24  ;;  %v491_v37 = vsub.f32 1.5, %v490_v30 }
 0x124   : > { %v472_v34 = vmul.f32 %v1589_v3, %v471_v27  ;;  %v498_v45 = vmul.f32 %v1593_v29, %v1839_v5  ;;  %v532_v35 = vadd.f32 %v1835_v32, %v520_v22  ;;  %vm504_vm9 = vweird.f32 %v1593_v29 }
 0x125   : > { %v542_v39 = vpack.c.bf16 %v534_v47, %v534_v47  ;;  %v492_v49 = vmul.f32 %v1591_v11, %v491_v37  ;;  %v536_v52 = vadd.f32 %v1835_v32, %v524_v31  ;;  %vm505_vm10 = vmor %vm503_vm7, %vm504_vm9 }
 0x126   : > { %v476_v40 = vsel %vm475_vm6, %v1589_v3, %v472_v34  ;;  %v499_v41 = vmul.f32 %v1593_v29, %v498_v45  ;;  %v540_v43 = vpack.c.bf16 %v532_v35, %v532_v35 }
 0x127   : > { %v511_v48 = vmul.f32 %v476_v40, %v1776_v51  ;;  %v566_v50 = vunpack.c.l.b16 %v542_v39  ;;  %v496_v56 = vsel %vm495_vm8, %v1591_v11, %v492_v49  ;;  %v544_v63 = vpack.c.bf16 %v536_v52, %v536_v52 }
 0x128   : > { %v500_v54 = vmul.f32 0.5, %v499_v41  ;;  %v564_v55 = vunpack.c.l.b16 %v540_v43  ;;  %v513_v42 = vmul.f32 %v496_v56, %v1783_v59 }
 0x129   : > { %v572_v57 = vpack.c.b16 %v566_v50, %v565_v44  ;;  %v523_v58 = vmul.f32 %v1825_v53, %v511_v48  ;;  %v568_v4 = vunpack.c.l.b16 %v544_v63 }
 0x12a   : > { %v501_v60 = vsub.f32 1.5, %v500_v54  ;;  %v571_v61 = vpack.c.b16 %v564_v55, %v563_v38  ;;  %v525_v1 = vmul.f32 %v1825_v53, %v513_v42 }
 0x12b   : > { %1473 = vmatmul.msk.bf16.vlgmr.msra.gmra.mxu1 %vm331_vm0, %v572_v57  ;;  %v535_v51 = vadd.f32 %v1835_v32, %v523_v58 }
 0x12c   : > { %v502_v0 = vmul.f32 %v1593_v29, %v501_v60  ;;  %1472 = vmatmul.msk.bf16.vlgmr.msra.gmra.mxu0 %vm331_vm0, %v571_v61  ;;  %v537_v6 = vadd.f32 %v1835_v32, %v525_v1  ;;  %v628_v61 = vld [vmem:[%s2162_s3] sm:$0xff] }
 0x12d   : > { %v543_v2 = vpack.c.bf16 %v535_v51, %v535_v51  ;;  %v632_v1 = vld [vmem:[%s2162_s3 + $0x20] sm:$0xff] }
 0x12e   : > { %v506_v33 = vsel %vm505_vm10, %v1593_v29, %v502_v0  ;;  %v545_v8 = vpack.c.bf16 %v537_v6, %v537_v6 }
 0x12f   : > { %v514_v3 = vmul.f32 %v506_v33, %v1789_v62  ;;  %v567_v59 = vunpack.c.l.b16 %v543_v2  ;;  %v1574_v62 = vld [vmem:[%s2161_s2] ss:$0 sm:$0xff] }
 0x130   : > { %v569_v10 = vunpack.c.l.b16 %v545_v8  ;;  %v636_v8 = vld [vmem:[%s2162_s3 + $0x40] sm:$0xff] }
 0x131   : > { %v573_v5 = vpack.c.b16 %v568_v4, %v567_v59  ;;  %v526_v26 = vmul.f32 %v1825_v53, %v514_v3  ;;  %v629_v59 = vld [vmem:[%s2162_s3 + $0x8] sm:$0xff] }
 0x133   : > { %1474 = vmatmul.msk.bf16.vlgmr.msra.gmra.mxu2 %vm331_vm0, %v573_v5  ;;  %v538_v7 = vadd.f32 %v1835_v32, %v526_v26  ;;  %v640_v26 = vld [vmem:[%s2162_s3 + $0x60] sm:$0xff] }
 0x135   : > { %v546_v9 = vpack.c.bf16 %v538_v7, %v538_v7 }
 0x137   : > { %v570_v11 = vunpack.c.l.b16 %v546_v9 }
 0x139   : > { %v574_v12 = vpack.c.b16 %v570_v11, %v569_v10 }
 0x13b   : > { %1475 = vmatmul.msk.bf16.vlgmr.msra.gmra.mxu3 %vm331_vm0, %v574_v12 }
 0x1a8   : > { %v613_v13 = vpop.f32.mrf.mxu1 }
 0x1a9   : > { %v608_v14 = vpop.f32.mrf.mxu0  ;;  %v614_v15 = vadd.f32 %v1574_v62, %v613_v13  ;;  %v633_v13 = vld [vmem:[%s2162_s3 + $0x28] sm:$0xff] }
 0x1aa   : > { %v609_v16 = vadd.f32 %v1574_v62, %v608_v14 }
 0x1ab   : > { %v646_v17 = vpack.c.bf16 %v614_v15, %v614_v15  ;;  %v637_v15 = vld [vmem:[%s2162_s3 + $0x48] sm:$0xff] }
 0x1ac   : > { %v644_v32 = vpack.c.bf16 %v609_v16, %v609_v16 }
 0x1ad   : > { %v682_v24 = vunpack.c.l.b16 %v646_v17 }
 0x1ae   : > { %v654_v25 = vunpack.c.l.b16 %v644_v32  ;;  %v641_v32 = vld [vmem:[%s2162_s3 + $0x68] sm:$0xff] }
 0x1b0   : > { %v615_v53 = vpop.f32.mrf.mxu1 }
 0x1b1   : > { %v610_v18 = vpop.f32.mrf.mxu0  ;;  %v616_v19 = vadd.f32 %v1574_v62, %v615_v53 }
 0x1b2   : > { %v611_v20 = vadd.f32 %v1574_v62, %v610_v18 }
 0x1b3   : > { %v647_v21 = vpack.c.bf16 %v616_v19, %v616_v19 }
 0x1b4   : > { %v645_v23 = vpack.c.bf16 %v611_v20, %v611_v20 }
 0x1b5   : > { %v683_v46 = vunpack.c.l.b16 %v647_v21 }
 0x1b6   : > { %v655_v27 = vunpack.c.l.b16 %v645_v23  ;;  %v618_v22 = vpop.f32.mrf.mxu2 }
 0x1b7   : > { %v1893_v28 = vpack.c.b16 %v683_v46, %v682_v24  ;;  %v619_v30 = vadd.f32 %v1574_v62, %v618_v22 }
 0x1b8   : > { %v1895_v29 = vpack.c.b16 %v655_v27, %v654_v25 }
 0x1b9   : > { %685 = vrot.lane.b32.xlu1 %v1893_v28, %s1667_s22  ;;  %v648_v34 = vpack.c.bf16 %v619_v30, %v619_v30 }
 0x1ba   : > { %657 = vrot.lane.b32.xlu2 %v1895_v29, %s1667_s22 }
 0x1bb   : > { %v709_v36 = vunpack.c.l.b16 %v648_v34 }
 0x1be   : > { %v620_v47 = vpop.f32.mrf.mxu2  ;;  %v623_v31 = vpop.f32.mrf.mxu3 }
 0x1bf   : > { %v621_v45 = vadd.f32 %v1574_v62, %v620_v47  ;;  %v624_v39 = vadd.f32 %v1574_v62, %v623_v31 }
 0x1c1   : > { %v649_v35 = vpack.c.bf16 %v621_v45, %v621_v45  ;;  %v650_v43 = vpack.c.bf16 %v624_v39, %v624_v39 }
 0x1c3   : > { %v710_v37 = vunpack.c.l.b16 %v649_v35  ;;  %v736_v49 = vunpack.c.l.b16 %v650_v43 }
 0x1c5   : > { %v1899_v40 = vpack.c.b16 %v710_v37, %v709_v36 }
 0x1c6   : > { %v625_v41 = vpop.f32.mrf.mxu3 }
 0x1c7   : > { %v626_v44 = vadd.f32 %v1574_v62, %v625_v41  ;;  %712 = vrot.lane.b32.xlu0 %v1899_v40, %s1667_s22 }
 0x1c9   : > { %v651_v48 = vpack.c.bf16 %v626_v44, %v626_v44 }
 0x1cb   : > { %v737_v50 = vunpack.c.l.b16 %v651_v48 }
 0x1cd   : > { %v1902_v52 = vpack.c.b16 %v737_v50, %v736_v49 }
 0x1cf   : > { %739 = vrot.lane.b32.xlu2 %v1902_v52, %s1667_s22  ;;  %s1670_s22 = smov 112  }
 0x214   : > { %v658_v54 = vpop.permute.xlu2 %657 }
 0x215   : > { %v664_v38 = vsel %vm659_vm11, %v658_v54, 0 }
 0x216   : > { %673 = vmatpush.bf16.xpose.msrb.mxu1 %v664_v38 }
 0x21d   : > { %1476 = vmatmul.msk.bf16.vlgmr.msrb.gmra.mxu1 %vm659_vm11, %v1895_v29 }
 0x229   : > { %v740_v55 = vpop.permute.xlu2 %739 }
 0x22a   : > { %v745_v56 = vsel %vm659_vm11, %v740_v55, 0 }
 0x22b   : > { %754 = vmatpush.bf16.xpose.msra.mxu1 %v745_v56  ;;  %v686_v57 = vpop.permute.xlu1 %685 }
 0x22c   : > { %v691_v58 = vsel %vm659_vm11, %v686_v57, 0 }
 0x22d   : > { %700 = vmatpush.bf16.xpose.msrb.mxu2 %v691_v58 }
 0x232   : > { %1479 = vmatmul.msk.bf16.vlgmr.msra.gmra.mxu1 %vm659_vm11, %v1902_v52 }
 0x234   : > { %1477 = vmatmul.msk.bf16.vlgmr.msrb.gmra.mxu2 %vm659_vm11, %v1893_v28 }
 0x239   : > { %v713_v42 = vpop.permute.xlu0 %712 }
 0x23a   : > { %v718_v60 = vsel %vm659_vm11, %v713_v42, 0 }
 0x23b   : > { %727 = vmatpush.bf16.xpose.msrb.mxu3 %v718_v60 }
 0x242   : > { %1478 = vmatmul.msk.bf16.vlgmr.msrb.gmra.mxu3 %vm659_vm11, %v1899_v40 }
 0x29a   : > { %v675_v51 = vpop.f32.mrf.mxu1 }
 0x29b   : > { %v676_v63 = vadd.f32 %v675_v51, %v628_v61 }
 0x29d   : > { %v761_v0 = vsel %vm659_vm11, %v676_v63, -inf }
 0x29e   : > { %762 = vmax.xlane.f32.xlu2 %v761_v0 }
 0x2a2   : > { %v677_v4 = vpop.f32.mrf.mxu1 }
 0x2a3   : > { %v678_v6 = vadd.f32 %v677_v4, %v629_v59 }
 0x2a5   : > { %v764_v5 = vsel %vm659_vm11, %v678_v6, -inf }
 0x2af   : > { %v756_v7 = vpop.f32.mrf.mxu1 }
 0x2b0   : > { %v1935_v10 = vadd.f32 %v756_v7, %v640_v26 }
 0x2b2   : > { %v779_v14 = vsel %vm659_vm11, %v1935_v10, -inf }
 0x2b7   : > { %v702_v2 = vpop.f32.mrf.mxu2  ;;  %v758_v20 = vpop.f32.mrf.mxu1 }
 0x2b8   : > { %v703_v33 = vadd.f32 %v702_v2, %v632_v1  ;;  %v759_v21 = vadd.f32 %v758_v20, %v641_v32 }
 0x2ba   : > { %v767_v3 = vsel %vm659_vm11, %v703_v33, -inf  ;;  %v782_v23 = vsel %vm659_vm11, %v759_v21, -inf }
 0x2bb   : > { %768 = vmax.xlane.f32.xlu1 %v767_v3 }
 0x2bf   : > { %v704_v62 = vpop.f32.mrf.mxu2 }
 0x2c0   : > { %v705_v16 = vadd.f32 %v704_v62, %v633_v13 }
 0x2c2   : > { %v770_v19 = vsel %vm659_vm11, %v705_v16, -inf }
 0x2c3   : > { %765 = vmax.xlane.f32.xlu1 %v764_v5 }
 0x2c5   : > { %v729_v9 = vpop.f32.mrf.mxu3 }
 0x2c6   : > { %v730_v11 = vadd.f32 %v729_v9, %v636_v8 }
 0x2c8   : > { %v773_v12 = vsel %vm659_vm11, %v730_v11, -inf }
 0x2c9   : > { %774 = vmax.xlane.f32.xlu0 %v773_v12 }
 0x2cb   : > { %780 = vmax.xlane.f32.xlu1 %v779_v14 }
 0x2cd   : > { %v731_v53 = vpop.f32.mrf.mxu3 }
 0x2ce   : > { %v732_v17 = vadd.f32 %v731_v53, %v637_v15 }
 0x2d0   : > { %v776_v18 = vsel %vm659_vm11, %v732_v17, -inf }
 0x2d1   : > { %777 = vmax.xlane.f32.xlu2 %v776_v18  ;;  %771 = vmax.xlane.f32.xlu0 %v770_v19 }
 0x2d9   : > { %783 = vmax.xlane.f32.xlu0 %v782_v23 }
 0x2e4   : > { %887 = vrot.lane.b32.xlu1 %v1893_v28, %s1668_s20 }
 0x2e9   : > { %959 = vrot.lane.b32.xlu2 %v1895_v29, %s1669_s21 }
 0x2ed   : > { %862 = vrot.lane.b32.xlu0 %v1895_v29, %s1668_s20 }
 0x2f1   : > { %957 = vrot.lane.b32.xlu2 %v1895_v29, %s1670_s22 }
 0x2f9   : > { %912 = vrot.lane.b32.xlu2 %v1899_v40, %s1668_s20 }
 0x301   : > { %937 = vrot.lane.b32.xlu2 %v1902_v52, %s1668_s20 }
 0x309   : > { %983 = vrot.lane.b32.xlu2 %v1893_v28, %s1669_s21 }
 0x311   : > { %v763_v24 = vpop.xlane.xlu2 %762 }
 0x312   : > { %v785_v46 = vsub.f32 %v676_v63, %v763_v24 }
 0x314   : > { %v793_v25 = vmul.f32 1.442695, %v785_v46 }
 0x316   : > { %1594 = vpow2.f32 %v793_v25 }
 0x31c   : > { %v1962_v27 = vpop.eup %1594 }
 0x31d   : > { %v809_v22 = vsel %vm659_vm11, %v1962_v27, 0.0 }
 0x31e   : > { %810 = vadd.xlane.f32.xlu0 %v809_v22 }
 0x32e   : > { %v769_v30 = vpop.xlane.xlu1 %768 }
 0x32f   : > { %v787_v47 = vsub.f32 %v703_v33, %v769_v30 }
 0x331   : > { %v797_v31 = vmul.f32 1.442695, %v787_v47 }
 0x333   : > { %1596 = vpow2.f32 %v797_v31 }
 0x336   : > { %v766_v34 = vpop.xlane.xlu1 %765 }
 0x337   : > { %v786_v45 = vsub.f32 %v678_v6, %v766_v34 }
 0x339   : > { %v1966_v35 = vpop.eup %1596  ;;  %v795_v36 = vmul.f32 1.442695, %v786_v45 }
 0x33a   : > { %v815_v37 = vsel %vm659_vm11, %v1966_v35, 0.0 }
 0x33b   : > { %1598 = vpow2.f32 %v795_v36  ;;  %816 = vadd.xlane.f32.xlu2 %v815_v37 }
 0x33c   : > { %v775_v39 = vpop.xlane.xlu0 %774 }
 0x33d   : > { %v789_v41 = vsub.f32 %v730_v11, %v775_v39 }
 0x33e   : > { %v781_v54 = vpop.xlane.xlu1 %780 }
 0x33f   : > { %v801_v43 = vmul.f32 1.442695, %v789_v41  ;;  %v791_v42 = vsub.f32 %v1935_v10, %v781_v54 }
 0x341   : > { %v1970_v44 = vpop.eup %1598  ;;  %1600 = vpow2.f32 %v801_v43  ;;  %v805_v61 = vmul.f32 1.442695, %v791_v42 }
 0x342   : > { %v812_v48 = vsel %vm659_vm11, %v1970_v44, 0.0 }
 0x343   : > { %813 = vadd.xlane.f32.xlu2 %v812_v48 }
 0x344   : > { %v778_v49 = vpop.xlane.xlu2 %777  ;;  %v772_v50 = vpop.xlane.xlu0 %771 }
 0x345   : > { %v790_v38 = vsub.f32 %v732_v17, %v778_v49  ;;  %v788_v55 = vsub.f32 %v705_v16, %v772_v50 }
 0x347   : > { %v1974_v56 = vpop.eup %1600  ;;  %v803_v57 = vmul.f32 1.442695, %v790_v38  ;;  %v799_v58 = vmul.f32 1.442695, %v788_v55 }
 0x348   : > { %v821_v60 = vsel %vm659_vm11, %v1974_v56, 0.0 }
 0x349   : > { %1602 = vpow2.f32 %v803_v57  ;;  %822 = vadd.xlane.f32.xlu0 %v821_v60 }
 0x34a   : > { %1604 = vpow2.f32 %v799_v58 }
 0x34b   : > { %1606 = vpow2.f32 %v805_v61 }
 0x34c   : > { %v960_v51 = vpop.permute.xlu2 %959  ;;  %v784_v63 = vpop.xlane.xlu0 %783 }
 0x34d   : > { %v792_v0 = vsub.f32 %v759_v21, %v784_v63  ;;  %v965_v7 = vsel %vm659_vm11, %v960_v51, 0 }
 0x34f   : > { %v1979_v1 = vpop.eup %1602  ;;  %v807_v2 = vmul.f32 1.442695, %v792_v0 }
 0x350   : > { %v1981_v33 = vpop.eup %1604  ;;  %v824_v3 = vsel %vm659_vm11, %v1979_v1, 0.0 }
 0x351   : > { %1608 = vpow2.f32 %v807_v2  ;;  %v818_v59 = vsel %vm659_vm11, %v1981_v33, 0.0  ;;  %825 = vadd.xlane.f32.xlu2 %v824_v3  ;;  %v1989_v6 = vpop.eup %1606 }
 0x352   : > { %819 = vadd.xlane.f32.xlu1 %v818_v59  ;;  %v827_v9 = vsel %vm659_vm11, %v1989_v6, 0.0 }
 0x354   : > { %v1987_v4 = vpop.permute.xlu2 %957 }
 0x356   : > { %v888_v5 = vpop.permute.xlu1 %887 }
 0x357   : > { %v1991_v26 = vpop.eup %1608  ;;  %900 = vmatpush.bf16.msra.mxu3 %v888_v5 }
 0x358   : > { %v830_v8 = vsel %vm659_vm11, %v1991_v26, 0.0 }
 0x359   : > { %831 = vadd.xlane.f32.xlu0 %v830_v8 }
 0x35a   : > { %828 = vadd.xlane.f32.xlu1 %v827_v9 }
 0x35b   : > { %974 = vmatpush.bf16.xpose.msrb.mxu3 %v965_v7 }
 0x35c   : > { %v913_v10 = vpop.permute.xlu2 %912 }
 0x35d   : > { %925 = vmatpush.bf16.msrb.mxu1 %v913_v10 }
 0x35f   : > { %v863_v11 = vpop.permute.xlu0 %862 }
 0x360   : > { %875 = vmatpush.bf16.msra.mxu2 %v863_v11 }
 0x364   : > { %v938_v12 = vpop.permute.xlu2 %937 }
 0x365   : > { %950 = vmatpush.bf16.msrb.mxu2 %v938_v12 }
 0x369   : > { %981 = vrot.lane.b32.xlu2 %v1893_v28, %s1670_s22 }
 0x36c   : > { %v984_v13 = vpop.permute.xlu2 %983 }
 0x36d   : > { %v989_v62 = vsel %vm659_vm11, %v984_v13, 0  ;;  %1005 = vrot.lane.b32.xlu0 %v1899_v40, %s1670_s22 }
 0x36e   : > { %998 = vmatpush.bf16.xpose.msra.mxu1 %v989_v62 }
 0x371   : > { %1031 = vrot.lane.b32.xlu2 %v1902_v52, %s1669_s21 }
 0x373   : > { %1007 = vrot.lane.b32.xlu1 %v1899_v40, %s1669_s21  ;;  %s1672_s21 = smov 16  }
 0x379   : > { %1029 = vrot.lane.b32.xlu2 %v1902_v52, %s1670_s22 }
 0x391   : > { %v811_v14 = vpop.xlane.xlu0 %810 }
 0x392   : > { %1610 = vrcp.f32 %v811_v14 }
 0x398   : > { %v1611_v53 = vpop.eup %1610 }
 0x399   : > { %v841_v17 = vmul.f32 %v1611_v53, %v1962_v27 }
 0x39b   : > { %v849_v32 = vpack.c.bf16 %v841_v17, %v841_v17 }
 0x39d   : > { %v859_v23 = vunpack.c.l.b16 %v849_v32  ;;  %v635_v32 = vld [vmem:[%s2162_s3 + $0x38] sm:$0xff] }
 0x3ae   : > { %v817_v15 = vpop.xlane.xlu2 %816 }
 0x3b6   : > { %v814_v16 = vpop.xlane.xlu2 %813 }
 0x3b7   : > { %1612 = vrcp.f32 %v814_v16  ;;  %v630_v16 = vld [vmem:[%s2162_s3 + $0x10] sm:$0xff] }
 0x3bc   : > { %v823_v18 = vpop.xlane.xlu0 %822 }
 0x3bd   : > { %v1613_v19 = vpop.eup %1612  ;;  %1614 = vrcp.f32 %v823_v18 }
 0x3be   : > { %v842_v20 = vmul.f32 %v1613_v19, %v1970_v44  ;;  %1616 = vrcp.f32 %v817_v15 }
 0x3c0   : > { %v850_v21 = vpack.c.bf16 %v842_v20, %v842_v20 }
 0x3c2   : > { %v860_v24 = vunpack.c.l.b16 %v850_v21  ;;  %v631_v21 = vld [vmem:[%s2162_s3 + $0x18] sm:$0xff] }
 0x3c3   : > { %v1615_v22 = vpop.eup %1614 }
 0x3c4   : > { %v861_v46 = vpack.c.b16 %v860_v24, %v859_v23  ;;  %v826_v25 = vpop.xlane.xlu2 %825  ;;  %v1617_v47 = vpop.eup %1616  ;;  %v845_v27 = vmul.f32 %v1615_v22, %v1974_v56 }
 0x3c5   : > { %1618 = vrcp.f32 %v826_v25  ;;  %v820_v30 = vpop.xlane.xlu1 %819  ;;  %v843_v31 = vmul.f32 %v1617_v47, %v1966_v35  ;;  %v642_v47 = vld [vmem:[%s2162_s3 + $0x70] sm:$0xff] }
 0x3c6   : > { %1620 = vrcp.f32 %v820_v30  ;;  %1480 = vmatmul.msk.bf16.vlgmr.msra.gmra.mxu2 %vm659_vm11, %v861_v46  ;;  %v853_v36 = vpack.c.bf16 %v845_v27, %v845_v27  ;;  %v639_v27 = vld [vmem:[%s2162_s3 + $0x58] sm:$0xff] }
 0x3c7   : > { %v851_v43 = vpack.c.bf16 %v843_v31, %v843_v31 }
 0x3c8   : > { %v909_v54 = vunpack.c.l.b16 %v853_v36 }
 0x3c9   : > { %v884_v55 = vunpack.c.l.b16 %v851_v43 }
 0x3cb   : > { %v1619_v34 = vpop.eup %1618 }
 0x3cc   : > { %v1621_v45 = vpop.eup %1620  ;;  %v846_v37 = vmul.f32 %v1619_v34, %v1979_v1  ;;  %v832_v39 = vpop.xlane.xlu0 %831 }
 0x3cd   : > { %v982_v41 = vpop.permute.xlu2 %981  ;;  %v844_v44 = vmul.f32 %v1621_v45, %v1981_v33  ;;  %1622 = vrcp.f32 %v832_v39  ;;  %v829_v48 = vpop.xlane.xlu1 %828 }
 0x3ce   : > { %v854_v49 = vpack.c.bf16 %v846_v37, %v846_v37  ;;  %1624 = vrcp.f32 %v829_v48  ;;  %v643_v48 = vld [vmem:[%s2162_s3 + $0x78] sm:$0xff] }
 0x3cf   : > { %v852_v50 = vpack.c.bf16 %v844_v44, %v844_v44 }
 0x3d0   : > { %v910_v38 = vunpack.c.l.b16 %v854_v49 }
 0x3d1   : > { %v885_v56 = vunpack.c.l.b16 %v852_v50 }
 0x3d2   : > { %v911_v35 = vpack.c.b16 %v910_v38, %v909_v54 }
 0x3d3   : > { %v1623_v57 = vpop.eup %1622  ;;  %v886_v58 = vpack.c.b16 %v885_v56, %v884_v55 }
 0x3d4   : > { %v1625_v42 = vpop.eup %1624  ;;  %v848_v60 = vmul.f32 %v1623_v57, %v1991_v26  ;;  %1482 = vmatmul.msk.bf16.vlgmr.msrb.gmra.mxu1 %vm659_vm11, %v911_v35 }
 0x3d5   : > { %v1032_v61 = vpop.permute.xlu2 %1031  ;;  %v847_v51 = vmul.f32 %v1625_v42, %v1989_v6  ;;  %1481 = vmatmul.msk.bf16.vlgmr.msra.gmra.mxu3 %vm659_vm11, %v886_v58 }
 0x3d6   : > { %v1037_v63 = vsel %vm659_vm11, %v1032_v61, 0  ;;  %v856_v0 = vpack.c.bf16 %v848_v60, %v848_v60 }
 0x3d7   : > { %1046 = vmatpush.bf16.xpose.msra.mxu3 %v1037_v63  ;;  %v855_v1 = vpack.c.bf16 %v847_v51, %v847_v51 }
 0x3d8   : > { %v935_v2 = vunpack.c.l.b16 %v856_v0 }
 0x3d9   : > { %v934_v33 = vunpack.c.l.b16 %v855_v1 }
 0x3db   : > { %v936_v3 = vpack.c.b16 %v935_v2, %v934_v33 }
 0x3dd   : > { %1483 = vmatmul.msk.bf16.vlgmr.msrb.gmra.mxu2 %vm659_vm11, %v936_v3  ;;  %v1030_v26 = vpop.permute.xlu2 %1029 }
 0x3df   : > { %v1006_v5 = vpop.permute.xlu0 %1005 }
 0x3e4   : > { %1485 = vmatmul.msk.bf16.vlgmr.msra.gmra.mxu1 %vm659_vm11, %v982_v41  ;;  %v638_v41 = vld [vmem:[%s2162_s3 + $0x50] sm:$0xff] }
 0x3e5   : > { %1484 = vmatmul.msk.bf16.vlgmr.msrb.gmra.mxu3 %vm659_vm11, %v1987_v4  ;;  %v1008_v59 = vpop.permute.xlu1 %1007  ;;  %v634_v4 = vld [vmem:[%s2162_s3 + $0x30] sm:$0xff] }
 0x3e6   : > { %v1013_v6 = vsel %vm659_vm11, %v1008_v59, 0 }
 0x3e7   : > { %1022 = vmatpush.bf16.xpose.msra.mxu2 %v1013_v6 }
 0x3ee   : > { %1486 = vmatmul.msk.bf16.vlgmr.msra.gmra.mxu2 %vm659_vm11, %v1006_v5 }
 0x3f5   : > { %1487 = vmatmul.msk.bf16.vlgmr.msra.gmra.mxu3 %vm659_vm11, %v1030_v26 }
 0x449   : > { %v2028_v7 = vpop.f32.mrf.mxu2 }
 0x451   : > { %v2030_v8 = vpop.f32.mrf.mxu1  ;;  %v2032_v9 = vpop.f32.mrf.mxu2 }
 0x458   : > { %v2034_v10 = vpop.f32.mrf.mxu3 }
 0x459   : > { %v2036_v11 = vpop.f32.mrf.mxu1 }
 0x460   : > { %v2041_v12 = vpop.f32.mrf.mxu3  ;;  %v2043_v13 = vpop.f32.mrf.mxu2 }
 0x461   : > { %v1000_v62 = vpop.f32.mrf.mxu1 }
 0x462   : > { %v1001_v14 = vadd.f32 %v1000_v62, %v634_v4 }
 0x464   : > { %v1059_v15 = vsel %vm659_vm11, %v1001_v14, -inf }
 0x465   : > { %1060 = vmax.xlane.f32.xlu2 %v1059_v15 }
 0x468   : > { %v2049_v53 = vpop.f32.mrf.mxu2  ;;  %v976_v17 = vpop.f32.mrf.mxu3 }
 0x469   : > { %v977_v18 = vadd.f32 %v976_v17, %v630_v16  ;;  %v1002_v20 = vpop.f32.mrf.mxu1 }
 0x46a   : > { %v1003_v23 = vadd.f32 %v1002_v20, %v635_v32 }
 0x46b   : > { %v1053_v19 = vsel %vm659_vm11, %v977_v18, -inf }
 0x46c   : > { %1054 = vmax.xlane.f32.xlu1 %v1053_v19  ;;  %v1062_v30 = vsel %vm659_vm11, %v1003_v23, -inf }
 0x470   : > { %v978_v24 = vpop.f32.mrf.mxu3 }
 0x471   : > { %v979_v46 = vadd.f32 %v978_v24, %v631_v21  ;;  %v1024_v25 = vpop.f32.mrf.mxu2 }
 0x472   : > { %v1025_v43 = vadd.f32 %v1024_v25, %v638_v41 }
 0x473   : > { %v1056_v22 = vsel %vm659_vm11, %v979_v46, -inf }
 0x474   : > { %1057 = vmax.xlane.f32.xlu0 %v1056_v22  ;;  %1063 = vmax.xlane.f32.xlu1 %v1062_v30  ;;  %v1065_v44 = vsel %vm659_vm11, %v1025_v43, -inf }
 0x478   : > { %v1048_v31 = vpop.f32.mrf.mxu3 }
 0x479   : > { %v1049_v34 = vadd.f32 %v1048_v31, %v642_v47  ;;  %v1026_v45 = vpop.f32.mrf.mxu2 }
 0x47a   : > { %v1027_v36 = vadd.f32 %v1026_v45, %v639_v27 }
 0x47b   : > { %v1071_v37 = vsel %vm659_vm11, %v1049_v34, -inf }
 0x47c   : > { %1072 = vmax.xlane.f32.xlu1 %v1071_v37  ;;  %v1068_v39 = vsel %vm659_vm11, %v1027_v36, -inf }
 0x47d   : > { %1069 = vmax.xlane.f32.xlu2 %v1068_v39 }
 0x480   : > { %v1050_v49 = vpop.f32.mrf.mxu3 }
 0x481   : > { %v1051_v50 = vadd.f32 %v1050_v49, %v643_v48 }
 0x483   : > { %v1074_v54 = vsel %vm659_vm11, %v1051_v50, -inf }
 0x488   : > { %1154 = vrot.lane.b32.xlu0 %v1895_v29, %s1671_s16 }
 0x4b2   : > { %1066 = vmax.xlane.f32.xlu0 %v1065_v44 }
 0x4ba   : > { %1075 = vmax.xlane.f32.xlu0 %v1074_v54 }
 0x4ce   : > { %1204 = vrot.lane.b32.xlu0 %v1899_v40, %s1671_s16 }
 0x4d8   : > { %v1061_v29 = vpop.xlane.xlu2 %1060 }
 0x4d9   : > { %v1079_v56 = vsub.f32 %v1001_v14, %v1061_v29 }
 0x4db   : > { %v1089_v57 = vmul.f32 1.442695, %v1079_v56 }
 0x4df   : > { %v1055_v38 = vpop.xlane.xlu1 %1054 }
 0x4e0   : > { %v1077_v55 = vsub.f32 %v977_v18, %v1055_v38 }
 0x4e2   : > { %v1085_v35 = vmul.f32 1.442695, %v1077_v55 }
 0x4e4   : > { %1626 = vpow2.f32 %v1085_v35 }
 0x4e5   : > { %1628 = vpow2.f32 %v1089_v57 }
 0x4e7   : > { %v1058_v58 = vpop.xlane.xlu0 %1057  ;;  %v1064_v42 = vpop.xlane.xlu1 %1063 }
 0x4e8   : > { %v1078_v60 = vsub.f32 %v979_v46, %v1058_v58  ;;  %v1080_v63 = vsub.f32 %v1003_v23, %v1064_v42 }
 0x4ea   : > { %v1627_v61 = vpop.eup %1626  ;;  %v1087_v51 = vmul.f32 1.442695, %v1078_v60  ;;  %v1091_v1 = vmul.f32 1.442695, %v1080_v63 }
 0x4eb   : > { %v1101_v0 = vsel %vm659_vm11, %v1627_v61, 0.0  ;;  %v2081_v2 = vpop.eup %1628 }
 0x4ec   : > { %1630 = vpow2.f32 %v1087_v51  ;;  %1102 = vadd.xlane.f32.xlu2 %v1101_v0  ;;  %v1107_v6 = vsel %vm659_vm11, %v2081_v2, 0.0 }
 0x4ed   : > { %1632 = vpow2.f32 %v1091_v1 }
 0x4ef   : > { %v1073_v40 = vpop.xlane.xlu1 %1072 }
 0x4f0   : > { %v1083_v3 = vsub.f32 %v1049_v34, %v1073_v40  ;;  %v1070_v26 = vpop.xlane.xlu2 %1069 }
 0x4f1   : > { %v1082_v62 = vsub.f32 %v1027_v36, %v1070_v26 }
 0x4f2   : > { %v1631_v33 = vpop.eup %1630  ;;  %v1097_v5 = vmul.f32 1.442695, %v1083_v3 }
 0x4f3   : > { %v1104_v59 = vsel %vm659_vm11, %v1631_v33, 0.0  ;;  %v1633_v4 = vpop.eup %1632  ;;  %v1095_v16 = vmul.f32 1.442695, %v1082_v62 }
 0x4f4   : > { %1105 = vadd.xlane.f32.xlu1 %v1104_v59  ;;  %1108 = vadd.xlane.f32.xlu2 %v1107_v6  ;;  %1634 = vpow2.f32 %v1097_v5  ;;  %v1110_v15 = vsel %vm659_vm11, %v1633_v4, 0.0 }
 0x4f5   : > { %1636 = vpow2.f32 %v1095_v16 }
 0x4fa   : > { %v1155_v14 = vpop.permute.xlu0 %1154  ;;  %v2087_v17 = vpop.eup %1634 }
 0x4fb   : > { %1167 = vmatpush.bf16.msrb.mxu0 %v1155_v14  ;;  %v1119_v18 = vsel %vm659_vm11, %v2087_v17, 0.0  ;;  %v1637_v19 = vpop.eup %1636 }
 0x4fc   : > { %1111 = vadd.xlane.f32.xlu1 %v1110_v15  ;;  %v1116_v32 = vsel %vm659_vm11, %v1637_v19, 0.0 }
 0x504   : > { %1120 = vadd.xlane.f32.xlu1 %v1119_v18 }
 0x50c   : > { %1117 = vadd.xlane.f32.xlu1 %v1116_v32 }
 0x525   : > { %v1067_v20 = vpop.xlane.xlu0 %1066  ;;  %1229 = vrot.lane.b32.xlu1 %v1902_v52, %s1671_s16 }
 0x526   : > { %v1081_v21 = vsub.f32 %v1025_v43, %v1067_v20 }
 0x528   : > { %v1093_v23 = vmul.f32 1.442695, %v1081_v21 }
 0x52a   : > { %1638 = vpow2.f32 %v1093_v23 }
 0x52d   : > { %v1076_v24 = vpop.xlane.xlu0 %1075 }
 0x52e   : > { %v1084_v46 = vsub.f32 %v1051_v50, %v1076_v24 }
 0x530   : > { %v1639_v25 = vpop.eup %1638  ;;  %v1099_v22 = vmul.f32 1.442695, %v1084_v46 }
 0x531   : > { %v1113_v30 = vsel %vm659_vm11, %v1639_v25, 0.0 }
 0x532   : > { %1640 = vpow2.f32 %v1099_v22  ;;  %1114 = vadd.xlane.f32.xlu2 %v1113_v30 }
 0x538   : > { %v1641_v47 = vpop.eup %1640 }
 0x539   : > { %v1122_v27 = vsel %vm659_vm11, %v1641_v47, 0.0 }
 0x53a   : > { %1123 = vadd.xlane.f32.xlu0 %v1122_v27 }
 0x540   : > { %v1205_v31 = vpop.permute.xlu0 %1204 }
 0x541   : > { %1217 = vmatpush.bf16.msrb.mxu2 %v1205_v31 }
 0x54a   : > { %1179 = vrot.lane.b32.xlu2 %v1893_v28, %s1671_s16 }
 0x55f   : > { %v1103_v52 = vpop.xlane.xlu2 %1102 }
 0x560   : > { %1642 = vrcp.f32 %v1103_v52  ;;  %v1510_v52 = vld [vmem:[%s2163_s4] sm:$0xff] }
 0x566   : > { %v1643_v45 = vpop.eup %1642 }
 0x567   : > { %v1106_v34 = vpop.xlane.xlu1 %1105  ;;  %v1133_v36 = vmul.f32 %v1643_v45, %v1627_v61  ;;  %v1109_v28 = vpop.xlane.xlu2 %1108 }
 0x568   : > { %1644 = vrcp.f32 %v1106_v34 }
 0x569   : > { %v1141_v39 = vpack.c.bf16 %v1133_v36, %v1133_v36 }
 0x56b   : > { %v1151_v44 = vunpack.c.l.b16 %v1141_v39 }
 0x56e   : > { %v1645_v37 = vpop.eup %1644 }
 0x56f   : > { %v1134_v41 = vmul.f32 %v1645_v37, %v1631_v33  ;;  %v1112_v50 = vpop.xlane.xlu1 %1111 }
 0x570   : > { %1646 = vrcp.f32 %v1112_v50 }
 0x571   : > { %v1142_v43 = vpack.c.bf16 %v1134_v41, %v1134_v41  ;;  %1648 = vrcp.f32 %v1109_v28 }
 0x573   : > { %v1152_v48 = vunpack.c.l.b16 %v1142_v43 }
 0x575   : > { %v1153_v49 = vpack.c.b16 %v1152_v48, %v1151_v44 }
 0x576   : > { %v1647_v55 = vpop.eup %1646 }
 0x577   : > { %1488 = vmatmul.msk.bf16.vlgmr.msrb.gmra.mxu0 %vm659_vm11, %v1153_v49  ;;  %v1121_v54 = vpop.xlane.xlu1 %1120  ;;  %v1649_v56 = vpop.eup %1648  ;;  %v1136_v35 = vmul.f32 %v1647_v55, %v1633_v4 }
 0x578   : > { %v1135_v57 = vmul.f32 %v1649_v56, %v2081_v2 }
 0x579   : > { %v1144_v60 = vpack.c.bf16 %v1136_v35, %v1136_v35 }
 0x57a   : > { %v1143_v61 = vpack.c.bf16 %v1135_v57, %v1135_v57 }
 0x57b   : > { %v1177_v63 = vunpack.c.l.b16 %v1144_v60 }
 0x57c   : > { %v1176_v1 = vunpack.c.l.b16 %v1143_v61 }
 0x57e   : > { %v1178_v5 = vpack.c.b16 %v1177_v63, %v1176_v1 }
 0x57f   : > { %v1118_v29 = vpop.xlane.xlu1 %1117 }
 0x580   : > { %1650 = vrcp.f32 %v1118_v29 }
 0x586   : > { %v1651_v42 = vpop.eup %1650 }
 0x587   : > { %v1138_v51 = vmul.f32 %v1651_v42, %v1637_v19 }
 0x589   : > { %v1146_v40 = vpack.c.bf16 %v1138_v51, %v1138_v51 }
 0x58b   : > { %v1202_v4 = vunpack.c.l.b16 %v1146_v40 }
 0x597   : > { %v1230_v38 = vpop.permute.xlu1 %1229 }
 0x598   : > { %1242 = vmatpush.bf16.msrb.mxu3 %v1230_v38 }
 0x5a5   : > { %v1115_v58 = vpop.xlane.xlu2 %1114 }
 0x5a6   : > { %1652 = vrcp.f32 %v1115_v58 }
 0x5a7   : > { %1654 = vrcp.f32 %v1121_v54 }
 0x5ac   : > { %v1653_v0 = vpop.eup %1652 }
 0x5ad   : > { %v1137_v33 = vmul.f32 %v1653_v0, %v1639_v25  ;;  %v1124_v3 = vpop.xlane.xlu0 %1123  ;;  %v1180_v59 = vpop.permute.xlu2 %1179 }
 0x5ae   : > { %v1655_v6 = vpop.eup %1654  ;;  %1656 = vrcp.f32 %v1124_v3  ;;  %1192 = vmatpush.bf16.msrb.mxu1 %v1180_v59 }
 0x5af   : > { %v1145_v26 = vpack.c.bf16 %v1137_v33, %v1137_v33  ;;  %v1139_v2 = vmul.f32 %v1655_v6, %v2087_v17 }
 0x5b1   : > { %v1201_v62 = vunpack.c.l.b16 %v1145_v26  ;;  %1489 = vmatmul.msk.bf16.vlgmr.msrb.gmra.mxu1 %vm659_vm11, %v1178_v5  ;;  %v1147_v16 = vpack.c.bf16 %v1139_v2, %v1139_v2 }
 0x5b3   : > { %v1203_v14 = vpack.c.b16 %v1202_v4, %v1201_v62  ;;  %v1226_v32 = vunpack.c.l.b16 %v1147_v16 }
 0x5b4   : > { %v1657_v15 = vpop.eup %1656 }
 0x5b5   : > { %v1140_v18 = vmul.f32 %v1657_v15, %v1641_v47  ;;  %1490 = vmatmul.msk.bf16.vlgmr.msrb.gmra.mxu2 %vm659_vm11, %v1203_v14  ;;  %v1511_v47 = vld [vmem:[%s2163_s4 + $0x8] sm:$0xff]  ;;  %v1575_v14 = vld [vmem:[%s2164_s5] ss:$0 sm:$0xff] }
 0x5b6   : > { %1355 = vmatpush.bf16.msra.mxu0 %v1511_v47 }
 0x5b7   : > { %v1148_v19 = vpack.c.bf16 %v1140_v18, %v1140_v18 }
 0x5b9   : > { %v1227_v20 = vunpack.c.l.b16 %v1148_v19 }
 0x5ba   : > { %1356 = vmatpush.bf16.msra.mxu0 %v1510_v52 }
 0x5bb   : > { %v1228_v21 = vpack.c.b16 %v1227_v20, %v1226_v32 }
 0x5bd   : > { %1491 = vmatmul.msk.bf16.vlgmr.msrb.gmra.mxu3 %vm659_vm11, %v1228_v21 }
 0x5f4   : > { %v1169_v23 = vpop.f32.mrf.mxu0 }
 0x5fc   : > { %v1171_v24 = vpop.f32.mrf.mxu0 }
 0x5fd   : > { %v1552_v46 = vpack.i.bf16 %v1171_v24, %v1169_v23 }
 0x5ff   : > { %1553 = vrot.lane.b32.xlu2 %v1552_v46, %s1672_s21 }
 0x62e   : > { %v1194_v17 = vpop.f32.mrf.mxu1 }
 0x636   : > { %v1196_v25 = vpop.f32.mrf.mxu1 }
 0x637   : > { %v1557_v22 = vpack.i.bf16 %v1196_v25, %v1194_v17 }
 0x638   : > { %v1219_v30 = vpop.f32.mrf.mxu2 }
 0x639   : > { %1558 = vrot.lane.b32.xlu2 %v1557_v22, %s1672_s21 }
 0x640   : > { %v1221_v27 = vpop.f32.mrf.mxu2  ;;  %v1244_v31 = vpop.f32.mrf.mxu3 }
 0x641   : > { %v1562_v34 = vpack.i.bf16 %v1221_v27, %v1219_v30 }
 0x643   : > { %1563 = vrot.lane.b32.xlu1 %v1562_v34, %s1672_s21 }
 0x648   : > { %v1246_v45 = vpop.f32.mrf.mxu3 }
 0x649   : > { %v1567_v36 = vpack.i.bf16 %v1246_v45, %v1244_v31 }
 0x64b   : > { %1568 = vrot.lane.b32.xlu2 %v1567_v36, %s1672_s21 }
 0x659   : > { %v1554_v37 = vpop.permute.xlu2 %1553 }
 0x65a   : > { %v1556_v39 = vunpack.i.h.bf16 %v1554_v37  ;;  %v1555_v41 = vunpack.i.l.bf16 %v1554_v37 }
 0x65c   : > { %v1282_v43 = vsel %vm659_vm11, %v2032_v9, %v1556_v39  ;;  %v1281_v44 = vsel %vm659_vm11, %v2028_v7, %v1555_v41 }
 0x65d   : > { %v1290_v48 = vpack.c.bf16 %v1282_v43, %v1282_v43  ;;  %v1289_v49 = vpack.c.bf16 %v1281_v44, %v1281_v44 }
 0x65f   : > { %v1314_v50 = vunpack.c.l.b16 %v1290_v48  ;;  %v1313_v54 = vunpack.c.l.b16 %v1289_v49 }
 0x661   : > { %v1321_v29 = vpack.c.b16 %v1314_v50, %v1313_v54 }
 0x663   : > { %1500 = vmatmul.msk.bf16.vlgmr.msra.gmra.mxu0 %vm331_vm0, %v1321_v29 }
 0x693   : > { %v1559_v38 = vpop.permute.xlu2 %1558 }
 0x694   : > { %v1561_v28 = vunpack.i.h.bf16 %v1559_v38  ;;  %v1560_v55 = vunpack.i.l.bf16 %v1559_v38 }
 0x696   : > { %v1284_v56 = vsel %vm659_vm11, %v2041_v12, %v1561_v28  ;;  %v1283_v35 = vsel %vm659_vm11, %v2034_v10, %v1560_v55 }
 0x697   : > { %v1291_v9 = vpack.c.bf16 %v1283_v35, %v1283_v35  ;;  %v1292_v57 = vpack.c.bf16 %v1284_v56, %v1284_v56 }
 0x699   : > { %v1315_v58 = vunpack.c.l.b16 %v1291_v9  ;;  %v1316_v7 = vunpack.c.l.b16 %v1292_v57 }
 0x69b   : > { %v1322_v42 = vpack.c.b16 %v1316_v7, %v1315_v58 }
 0x69d   : > { %1501 = vmatmul.msk.bf16.gmra.mxu0 %vm331_vm0, %v1322_v42 }
 0x6a5   : > { %v1569_v40 = vpop.permute.xlu2 %1568 }
 0x6a6   : > { %v1571_v59 = vunpack.i.h.bf16 %v1569_v40  ;;  %v1570_v6 = vunpack.i.l.bf16 %v1569_v40 }
 0x6a8   : > { %v1288_v5 = vsel %vm659_vm11, %v2049_v53, %v1571_v59 }
 0x6a9   : > { %v1296_v26 = vpack.c.bf16 %v1288_v5, %v1288_v5 }
 0x6b5   : > { %v1564_v60 = vpop.permute.xlu1 %1563 }
 0x6b6   : > { %v1566_v61 = vunpack.i.h.bf16 %v1564_v60  ;;  %v1565_v51 = vunpack.i.l.bf16 %v1564_v60 }
 0x6b8   : > { %v1286_v63 = vsel %vm659_vm11, %v2036_v11, %v1566_v61  ;;  %v1285_v0 = vsel %vm659_vm11, %v2030_v8, %v1565_v51  ;;  %v1287_v11 = vsel %vm659_vm11, %v2043_v13, %v1570_v6  ;;  %v1320_v8 = vunpack.c.l.b16 %v1296_v26 }
 0x6b9   : > { %v1294_v12 = vpack.c.bf16 %v1286_v63, %v1286_v63  ;;  %v1293_v1 = vpack.c.bf16 %v1285_v0, %v1285_v0  ;;  %v1295_v2 = vpack.c.bf16 %v1287_v11, %v1287_v11 }
 0x6bb   : > { %v1318_v10 = vunpack.c.l.b16 %v1294_v12  ;;  %v1317_v33 = vunpack.c.l.b16 %v1293_v1  ;;  %v1319_v4 = vunpack.c.l.b16 %v1295_v2 }
 0x6bd   : > { %v1323_v3 = vpack.c.b16 %v1318_v10, %v1317_v33  ;;  %v1324_v62 = vpack.c.b16 %v1320_v8, %v1319_v4 }
 0x6bf   : > { %1502 = vmatmul.msk.bf16.gmra.mxu0 %vm331_vm0, %v1323_v3 }
 0x6cf   : > { %1503 = vmatmul.msk.bf16.gmra.mxu0 %vm331_vm0, %v1324_v62 }
 0x6e0   : > { %v1358_v15 = vpop.f32.mrf.mxu0 }
 0x6e1   : > { %v1359_v16 = vadd.f32 %v1575_v14, %v1358_v15 }
 0x6e3   : > { %v1378_v13 = vpack.c.bf16 %v1359_v16, %v1359_v16 }
 0x6e5   : > { %1387 = vst.msk [vmem:[%s2138_s11] sm:$0xf] %vm1386_vm12, %v1378_v13 }
 0x6e8   : > { %v1360_v53 = vpop.f32.mrf.mxu0 }
 0x6e9   : > { %v1361_v18 = vadd.f32 %v1575_v14, %v1360_v53 }
 0x6eb   : > { %v1379_v19 = vpack.c.bf16 %v1361_v18, %v1361_v18 }
 0x6ed   : > { %1388 = vst.msk [vmem:[%s2138_s11 + $0x4] sm:$0xf] %vm1386_vm12, %v1379_v19 }
 0x71a   : > { %v1363_v32 = vpop.f32.mrf.mxu0 }
 0x71b   : > { %v1364_v20 = vadd.f32 %v1575_v14, %v1363_v32 }
 0x71d   : > { %v1380_v21 = vpack.c.bf16 %v1364_v20, %v1364_v20 }
 0x71f   : > { %1389 = vst.msk [vmem:[%s2138_s11 + $0x8] sm:$0xf] %vm1386_vm12, %v1380_v21 }
 0x722   : > { %v1365_v23 = vpop.f32.mrf.mxu0 }
 0x723   : > { %v1366_v24 = vadd.f32 %v1575_v14, %v1365_v23 }
 0x725   : > { %v1381_v46 = vpack.c.bf16 %v1366_v24, %v1366_v24 }
 0x727   : > { %1390 = vst.msk [vmem:[%s2138_s11 + $0xc] sm:$0xf] %vm1386_vm12, %v1381_v46 }
 0x73c   : > { %v1368_v17 = vpop.f32.mrf.mxu0 }
 0x73d   : > { %v1369_v25 = vadd.f32 %v1575_v14, %v1368_v17 }
 0x73f   : > { %v1382_v22 = vpack.c.bf16 %v1369_v25, %v1369_v25 }
 0x741   : > { %1391 = vst.msk [vmem:[%s2138_s11 + $0x10] sm:$0xf] %vm1386_vm12, %v1382_v22 }
 0x744   : > { %v1370_v30 = vpop.f32.mrf.mxu0 }
 0x745   : > { %v1371_v47 = vadd.f32 %v1575_v14, %v1370_v30 }
 0x747   : > { %v1383_v27 = vpack.c.bf16 %v1371_v47, %v1371_v47 }
 0x749   : > { %1392 = vst.msk [vmem:[%s2138_s11 + $0x14] sm:$0xf] %vm1386_vm12, %v1383_v27 }
 0x74c   : > { %v1373_v31 = vpop.f32.mrf.mxu0 }
 0x74d   : > { %v1374_v52 = vadd.f32 %v1575_v14, %v1373_v31 }
 0x74f   : > { %v1384_v34 = vpack.c.bf16 %v1374_v52, %v1374_v52 }
 0x751   : > { %1393 = vst.msk [vmem:[%s2138_s11 + $0x18] sm:$0xf] %vm1386_vm12, %v1384_v34 }
 0x754   : > { %v1375_v45 = vpop.f32.mrf.mxu0 }
 0x755   : > { %v1376_v36 = vadd.f32 %v1575_v14, %v1375_v45 }
 0x757   : > { %v1385_v37 = vpack.c.bf16 %v1376_v36, %v1376_v36 }
 0x759   : > { %1394 = vst.msk [vmem:[%s2138_s11 + $0x1c] sm:$0xf] %vm1386_vm12, %v1385_v37 }
 0x75a PF: > { %s18_s27 = sadd.s32 1, %s1664_s27  }
 0x75b   : > { %p15_p4 = scmp.ge.s32.totalorder %s18_s27, 4  }
 0x75d   :  { %17 = sbr.rel (!%p15_p4) target bundleno = 1 (0x1), region = 82 }

// kernel: _lambda_.25
= control target key start
LH: loop header
LB: loop body
LE: loop exit
PB: predicated region body
PF: predicated region fallthrough
CT: control target
= control target key end

     0   :  { %s561_s15 = smov 0   ;;  %s629_s0 = inlined_call_operand.vmem [shape: bf16[128,128], index: 0, kind: input, shape index: {}]   ;;  %s630_s1 = inlined_call_operand.vmem [shape: bf16[128,32], index: 1, kind: input, shape index: {}]   ;;  %s631_s2 = inlined_call_operand.vmem [shape: f32[1,32], index: 2, kind: input, shape index: {}]   ;;  %s632_s3 = inlined_call_operand.vmem [shape: f32[1,32], index: 3, kind: input, shape index: {}]   ;;  %s633_s4 = inlined_call_operand.vmem [shape: bf16[128,32], index: 4, kind: output, shape index: {}]  }
   0x1 LB: > { %s423_s16 = sadd.s32 4294967295, %s534_s15   ;;  %p427_p0 = scmp.ge.s32.totalorder %s534_s15, 1  ;;  %s534_s15 = sphi %s561_s15, %s14_s15  }
   0x2   : > { %p163_p1 = scmp.lt.s32.totalorder %s534_s15, 3 }
   0x4   : > { %p164_p2 = pnand %p427_p0, %p163_p1 }
   0x5   : > { %s428_s25 = sshll.u32 (!%p164_p2), %s423_s16, 3 }
   0x6   : > { %167 = sbr.rel (%p164_p2) target bundleno = 192 (0xc0), region = 36  ;;  %p190_p3 = scmp.lt.s32.totalorder (!%p164_p2), %s428_s25, 15 }
   0xb   : > { %v493_v0 = vld [vmem:[%s630_s1 + $0x38] sm:$0xff]  ;;  %v492_v1 = vld [vmem:[%s630_s1 + $0x30] sm:$0xff]  ;;  %v491_v2 = vld [vmem:[%s630_s1 + $0x28] sm:$0xff]  ;;  %s635_s25 = smov (!%p190_p3, %s428_s25), 15  ;;  %vm358_vm0 = vcmask 257024  }
   0xc   : > { %297 = vmatpush.bf16.msra.mxu0 %v493_v0  ;;  %494 = vmatpush.bf16.msra.mxu1 %v493_v0  ;;  %v490_v3 = vld [vmem:[%s630_s1 + $0x20] sm:$0xff]  ;;  %v489_v4 = vld [vmem:[%s630_s1 + $0x18] sm:$0xff]  ;;  %v488_v5 = vld [vmem:[%s630_s1 + $0x10] sm:$0xff]  ;;  %s429_s6 = sshll.u32 %s635_s25, 2 }
   0xd   : > { %495 = vmatpush.bf16.msra.mxu2 %v493_v0  ;;  %496 = vmatpush.bf16.msra.mxu3 %v493_v0  ;;  %v487_v6 = vld [vmem:[%s630_s1 + $0x8] sm:$0xff]  ;;  %v486_v7 = vld [vmem:[%s630_s1] sm:$0xff]  ;;  %s193_s11 = scalar_lea.vmem %s629_s0, %s429_s6  ;;  %s608_s19 = scalar_lea.vmem %s633_s4, %s429_s6 }
   0xe   : > { %v482_v8 = vld [vmem:[%s193_s11] sm:$0xff]  ;;  %v483_v9 = vld [vmem:[%s193_s11 + $0x8] sm:$0xff]  ;;  %v484_v10 = vld [vmem:[%s193_s11 + $0x10] sm:$0xff] }
   0xf   : > { %v485_v11 = vld [vmem:[%s193_s11 + $0x18] sm:$0xff]  ;;  %v526_v12 = vld [vmem:[%s631_s2] ss:$0 sm:$0xff] }
  0x10   : > { %298 = vmatpush.bf16.msra.mxu0 %v492_v1  ;;  %497 = vmatpush.bf16.msra.mxu1 %v492_v1  ;;  %v527_v13 = vld [vmem:[%s632_s3] ss:$0 sm:$0xff] }
  0x11   : > { %498 = vmatpush.bf16.msra.mxu2 %v492_v1  ;;  %499 = vmatpush.bf16.msra.mxu3 %v492_v1 }
  0x14   : > { %299 = vmatpush.bf16.msra.mxu0 %v491_v2  ;;  %500 = vmatpush.bf16.msra.mxu1 %v491_v2 }
  0x15   : > { %501 = vmatpush.bf16.msra.mxu2 %v491_v2  ;;  %502 = vmatpush.bf16.msra.mxu3 %v491_v2 }
  0x18   : > { %300 = vmatpush.bf16.msra.mxu0 %v490_v3  ;;  %503 = vmatpush.bf16.msra.mxu1 %v490_v3 }
  0x19   : > { %504 = vmatpush.bf16.msra.mxu2 %v490_v3  ;;  %505 = vmatpush.bf16.msra.mxu3 %v490_v3 }
  0x1c   : > { %301 = vmatpush.bf16.msra.mxu0 %v489_v4  ;;  %506 = vmatpush.bf16.msra.mxu1 %v489_v4 }
  0x1d   : > { %507 = vmatpush.bf16.msra.mxu2 %v489_v4  ;;  %508 = vmatpush.bf16.msra.mxu3 %v489_v4 }
  0x20   : > { %302 = vmatpush.bf16.msra.mxu0 %v488_v5  ;;  %509 = vmatpush.bf16.msra.mxu1 %v488_v5 }
  0x21   : > { %510 = vmatpush.bf16.msra.mxu2 %v488_v5  ;;  %511 = vmatpush.bf16.msra.mxu3 %v488_v5 }
  0x24   : > { %303 = vmatpush.bf16.msra.mxu0 %v487_v6  ;;  %512 = vmatpush.bf16.msra.mxu1 %v487_v6 }
  0x25   : > { %513 = vmatpush.bf16.msra.mxu2 %v487_v6  ;;  %514 = vmatpush.bf16.msra.mxu3 %v487_v6 }
  0x28   : > { %304 = vmatpush.bf16.msra.mxu0 %v486_v7  ;;  %515 = vmatpush.bf16.msra.mxu1 %v486_v7 }
  0x29   : > { %516 = vmatpush.bf16.msra.mxu2 %v486_v7  ;;  %517 = vmatpush.bf16.msra.mxu3 %v486_v7 }
  0x2b   : > { %305 = vmatmul.bf16.vlgmr.msra.gmra.mxu0 %v482_v8  ;;  %310 = vmatmul.bf16.vlgmr.msra.gmra.mxu1 %v483_v9 }
  0x2c   : > { %315 = vmatmul.bf16.vlgmr.msra.gmra.mxu2 %v484_v10  ;;  %320 = vmatmul.bf16.vlgmr.msra.gmra.mxu3 %v485_v11 }
  0xa8   : > { %v306_v14 = vpop.f32.mrf.mxu0  ;;  %v311_v15 = vpop.f32.mrf.mxu1 }
  0xa9   : > { %v330_v16 = vmul.f32 %v526_v12, %v306_v14  ;;  %v332_v17 = vmul.f32 %v526_v12, %v311_v15 }
  0xab   : > { %v342_v18 = vadd.f32 %v527_v13, %v330_v16  ;;  %v344_v19 = vadd.f32 %v527_v13, %v332_v17 }
  0xad   : > { %v350_v20 = vpack.c.bf16 %v342_v18, %v342_v18  ;;  %v352_v21 = vpack.c.bf16 %v344_v19, %v344_v19 }
  0xaf   : > { %359 = vst.msk [vmem:[%s608_s19] sm:$0xf] %vm358_vm0, %v350_v20  ;;  %v316_v22 = vpop.f32.mrf.mxu2  ;;  %v321_v23 = vpop.f32.mrf.mxu3 }
  0xb0   : > { %361 = vst.msk [vmem:[%s608_s19 + $0x8] sm:$0xf] %vm358_vm0, %v352_v21  ;;  %v334_v24 = vmul.f32 %v526_v12, %v316_v22  ;;  %v336_v25 = vmul.f32 %v526_v12, %v321_v23  ;;  %v308_v26 = vpop.f32.mrf.mxu0  ;;  %v313_v27 = vpop.f32.mrf.mxu1 }
  0xb1   : > { %v331_v28 = vmul.f32 %v526_v12, %v308_v26  ;;  %v333_v29 = vmul.f32 %v526_v12, %v313_v27 }
  0xb2   : > { %v346_v30 = vadd.f32 %v527_v13, %v334_v24  ;;  %v348_v31 = vadd.f32 %v527_v13, %v336_v25 }
  0xb3   : > { %v343_v32 = vadd.f32 %v527_v13, %v331_v28  ;;  %v345_v33 = vadd.f32 %v527_v13, %v333_v29 }
  0xb4   : > { %v354_v34 = vpack.c.bf16 %v346_v30, %v346_v30  ;;  %v356_v35 = vpack.c.bf16 %v348_v31, %v348_v31 }
  0xb5   : > { %v351_v36 = vpack.c.bf16 %v343_v32, %v343_v32  ;;  %v353_v37 = vpack.c.bf16 %v345_v33, %v345_v33 }
  0xb6   : > { %363 = vst.msk [vmem:[%s608_s19 + $0x10] sm:$0xf] %vm358_vm0, %v354_v34 }
  0xb7   : > { %365 = vst.msk [vmem:[%s608_s19 + $0x18] sm:$0xf] %vm358_vm0, %v356_v35  ;;  %v318_v38 = vpop.f32.mrf.mxu2  ;;  %v323_v39 = vpop.f32.mrf.mxu3 }
  0xb8   : > { %360 = vst.msk [vmem:[%s608_s19 + $0x4] sm:$0xf] %vm358_vm0, %v351_v36  ;;  %v335_v40 = vmul.f32 %v526_v12, %v318_v38  ;;  %v337_v41 = vmul.f32 %v526_v12, %v323_v39 }
  0xb9   : > { %362 = vst.msk [vmem:[%s608_s19 + $0xc] sm:$0xf] %vm358_vm0, %v353_v37 }
  0xba   : > { %v347_v42 = vadd.f32 %v527_v13, %v335_v40  ;;  %v349_v43 = vadd.f32 %v527_v13, %v337_v41 }
  0xbc   : > { %v355_v44 = vpack.c.bf16 %v347_v42, %v347_v42  ;;  %v357_v45 = vpack.c.bf16 %v349_v43, %v349_v43 }
  0xbe   : > { %364 = vst.msk [vmem:[%s608_s19 + $0x14] sm:$0xf] %vm358_vm0, %v355_v44 }
  0xbf   : > { %366 = vst.msk [vmem:[%s608_s19 + $0x1c] sm:$0xf] %vm358_vm0, %v357_v45 }
  0xc0 PF: > { %s14_s15 = sadd.s32 1, %s534_s15  }
  0xc1   : > { %p11_p4 = scmp.ge.s32.totalorder %s14_s15, 4  }
  0xc3   :  { %13 = sbr.rel (!%p11_p4) target bundleno = 1 (0x1), region = 66 }

// kernel: _lambda_.24
= control target key start
LH: loop header
LB: loop body
LE: loop exit
PB: predicated region body
PF: predicated region fallthrough
CT: control target
= control target key end

     0   :  { %s1161_s21 = smov 0   ;;  %s1658_s0 = inlined_call_operand.vmem [shape: bf16[128,32], index: 0, kind: input, shape index: {}]   ;;  %s1659_s1 = inlined_call_operand.vmem [shape: bf16[32,128], index: 1, kind: input, shape index: {}]   ;;  %s1660_s2 = inlined_call_operand.vmem [shape: f32[1,128], index: 2, kind: input, shape index: {}]   ;;  %s1661_s3 = inlined_call_operand.vmem [shape: f32[1,128], index: 3, kind: input, shape index: {}]   ;;  %s1662_s4 = inlined_call_operand.vmem [shape: f32[1,32], index: 4, kind: input, shape index: {}]   ;;  %s1663_s5 = inlined_call_operand.vmem [shape: f32[1,32], index: 5, kind: input, shape index: {}]   ;;  %s1664_s6 = inlined_call_operand.vmem [shape: bf16[128,128], index: 6, kind: output, shape index: {}]  }
   0x1 LB: > { %s989_s22 = sadd.s32 4294967295, %s1123_s21   ;;  %p993_p0 = scmp.ge.s32.totalorder %s1123_s21, 1  ;;  %s1123_s21 = sphi %s1161_s21, %s16_s21  }
   0x2   : > { %p213_p1 = scmp.lt.s32.totalorder %s1123_s21, 3 }
   0x4   : > { %p214_p2 = pnand %p993_p0, %p213_p1 }
   0x5   : > { %s994_s23 = sshll.u32 (!%p214_p2), %s989_s22, 3 }
   0x6   : > { %217 = sbr.rel (%p214_p2) target bundleno = 540 (0x21c), region = 44  ;;  %p244_p3 = scmp.lt.s32.totalorder (!%p214_p2), %s994_s23, 15 }
   0xb   : > { %s1684_s23 = smov (!%p244_p3, %s994_s23), 15  ;;  %vm272_vm0 = vcmask 261120   ;;  %v1125_v20 = vmov 32.0  }
   0xc   : > { %s995_s24 = sshll.u32 %s1684_s23, 2  ;;  %1083 = vrcp.f32 %v1125_v20 }
   0xd   : > { %s247_s27 = scalar_lea.vmem %s1658_s0, %s995_s24  ;;  %s1614_s18 = scalar_lea.vmem %s1664_s6, %s995_s24 }
   0xe   : > { %v1060_v0 = vld [vmem:[%s247_s27 + $0x18] sm:$0xff]   ;;  %v1059_v1 = vld [vmem:[%s247_s27 + $0x10] sm:$0xff]   ;;  %v1023_v2 = vld [vmem:[%s247_s27] sm:$0xff]  }
   0xf   : > { %v1036_v3 = vunpack.c.l.bf16 %v1060_v0  ;;  %v1032_v4 = vunpack.c.l.bf16 %v1059_v1  ;;  %v1024_v5 = vunpack.c.l.bf16 %v1023_v2  ;;  %v1037_v9 = vunpack.c.h.bf16 %v1060_v0  ;;  %v1058_v15 = vld [vmem:[%s247_s27 + $0x8] sm:$0xff]  }
  0x10   : > { %v1033_v10 = vunpack.c.h.bf16 %v1059_v1  ;;  %v1025_v11 = vunpack.c.h.bf16 %v1023_v2  ;;  %v1028_v16 = vunpack.c.l.bf16 %v1058_v15  ;;  %v1029_v17 = vunpack.c.h.bf16 %v1058_v15 }
  0x11   : > { %v291_v6 = vsel %vm272_vm0, %v1036_v3, 0.0  ;;  %v285_v7 = vsel %vm272_vm0, %v1032_v4, 0.0  ;;  %v273_v8 = vsel %vm272_vm0, %v1024_v5, 0.0  ;;  %v294_v12 = vsel %vm272_vm0, %v1037_v9, 0.0 }
  0x12   : > { %292 = vadd.xlane.f32.xlu1 %v291_v6  ;;  %286 = vadd.xlane.f32.xlu0 %v285_v7  ;;  %v288_v13 = vsel %vm272_vm0, %v1033_v10, 0.0  ;;  %v276_v14 = vsel %vm272_vm0, %v1025_v11, 0.0  ;;  %v279_v18 = vsel %vm272_vm0, %v1028_v16, 0.0  ;;  %v282_v19 = vsel %vm272_vm0, %v1029_v17, 0.0  ;;  %v1084_v21 = vpop.eup %1083  ;;  %v1021_v7 = vld [vmem:[%s1659_s1 + $0x8] sm:$0xff] }
  0x13   : > { %274 = vadd.xlane.f32.xlu2 %v273_v8  ;;  %v298_v22 = vmul.f32 32.0, %v1084_v21  ;;  %vm302_vm1 = vweird.f32 %v1084_v21  ;;  %1065 = vmatpush.bf16.msra.mxu2 %v1021_v7 }
  0x14   : > { %1066 = vmatpush.bf16.msra.mxu3 %v1021_v7  ;;  %518 = vmatpush.bf16.msra.mxu0 %v1021_v7 }
  0x15   : > { %v299_v23 = vsub.f32 1.0, %v298_v22  ;;  %1064 = vmatpush.bf16.msra.mxu1 %v1021_v7 }
  0x17   : > { %v300_v24 = vmul.f32 %v1084_v21, %v299_v23 }
  0x19   : > { %v301_v25 = vadd.f32 %v1084_v21, %v300_v24 }
  0x1a   : > { %295 = vadd.xlane.f32.xlu1 %v294_v12  ;;  %289 = vadd.xlane.f32.xlu0 %v288_v13 }
  0x1b   : > { %277 = vadd.xlane.f32.xlu2 %v276_v14  ;;  %v1185_v26 = vsel %vm302_vm1, %v1084_v21, %v301_v25 }
  0x22   : > { %280 = vadd.xlane.f32.xlu0 %v279_v18  ;;  %283 = vadd.xlane.f32.xlu1 %v282_v19 }
  0x85   : > { %v293_v27 = vpop.xlane.xlu1 %292  ;;  %v287_v28 = vpop.xlane.xlu0 %286 }
  0x86   : > { %v310_v29 = vmul.f32 %v1185_v26, %v293_v27  ;;  %v308_v30 = vmul.f32 %v1185_v26, %v287_v28  ;;  %v275_v31 = vpop.xlane.xlu2 %274 }
  0x87   : > { %v304_v40 = vmul.f32 %v1185_v26, %v275_v31 }
  0x88   : > { %v1189_v32 = vsub.f32 %v1036_v3, %v310_v29  ;;  %v1191_v33 = vsub.f32 %v1032_v4, %v308_v30 }
  0x89   : > { %v1209_v48 = vsub.f32 %v1024_v5, %v304_v40 }
  0x8a   : > { %v326_v34 = vmul.f32 %v1189_v32, %v1189_v32  ;;  %v324_v35 = vmul.f32 %v1191_v33, %v1191_v33 }
  0x8b   : > { %v320_v59 = vmul.f32 %v1209_v48, %v1209_v48 }
  0x8c   : > { %v346_v36 = vsel %vm272_vm0, %v326_v34, 0.0  ;;  %v340_v37 = vsel %vm272_vm0, %v324_v35, 0.0 }
  0x8d   : > { %v296_v38 = vpop.xlane.xlu1 %295  ;;  %v290_v39 = vpop.xlane.xlu0 %289  ;;  %347 = vadd.xlane.f32.xlu1 %v346_v36  ;;  %341 = vadd.xlane.f32.xlu2 %v340_v37  ;;  %v328_v63 = vsel %vm272_vm0, %v320_v59, 0.0 }
  0x8e   : > { %v311_v41 = vmul.f32 %v1185_v26, %v296_v38  ;;  %v309_v42 = vmul.f32 %v1185_v26, %v290_v39  ;;  %v278_v43 = vpop.xlane.xlu2 %277 }
  0x8f   : > { %v305_v44 = vmul.f32 %v1185_v26, %v278_v43 }
  0x90   : > { %v1203_v45 = vsub.f32 %v1037_v9, %v311_v41  ;;  %v1205_v46 = vsub.f32 %v1033_v10, %v309_v42  ;;  %v1020_v10 = vld [vmem:[%s1659_s1] sm:$0xff] }
  0x91   : > { %v1207_v47 = vsub.f32 %v1025_v11, %v305_v44  ;;  %1068 = vmatpush.bf16.msra.mxu2 %v1020_v10  ;;  %1069 = vmatpush.bf16.msra.mxu3 %v1020_v10 }
  0x92   : > { %v325_v49 = vmul.f32 %v1205_v46, %v1205_v46  ;;  %v327_v50 = vmul.f32 %v1203_v45, %v1203_v45  ;;  %519 = vmatpush.bf16.msra.mxu0 %v1020_v10  ;;  %1067 = vmatpush.bf16.msra.mxu1 %v1020_v10 }
  0x93   : > { %v321_v51 = vmul.f32 %v1207_v47, %v1207_v47 }
  0x94   : > { %v343_v52 = vsel %vm272_vm0, %v325_v49, 0.0  ;;  %v349_v53 = vsel %vm272_vm0, %v327_v50, 0.0 }
  0x95   : > { %344 = vadd.xlane.f32.xlu0 %v343_v52  ;;  %v281_v54 = vpop.xlane.xlu0 %280  ;;  %350 = vadd.xlane.f32.xlu2 %v349_v53  ;;  %v331_v55 = vsel %vm272_vm0, %v321_v51, 0.0  ;;  %v284_v56 = vpop.xlane.xlu1 %283 }
  0x96   : > { %v306_v57 = vmul.f32 %v1185_v26, %v281_v54  ;;  %332 = vadd.xlane.f32.xlu1 %v331_v55  ;;  %v307_v58 = vmul.f32 %v1185_v26, %v284_v56 }
  0x98   : > { %v1224_v60 = vsub.f32 %v1028_v16, %v306_v57  ;;  %v1226_v61 = vsub.f32 %v1029_v17, %v307_v58 }
  0x9a   : > { %v322_v62 = vmul.f32 %v1224_v60, %v1224_v60  ;;  %v323_v1 = vmul.f32 %v1226_v61, %v1226_v61 }
  0x9c   : > { %v334_v0 = vsel %vm272_vm0, %v322_v62, 0.0  ;;  %v337_v2 = vsel %vm272_vm0, %v323_v1, 0.0 }
  0x9d   : > { %335 = vadd.xlane.f32.xlu2 %v334_v0  ;;  %329 = vadd.xlane.f32.xlu0 %v328_v63 }
  0xa5   : > { %338 = vadd.xlane.f32.xlu0 %v337_v2 }
 0x100   : > { %v348_v3 = vpop.xlane.xlu1 %347  ;;  %v342_v4 = vpop.xlane.xlu2 %341 }
 0x101   : > { %v358_v5 = vmul.f32 %v348_v3, %v1185_v26  ;;  %v356_v6 = vmul.f32 %v342_v4, %v1185_v26  ;;  %v1282_v3 = vld [vmem:[%s1662_s4] ss:$0 sm:$0xff] }
 0x103   : > { %v366_v8 = vadd.f32 1e-05, %v358_v5  ;;  %v364_v9 = vadd.f32 1e-05, %v356_v6 }
 0x105   : > { %1085 = vrsqrt.f32 %v366_v8  ;;  %vm434_vm2 = vweird.f32 %v366_v8  ;;  %vm414_vm5 = vweird.f32 %v364_v9 }
 0x106   : > { %1087 = vrsqrt.f32 %v364_v9 }
 0x108   : > { %v345_v11 = vpop.xlane.xlu0 %344  ;;  %v351_v12 = vpop.xlane.xlu2 %350 }
 0x109   : > { %v357_v13 = vmul.f32 %v345_v11, %v1185_v26  ;;  %v333_v14 = vpop.xlane.xlu1 %332  ;;  %v359_v15 = vmul.f32 %v351_v12, %v1185_v26 }
 0x10a   : > { %v353_v16 = vmul.f32 %v333_v14, %v1185_v26 }
 0x10b   : > { %v1086_v17 = vpop.eup %1085  ;;  %v365_v18 = vadd.f32 1e-05, %v357_v13  ;;  %v1246_v19 = vadd.f32 1e-05, %v359_v15  ;;  %v1080_v15 = vld [vmem:[%s1663_s5] ss:$0 sm:$0xff] }
 0x10c   : > { %v1088_v20 = vpop.eup %1087  ;;  %v429_v21 = vmul.f32 %v1086_v17, %v366_v8  ;;  %v361_v22 = vadd.f32 1e-05, %v353_v16  ;;  %vm435_vm4 = vweird.f32 %v1086_v17 }
 0x10d   : > { %v409_v23 = vmul.f32 %v1088_v20, %v364_v9  ;;  %1089 = vrsqrt.f32 %v365_v18  ;;  %vm415_vm3 = vweird.f32 %v1088_v20  ;;  %vm424_vm7 = vweird.f32 %v365_v18  ;;  %vm1269_vm8 = vmor %vm434_vm2, %vm435_vm4 }
 0x10e   : > { %v430_v24 = vmul.f32 %v1086_v17, %v429_v21  ;;  %1091 = vrsqrt.f32 %v361_v22  ;;  %vm1259_vm6 = vmor %vm414_vm5, %vm415_vm3  ;;  %vm384_vm9 = vweird.f32 %v361_v22  ;;  %vm444_vm12 = vweird.f32 %v1246_v19 }
 0x10f   : > { %v410_v25 = vmul.f32 %v1088_v20, %v409_v23  ;;  %1093 = vrsqrt.f32 %v1246_v19 }
 0x110   : > { %v431_v27 = vmul.f32 0.5, %v430_v24  ;;  %v330_v28 = vpop.xlane.xlu0 %329  ;;  %v336_v29 = vpop.xlane.xlu2 %335 }
 0x111   : > { %v411_v30 = vmul.f32 0.5, %v410_v25  ;;  %v352_v31 = vmul.f32 %v330_v28, %v1185_v26  ;;  %v354_v34 = vmul.f32 %v336_v29, %v1185_v26 }
 0x112   : > { %v432_v35 = vsub.f32 1.5, %v431_v27 }
 0x113   : > { %v1090_v36 = vpop.eup %1089  ;;  %v412_v37 = vsub.f32 1.5, %v411_v30  ;;  %v1251_v38 = vadd.f32 1e-05, %v352_v31  ;;  %v1255_v41 = vadd.f32 1e-05, %v354_v34 }
 0x114   : > { %v1253_v39 = vpop.eup %1091  ;;  %v419_v40 = vmul.f32 %v1090_v36, %v365_v18  ;;  %v433_v43 = vmul.f32 %v1086_v17, %v432_v35  ;;  %vm425_vm10 = vweird.f32 %v1090_v36 }
 0x115   : > { %v1094_v42 = vpop.eup %1093  ;;  %v413_v44 = vmul.f32 %v1088_v20, %v412_v37  ;;  %v379_v49 = vmul.f32 %v1253_v39, %v361_v22  ;;  %1095 = vrsqrt.f32 %v1251_v38  ;;  %vm385_vm11 = vweird.f32 %v1253_v39  ;;  %vm426_vm14 = vmor %vm424_vm7, %vm425_vm10 }
 0x116   : > { %v420_v51 = vmul.f32 %v1090_v36, %v419_v40  ;;  %v439_v52 = vmul.f32 %v1094_v42, %v1246_v19  ;;  %1097 = vrsqrt.f32 %v1255_v41  ;;  %v437_v59 = vsel %vm1269_vm8, %v1086_v17, %v433_v43  ;;  %vm1291_vm15 = vmor %vm384_vm9, %vm385_vm11 }
 0x117   : > { %v417_v53 = vsel %vm1259_vm6, %v1088_v20, %v413_v44  ;;  %v380_v54 = vmul.f32 %v1253_v39, %v379_v49  ;;  %vm445_vm13 = vweird.f32 %v1094_v42  ;;  %v454_v7 = vmul.f32 %v437_v59, %v1189_v32 }
 0x118   : > { %v421_v56 = vmul.f32 0.5, %v420_v51  ;;  %v440_v57 = vmul.f32 %v1094_v42, %v439_v52  ;;  %v339_v58 = vpop.xlane.xlu0 %338  ;;  %v452_v0 = vmul.f32 %v417_v53, %v1191_v33  ;;  %vm446_vm1 = vmor %vm444_vm12, %vm445_vm13  ;;  %vm374_vm2 = vweird.f32 %v1251_v38 }
 0x119   : > { %v381_v62 = vmul.f32 0.5, %v380_v54  ;;  %v355_v63 = vmul.f32 %v339_v58, %v1185_v26  ;;  %v466_v22 = vmul.f32 %v1282_v3, %v454_v7  ;;  %vm394_vm4 = vweird.f32 %v1255_v41 }
 0x11a   : > { %v422_v1 = vsub.f32 1.5, %v421_v56  ;;  %v441_v2 = vmul.f32 0.5, %v440_v57  ;;  %v464_v32 = vmul.f32 %v1282_v3, %v452_v0 }
 0x11b   : > { %v1096_v4 = vpop.eup %1095  ;;  %v382_v5 = vsub.f32 1.5, %v381_v62  ;;  %v363_v6 = vadd.f32 1e-05, %v355_v63 }
 0x11c   : > { %v423_v26 = vmul.f32 %v1090_v36, %v422_v1  ;;  %v442_v33 = vsub.f32 1.5, %v441_v2  ;;  %v369_v8 = vmul.f32 %v1096_v4, %v1251_v38  ;;  %v1098_v11 = vpop.eup %1097  ;;  %vm375_vm3 = vweird.f32 %v1096_v4 }
 0x11d   : > { %v383_v9 = vmul.f32 %v1253_v39, %v382_v5  ;;  %1099 = vrsqrt.f32 %v363_v6  ;;  %v389_v17 = vmul.f32 %v1098_v11, %v1255_v41  ;;  %v476_v19 = vadd.f32 %v1080_v15, %v464_v32  ;;  %vm376_vm5 = vmor %vm374_vm2, %vm375_vm3 }
 0x11e   : > { %v427_v12 = vsel %vm426_vm14, %v1090_v36, %v423_v26  ;;  %v443_v13 = vmul.f32 %v1094_v42, %v442_v33  ;;  %v370_v14 = vmul.f32 %v1096_v4, %v369_v8  ;;  %vm395_vm6 = vweird.f32 %v1098_v11 }
 0x11f   : > { %v453_v16 = vmul.f32 %v427_v12, %v1205_v46  ;;  %v387_v18 = vsel %vm1291_vm15, %v1253_v39, %v383_v9  ;;  %v390_v24 = vmul.f32 %v1098_v11, %v389_v17  ;;  %vm396_vm7 = vmor %vm394_vm4, %vm395_vm6  ;;  %vm404_vm9 = vweird.f32 %v363_v6 }
 0x120   : > { %v447_v20 = vsel %vm446_vm1, %v1094_v42, %v443_v13  ;;  %v371_v21 = vmul.f32 0.5, %v370_v14  ;;  %v449_v28 = vmul.f32 %v387_v18, %v1207_v47 }
 0x121   : > { %v455_v23 = vmul.f32 %v447_v20, %v1203_v45  ;;  %v465_v25 = vmul.f32 %v1282_v3, %v453_v16  ;;  %v391_v29 = vmul.f32 0.5, %v390_v24  ;;  %v478_v45 = vadd.f32 %v1080_v15, %v466_v22 }
 0x122   : > { %v372_v46 = vsub.f32 1.5, %v371_v21  ;;  %v461_v44 = vmul.f32 %v1282_v3, %v449_v28 }
 0x123   : > { %v1100_v27 = vpop.eup %1099  ;;  %v477_v30 = vadd.f32 %v1080_v15, %v465_v25  ;;  %v467_v31 = vmul.f32 %v1282_v3, %v455_v23  ;;  %v392_v36 = vsub.f32 1.5, %v391_v29 }
 0x124   : > { %v373_v34 = vmul.f32 %v1096_v4, %v372_v46  ;;  %v399_v35 = vmul.f32 %v1100_v27, %v363_v6  ;;  %vm405_vm8 = vweird.f32 %v1100_v27  ;;  %v473_v54 = vadd.f32 %v1080_v15, %v461_v44 }
 0x125   : > { %v482_v37 = vpack.c.bf16 %v477_v30, %v476_v19  ;;  %v479_v39 = vadd.f32 %v1080_v15, %v467_v31  ;;  %v393_v43 = vmul.f32 %v1098_v11, %v392_v36  ;;  %vm406_vm10 = vmor %vm404_vm9, %vm405_vm8 }
 0x126   : > { %v377_v38 = vsel %vm376_vm5, %v1096_v4, %v373_v34  ;;  %v400_v40 = vmul.f32 %v1100_v27, %v399_v35 }
 0x127   : > { %v448_v42 = vmul.f32 %v377_v38, %v1209_v48  ;;  %1008 = vmatmul.msk.bf16.vlgmr.msra.gmra.mxu2 %vm272_vm0, %v482_v37  ;;  %v483_v47 = vpack.c.bf16 %v479_v39, %v478_v45  ;;  %v397_v50 = vsel %vm396_vm7, %v1098_v11, %v393_v43 }
 0x128   : > { %v401_v49 = vmul.f32 0.5, %v400_v40  ;;  %v450_v53 = vmul.f32 %v397_v50, %v1224_v60  ;;  %v1330_v60 = vld [vmem:[%s1660_s2] ss:$0 sm:$0xff] }
 0x129   : > { %1009 = vmatmul.msk.bf16.vlgmr.msra.gmra.mxu3 %vm272_vm0, %v483_v47  ;;  %v460_v51 = vmul.f32 %v1282_v3, %v448_v42 }
 0x12a   : > { %v402_v52 = vsub.f32 1.5, %v401_v49  ;;  %v462_v58 = vmul.f32 %v1282_v3, %v450_v53 }
 0x12b   : > { %v472_v48 = vadd.f32 %v1080_v15, %v460_v51 }
 0x12c   : > { %v403_v55 = vmul.f32 %v1100_v27, %v402_v52  ;;  %v474_v62 = vadd.f32 %v1080_v15, %v462_v58 }
 0x12d   : > { %v480_v56 = vpack.c.bf16 %v473_v54, %v472_v48 }
 0x12e   : > { %v407_v57 = vsel %vm406_vm10, %v1100_v27, %v403_v55 }
 0x12f   : > { %v451_v41 = vmul.f32 %v407_v57, %v1226_v61  ;;  %1006 = vmatmul.msk.bf16.vlgmr.msra.gmra.mxu0 %vm272_vm0, %v480_v56  ;;  %v1335_v61 = vld [vmem:[%s1661_s3] ss:$0 sm:$0xff] }
 0x131   : > { %v463_v59 = vmul.f32 %v1282_v3, %v451_v41 }
 0x133   : > { %v475_v63 = vadd.f32 %v1080_v15, %v463_v59 }
 0x135   : > { %v481_v0 = vpack.c.bf16 %v475_v63, %v474_v62 }
 0x137   : > { %1007 = vmatmul.msk.bf16.vlgmr.msra.gmra.mxu1 %vm272_vm0, %v481_v0 }
 0x1aa   : > { %v531_v1 = vpop.f32.mrf.mxu2 }
 0x1ab   : > { %v549_v2 = vmul.f32 %v1330_v60, %v531_v1 }
 0x1ac   : > { %v536_v4 = vpop.f32.mrf.mxu3  ;;  %v521_v3 = vpop.f32.mrf.mxu0 }
 0x1ad   : > { %v1339_v5 = vadd.f32 %v1335_v61, %v549_v2  ;;  %v551_v6 = vmul.f32 %v1330_v60, %v536_v4  ;;  %v545_v7 = vmul.f32 %v1330_v60, %v521_v3 }
 0x1af   : > { %v1344_v26 = vmul.f32 0.70710677, %v1339_v5  ;;  %v1347_v33 = vadd.f32 %v1335_v61, %v551_v6  ;;  %v1350_v8 = vadd.f32 %v1335_v61, %v545_v7 }
 0x1b1   : > { %v741_v9 = vmul.f32 %v1344_v26, %v1344_v26  ;;  %v1355_v10 = vmul.f32 0.70710677, %v1347_v33  ;;  %v1358_v11 = vmul.f32 0.70710677, %v1350_v8 }
 0x1b2   : > { %v533_v12 = vpop.f32.mrf.mxu2 }
 0x1b3   : > { %v1360_v13 = vmin.f32 %v741_v9, 16.0  ;;  %v821_v14 = vmul.f32 %v1355_v10, %v1355_v10  ;;  %v550_v32 = vmul.f32 %v1330_v60, %v533_v12  ;;  %v581_v15 = vmul.f32 %v1358_v11, %v1358_v11 }
 0x1b4   : > { %v538_v37 = vpop.f32.mrf.mxu3 }
 0x1b5   : > { %v743_v16 = vmul.f32 2.1237322e-06, %v1360_v13  ;;  %v754_v17 = vmul.f32 3.8918573e-05, %v1360_v13  ;;  %v1369_v18 = vmin.f32 %v821_v14, 16.0  ;;  %v1371_v20 = vmin.f32 %v581_v15, 16.0 }
 0x1b6   : > { %v1375_v23 = vadd.f32 %v1335_v61, %v550_v32  ;;  %v552_v50 = vmul.f32 %v1330_v60, %v538_v37 }
 0x1b7   : > { %v755_v21 = vadd.f32 0.001143296, %v754_v17  ;;  %v823_v22 = vmul.f32 2.1237322e-06, %v1369_v18  ;;  %v744_v24 = vadd.f32 0.00028619796, %v743_v16  ;;  %v523_v16 = vpop.f32.mrf.mxu0 }
 0x1b8   : > { %v834_v25 = vmul.f32 3.8918573e-05, %v1369_v18  ;;  %v594_v46 = vmul.f32 3.8918573e-05, %v1371_v20  ;;  %v583_v29 = vmul.f32 2.1237322e-06, %v1371_v20  ;;  %v1400_v62 = vadd.f32 %v1335_v61, %v552_v50 }
 0x1b9   : > { %v756_v19 = vmul.f32 %v755_v21, %v1360_v13  ;;  %v824_v27 = vadd.f32 0.00028619796, %v823_v22  ;;  %v1382_v34 = vmul.f32 0.70710677, %v1375_v23  ;;  %v745_v35 = vmul.f32 %v744_v24, %v1360_v13 }
 0x1ba   : > { %v835_v28 = vadd.f32 0.001143296, %v834_v25  ;;  %v595_v30 = vadd.f32 0.001143296, %v594_v46  ;;  %v584_v43 = vadd.f32 0.00028619796, %v583_v29 }
 0x1bb   : > { %v757_v31 = vadd.f32 0.014752088, %v756_v19  ;;  %v825_v38 = vmul.f32 %v824_v27, %v1369_v18  ;;  %v781_v40 = vmul.f32 %v1382_v34, %v1382_v34  ;;  %v746_v51 = vadd.f32 0.0036580483, %v745_v35 }
 0x1bc   : > { %v836_v45 = vmul.f32 %v835_v28, %v1369_v18  ;;  %v596_v36 = vmul.f32 %v595_v30, %v1371_v20  ;;  %v585_v57 = vmul.f32 %v584_v43, %v1371_v20  ;;  %v1412_v15 = vmul.f32 0.70710677, %v1400_v62 }
 0x1bd   : > { %v758_v39 = vmul.f32 %v757_v31, %v1360_v13  ;;  %v1391_v49 = vmin.f32 %v781_v40, 16.0  ;;  %v826_v54 = vadd.f32 0.0036580483, %v825_v38  ;;  %v747_v63 = vmul.f32 %v746_v51, %v1360_v13 }
 0x1be   : > { %v837_v42 = vadd.f32 0.014752088, %v836_v45  ;;  %v597_v47 = vadd.f32 0.014752088, %v596_v36  ;;  %v586_v9 = vadd.f32 0.0036580483, %v585_v57  ;;  %v546_v27 = vmul.f32 %v1330_v60, %v523_v16 }
 0x1bf   : > { %v759_v44 = vadd.f32 0.112945676, %v758_v39  ;;  %v783_v55 = vmul.f32 2.1237322e-06, %v1391_v49  ;;  %v794_v2 = vmul.f32 3.8918573e-05, %v1391_v49  ;;  %v827_v3 = vmul.f32 %v826_v54, %v1369_v18  ;;  %v526_v54 = vpop.f32.mrf.mxu1 }
 0x1c0   : > { %v838_v52 = vmul.f32 %v837_v42, %v1369_v18  ;;  %v598_v53 = vmul.f32 %v597_v47, %v1371_v20  ;;  %v748_v17 = vadd.f32 0.05243302, %v747_v63  ;;  %v587_v19 = vmul.f32 %v586_v9, %v1371_v20 }
 0x1c1   : > { %v760_v48 = vmul.f32 %v759_v44, %v1360_v13  ;;  %v784_v59 = vadd.f32 0.00028619796, %v783_v55  ;;  %v795_v24 = vadd.f32 0.001143296, %v794_v2  ;;  %v828_v25 = vadd.f32 0.05243302, %v827_v3 }
 0x1c2   : > { %v839_v56 = vadd.f32 0.112945676, %v838_v52  ;;  %v599_v41 = vadd.f32 0.112945676, %v598_v53  ;;  %v861_v30 = vmul.f32 %v1412_v15, %v1412_v15  ;;  %v749_v31 = vmul.f32 %v748_v17, %v1360_v13 }
 0x1c3   : > { %v761_v58 = vadd.f32 0.4994258, %v760_v48  ;;  %v785_v6 = vmul.f32 %v784_v59, %v1391_v49  ;;  %v796_v29 = vmul.f32 %v795_v24, %v1391_v49  ;;  %v829_v45 = vmul.f32 %v828_v25, %v1369_v18 }
 0x1c4   : > { %v840_v0 = vmul.f32 %v839_v56, %v1369_v18  ;;  %v600_v1 = vmul.f32 %v599_v41, %v1371_v20  ;;  %v588_v36 = vadd.f32 0.05243302, %v587_v19  ;;  %v1431_v37 = vadd.f32 %v1335_v61, %v546_v27 }
 0x1c5   : > { %v762_v4 = vmul.f32 %v761_v58, %v1360_v13  ;;  %v786_v32 = vadd.f32 0.0036580483, %v785_v6  ;;  %v797_v40 = vadd.f32 0.014752088, %v796_v29  ;;  %v1435_v42 = vmin.f32 %v861_v30, 16.0 }
 0x1c6   : > { %v841_v7 = vadd.f32 0.4994258, %v840_v0  ;;  %v601_v12 = vadd.f32 0.4994258, %v600_v1  ;;  %v750_v43 = vadd.f32 0.18741608, %v749_v31  ;;  %v589_v56 = vmul.f32 %v588_v36, %v1371_v20 }
 0x1c7   : > { %v1409_v14 = vadd.f32 1.0, %v762_v4  ;;  %v787_v28 = vmul.f32 %v786_v32, %v1391_v49  ;;  %v830_v44 = vadd.f32 0.18741608, %v829_v45  ;;  %v798_v50 = vmul.f32 %v797_v40, %v1391_v49 }
 0x1c8   : > { %v842_v21 = vmul.f32 %v841_v7, %v1369_v18  ;;  %v602_v22 = vmul.f32 %v601_v12, %v1371_v20  ;;  %v863_v51 = vmul.f32 2.1237322e-06, %v1435_v42  ;;  %v874_v52 = vmul.f32 3.8918573e-05, %v1435_v42 }
 0x1c9   : > { %1101 = vrcp.f32 %v1409_v14  ;;  %v788_v38 = vadd.f32 0.05243302, %v787_v28  ;;  %v1444_v48 = vmul.f32 0.70710677, %v1431_v37  ;;  %v799_v41 = vadd.f32 0.112945676, %v798_v50 }
 0x1ca   : > { %v1417_v46 = vadd.f32 1.0, %v842_v21  ;;  %v1426_v35 = vadd.f32 1.0, %v602_v22  ;;  %v1451_v58 = vmul.f32 0.5, %v1339_v5  ;;  %v751_v59 = vmul.f32 %v750_v43, %v1360_v13 }
 0x1cb   : > { %v789_v57 = vmul.f32 %v788_v38, %v1391_v49  ;;  %v864_v63 = vadd.f32 0.00028619796, %v863_v51  ;;  %v831_v0 = vmul.f32 %v830_v44, %v1369_v18  ;;  %v800_v1 = vmul.f32 %v799_v41, %v1391_v49 }
 0x1cc   : > { %1103 = vrcp.f32 %v1417_v46  ;;  %v875_v2 = vadd.f32 0.001143296, %v874_v52  ;;  %v547_v4 = vmul.f32 %v1330_v60, %v526_v54  ;;  %v621_v13 = vmul.f32 %v1444_v48, %v1444_v48 }
 0x1cd   : > { %1105 = vrcp.f32 %v1426_v35  ;;  %v865_v5 = vmul.f32 %v864_v63, %v1435_v42  ;;  %v590_v9 = vadd.f32 0.18741608, %v589_v56  ;;  %v790_v12 = vadd.f32 0.18741608, %v789_v57  ;;  %v528_v57 = vpop.f32.mrf.mxu1 }
 0x1ce   : > { %v801_v18 = vadd.f32 0.4994258, %v800_v1  ;;  %v876_v32 = vmul.f32 %v875_v2, %v1435_v42  ;;  %v752_v16 = vadd.f32 1.1283791, %v751_v59  ;;  %v773_v17 = vand.u32 2147483647, %v1409_v14 }
 0x1cf   : > { %v1433_v39 = vpop.eup %1101  ;;  %v1468_v21 = vmul.f32 0.5, %v1375_v23  ;;  %v1470_v22 = vmin.f32 %v621_v13, 16.0  ;;  %v775_v24 = vand.u32 2147483648, %v1409_v14  ;;  %v832_v25 = vadd.f32 1.1283791, %v831_v0 }
 0x1d0   : > { %v765_v47 = vmul.f32 %v1433_v39, %v1409_v14  ;;  %v802_v27 = vmul.f32 %v801_v18, %v1391_v49  ;;  %vm770_vm0 = vweird.f32 %v1433_v39  ;;  %v866_v30 = vadd.f32 0.0036580483, %v865_v5 }
 0x1d1   : > { %v791_v31 = vmul.f32 %v790_v12, %v1391_v49  ;;  %v877_v45 = vadd.f32 0.014752088, %v876_v32  ;;  %v623_v36 = vmul.f32 2.1237322e-06, %v1470_v22  ;;  %v753_v38 = vmul.f32 %v752_v16, %v1344_v26 }
 0x1d2   : > { %v766_v53 = vsub.f32 1.0, %v765_v47  ;;  %v1446_v55 = vpop.eup %1103  ;;  %v1479_v23 = vadd.f32 1.0, %v802_v27  ;;  %vm769_vm11 = vweird.f32 %v1409_v14  ;;  %v1485_v40 = vmul.f32 %v590_v9, %v1371_v20 }
 0x1d3   : > { %v1457_v3 = vpop.eup %1105  ;;  %v845_v7 = vmul.f32 %v1446_v55, %v1417_v46  ;;  %v1488_v43 = vadd.f32 %v1335_v61, %v547_v4  ;;  %vm1490_vm12 = vmor %vm769_vm11, %vm770_vm0  ;;  %vm1494_vm13 = vcmp.eq.f32.partialorder %v773_v17, 8.507059e+37  ;;  %v776_v44 = vor.u32 1.1754944e-38, %v775_v24 }
 0x1d4   : > { %v767_v6 = vmul.f32 %v1433_v39, %v766_v53  ;;  %v605_v19 = vmul.f32 %v1457_v3, %v1426_v35  ;;  %1107 = vrcp.f32 %v1479_v23  ;;  %v1503_v20 = vmul.f32 %v832_v25, %v1355_v10 }
 0x1d5   : > { %v846_v29 = vsub.f32 1.0, %v845_v7  ;;  %v634_v51 = vmul.f32 3.8918573e-05, %v1470_v22  ;;  %vm849_vm14 = vweird.f32 %v1417_v46  ;;  %v792_v52 = vadd.f32 1.1283791, %v791_v31 }
 0x1d6   : > { %v768_v28 = vadd.f32 %v1433_v39, %v767_v6  ;;  %v606_v50 = vsub.f32 1.0, %v605_v19  ;;  %v867_v53 = vmul.f32 %v866_v30, %v1435_v42  ;;  %v878_v54 = vmul.f32 %v877_v45, %v1435_v42 }
 0x1d7   : > { %v847_v14 = vmul.f32 %v1446_v55, %v846_v29  ;;  %v624_v56 = vadd.f32 0.00028619796, %v623_v36  ;;  %v853_v41 = vand.u32 2147483647, %v1417_v46  ;;  %v613_v10 = vand.u32 2147483647, %v1426_v35 }
 0x1d8   : > { %v772_v26 = vsel %vm1490_vm12, %v1433_v39, %v768_v28  ;;  %v855_v39 = vand.u32 2147483648, %v1417_v46  ;;  %v615_v59 = vand.u32 2147483648, %v1426_v35  ;;  %v607_v0 = vmul.f32 %v1457_v3, %v606_v50 }
 0x1d9   : > { %v777_v63 = vsel %vm1494_vm13, %v776_v44, %v772_v26  ;;  %v879_v1 = vadd.f32 0.112945676, %v878_v54  ;;  %v625_v2 = vmul.f32 %v624_v56, %v1470_v22  ;;  %vm850_vm15 = vweird.f32 %v1446_v55 }
 0x1da   : > { %v635_v4 = vadd.f32 0.001143296, %v634_v51  ;;  %v1520_v6 = vmul.f32 0.70710677, %v1488_v43  ;;  %v548_v7 = vmul.f32 %v1330_v60, %v528_v57  ;;  %v1108_v5 = vpop.eup %1107  ;;  %v848_v13 = vadd.f32 %v1446_v55, %v847_v14  ;;  %vm1552_vm5 = vmor %vm849_vm14, %vm850_vm15 }
 0x1db   : > { %v793_v9 = vmul.f32 %v792_v52, %v1382_v34  ;;  %v868_v12 = vadd.f32 0.05243302, %v867_v53  ;;  %v880_v18 = vmul.f32 %v879_v1, %v1435_v42  ;;  %v778_v32 = vmul.f32 %v777_v63, %v753_v38 }
 0x1dc   : > { %vm610_vm1 = vweird.f32 %v1457_v3  ;;  %v805_v16 = vmul.f32 %v1108_v5, %v1479_v23  ;;  %v626_v17 = vadd.f32 0.0036580483, %v625_v2  ;;  %v636_v24 = vmul.f32 %v635_v4, %v1470_v22 }
 0x1dd   : > { %v1530_v25 = vadd.f32 %v1457_v3, %v607_v0  ;;  %v813_v60 = vand.u32 2147483647, %v1479_v23  ;;  %v881_v19 = vadd.f32 0.4994258, %v880_v18  ;;  %v661_v34 = vmul.f32 %v1520_v6, %v1520_v6 }
 0x1de   : > { %vm1535_vm2 = vcmp.eq.f32.partialorder %v853_v41, 8.507059e+37  ;;  %vm609_vm3 = vweird.f32 %v1426_v35  ;;  %v806_v28 = vsub.f32 1.0, %v805_v16  ;;  %v815_v29 = vand.u32 2147483648, %v1479_v23 }
 0x1df   : > { %v637_v30 = vadd.f32 0.014752088, %v636_v24  ;;  %v1542_v31 = vadd.f32 %v1335_v61, %v548_v7  ;;  %vm810_vm4 = vweird.f32 %v1108_v5  ;;  %v869_v45 = vmul.f32 %v868_v12, %v1435_v42  ;;  %vm1584_vm10 = vmor %vm609_vm3, %vm610_vm1 }
 0x1e0   : > { %v882_v36 = vmul.f32 %v881_v19, %v1435_v42  ;;  %v1546_v38 = vmin.f32 %v661_v34, 16.0  ;;  %v807_v49 = vmul.f32 %v1108_v5, %v806_v28  ;;  %v627_v44 = vmul.f32 %v626_v17, %v1470_v22 }
 0x1e1   : > { %v638_v61 = vmul.f32 %v637_v30, %v1470_v22  ;;  %v1559_v50 = vmul.f32 0.70710677, %v1542_v31  ;;  %v852_v26 = vsel %vm1552_vm5, %v1446_v55, %v848_v13  ;;  %v1014_v52 = vclamps-f32 %v778_v32, 1.0 }
 0x1e2   : > { %v1564_v14 = vadd.f32 1.0, %v882_v36  ;;  %v663_v46 = vmul.f32 2.1237322e-06, %v1546_v38  ;;  %v674_v51 = vmul.f32 3.8918573e-05, %v1546_v38  ;;  %v808_v53 = vadd.f32 %v1108_v5, %v807_v49 }
 0x1e3   : > { %vm809_vm6 = vweird.f32 %v1479_v23  ;;  %v639_v54 = vadd.f32 0.112945676, %v638_v61  ;;  %v816_v56 = vor.u32 1.1754944e-38, %v815_v29  ;;  %v870_v57 = vadd.f32 0.18741608, %v869_v45 }
 0x1e4   : > { %vm811_vm7 = vmor %vm809_vm6, %vm810_vm4  ;;  %1109 = vrcp.f32 %v1564_v14  ;;  %v701_v55 = vmul.f32 %v1559_v50, %v1559_v50  ;;  %vm814_vm8 = vcmp.eq.f32.partialorder %v813_v60, 8.507059e+37  ;;  %v628_v63 = vadd.f32 0.05243302, %v627_v44 }
 0x1e5   : > { %v812_v41 = vsel %vm811_vm7, %v1108_v5, %v808_v53  ;;  %v640_v0 = vmul.f32 %v639_v54, %v1470_v22  ;;  %v856_v1 = vor.u32 1.1754944e-38, %v855_v39  ;;  %v664_v4 = vadd.f32 0.00028619796, %v663_v46 }
 0x1e6   : > { %v817_v2 = vsel %vm814_vm8, %v816_v56, %v812_v41  ;;  %v675_v7 = vadd.f32 0.001143296, %v674_v51  ;;  %v905_v23 = vadd.f32 1.0, %v1014_v52  ;;  %vm1574_vm9 = vcmp.eq.f32.partialorder %v613_v10, 8.507059e+37 }
 0x1e7   : > { %v616_v12 = vor.u32 1.1754944e-38, %v615_v59  ;;  %v818_v18 = vmul.f32 %v817_v2, %v793_v9  ;;  %v641_v32 = vadd.f32 0.4994258, %v640_v0  ;;  %v857_v16 = vsel %vm1535_vm2, %v856_v1, %v852_v26 }
 0x1e8   : > { %v871_v5 = vmul.f32 %v870_v57, %v1435_v42  ;;  %v676_v10 = vmul.f32 %v675_v7, %v1546_v38  ;;  %v1590_v17 = vmin.f32 %v701_v55, 16.0  ;;  %v612_v59 = vsel %vm1584_vm10, %v1457_v3, %v1530_v25 }
 0x1e9   : > { %v1015_v9 = vclamps-f32 %v818_v18, 1.0  ;;  %v629_v24 = vmul.f32 %v628_v63, %v1470_v22  ;;  %v642_v35 = vmul.f32 %v641_v32, %v1470_v22  ;;  %v665_v19 = vmul.f32 %v664_v4, %v1546_v38 }
 0x1ea   : > { %v1110_v60 = vpop.eup %1109  ;;  %v677_v34 = vadd.f32 0.014752088, %v676_v10  ;;  %v703_v42 = vmul.f32 2.1237322e-06, %v1590_v17  ;;  %v714_v27 = vmul.f32 3.8918573e-05, %v1590_v17  ;;  %v913_v28 = vmul.f32 %v905_v23, %v1451_v58 }
 0x1eb   : > { %v858_v29 = vmul.f32 %v857_v16, %v1503_v20  ;;  %v906_v30 = vadd.f32 1.0, %v1015_v9  ;;  %v885_v3 = vmul.f32 %v1110_v60, %v1564_v14  ;;  %v872_v25 = vadd.f32 1.1283791, %v871_v5 }
 0x1ec   : > { %v1604_v45 = vadd.f32 1.0, %v642_v35  ;;  %v678_v36 = vmul.f32 %v677_v34, %v1546_v38  ;;  %v704_v47 = vadd.f32 0.00028619796, %v703_v42  ;;  %v893_v61 = vand.u32 2147483647, %v1564_v14 }
 0x1ed   : > { %v914_v49 = vmul.f32 %v906_v30, %v1468_v21  ;;  %v886_v44 = vsub.f32 1.0, %v885_v3  ;;  %v715_v26 = vadd.f32 0.001143296, %v714_v27  ;;  %v895_v58 = vand.u32 2147483648, %v1564_v14 }
 0x1ee   : > { %v630_v20 = vadd.f32 0.18741608, %v629_v24  ;;  %1111 = vrcp.f32 %v1604_v45  ;;  %v666_v46 = vadd.f32 0.0036580483, %v665_v19  ;;  %vm890_vm0 = vweird.f32 %v1110_v60 }
 0x1ef   : > { %v1051_v51 = vpack.c.bf16 %v914_v49, %v913_v28  ;;  %v887_v52 = vmul.f32 %v1110_v60, %v886_v44  ;;  %v679_v21 = vadd.f32 0.112945676, %v678_v36  ;;  %v592_v53 = vadd.f32 1.1283791, %v1485_v40 }
 0x1f0   : > { %v617_v54 = vsel %vm1574_vm9, %v616_v12, %v612_v59  ;;  %v705_v56 = vmul.f32 %v704_v47, %v1590_v17  ;;  %v716_v57 = vmul.f32 %v715_v26, %v1590_v17  ;;  %v1016_v55 = vclamps-f32 %v858_v29, 1.0 }
 0x1f1   : > { %1062 = vst [vmem:[%s1614_s18 + $0x10] sm:$0xff] %v1051_v51   ;;  %v888_v41 = vadd.f32 %v1110_v60, %v887_v52  ;;  %vm889_vm11 = vweird.f32 %v1564_v14  ;;  %v680_v63 = vmul.f32 %v679_v21, %v1546_v38  ;;  %v873_v0 = vmul.f32 %v872_v25, %v1412_v15 }
 0x1f2   : > { %vm891_vm12 = vmor %vm889_vm11, %vm890_vm0  ;;  %vm894_vm13 = vcmp.eq.f32.partialorder %v893_v61, 8.507059e+37  ;;  %v896_v1 = vor.u32 1.1754944e-38, %v895_v58  ;;  %v717_v40 = vadd.f32 0.014752088, %v716_v57  ;;  %v631_v4 = vmul.f32 %v630_v20, %v1470_v22 }
 0x1f3   : > { %v892_v2 = vsel %vm891_vm12, %v1110_v60, %v888_v41  ;;  %v667_v7 = vmul.f32 %v666_v46, %v1546_v38  ;;  %v681_v23 = vadd.f32 0.4994258, %v680_v63  ;;  %v593_v12 = vmul.f32 %v592_v53, %v1358_v11 }
 0x1f4   : > { %v1112_v13 = vpop.eup %1111  ;;  %v897_v18 = vsel %vm894_vm13, %v896_v1, %v892_v2  ;;  %v706_v32 = vadd.f32 0.0036580483, %v705_v56  ;;  %v718_v14 = vmul.f32 %v717_v40, %v1590_v17  ;;  %v571_v16 = vmul.f32 0.5, %v1347_v33 }
 0x1f5   : > { %v572_v15 = vmul.f32 0.5, %v1400_v62  ;;  %v898_v39 = vmul.f32 %v897_v18, %v873_v0  ;;  %v645_v5 = vmul.f32 %v1112_v13, %v1604_v45  ;;  %v907_v10 = vadd.f32 1.0, %v1016_v55 }
 0x1f6   : > { %v618_v59 = vmul.f32 %v617_v54, %v593_v12  ;;  %v682_v22 = vmul.f32 %v681_v23, %v1546_v38  ;;  %v719_v9 = vadd.f32 0.112945676, %v718_v14  ;;  %v632_v35 = vadd.f32 1.1283791, %v631_v4 }
 0x1f7   : > { %v1017_v24 = vclamps-f32 %v898_v39, 1.0  ;;  %v646_v60 = vsub.f32 1.0, %v645_v5  ;;  %v668_v11 = vadd.f32 0.05243302, %v667_v7  ;;  %v655_v19 = vand.u32 2147483648, %v1604_v45 }
 0x1f8   : > { %v683_v34 = vadd.f32 1.0, %v682_v22  ;;  %v707_v42 = vmul.f32 %v706_v32, %v1590_v17  ;;  %v720_v33 = vmul.f32 %v719_v9, %v1590_v17  ;;  %vm650_vm14 = vweird.f32 %v1112_v13 }
 0x1f9   : > { %v908_v62 = vadd.f32 1.0, %v1017_v24  ;;  %v647_v27 = vmul.f32 %v1112_v13, %v646_v60  ;;  %v653_v28 = vand.u32 2147483647, %v1604_v45  ;;  %v915_v29 = vmul.f32 %v907_v10, %v571_v16 }
 0x1fa   : > { %vm649_vm15 = vweird.f32 %v1604_v45  ;;  %1113 = vrcp.f32 %v683_v34  ;;  %v669_v25 = vmul.f32 %v668_v11, %v1546_v38  ;;  %v721_v36 = vadd.f32 0.4994258, %v720_v33 }
 0x1fb   : > { %v916_v30 = vmul.f32 %v908_v62, %v572_v15  ;;  %v648_v3 = vadd.f32 %v1112_v13, %v647_v27  ;;  %v1010_v47 = vclamps-f32 %v618_v59, 1.0  ;;  %v633_v49 = vmul.f32 %v632_v35, %v1444_v48  ;;  %vm651_vm1 = vmor %vm649_vm15, %vm650_vm14 }
 0x1fc   : > { %v656_v44 = vor.u32 1.1754944e-38, %v655_v19  ;;  %v708_v61 = vadd.f32 0.05243302, %v707_v42  ;;  %vm654_vm2 = vcmp.eq.f32.partialorder %v653_v28, 8.507059e+37  ;;  %v722_v20 = vmul.f32 %v721_v36, %v1590_v17 }
 0x1fd   : > { %v1056_v26 = vpack.c.bf16 %v916_v30, %v915_v29  ;;  %v652_v58 = vsel %vm651_vm1, %v1112_v13, %v648_v3  ;;  %v670_v51 = vadd.f32 0.18741608, %v669_v25  ;;  %v901_v53 = vadd.f32 1.0, %v1010_v47 }
 0x1fe   : > { %v657_v46 = vsel %vm654_vm2, %v656_v44, %v652_v58  ;;  %v723_v52 = vadd.f32 1.0, %v722_v20  ;;  %v709_v54 = vmul.f32 %v708_v61, %v1590_v17  ;;  %v565_v48 = vmul.f32 0.5, %v1350_v8 }
 0x1ff   : > { %1063 = vst [vmem:[%s1614_s18 + $0x18] sm:$0xff] %v1056_v26   ;;  %v658_v45 = vmul.f32 %v657_v46, %v633_v49  ;;  %v566_v55 = vmul.f32 0.5, %v1431_v37  ;;  %v671_v63 = vmul.f32 %v670_v51, %v1546_v38  ;;  %v695_v40 = vand.u32 2147483648, %v683_v34 }
 0x200   : > { %v1114_v21 = vpop.eup %1113  ;;  %1115 = vrcp.f32 %v723_v52  ;;  %v909_v1 = vmul.f32 %v901_v53, %v565_v48  ;;  %v710_v2 = vadd.f32 0.18741608, %v709_v54  ;;  %v693_v23 = vand.u32 2147483647, %v683_v34 }
 0x201   : > { %v1011_v56 = vclamps-f32 %v658_v45, 1.0  ;;  %v685_v57 = vmul.f32 %v1114_v21, %v683_v34  ;;  %vm690_vm3 = vweird.f32 %v1114_v21  ;;  %v672_v12 = vadd.f32 1.1283791, %v671_v63 }
 0x202   : > { %vm689_vm4 = vweird.f32 %v683_v34  ;;  %v696_v32 = vor.u32 1.1754944e-38, %v695_v40  ;;  %v711_v37 = vmul.f32 %v710_v2, %v1590_v17  ;;  %vm694_vm6 = vcmp.eq.f32.partialorder %v693_v23, 8.507059e+37 }
 0x203   : > { %v902_v41 = vadd.f32 1.0, %v1011_v56  ;;  %v686_v0 = vsub.f32 1.0, %v685_v57  ;;  %vm691_vm5 = vmor %vm689_vm4, %vm690_vm3  ;;  %v673_v15 = vmul.f32 %v672_v12, %v1520_v6  ;;  %v735_v10 = vand.u32 2147483648, %v723_v52 }
 0x204   : > { %v712_v5 = vadd.f32 1.1283791, %v711_v37  ;;  %v733_v9 = vand.u32 2147483647, %v723_v52  ;;  %vm729_vm8 = vweird.f32 %v723_v52  ;;  %v567_v33 = vmul.f32 0.5, %v1488_v43 }
 0x205   : > { %v910_v4 = vmul.f32 %v902_v41, %v566_v55  ;;  %v687_v7 = vmul.f32 %v1114_v21, %v686_v0  ;;  %v736_v35 = vor.u32 1.1754944e-38, %v735_v10  ;;  %v568_v62 = vmul.f32 0.5, %v1542_v31 }
 0x206   : > { %v1116_v8 = vpop.eup %1115  ;;  %v713_v60 = vmul.f32 %v712_v5, %v1559_v50  ;;  %vm734_vm10 = vcmp.eq.f32.partialorder %v733_v9, 8.507059e+37 }
 0x207   : > { %v1041_v13 = vpack.c.bf16 %v910_v4, %v909_v1  ;;  %v688_v18 = vadd.f32 %v1114_v21, %v687_v7  ;;  %v725_v14 = vmul.f32 %v1116_v8, %v723_v52  ;;  %vm730_vm7 = vweird.f32 %v1116_v8 }
 0x208   : > { %vm731_vm9 = vmor %vm729_vm8, %vm730_vm7 }
 0x209   : > { %1042 = vst [vmem:[%s1614_s18] sm:$0xff] %v1041_v13   ;;  %v692_v38 = vsel %vm691_vm5, %v1114_v21, %v688_v18  ;;  %v726_v39 = vsub.f32 1.0, %v725_v14 }
 0x20a   : > { %v697_v16 = vsel %vm694_vm6, %v696_v32, %v692_v38 }
 0x20b   : > { %v698_v59 = vmul.f32 %v697_v16, %v673_v15  ;;  %v727_v22 = vmul.f32 %v1116_v8, %v726_v39 }
 0x20d   : > { %v728_v24 = vadd.f32 %v1116_v8, %v727_v22  ;;  %v1012_v17 = vclamps-f32 %v698_v59, 1.0 }
 0x20f   : > { %v732_v11 = vsel %vm731_vm9, %v1116_v8, %v728_v24  ;;  %v903_v6 = vadd.f32 1.0, %v1012_v17 }
 0x210   : > { %v737_v19 = vsel %vm734_vm10, %v736_v35, %v732_v11 }
 0x211   : > { %v738_v34 = vmul.f32 %v737_v19, %v713_v60  ;;  %v911_v28 = vmul.f32 %v903_v6, %v567_v33 }
 0x213   : > { %v1013_v42 = vclamps-f32 %v738_v34, 1.0 }
 0x215   : > { %v904_v27 = vadd.f32 1.0, %v1013_v42 }
 0x217   : > { %v912_v29 = vmul.f32 %v904_v27, %v568_v62 }
 0x219   : > { %v1046_v30 = vpack.c.bf16 %v912_v29, %v911_v28 }
 0x21b   : > { %1061 = vst [vmem:[%s1614_s18 + $0x8] sm:$0xff] %v1046_v30  }
 0x21c PF: > { %s16_s21 = sadd.s32 1, %s1123_s21  }
 0x21d   : > { %p13_p4 = scmp.ge.s32.totalorder %s16_s21, 4  }
 0x21f   :  { %15 = sbr.rel (!%p13_p4) target bundleno = 1 (0x1), region = 74 }

// kernel: _lambda_.37
= control target key start
LH: loop header
LB: loop body
LE: loop exit
PB: predicated region body
PF: predicated region fallthrough
CT: control target
= control target key end

     0   :  { %s479_s15 = smov 0   ;;  %s526_s0 = inlined_call_operand.vmem [shape: bf16[128,32], index: 0, kind: input, shape index: {}]   ;;  %s527_s1 = inlined_call_operand.vmem [shape: bf16[32,32], index: 1, kind: input, shape index: {}]   ;;  %s528_s2 = inlined_call_operand.vmem [shape: f32[1,32], index: 2, kind: input, shape index: {}]   ;;  %s529_s3 = inlined_call_operand.vmem [shape: f32[1,32], index: 3, kind: input, shape index: {}]   ;;  %s530_s4 = inlined_call_operand.vmem [shape: bf16[128,32], index: 4, kind: output, shape index: {}]  }
   0x1 LB: > { %s385_s16 = sadd.s32 4294967295, %s452_s15   ;;  %p389_p0 = scmp.ge.s32.totalorder %s452_s15, 1  ;;  %s452_s15 = sphi %s479_s15, %s14_s15  }
   0x2   : > { %p163_p1 = scmp.lt.s32.totalorder %s452_s15, 3 }
   0x4   : > { %p164_p2 = pnand %p389_p0, %p163_p1 }
   0x5   : > { %s390_s19 = sshll.u32 (!%p164_p2), %s385_s16, 3 }
   0x6   : > { %167 = sbr.rel (%p164_p2) target bundleno = 168 (0xa8), region = 36  ;;  %p190_p3 = scmp.lt.s32.totalorder (!%p164_p2), %s390_s19, 15 }
   0xb   : > { %v429_v0 = vld [vmem:[%s527_s1 + $0x8] sm:$0xff]  ;;  %v428_v1 = vld [vmem:[%s527_s1] sm:$0xff]  ;;  %s532_s19 = smov (!%p190_p3, %s390_s19), 15  ;;  %vm246_vm0 = vcmask 261120   ;;  %vm320_vm1 = vcmask 257024  }
   0xc   : > { %265 = vmatpush.bf16.msra.mxu0 %v429_v0  ;;  %430 = vmatpush.bf16.msra.mxu1 %v429_v0  ;;  %s391_s22 = sshll.u32 %s532_s19, 2  ;;  %v444_v6 = vld [vmem:[%s528_s2] ss:$0 sm:$0xff] }
   0xd   : > { %431 = vmatpush.bf16.msra.mxu2 %v429_v0  ;;  %432 = vmatpush.bf16.msra.mxu3 %v429_v0  ;;  %s193_s25 = scalar_lea.vmem %s526_s0, %s391_s22  ;;  %v445_v7 = vld [vmem:[%s529_s3] ss:$0 sm:$0xff]  ;;  %s505_s6 = scalar_lea.vmem %s530_s4, %s391_s22 }
   0xe   : > { %v424_v2 = vld [vmem:[%s193_s25] sm:$0xff]  ;;  %v425_v3 = vld [vmem:[%s193_s25 + $0x8] sm:$0xff]  ;;  %v426_v4 = vld [vmem:[%s193_s25 + $0x10] sm:$0xff] }
   0xf   : > { %v427_v5 = vld [vmem:[%s193_s25 + $0x18] sm:$0xff] }
  0x10   : > { %266 = vmatpush.bf16.msra.mxu0 %v428_v1  ;;  %433 = vmatpush.bf16.msra.mxu1 %v428_v1 }
  0x11   : > { %434 = vmatpush.bf16.msra.mxu2 %v428_v1  ;;  %435 = vmatpush.bf16.msra.mxu3 %v428_v1 }
  0x13   : > { %418 = vmatmul.msk.bf16.vlgmr.msra.gmra.mxu0 %vm246_vm0, %v424_v2  ;;  %419 = vmatmul.msk.bf16.vlgmr.msra.gmra.mxu1 %vm246_vm0, %v425_v3 }
  0x14   : > { %420 = vmatmul.msk.bf16.vlgmr.msra.gmra.mxu2 %vm246_vm0, %v426_v4  ;;  %421 = vmatmul.msk.bf16.vlgmr.msra.gmra.mxu3 %vm246_vm0, %v427_v5 }
  0x90   : > { %v268_v8 = vpop.f32.mrf.mxu0  ;;  %v273_v9 = vpop.f32.mrf.mxu1 }
  0x91   : > { %v292_v10 = vmul.f32 %v444_v6, %v268_v8  ;;  %v294_v11 = vmul.f32 %v444_v6, %v273_v9 }
  0x93   : > { %v304_v12 = vadd.f32 %v445_v7, %v292_v10  ;;  %v306_v13 = vadd.f32 %v445_v7, %v294_v11 }
  0x95   : > { %v312_v14 = vpack.c.bf16 %v304_v12, %v304_v12  ;;  %v314_v15 = vpack.c.bf16 %v306_v13, %v306_v13 }
  0x97   : > { %321 = vst.msk [vmem:[%s505_s6] sm:$0xf] %vm320_vm1, %v312_v14  ;;  %v278_v16 = vpop.f32.mrf.mxu2  ;;  %v283_v17 = vpop.f32.mrf.mxu3 }
  0x98   : > { %323 = vst.msk [vmem:[%s505_s6 + $0x8] sm:$0xf] %vm320_vm1, %v314_v15  ;;  %v296_v18 = vmul.f32 %v444_v6, %v278_v16  ;;  %v298_v19 = vmul.f32 %v444_v6, %v283_v17  ;;  %v270_v20 = vpop.f32.mrf.mxu0  ;;  %v275_v21 = vpop.f32.mrf.mxu1 }
  0x99   : > { %v293_v22 = vmul.f32 %v444_v6, %v270_v20  ;;  %v295_v23 = vmul.f32 %v444_v6, %v275_v21 }
  0x9a   : > { %v308_v24 = vadd.f32 %v445_v7, %v296_v18  ;;  %v310_v25 = vadd.f32 %v445_v7, %v298_v19 }
  0x9b   : > { %v305_v26 = vadd.f32 %v445_v7, %v293_v22  ;;  %v307_v27 = vadd.f32 %v445_v7, %v295_v23 }
  0x9c   : > { %v316_v28 = vpack.c.bf16 %v308_v24, %v308_v24  ;;  %v318_v29 = vpack.c.bf16 %v310_v25, %v310_v25 }
  0x9d   : > { %v313_v30 = vpack.c.bf16 %v305_v26, %v305_v26  ;;  %v315_v31 = vpack.c.bf16 %v307_v27, %v307_v27 }
  0x9e   : > { %325 = vst.msk [vmem:[%s505_s6 + $0x10] sm:$0xf] %vm320_vm1, %v316_v28 }
  0x9f   : > { %327 = vst.msk [vmem:[%s505_s6 + $0x18] sm:$0xf] %vm320_vm1, %v318_v29  ;;  %v280_v32 = vpop.f32.mrf.mxu2  ;;  %v285_v33 = vpop.f32.mrf.mxu3 }
  0xa0   : > { %322 = vst.msk [vmem:[%s505_s6 + $0x4] sm:$0xf] %vm320_vm1, %v313_v30  ;;  %v297_v34 = vmul.f32 %v444_v6, %v280_v32  ;;  %v299_v35 = vmul.f32 %v444_v6, %v285_v33 }
  0xa1   : > { %324 = vst.msk [vmem:[%s505_s6 + $0xc] sm:$0xf] %vm320_vm1, %v315_v31 }
  0xa2   : > { %v309_v36 = vadd.f32 %v445_v7, %v297_v34  ;;  %v311_v37 = vadd.f32 %v445_v7, %v299_v35 }
  0xa4   : > { %v317_v38 = vpack.c.bf16 %v309_v36, %v309_v36  ;;  %v319_v39 = vpack.c.bf16 %v311_v37, %v311_v37 }
  0xa6   : > { %326 = vst.msk [vmem:[%s505_s6 + $0x14] sm:$0xf] %vm320_vm1, %v317_v38 }
  0xa7   : > { %328 = vst.msk [vmem:[%s505_s6 + $0x1c] sm:$0xf] %vm320_vm1, %v319_v39 }
  0xa8 PF: > { %s14_s15 = sadd.s32 1, %s452_s15  }
  0xa9   : > { %p11_p4 = scmp.ge.s32.totalorder %s14_s15, 4  }
  0xab   :  { %13 = sbr.rel (!%p11_p4) target bundleno = 1 (0x1), region = 66 }

// kernel: _lambda_.31
= control target key start
LH: loop header
LB: loop body
LE: loop exit
PB: predicated region body
PF: predicated region fallthrough
CT: control target
= control target key end

     0   :  { %s796_s21 = smov 0   ;;  %s970_s0 = inlined_call_operand.vmem [shape: bf16[32,64], index: 0, kind: input, shape index: {}]   ;;  %s971_s1 = inlined_call_operand.vmem [shape: bf16[64,256], index: 1, kind: input, shape index: {}]   ;;  %s972_s2 = inlined_call_operand.vmem [shape: f32[1,256], index: 2, kind: input, shape index: {}]   ;;  %s973_s3 = inlined_call_operand.vmem [shape: f32[1,256], index: 3, kind: input, shape index: {}]   ;;  %s974_s4 = inlined_call_operand.vmem [shape: f32[1,64], index: 4, kind: input, shape index: {}]   ;;  %s975_s5 = inlined_call_operand.vmem [shape: f32[1,64], index: 5, kind: input, shape index: {}]   ;;  %s976_s6 = inlined_call_operand.vmem [shape: bf16[32,256], index: 6, kind: output, shape index: {}]  }
   0x1 LB: > { %s664_s22 = sadd.s32 4294967295, %s758_s21   ;;  %p668_p0 = scmp.ge.s32.totalorder %s758_s21, 1  ;;  %s758_s21 = sphi %s796_s21, %s16_s21  }
   0x2   : > { %p213_p1 = scmp.lt.s32.totalorder %s758_s21, 3 }
   0x4   : > { %p214_p2 = pnand %p668_p0, %p213_p1 }
   0x5   : > { %s669_s23 = sshll.u32 (!%p214_p2), %s664_s22, 1 }
   0x6   : > { %217 = sbr.rel (%p214_p2) target bundleno = 490 (0x1ea), region = 44  ;;  %p245_p3 = scmp.lt.s32.totalorder (!%p214_p2), %s669_s23, 3 }
   0xb   : > { %s978_s23 = smov (!%p245_p3, %s669_s23), 3  ;;  %vm262_vm0 = vcmask 523264   ;;  %v760_v5 = vmov 64.0   ;;  %v700_v22 = vld [vmem:[%s971_s1 + $0x30] sm:$0xf] }
   0xc   : > { %s670_s24 = sshll.u32 %s978_s23, 2  ;;  %738 = vrcp.f32 %v760_v5  ;;  %v722_v23 = vld [vmem:[%s971_s1 + $0x34] sm:$0xf0]  ;;  %v721_v24 = vld [vmem:[%s971_s1 + $0x34] sm:$0xf] }
   0xd   : > { %s248_s27 = scalar_lea.vmem %s970_s0, %s670_s24  ;;  %v701_v25 = vor.u32 %v722_v23, %v700_v22  ;;  %v702_v26 = vld [vmem:[%s971_s1 + $0x38] sm:$0xf0]  ;;  %v692_v28 = vld [vmem:[%s971_s1 + $0x20] sm:$0xf]  ;;  %v720_v29 = vld [vmem:[%s971_s1 + $0x24] sm:$0xf0] }
   0xe   : > { %v724_v0 = vld [vmem:[%s248_s27] sm:$0xff]   ;;  %v705_v27 = vor.u32 %v721_v24, %v702_v26  ;;  %v693_v31 = vor.u32 %v720_v29, %v692_v28  ;;  %v694_v32 = vld [vmem:[%s971_s1 + $0x28] sm:$0xf0]  ;;  %v684_v34 = vld [vmem:[%s971_s1 + $0x10] sm:$0xf]  ;;  %s714_s24 = sshll.u32 %s978_s23, 3 }
   0xf   : > { %v725_v1 = vunpack.c.l.bf16 %v724_v0  ;;  %v726_v3 = vunpack.c.h.bf16 %v724_v0  ;;  %382 = vmatpush.bf16.msra.mxu0 %v701_v25  ;;  %v719_v30 = vld [vmem:[%s971_s1 + $0x24] sm:$0xf]  ;;  %v718_v35 = vld [vmem:[%s971_s1 + $0x14] sm:$0xf0]  ;;  %v717_v36 = vld [vmem:[%s971_s1 + $0x14] sm:$0xf]  ;;  %s958_s27 = scalar_lea.vmem %s976_s6, %s714_s24 }
  0x10   : > { %396 = vmatpush.bf16.msra.mxu1 %v705_v27  ;;  %v697_v33 = vor.u32 %v719_v30, %v694_v32  ;;  %v685_v37 = vor.u32 %v718_v35, %v684_v34  ;;  %v686_v38 = vld [vmem:[%s971_s1 + $0x18] sm:$0xf0]  ;;  %v676_v40 = vld [vmem:[%s971_s1] sm:$0xf]  ;;  %v716_v41 = vld [vmem:[%s971_s1 + $0x4] sm:$0xf0] }
  0x11   : > { %v263_v2 = vsel %vm262_vm0, %v725_v1, 0.0  ;;  %v266_v4 = vsel %vm262_vm0, %v726_v3, 0.0  ;;  %v689_v39 = vor.u32 %v717_v36, %v686_v38  ;;  %v715_v42 = vld [vmem:[%s971_s1 + $0x4] sm:$0xf]  ;;  %v677_v44 = vor.u32 %v716_v41, %v676_v40  ;;  %v678_v45 = vld [vmem:[%s971_s1 + $0x8] sm:$0xf0] }
  0x12   : > { %264 = vadd.xlane.f32.xlu0 %v263_v2  ;;  %v739_v6 = vpop.eup %738  ;;  %v681_v47 = vor.u32 %v715_v42, %v678_v45 }
  0x13   : > { %v270_v7 = vmul.f32 64.0, %v739_v6  ;;  %vm274_vm1 = vweird.f32 %v739_v6  ;;  %383 = vmatpush.bf16.msra.mxu0 %v693_v31 }
  0x14   : > { %397 = vmatpush.bf16.msra.mxu1 %v697_v33 }
  0x15   : > { %v271_v8 = vsub.f32 1.0, %v270_v7 }
  0x17   : > { %v272_v9 = vmul.f32 %v739_v6, %v271_v8  ;;  %384 = vmatpush.bf16.msra.mxu0 %v685_v37 }
  0x18   : > { %398 = vmatpush.bf16.msra.mxu1 %v689_v39 }
  0x19   : > { %v273_v10 = vadd.f32 %v739_v6, %v272_v9 }
  0x1a   : > { %267 = vadd.xlane.f32.xlu0 %v266_v4 }
  0x1b   : > { %v275_v11 = vsel %vm274_vm1, %v739_v6, %v273_v10  ;;  %385 = vmatpush.bf16.msra.mxu0 %v677_v44  ;;  %v737_v6 = vld [vmem:[%s975_s5] ss:$0 sm:$0xff] }
  0x1c   : > { %399 = vmatpush.bf16.msra.mxu1 %v681_v47 }
  0x85   : > { %v265_v12 = vpop.xlane.xlu0 %264 }
  0x86   : > { %v276_v13 = vmul.f32 %v275_v11, %v265_v12  ;;  %v416_v12 = vld [vmem:[%s973_s3] sm:$0x3] }
  0x88   : > { %v812_v14 = vsub.f32 %v725_v1, %v276_v13  ;;  %v736_v1 = vld [vmem:[%s974_s4] ss:$0 sm:$0xff] }
  0x8a   : > { %v280_v15 = vmul.f32 %v812_v14, %v812_v14 }
  0x8c   : > { %v282_v16 = vsel %vm262_vm0, %v280_v15, 0.0  ;;  %v418_v15 = vperm.slane %v416_v12, 0 }
  0x8d   : > { %283 = vadd.xlane.f32.xlu1 %v282_v16  ;;  %v268_v17 = vpop.xlane.xlu0 %267  ;;  %v419_v16 = vperm.slane %v416_v12, 1 }
  0x8e   : > { %v277_v18 = vmul.f32 %v275_v11, %v268_v17 }
  0x90   : > { %v817_v19 = vsub.f32 %v726_v3, %v277_v18 }
  0x92   : > { %v281_v20 = vmul.f32 %v817_v19, %v817_v19 }
  0x94   : > { %v285_v21 = vsel %vm262_vm0, %v281_v20, 0.0 }
  0x95   : > { %286 = vadd.xlane.f32.xlu1 %v285_v21 }
 0x100   : > { %v284_v43 = vpop.xlane.xlu1 %283 }
 0x101   : > { %v288_v46 = vmul.f32 %v284_v43, %v275_v11 }
 0x103   : > { %v290_v48 = vadd.f32 1e-05, %v288_v46 }
 0x105   : > { %740 = vrsqrt.f32 %v290_v48  ;;  %vm298_vm3 = vweird.f32 %v290_v48 }
 0x108   : > { %v287_v49 = vpop.xlane.xlu1 %286 }
 0x109   : > { %v289_v50 = vmul.f32 %v287_v49, %v275_v11  ;;  %v406_v11 = vld [vmem:[%s972_s2] sm:$0x3] }
 0x10a   : > { %v408_v13 = vperm.slane %v406_v11, 0 }
 0x10b   : > { %v741_v51 = vpop.eup %740  ;;  %v291_v52 = vadd.f32 1e-05, %v289_v50 }
 0x10c   : > { %v293_v53 = vmul.f32 %v741_v51, %v290_v48  ;;  %vm299_vm2 = vweird.f32 %v741_v51 }
 0x10d   : > { %742 = vrsqrt.f32 %v291_v52  ;;  %vm300_vm4 = vmor %vm298_vm3, %vm299_vm2  ;;  %vm308_vm6 = vweird.f32 %v291_v52 }
 0x10e   : > { %v294_v54 = vmul.f32 %v741_v51, %v293_v53 }
 0x110   : > { %v295_v55 = vmul.f32 0.5, %v294_v54 }
 0x112   : > { %v296_v56 = vsub.f32 1.5, %v295_v55 }
 0x113   : > { %v743_v57 = vpop.eup %742 }
 0x114   : > { %v297_v58 = vmul.f32 %v741_v51, %v296_v56  ;;  %v303_v59 = vmul.f32 %v743_v57, %v291_v52  ;;  %vm309_vm5 = vweird.f32 %v743_v57 }
 0x115   : > { %vm310_vm7 = vmor %vm308_vm6, %vm309_vm5 }
 0x116   : > { %v304_v60 = vmul.f32 %v743_v57, %v303_v59  ;;  %v301_v61 = vsel %vm300_vm4, %v741_v51, %v297_v58 }
 0x117   : > { %v312_v0 = vmul.f32 %v301_v61, %v812_v14  ;;  %v409_v14 = vperm.slane %v406_v11, 1 }
 0x118   : > { %v305_v62 = vmul.f32 0.5, %v304_v60 }
 0x119   : > { %v318_v5 = vmul.f32 %v736_v1, %v312_v0 }
 0x11a   : > { %v306_v63 = vsub.f32 1.5, %v305_v62 }
 0x11b   : > { %v324_v8 = vadd.f32 %v737_v6, %v318_v5 }
 0x11c   : > { %v307_v2 = vmul.f32 %v743_v57, %v306_v63 }
 0x11e   : > { %v311_v3 = vsel %vm310_vm7, %v743_v57, %v307_v2 }
 0x11f   : > { %v313_v4 = vmul.f32 %v311_v3, %v817_v19 }
 0x121   : > { %v319_v7 = vmul.f32 %v736_v1, %v313_v4 }
 0x123   : > { %v325_v9 = vadd.f32 %v737_v6, %v319_v7 }
 0x125   : > { %v326_v10 = vpack.c.bf16 %v325_v9, %v324_v8 }
 0x127   : > { %706 = vmatmul.msk.bf16.vlgmr.msra.gmra.mxu0 %vm262_vm0, %v326_v10  ;;  %707 = vmatmul.msk.bf16.vlgmr.msra.gmra.mxu1 %vm262_vm0, %v326_v10 }
 0x1a4   : > { %v387_v17 = vpop.f32.mrf.mxu0  ;;  %v401_v18 = vpop.f32.mrf.mxu1 }
 0x1a5   : > { %v412_v19 = vmul.f32 %v408_v13, %v387_v17  ;;  %v413_v20 = vmul.f32 %v409_v14, %v401_v18 }
 0x1a7   : > { %v886_v21 = vadd.f32 %v418_v15, %v412_v19  ;;  %v888_v22 = vadd.f32 %v419_v16, %v413_v20 }
 0x1a9   : > { %v891_v23 = vmul.f32 0.70710677, %v886_v21  ;;  %v894_v24 = vmul.f32 0.70710677, %v888_v22 }
 0x1ab   : > { %v434_v25 = vmul.f32 %v891_v23, %v891_v23  ;;  %v474_v26 = vmul.f32 %v894_v24, %v894_v24 }
 0x1ac   : > { %v389_v27 = vpop.f32.mrf.mxu0  ;;  %v403_v28 = vpop.f32.mrf.mxu1 }
 0x1ad   : > { %v435_v29 = vmin.f32 %v434_v25, 16.0  ;;  %v900_v30 = vmin.f32 %v474_v26, 16.0  ;;  %v414_v31 = vmul.f32 %v408_v13, %v389_v27  ;;  %v415_v32 = vmul.f32 %v409_v14, %v403_v28 }
 0x1af   : > { %v436_v33 = vmul.f32 2.1237322e-06, %v435_v29  ;;  %v447_v34 = vmul.f32 3.8918573e-05, %v435_v29  ;;  %v476_v35 = vmul.f32 2.1237322e-06, %v900_v30  ;;  %v903_v36 = vadd.f32 %v418_v15, %v414_v31 }
 0x1b0   : > { %v487_v37 = vmul.f32 3.8918573e-05, %v900_v30  ;;  %v906_v38 = vadd.f32 %v419_v16, %v415_v32 }
 0x1b1   : > { %v437_v39 = vadd.f32 0.00028619796, %v436_v33  ;;  %v448_v40 = vadd.f32 0.001143296, %v447_v34  ;;  %v477_v41 = vadd.f32 0.00028619796, %v476_v35 }
 0x1b2   : > { %v488_v42 = vadd.f32 0.001143296, %v487_v37  ;;  %v909_v43 = vmul.f32 0.70710677, %v903_v36  ;;  %v913_v47 = vmul.f32 0.70710677, %v906_v38 }
 0x1b3   : > { %v438_v44 = vmul.f32 %v437_v39, %v435_v29  ;;  %v449_v45 = vmul.f32 %v448_v40, %v435_v29  ;;  %v478_v46 = vmul.f32 %v477_v41, %v900_v30 }
 0x1b4   : > { %v489_v48 = vmul.f32 %v488_v42, %v900_v30  ;;  %v514_v49 = vmul.f32 %v909_v43, %v909_v43  ;;  %v554_v53 = vmul.f32 %v913_v47, %v913_v47 }
 0x1b5   : > { %v439_v50 = vadd.f32 0.0036580483, %v438_v44  ;;  %v450_v51 = vadd.f32 0.014752088, %v449_v45  ;;  %v479_v52 = vadd.f32 0.0036580483, %v478_v46 }
 0x1b6   : > { %v490_v54 = vadd.f32 0.014752088, %v489_v48  ;;  %v920_v55 = vmin.f32 %v514_v49, 16.0  ;;  %v926_v62 = vmin.f32 %v554_v53, 16.0 }
 0x1b7   : > { %v440_v56 = vmul.f32 %v439_v50, %v435_v29  ;;  %v451_v57 = vmul.f32 %v450_v51, %v435_v29  ;;  %v480_v58 = vmul.f32 %v479_v52, %v900_v30 }
 0x1b8   : > { %v491_v59 = vmul.f32 %v490_v54, %v900_v30  ;;  %v516_v60 = vmul.f32 2.1237322e-06, %v920_v55  ;;  %v527_v61 = vmul.f32 3.8918573e-05, %v920_v55  ;;  %v567_v10 = vmul.f32 3.8918573e-05, %v926_v62 }
 0x1b9   : > { %v441_v63 = vadd.f32 0.05243302, %v440_v56  ;;  %v452_v0 = vadd.f32 0.112945676, %v451_v57  ;;  %v481_v6 = vadd.f32 0.05243302, %v480_v58 }
 0x1ba   : > { %v492_v1 = vadd.f32 0.112945676, %v491_v59  ;;  %v517_v2 = vadd.f32 0.00028619796, %v516_v60  ;;  %v528_v3 = vadd.f32 0.001143296, %v527_v61 }
 0x1bb   : > { %v442_v4 = vmul.f32 %v441_v63, %v435_v29  ;;  %v453_v5 = vmul.f32 %v452_v0, %v435_v29  ;;  %v556_v12 = vmul.f32 2.1237322e-06, %v926_v62  ;;  %v482_v17 = vmul.f32 %v481_v6, %v900_v30 }
 0x1bc   : > { %v493_v7 = vmul.f32 %v492_v1, %v900_v30  ;;  %v518_v8 = vmul.f32 %v517_v2, %v920_v55  ;;  %v529_v9 = vmul.f32 %v528_v3, %v920_v55  ;;  %v568_v25 = vadd.f32 0.001143296, %v567_v10 }
 0x1bd   : > { %v454_v11 = vadd.f32 0.4994258, %v453_v5  ;;  %v443_v15 = vadd.f32 0.18741608, %v442_v4  ;;  %v557_v27 = vadd.f32 0.00028619796, %v556_v12 }
 0x1be   : > { %v494_v13 = vadd.f32 0.4994258, %v493_v7  ;;  %v530_v14 = vadd.f32 0.014752088, %v529_v9  ;;  %v519_v19 = vadd.f32 0.0036580483, %v518_v8  ;;  %v569_v32 = vmul.f32 %v568_v25, %v926_v62 }
 0x1bf   : > { %v455_v16 = vmul.f32 %v454_v11, %v435_v29  ;;  %v444_v33 = vmul.f32 %v443_v15, %v435_v29  ;;  %v483_v34 = vadd.f32 0.18741608, %v482_v17  ;;  %v558_v37 = vmul.f32 %v557_v27, %v926_v62 }
 0x1c0   : > { %v495_v18 = vmul.f32 %v494_v13, %v900_v30  ;;  %v531_v20 = vmul.f32 %v530_v14, %v920_v55  ;;  %v520_v35 = vmul.f32 %v519_v19, %v920_v55  ;;  %v570_v40 = vadd.f32 0.014752088, %v569_v32 }
 0x1c1   : > { %v456_v26 = vadd.f32 1.0, %v455_v16  ;;  %v445_v41 = vadd.f32 1.1283791, %v444_v33  ;;  %v484_v42 = vmul.f32 %v483_v34, %v900_v30  ;;  %v559_v49 = vadd.f32 0.0036580483, %v558_v37 }
 0x1c2   : > { %v496_v28 = vadd.f32 1.0, %v495_v18  ;;  %v532_v31 = vadd.f32 0.112945676, %v531_v20  ;;  %v521_v44 = vadd.f32 0.05243302, %v520_v35  ;;  %v571_v46 = vmul.f32 %v570_v40, %v926_v62 }
 0x1c3   : > { %744 = vrcp.f32 %v456_v26  ;;  %v446_v52 = vmul.f32 %v445_v41, %v891_v23  ;;  %v485_v53 = vadd.f32 1.1283791, %v484_v42  ;;  %v466_v58 = vand.u32 2147483647, %v456_v26 }
 0x1c4   : > { %746 = vrcp.f32 %v496_v28  ;;  %v533_v39 = vmul.f32 %v532_v31, %v920_v55  ;;  %v572_v56 = vadd.f32 0.112945676, %v571_v46  ;;  %v522_v59 = vmul.f32 %v521_v44, %v920_v55 }
 0x1c5   : > { %v468_v60 = vand.u32 2147483648, %v456_v26  ;;  %v560_v63 = vmul.f32 %v559_v49, %v926_v62  ;;  %v508_v2 = vand.u32 2147483648, %v496_v28  ;;  %v506_v23 = vand.u32 2147483647, %v496_v28 }
 0x1c6   : > { %v534_v45 = vadd.f32 0.4994258, %v533_v39  ;;  %v573_v0 = vmul.f32 %v572_v56, %v926_v62  ;;  %vm462_vm10 = vweird.f32 %v456_v26  ;;  %vm502_vm11 = vweird.f32 %v496_v28 }
 0x1c7   : > { %v523_v6 = vadd.f32 0.18741608, %v522_v59  ;;  %v469_v7 = vor.u32 1.1754944e-38, %v468_v60  ;;  %v561_v9 = vadd.f32 0.05243302, %v560_v63  ;;  %vm467_vm13 = vcmp.eq.f32.partialorder %v466_v58, 8.507059e+37 }
 0x1c8   : > { %v535_v51 = vmul.f32 %v534_v45, %v920_v55  ;;  %v574_v4 = vadd.f32 0.4994258, %v573_v0  ;;  %v486_v12 = vmul.f32 %v485_v53, %v894_v24  ;;  %v509_v13 = vor.u32 1.1754944e-38, %v508_v2 }
 0x1c9   : > { %v745_v48 = vpop.eup %744  ;;  %vm507_vm15 = vcmp.eq.f32.partialorder %v506_v23, 8.507059e+37  ;;  %v524_v20 = vmul.f32 %v523_v6, %v920_v55  ;;  %v562_v27 = vmul.f32 %v561_v9, %v926_v62  ;;  %v426_v24 = vmul.f32 0.5, %v886_v21 }
 0x1ca   : > { %v747_v29 = vpop.eup %746  ;;  %v458_v50 = vmul.f32 %v745_v48, %v456_v26  ;;  %v536_v30 = vadd.f32 1.0, %v535_v51  ;;  %vm463_vm8 = vweird.f32 %v745_v48  ;;  %v575_v10 = vmul.f32 %v574_v4, %v926_v62 }
 0x1cb   : > { %v498_v54 = vmul.f32 %v747_v29, %v496_v28  ;;  %vm503_vm9 = vweird.f32 %v747_v29  ;;  %vm464_vm12 = vmor %vm462_vm10, %vm463_vm8  ;;  %v427_v31 = vmul.f32 0.5, %v888_v22  ;;  %v525_v35 = vadd.f32 1.1283791, %v524_v20 }
 0x1cc   : > { %v459_v57 = vsub.f32 1.0, %v458_v50  ;;  %748 = vrcp.f32 %v536_v30  ;;  %vm504_vm14 = vmor %vm502_vm11, %vm503_vm9  ;;  %v576_v16 = vadd.f32 1.0, %v575_v10  ;;  %v546_v37 = vand.u32 2147483647, %v536_v30 }
 0x1cd   : > { %v499_v61 = vsub.f32 1.0, %v498_v54  ;;  %v548_v39 = vand.u32 2147483648, %v536_v30  ;;  %v563_v55 = vadd.f32 0.18741608, %v562_v27  ;;  %vm542_vm1 = vweird.f32 %v536_v30 }
 0x1ce   : > { %v460_v1 = vmul.f32 %v745_v48, %v459_v57  ;;  %750 = vrcp.f32 %v576_v16  ;;  %v526_v21 = vmul.f32 %v525_v35, %v909_v43  ;;  %vm547_vm3 = vcmp.eq.f32.partialorder %v546_v37, 8.507059e+37 }
 0x1cf   : > { %v500_v3 = vmul.f32 %v747_v29, %v499_v61  ;;  %v549_v22 = vor.u32 1.1754944e-38, %v548_v39  ;;  %v588_v54 = vand.u32 2147483648, %v576_v16  ;;  %v586_v58 = vand.u32 2147483647, %v576_v16 }
 0x1d0   : > { %v461_v5 = vadd.f32 %v745_v48, %v460_v1  ;;  %vm582_vm5 = vweird.f32 %v576_v16  ;;  %v428_v1 = vmul.f32 0.5, %v903_v36  ;;  %v429_v23 = vmul.f32 0.5, %v906_v38 }
 0x1d1   : > { %v501_v8 = vadd.f32 %v747_v29, %v500_v3  ;;  %v589_v43 = vor.u32 1.1754944e-38, %v588_v54  ;;  %vm587_vm7 = vcmp.eq.f32.partialorder %v586_v58, 8.507059e+37 }
 0x1d2   : > { %v465_v11 = vsel %vm464_vm12, %v745_v48, %v461_v5  ;;  %v749_v17 = vpop.eup %748 }
 0x1d3   : > { %v470_v14 = vsel %vm467_vm13, %v469_v7, %v465_v11  ;;  %v505_v15 = vsel %vm504_vm14, %v747_v29, %v501_v8  ;;  %v538_v26 = vmul.f32 %v749_v17, %v536_v30  ;;  %vm543_vm0 = vweird.f32 %v749_v17 }
 0x1d4   : > { %v471_v18 = vmul.f32 %v470_v14, %v446_v52  ;;  %v510_v19 = vsel %vm507_vm15, %v509_v13, %v505_v15  ;;  %v751_v46 = vpop.eup %750  ;;  %vm544_vm2 = vmor %vm542_vm1, %vm543_vm0  ;;  %v564_v29 = vmul.f32 %v563_v55, %v926_v62 }
 0x1d5   : > { %v511_v25 = vmul.f32 %v510_v19, %v486_v12  ;;  %v539_v33 = vsub.f32 1.0, %v538_v26  ;;  %v578_v50 = vmul.f32 %v751_v46, %v576_v16  ;;  %vm583_vm4 = vweird.f32 %v751_v46 }
 0x1d6   : > { %v708_v28 = vclamps-f32 %v471_v18, 1.0  ;;  %v565_v56 = vadd.f32 1.1283791, %v564_v29  ;;  %vm584_vm6 = vmor %vm582_vm5, %vm583_vm4 }
 0x1d7   : > { %v709_v32 = vclamps-f32 %v511_v25, 1.0  ;;  %v540_v41 = vmul.f32 %v749_v17, %v539_v33  ;;  %v579_v53 = vsub.f32 1.0, %v578_v50 }
 0x1d8   : > { %v594_v34 = vadd.f32 1.0, %v708_v28  ;;  %v566_v60 = vmul.f32 %v565_v56, %v913_v47 }
 0x1d9   : > { %v595_v40 = vadd.f32 1.0, %v709_v32  ;;  %v541_v45 = vadd.f32 %v749_v17, %v540_v41  ;;  %v580_v57 = vmul.f32 %v751_v46, %v579_v53 }
 0x1da   : > { %v598_v42 = vmul.f32 %v594_v34, %v426_v24 }
 0x1db   : > { %v599_v44 = vmul.f32 %v595_v40, %v427_v31  ;;  %v545_v49 = vsel %vm544_vm2, %v749_v17, %v541_v45  ;;  %v581_v30 = vadd.f32 %v751_v46, %v580_v57 }
 0x1dc   : > { %v550_v51 = vsel %vm547_vm3, %v549_v22, %v545_v49 }
 0x1dd   : > { %v602_v48 = vpack.c.bf16 %v599_v44, %v598_v42  ;;  %v551_v52 = vmul.f32 %v550_v51, %v526_v21  ;;  %v585_v61 = vsel %vm584_vm6, %v751_v46, %v581_v30 }
 0x1de   : > { %v590_v62 = vsel %vm587_vm7, %v589_v43, %v585_v61 }
 0x1df   : > { %604 = vst [vmem:[%s958_s27] sm:$0xff] %v602_v48  ;;  %v710_v59 = vclamps-f32 %v551_v52, 1.0  ;;  %v591_v0 = vmul.f32 %v590_v62, %v566_v60 }
 0x1e1   : > { %v596_v63 = vadd.f32 1.0, %v710_v59  ;;  %v711_v2 = vclamps-f32 %v591_v0, 1.0 }
 0x1e3   : > { %v600_v3 = vmul.f32 %v596_v63, %v428_v1  ;;  %v597_v4 = vadd.f32 1.0, %v711_v2 }
 0x1e5   : > { %v601_v5 = vmul.f32 %v597_v4, %v429_v23 }
 0x1e7   : > { %v603_v6 = vpack.c.bf16 %v601_v5, %v600_v3 }
 0x1e9   : > { %605 = vst [vmem:[%s958_s27 + $0x8] sm:$0xff] %v603_v6 }
 0x1ea PF: > { %s16_s21 = sadd.s32 1, %s758_s21  }
 0x1eb   : > { %p13_p4 = scmp.ge.s32.totalorder %s16_s21, 4  }
 0x1ed   :  { %15 = sbr.rel (!%p13_p4) target bundleno = 1 (0x1), region = 74 }

// kernel: _lambda_.32
= control target key start
LH: loop header
LB: loop body
LE: loop exit
PB: predicated region body
PF: predicated region fallthrough
CT: control target
= control target key end

     0   :  { %s591_s15 = smov 0   ;;  %s666_s0 = inlined_call_operand.vmem [shape: bf16[32,256], index: 0, kind: input, shape index: {}]   ;;  %s667_s1 = inlined_call_operand.vmem [shape: bf16[256,64], index: 1, kind: input, shape index: {}]   ;;  %s668_s2 = inlined_call_operand.vmem [shape: f32[1,64], index: 2, kind: input, shape index: {}]   ;;  %s669_s3 = inlined_call_operand.vmem [shape: f32[1,64], index: 3, kind: input, shape index: {}]   ;;  %s670_s4 = inlined_call_operand.vmem [shape: bf16[32,64], index: 4, kind: output, shape index: {}]  }
   0x1 LB: > { %s445_s16 = sadd.s32 4294967295, %s564_s15   ;;  %p449_p0 = scmp.ge.s32.totalorder %s564_s15, 1  ;;  %s564_s15 = sphi %s591_s15, %s14_s15  }
   0x2   : > { %p164_p1 = scmp.lt.s32.totalorder %s564_s15, 3 }
   0x4   : > { %p165_p2 = pnand %p449_p0, %p164_p1 }
   0x5   : > { %s450_s29 = sshll.u32 (!%p165_p2), %s445_s16, 1 }
   0x6   : > { %168 = sbr.rel (%p165_p2) target bundleno = 187 (0xbb), region = 36  ;;  %p192_p3 = scmp.lt.s32.totalorder (!%p165_p2), %s450_s29, 3 }
   0xb   : > { %v539_v0 = vld [vmem:[%s667_s1 + $0x38] sm:$0xff]  ;;  %v538_v2 = vld [vmem:[%s667_s1 + $0x30] sm:$0xff]  ;;  %v537_v4 = vld [vmem:[%s667_s1 + $0x28] sm:$0xff]  ;;  %s672_s29 = smov (!%p192_p3, %s450_s29), 3  ;;  %vm386_vm0 = vcmask 519168  }
   0xc   : > { %v547_v1 = vld [vmem:[%s667_s1 + $0x78] sm:$0xff]  ;;  %344 = vmatpush.bf16.msra.mxu0 %v539_v0  ;;  %v546_v3 = vld [vmem:[%s667_s1 + $0x70] sm:$0xff]  ;;  %v545_v5 = vld [vmem:[%s667_s1 + $0x68] sm:$0xff]  ;;  %s529_s17 = sshll.u32 %s672_s29, 3  ;;  %s454_s8 = sshll.u32 %s672_s29, 2 }
   0xd   : > { %358 = vmatpush.bf16.msra.mxu1 %v547_v1  ;;  %v536_v6 = vld [vmem:[%s667_s1 + $0x20] sm:$0xff]  ;;  %v535_v8 = vld [vmem:[%s667_s1 + $0x18] sm:$0xff]  ;;  %v534_v10 = vld [vmem:[%s667_s1 + $0x10] sm:$0xff]  ;;  %s196_s24 = scalar_lea.vmem %s666_s0, %s529_s17  ;;  %s202_s11 = scalar_lea.vmem %s670_s4, %s454_s8 }
   0xe   : > { %v544_v7 = vld [vmem:[%s667_s1 + $0x60] sm:$0xff]  ;;  %v543_v9 = vld [vmem:[%s667_s1 + $0x58] sm:$0xff]  ;;  %v542_v11 = vld [vmem:[%s667_s1 + $0x50] sm:$0xff] }
   0xf   : > { %v533_v12 = vld [vmem:[%s667_s1 + $0x8] sm:$0xff]  ;;  %v532_v14 = vld [vmem:[%s667_s1] sm:$0xff] }
  0x10   : > { %345 = vmatpush.bf16.msra.mxu0 %v538_v2  ;;  %v541_v13 = vld [vmem:[%s667_s1 + $0x48] sm:$0xff]  ;;  %v540_v15 = vld [vmem:[%s667_s1 + $0x40] sm:$0xff] }
  0x11   : > { %359 = vmatpush.bf16.msra.mxu1 %v546_v3  ;;  %v457_v16 = vld [vmem:[%s196_s24] sm:$0xf]  ;;  %v531_v17 = vld [vmem:[%s196_s24 + $0x4] sm:$0xf0]  ;;  %v530_v18 = vld [vmem:[%s196_s24 + $0x4] sm:$0xf] }
  0x12   : > { %v459_v19 = vld [vmem:[%s196_s24 + $0x8] sm:$0xf0]  ;;  %v458_v20 = vor.u32 %v531_v17, %v457_v16  ;;  %v556_v22 = vld [vmem:[%s668_s2] ss:$0 sm:$0xff] }
  0x13   : > { %v462_v21 = vor.u32 %v530_v18, %v459_v19  ;;  %v557_v26 = vld [vmem:[%s669_s3] ss:$0 sm:$0xff] }
  0x14   : > { %346 = vmatpush.bf16.msra.mxu0 %v537_v4 }
  0x15   : > { %360 = vmatpush.bf16.msra.mxu1 %v545_v5 }
  0x18   : > { %347 = vmatpush.bf16.msra.mxu0 %v536_v6 }
  0x19   : > { %361 = vmatpush.bf16.msra.mxu1 %v544_v7 }
  0x1c   : > { %348 = vmatpush.bf16.msra.mxu0 %v535_v8 }
  0x1d   : > { %362 = vmatpush.bf16.msra.mxu1 %v543_v9 }
  0x20   : > { %349 = vmatpush.bf16.msra.mxu0 %v534_v10 }
  0x21   : > { %363 = vmatpush.bf16.msra.mxu1 %v542_v11 }
  0x24   : > { %350 = vmatpush.bf16.msra.mxu0 %v533_v12 }
  0x25   : > { %364 = vmatpush.bf16.msra.mxu1 %v541_v13 }
  0x28   : > { %351 = vmatpush.bf16.msra.mxu0 %v532_v14 }
  0x29   : > { %365 = vmatpush.bf16.msra.mxu1 %v540_v15 }
  0x2b   : > { %352 = vmatmul.bf16.vlgmr.msra.gmra.mxu0 %v458_v20 }
  0x2c   : > { %366 = vmatmul.bf16.vlgmr.msra.gmra.mxu1 %v462_v21 }
  0xa8   : > { %v353_v23 = vpop.f32.mrf.mxu0 }
  0xa9   : > { %v367_v24 = vpop.f32.mrf.mxu1 }
  0xaa   : > { %v368_v25 = vadd.f32 %v367_v24, %v353_v23 }
  0xac   : > { %v376_v27 = vmul.f32 %v556_v22, %v368_v25 }
  0xae   : > { %v382_v28 = vadd.f32 %v557_v26, %v376_v27 }
  0xb0   : > { %v384_v29 = vpack.c.bf16 %v382_v28, %v382_v28  ;;  %v355_v30 = vpop.f32.mrf.mxu0 }
  0xb1   : > { %v369_v31 = vpop.f32.mrf.mxu1 }
  0xb2   : > { %387 = vst.msk [vmem:[%s202_s11] sm:$0xf] %vm386_vm0, %v384_v29  ;;  %v370_v32 = vadd.f32 %v369_v31, %v355_v30 }
  0xb4   : > { %v377_v33 = vmul.f32 %v556_v22, %v370_v32 }
  0xb6   : > { %v383_v34 = vadd.f32 %v557_v26, %v377_v33 }
  0xb8   : > { %v385_v35 = vpack.c.bf16 %v383_v34, %v383_v34 }
  0xba   : > { %388 = vst.msk [vmem:[%s202_s11 + $0x4] sm:$0xf] %vm386_vm0, %v385_v35 }
  0xbb PF: > { %s14_s15 = sadd.s32 1, %s564_s15  }
  0xbc   : > { %p11_p4 = scmp.ge.s32.totalorder %s14_s15, 4  }
  0xbe   :  { %13 = sbr.rel (!%p11_p4) target bundleno = 1 (0x1), region = 66 }

// kernel: _lambda_.29
= control target key start
LH: loop header
LB: loop body
LE: loop exit
PB: predicated region body
PF: predicated region fallthrough
CT: control target
= control target key end

     0   :  { %s588_s21 = smov 0   ;;  %s648_s0 = inlined_call_operand.vmem [shape: bf16[32,128], index: 0, kind: input, shape index: {}]   ;;  %s649_s1 = inlined_call_operand.vmem [shape: bf16[128,64], index: 1, kind: input, shape index: {}]   ;;  %s650_s2 = inlined_call_operand.vmem [shape: f32[1,64], index: 2, kind: input, shape index: {}]   ;;  %s651_s3 = inlined_call_operand.vmem [shape: f32[1,64], index: 3, kind: input, shape index: {}]   ;;  %s652_s4 = inlined_call_operand.vmem [shape: f32[1,128], index: 4, kind: input, shape index: {}]   ;;  %s653_s5 = inlined_call_operand.vmem [shape: f32[1,128], index: 5, kind: input, shape index: {}]   ;;  %s654_s6 = inlined_call_operand.vmem [shape: bf16[32,64], index: 6, kind: output, shape index: {}]  }
   0x1 LB: > { %s470_s22 = sadd.s32 4294967295, %s550_s21   ;;  %p474_p0 = scmp.ge.s32.totalorder %s550_s21, 1  ;;  %s550_s21 = sphi %s588_s21, %s16_s21  }
   0x2   : > { %p213_p1 = scmp.lt.s32.totalorder %s550_s21, 3 }
   0x4   : > { %p214_p2 = pnand %p474_p0, %p213_p1 }
   0x5   : > { %s475_s23 = sshll.u32 (!%p214_p2), %s470_s22, 1 }
   0x6   : > { %217 = sbr.rel (%p214_p2) target bundleno = 434 (0x1b2), region = 44  ;;  %p244_p3 = scmp.lt.s32.totalorder (!%p214_p2), %s475_s23, 3 }
   0xb   : > { %s656_s23 = smov (!%p244_p3, %s475_s23), 3  ;;  %v552_v3 = vmov 128.0   ;;  %v520_v18 = vld [vmem:[%s649_s1 + $0x38] sm:$0xff]  ;;  %v519_v19 = vld [vmem:[%s649_s1 + $0x30] sm:$0xff]  ;;  %v518_v20 = vld [vmem:[%s649_s1 + $0x28] sm:$0xff]  ;;  %vm411_vm7 = vcmask 519168  }
   0xc   : > { %s476_s24 = sshll.u32 %s656_s23, 2  ;;  %538 = vrcp.f32 %v552_v3  ;;  %383 = vmatpush.bf16.msra.mxu0 %v520_v18  ;;  %v517_v21 = vld [vmem:[%s649_s1 + $0x20] sm:$0xff]  ;;  %v516_v22 = vld [vmem:[%s649_s1 + $0x18] sm:$0xff]  ;;  %v515_v23 = vld [vmem:[%s649_s1 + $0x10] sm:$0xff] }
   0xd   : > { %s247_s27 = scalar_lea.vmem %s648_s0, %s476_s24  ;;  %v514_v24 = vld [vmem:[%s649_s1 + $0x8] sm:$0xff]  ;;  %v513_v26 = vld [vmem:[%s649_s1] sm:$0xff]  ;;  %s253_s9 = scalar_lea.vmem %s654_s6, %s476_s24 }
   0xe   : > { %v522_v0 = vld [vmem:[%s247_s27] sm:$0xff]  }
   0xf   : > { %v523_v1 = vunpack.c.l.bf16 %v522_v0  ;;  %v524_v2 = vunpack.c.h.bf16 %v522_v0  ;;  %v534_v45 = vld [vmem:[%s652_s4] ss:$0 sm:$0xff] }
  0x10   : > { %384 = vmatpush.bf16.msra.mxu0 %v519_v19  ;;  %v535_v50 = vld [vmem:[%s653_s5] ss:$0 sm:$0xff] }
  0x11   : > { %259 = vadd.xlane.f32.xlu0 %v523_v1  ;;  %v536_v55 = vld [vmem:[%s650_s2] ss:$0 sm:$0xff] }
  0x12   : > { %v539_v4 = vpop.eup %538  ;;  %v537_v56 = vld [vmem:[%s651_s3] ss:$0 sm:$0xff] }
  0x13   : > { %v264_v5 = vmul.f32 128.0, %v539_v4  ;;  %vm268_vm0 = vweird.f32 %v539_v4 }
  0x14   : > { %385 = vmatpush.bf16.msra.mxu0 %v518_v20 }
  0x15   : > { %v265_v6 = vsub.f32 1.0, %v264_v5 }
  0x17   : > { %v266_v7 = vmul.f32 %v539_v4, %v265_v6 }
  0x18   : > { %386 = vmatpush.bf16.msra.mxu0 %v517_v21 }
  0x19   : > { %261 = vadd.xlane.f32.xlu0 %v524_v2  ;;  %v267_v8 = vadd.f32 %v539_v4, %v266_v7 }
  0x1b   : > { %v269_v9 = vsel %vm268_vm0, %v539_v4, %v267_v8 }
  0x1c   : > { %387 = vmatpush.bf16.msra.mxu0 %v516_v22 }
  0x20   : > { %388 = vmatpush.bf16.msra.mxu0 %v515_v23 }
  0x24   : > { %389 = vmatpush.bf16.msra.mxu0 %v514_v24 }
  0x28   : > { %390 = vmatpush.bf16.msra.mxu0 %v513_v26 }
  0x84   : > { %v260_v10 = vpop.xlane.xlu0 %259 }
  0x85   : > { %v270_v11 = vmul.f32 %v269_v9, %v260_v10 }
  0x87   : > { %v272_v12 = vsub.f32 %v523_v1, %v270_v11 }
  0x89   : > { %v274_v13 = vmul.f32 %v272_v12, %v272_v12 }
  0x8b   : > { %276 = vadd.xlane.f32.xlu1 %v274_v13 }
  0x8c   : > { %v262_v14 = vpop.xlane.xlu0 %261 }
  0x8d   : > { %v271_v15 = vmul.f32 %v269_v9, %v262_v14 }
  0x8f   : > { %v273_v16 = vsub.f32 %v524_v2, %v271_v15 }
  0x91   : > { %v275_v17 = vmul.f32 %v273_v16, %v273_v16 }
  0x93   : > { %278 = vadd.xlane.f32.xlu1 %v275_v17 }
  0xfe   : > { %v277_v25 = vpop.xlane.xlu1 %276 }
  0xff   : > { %v280_v27 = vmul.f32 %v277_v25, %v269_v9 }
 0x101   : > { %v282_v28 = vadd.f32 1e-05, %v280_v27 }
 0x103   : > { %540 = vrsqrt.f32 %v282_v28  ;;  %vm290_vm2 = vweird.f32 %v282_v28 }
 0x106   : > { %v279_v29 = vpop.xlane.xlu1 %278 }
 0x107   : > { %v281_v30 = vmul.f32 %v279_v29, %v269_v9 }
 0x109   : > { %v541_v31 = vpop.eup %540  ;;  %v283_v32 = vadd.f32 1e-05, %v281_v30 }
 0x10a   : > { %v285_v33 = vmul.f32 %v541_v31, %v282_v28  ;;  %vm291_vm1 = vweird.f32 %v541_v31 }
 0x10b   : > { %542 = vrsqrt.f32 %v283_v32  ;;  %vm292_vm3 = vmor %vm290_vm2, %vm291_vm1  ;;  %vm300_vm5 = vweird.f32 %v283_v32 }
 0x10c   : > { %v286_v34 = vmul.f32 %v541_v31, %v285_v33 }
 0x10e   : > { %v287_v35 = vmul.f32 0.5, %v286_v34 }
 0x110   : > { %v288_v36 = vsub.f32 1.5, %v287_v35 }
 0x111   : > { %v543_v37 = vpop.eup %542 }
 0x112   : > { %v289_v38 = vmul.f32 %v541_v31, %v288_v36  ;;  %v295_v39 = vmul.f32 %v543_v37, %v283_v32  ;;  %vm301_vm4 = vweird.f32 %v543_v37 }
 0x113   : > { %vm302_vm6 = vmor %vm300_vm5, %vm301_vm4 }
 0x114   : > { %v296_v40 = vmul.f32 %v543_v37, %v295_v39  ;;  %v293_v42 = vsel %vm292_vm3, %v541_v31, %v289_v38 }
 0x115   : > { %v304_v44 = vmul.f32 %v293_v42, %v272_v12 }
 0x116   : > { %v297_v41 = vmul.f32 0.5, %v296_v40 }
 0x117   : > { %v310_v49 = vmul.f32 %v534_v45, %v304_v44 }
 0x118   : > { %v298_v43 = vsub.f32 1.5, %v297_v41 }
 0x119   : > { %v316_v52 = vadd.f32 %v535_v50, %v310_v49 }
 0x11a   : > { %v299_v46 = vmul.f32 %v543_v37, %v298_v43 }
 0x11c   : > { %v303_v47 = vsel %vm302_vm6, %v543_v37, %v299_v46 }
 0x11d   : > { %v305_v48 = vmul.f32 %v303_v47, %v273_v16 }
 0x11f   : > { %v311_v51 = vmul.f32 %v534_v45, %v305_v48 }
 0x121   : > { %v317_v53 = vadd.f32 %v535_v50, %v311_v51 }
 0x123   : > { %v318_v54 = vpack.c.bf16 %v317_v53, %v316_v52 }
 0x125   : > { %391 = vmatmul.bf16.vlgmr.msra.gmra.mxu0 %v318_v54 }
 0x1a2   : > { %v392_v57 = vpop.f32.mrf.mxu0 }
 0x1a3   : > { %v401_v58 = vmul.f32 %v536_v55, %v392_v57 }
 0x1a5   : > { %v407_v59 = vadd.f32 %v537_v56, %v401_v58 }
 0x1a7   : > { %v409_v60 = vpack.c.bf16 %v407_v59, %v407_v59 }
 0x1a9   : > { %412 = vst.msk [vmem:[%s253_s9] sm:$0xf] %vm411_vm7, %v409_v60 }
 0x1aa   : > { %v394_v61 = vpop.f32.mrf.mxu0 }
 0x1ab   : > { %v402_v62 = vmul.f32 %v536_v55, %v394_v61 }
 0x1ad   : > { %v408_v63 = vadd.f32 %v537_v56, %v402_v62 }
 0x1af   : > { %v410_v0 = vpack.c.bf16 %v408_v63, %v408_v63 }
 0x1b1   : > { %413 = vst.msk [vmem:[%s253_s9 + $0x4] sm:$0xf] %vm411_vm7, %v410_v0 }
 0x1b2 PF: > { %s16_s21 = sadd.s32 1, %s550_s21  }
 0x1b3   : > { %p13_p4 = scmp.ge.s32.totalorder %s16_s21, 4  }
 0x1b5   :  { %15 = sbr.rel (!%p13_p4) target bundleno = 1 (0x1), region = 74 }

// kernel: _lambda_.30
= control target key start
LH: loop header
LB: loop body
LE: loop exit
PB: predicated region body
PF: predicated region fallthrough
CT: control target
= control target key end

     0   :  { %s1151_s27 = smov 0   ;;  %s1342_s0 = inlined_call_operand.vmem [shape: bf16[2,16,64], index: 0, kind: input, shape index: {}]   ;;  %s1343_s1 = inlined_call_operand.vmem [shape: bf16[64,192], index: 1, kind: input, shape index: {}]   ;;  %s1344_s2 = inlined_call_operand.vmem [shape: f32[1,192], index: 2, kind: input, shape index: {}]   ;;  %s1345_s3 = inlined_call_operand.vmem [shape: f32[1,4,16,16], index: 3, kind: input, shape index: {}]   ;;  %s1346_s4 = inlined_call_operand.vmem [shape: bf16[64,64], index: 4, kind: input, shape index: {}]   ;;  %s1347_s5 = inlined_call_operand.vmem [shape: f32[1,64], index: 5, kind: input, shape index: {}, may-alias: {5,7}]   ;;  %s1348_s6 = inlined_call_operand.vmem [shape: f32[1,64], index: 6, kind: input, shape index: {}]   ;;  %s1349_s7 = inlined_call_operand.vmem [shape: f32[1,64], index: 7, kind: input, shape index: {}, may-alias: {5,7}]   ;;  %s1350_s8 = inlined_call_operand.vmem [shape: bf16[2,16,64], index: 8, kind: output, shape index: {}]  }
   0x1 LB: > { %s930_s28 = sadd.s32 4294967295, %s1096_s27   ;;  %p934_p0 = scmp.ge.s32.totalorder %s1096_s27, 1  ;;  %s1096_s27 = sphi %s1151_s27, %s18_s27  }
   0x2   : > { %p262_p1 = scmp.lt.s32.totalorder %s1096_s27, 3 }
   0x4   : > { %p263_p2 = pnand %p934_p0, %p262_p1 }
   0x5   : > { %p296_p3 = scmp.lt.s32.totalorder (!%p263_p2), %s930_s28, 1  ;;  %s1099_s11 = smov (!%p263_p2), 48  }
   0x6   : > { %266 = sbr.rel (%p263_p2) target bundleno = 1792 (0x700), region = 52  ;;  %s1100_s12 = smov (!%p263_p2), 64  }
   0x7   : > { %s1101_s17 = smov (!%p263_p2), 80   ;;  %s1102_s18 = smov (!%p263_p2), 16  }
   0x8   : > { %s1103_s19 = smov (!%p263_p2), 112   ;;  %s1104_s20 = smov (!%p263_p2), 96  }
   0x9   : > { %s1105_s21 = smov (!%p263_p2), 32  }
   0xb   : > { %s1352_s28 = smov (!%p296_p3, %s930_s28), 1  ;;  %vm311_vm0 = vcmask 523264   ;;  %v1098_v5 = vmov 64.0   ;;  %v965_v22 = vld [vmem:[%s1343_s1 + $0x30] sm:$0xf]  ;;  %vm486_vm8 = vcmask 130048  }
   0xc   : > { %s1000_s29 = sshll.u32 %s1352_s28, 3  ;;  %1052 = vrcp.f32 %v1098_v5  ;;  %v1009_v23 = vld [vmem:[%s1343_s1 + $0x34] sm:$0xf0]  ;;  %v1008_v24 = vld [vmem:[%s1343_s1 + $0x34] sm:$0xf]  ;;  %vm804_vm9 = vcmask 261120  }
   0xd   : > { %s300_s10 = scalar_lea.vmem %s1342_s0, %s1000_s29  ;;  %v966_v25 = vor.u32 %v1009_v23, %v965_v22  ;;  %v967_v26 = vld [vmem:[%s1343_s1 + $0x38] sm:$0xf0]  ;;  %v957_v28 = vld [vmem:[%s1343_s1 + $0x20] sm:$0xf]  ;;  %v1007_v29 = vld [vmem:[%s1343_s1 + $0x24] sm:$0xf0]  ;;  %s305_s30 = scalar_lea.vmem %s1350_s8, %s1000_s29 }
   0xe   : > { %v1015_v0 = vld [vmem:[%s300_s10] sm:$0xff]   ;;  %v970_v27 = vor.u32 %v1008_v24, %v967_v26  ;;  %v958_v31 = vor.u32 %v1007_v29, %v957_v28  ;;  %v959_v32 = vld [vmem:[%s1343_s1 + $0x28] sm:$0xf0]  ;;  %v949_v34 = vld [vmem:[%s1343_s1 + $0x10] sm:$0xf]  ;;  %vm807_vm10 = vcmask 392192  }
   0xf   : > { %v1016_v1 = vunpack.c.l.bf16 %v1015_v0  ;;  %v1017_v3 = vunpack.c.h.bf16 %v1015_v0  ;;  %443 = vmatpush.bf16.msra.mxu0 %v966_v25  ;;  %v1006_v30 = vld [vmem:[%s1343_s1 + $0x24] sm:$0xf]  ;;  %v1005_v35 = vld [vmem:[%s1343_s1 + $0x14] sm:$0xf0]  ;;  %v1004_v36 = vld [vmem:[%s1343_s1 + $0x14] sm:$0xf] }
  0x10   : > { %457 = vmatpush.bf16.msra.mxu1 %v970_v27  ;;  %v962_v33 = vor.u32 %v1006_v30, %v959_v32  ;;  %v950_v38 = vor.u32 %v1005_v35, %v949_v34  ;;  %v951_v39 = vld [vmem:[%s1343_s1 + $0x18] sm:$0xf0]  ;;  %v941_v42 = vld [vmem:[%s1343_s1] sm:$0xf]  ;;  %v1003_v43 = vld [vmem:[%s1343_s1 + $0x4] sm:$0xf0] }
  0x11   : > { %v312_v2 = vsel %vm311_vm0, %v1016_v1, 0.0  ;;  %v315_v4 = vsel %vm311_vm0, %v1017_v3, 0.0  ;;  %v954_v41 = vor.u32 %v1004_v36, %v951_v39  ;;  %v1002_v44 = vld [vmem:[%s1343_s1 + $0x4] sm:$0xf]  ;;  %v943_v45 = vld [vmem:[%s1343_s1 + $0x8] sm:$0xf0]  ;;  %v942_v47 = vor.u32 %v1003_v43, %v941_v42 }
  0x12   : > { %313 = vadd.xlane.f32.xlu0 %v312_v2  ;;  %v1053_v6 = vpop.eup %1052  ;;  %v946_v48 = vor.u32 %v1002_v44, %v943_v45  ;;  %v1049_v63 = vld [vmem:[%s1348_s6] ss:$0 sm:$0xff]  ;;  %v468_v44 = vld [vmem:[%s1345_s3 + $0x8] sm:$0xff]  ;;  %vm872_vm11 = vcmask 519168  }
  0x13   : > { %v319_v7 = vmul.f32 64.0, %v1053_v6  ;;  %vm323_vm1 = vweird.f32 %v1053_v6  ;;  %444 = vmatpush.bf16.msra.mxu0 %v958_v31 }
  0x14   : > { %458 = vmatpush.bf16.msra.mxu1 %v962_v33 }
  0x15   : > { %v320_v8 = vsub.f32 1.0, %v319_v7 }
  0x17   : > { %v321_v9 = vmul.f32 %v1053_v6, %v320_v8  ;;  %445 = vmatpush.bf16.msra.mxu0 %v950_v38 }
  0x18   : > { %459 = vmatpush.bf16.msra.mxu1 %v954_v41 }
  0x19   : > { %v322_v10 = vadd.f32 %v1053_v6, %v321_v9 }
  0x1a   : > { %316 = vadd.xlane.f32.xlu0 %v315_v4 }
  0x1b   : > { %v324_v11 = vsel %vm323_vm1, %v1053_v6, %v322_v10  ;;  %446 = vmatpush.bf16.msra.mxu0 %v942_v47 }
  0x1c   : > { %460 = vmatpush.bf16.msra.mxu1 %v946_v48 }
  0x85   : > { %v314_v12 = vpop.xlane.xlu0 %313 }
  0x86   : > { %v325_v13 = vmul.f32 %v324_v11, %v314_v12 }
  0x88   : > { %v1169_v14 = vsub.f32 %v1016_v1, %v325_v13 }
  0x8a   : > { %v329_v15 = vmul.f32 %v1169_v14, %v1169_v14 }
  0x8c   : > { %v331_v16 = vsel %vm311_vm0, %v329_v15, 0.0  ;;  %v385_v15 = vld [vmem:[%s1344_s2] sm:$0x3] }
  0x8d   : > { %332 = vadd.xlane.f32.xlu1 %v331_v16  ;;  %v317_v17 = vpop.xlane.xlu0 %316 }
  0x8e   : > { %v326_v18 = vmul.f32 %v324_v11, %v317_v17 }
  0x90   : > { %v1174_v19 = vsub.f32 %v1017_v3, %v326_v18  ;;  %v1050_v3 = vld [vmem:[%s1349_s7] ss:$0 sm:$0xff]  ;;  %v387_v18 = vperm.slane %v385_v15, 0 }
  0x92   : > { %v330_v20 = vmul.f32 %v1174_v19, %v1174_v19 }
  0x94   : > { %v334_v21 = vsel %vm311_vm0, %v330_v20, 0.0 }
  0x95   : > { %335 = vadd.xlane.f32.xlu1 %v334_v21 }
 0x100   : > { %v333_v37 = vpop.xlane.xlu1 %332 }
 0x101   : > { %v337_v40 = vmul.f32 %v333_v37, %v324_v11 }
 0x103   : > { %v339_v46 = vadd.f32 1e-05, %v337_v40  ;;  %v467_v40 = vld [vmem:[%s1345_s3] sm:$0xff] }
 0x105   : > { %1054 = vrsqrt.f32 %v339_v46  ;;  %vm347_vm3 = vweird.f32 %v339_v46 }
 0x108   : > { %v336_v49 = vpop.xlane.xlu1 %335 }
 0x109   : > { %v338_v50 = vmul.f32 %v336_v49, %v324_v11 }
 0x10b   : > { %v1055_v51 = vpop.eup %1054  ;;  %v340_v52 = vadd.f32 1e-05, %v338_v50 }
 0x10c   : > { %v342_v53 = vmul.f32 %v1055_v51, %v339_v46  ;;  %vm348_vm2 = vweird.f32 %v1055_v51 }
 0x10d   : > { %1056 = vrsqrt.f32 %v340_v52  ;;  %vm349_vm4 = vmor %vm347_vm3, %vm348_vm2  ;;  %vm357_vm6 = vweird.f32 %v340_v52 }
 0x10e   : > { %v343_v54 = vmul.f32 %v1055_v51, %v342_v53 }
 0x110   : > { %v344_v55 = vmul.f32 0.5, %v343_v54 }
 0x112   : > { %v345_v56 = vsub.f32 1.5, %v344_v55 }
 0x113   : > { %v1057_v57 = vpop.eup %1056 }
 0x114   : > { %v346_v58 = vmul.f32 %v1055_v51, %v345_v56  ;;  %v352_v59 = vmul.f32 %v1057_v57, %v340_v52  ;;  %vm358_vm5 = vweird.f32 %v1057_v57 }
 0x115   : > { %vm359_vm7 = vmor %vm357_vm6, %vm358_vm5 }
 0x116   : > { %v350_v60 = vsel %vm349_vm4, %v1055_v51, %v346_v58  ;;  %v353_v61 = vmul.f32 %v1057_v57, %v352_v59 }
 0x117   : > { %v361_v62 = vmul.f32 %v350_v60, %v1169_v14 }
 0x118   : > { %v354_v0 = vmul.f32 0.5, %v353_v61 }
 0x119   : > { %v367_v2 = vmul.f32 %v1049_v63, %v361_v62 }
 0x11a   : > { %v355_v1 = vsub.f32 1.5, %v354_v0 }
 0x11b   : > { %v373_v7 = vadd.f32 %v1050_v3, %v367_v2 }
 0x11c   : > { %v356_v4 = vmul.f32 %v1057_v57, %v355_v1 }
 0x11d   : > { %v375_v10 = vpack.c.bf16 %v373_v7, %v373_v7 }
 0x11e   : > { %v360_v5 = vsel %vm359_vm7, %v1057_v57, %v356_v4 }
 0x11f   : > { %v362_v6 = vmul.f32 %v360_v5, %v1174_v19  ;;  %v393_v12 = vunpack.c.l.b16 %v375_v10  ;;  %v388_v19 = vperm.slane %v385_v15, 1 }
 0x121   : > { %v368_v8 = vmul.f32 %v1049_v63, %v362_v6 }
 0x123   : > { %v374_v9 = vadd.f32 %v1050_v3, %v368_v8 }
 0x125   : > { %v376_v11 = vpack.c.bf16 %v374_v9, %v374_v9 }
 0x127   : > { %v394_v13 = vunpack.c.l.b16 %v376_v11 }
 0x129   : > { %v395_v14 = vpack.c.b16 %v394_v13, %v393_v12 }
 0x12b   : > { %971 = vmatmul.msk.bf16.vlgmr.msra.gmra.mxu0 %vm311_vm0, %v395_v14  ;;  %972 = vmatmul.msk.bf16.vlgmr.msra.gmra.mxu1 %vm311_vm0, %v395_v14  ;;  %v469_v14 = vld [vmem:[%s1345_s3 + $0x10] sm:$0xff] }
 0x1a8   : > { %v448_v16 = vpop.f32.mrf.mxu0  ;;  %v462_v17 = vpop.f32.mrf.mxu1 }
 0x1a9   : > { %v449_v20 = vadd.f32 %v448_v16, %v387_v18  ;;  %v463_v21 = vadd.f32 %v462_v17, %v388_v19 }
 0x1ab   : > { %v475_v24 = vpack.c.bf16 %v449_v20, %v449_v20  ;;  %v477_v25 = vpack.c.bf16 %v463_v21, %v463_v21 }
 0x1ad   : > { %v481_v30 = vunpack.c.l.b16 %v475_v24  ;;  %v538_v31 = vunpack.c.l.b16 %v477_v25  ;;  %v473_v24 = vld [vmem:[%s1345_s3 + $0x30] sm:$0xff] }
 0x1b0   : > { %v450_v22 = vpop.f32.mrf.mxu0  ;;  %v464_v23 = vpop.f32.mrf.mxu1 }
 0x1b1   : > { %v451_v26 = vadd.f32 %v450_v22, %v387_v18  ;;  %v465_v27 = vadd.f32 %v464_v23, %v388_v19  ;;  %v470_v18 = vld [vmem:[%s1345_s3 + $0x18] sm:$0xff]  ;;  %v471_v22 = vld [vmem:[%s1345_s3 + $0x20] sm:$0xff] }
 0x1b3   : > { %v476_v28 = vpack.c.bf16 %v451_v26, %v451_v26  ;;  %v478_v29 = vpack.c.bf16 %v465_v27, %v465_v27 }
 0x1b5   : > { %v482_v32 = vunpack.c.l.b16 %v476_v28  ;;  %v539_v33 = vunpack.c.l.b16 %v478_v29 }
 0x1b7   : > { %v483_v34 = vpack.c.b16 %v482_v32, %v481_v30  ;;  %v1240_v35 = vpack.c.b16 %v539_v33, %v538_v31  ;;  %v474_v30 = vld [vmem:[%s1345_s3 + $0x38] sm:$0xff] }
 0x1b9   : > { %552 = vmatpush.bf16.msra.mxu3 %v1240_v35  ;;  %561 = vrot.lane.b32.xlu1 %v483_v34, %s1099_s11 }
 0x1ba   : > { %484 = vrot.lane.b32.xlu2 %v483_v34, %s1100_s12 }
 0x214   : > { %v485_v36 = vpop.permute.xlu2 %484 }
 0x215   : > { %v491_v37 = vsel %vm486_vm8, %v485_v36, 0 }
 0x216   : > { %500 = vmatpush.bf16.xpose.msra.mxu2 %v491_v37 }
 0x21d   : > { %973 = vmatmul.msk.bf16.vlgmr.msra.gmra.mxu2 %vm486_vm8, %v483_v34 }
 0x22b   : > { %v562_v38 = vpop.permute.xlu1 %561 }
 0x22c   : > { %v567_v39 = vsel %vm486_vm8, %v562_v38, 0 }
 0x22d   : > { %576 = vmatpush.bf16.xpose.msrb.mxu3 %v567_v39 }
 0x2a0   : > { %v502_v41 = vpop.f32.mrf.mxu2 }
 0x2a1   : > { %v503_v42 = vadd.f32 %v502_v41, %v467_v40 }
 0x2a3   : > { %v507_v43 = vsel %vm486_vm8, %v503_v42, -inf }
 0x2a4   : > { %508 = vmax.xlane.f32.xlu2 %v507_v43 }
 0x2a8   : > { %v504_v45 = vpop.f32.mrf.mxu2 }
 0x2a9   : > { %v505_v46 = vadd.f32 %v504_v45, %v468_v44 }
 0x2ab   : > { %v510_v47 = vsel %vm486_vm8, %v505_v46, -inf }
 0x2ac   : > { %511 = vmax.xlane.f32.xlu0 %v510_v47 }
 0x2bc   : > { %705 = vrot.lane.b32.xlu2 %v483_v34, %s1101_s17 }
 0x317   : > { %v509_v48 = vpop.xlane.xlu2 %508 }
 0x318   : > { %v513_v49 = vsub.f32 %v503_v42, %v509_v48 }
 0x31a   : > { %v515_v50 = vmul.f32 1.442695, %v513_v49 }
 0x31c   : > { %1058 = vpow2.f32 %v515_v50 }
 0x31f   : > { %v512_v51 = vpop.xlane.xlu0 %511  ;;  %v706_v11 = vpop.permute.xlu2 %705 }
 0x320   : > { %v514_v52 = vsub.f32 %v505_v46, %v512_v51 }
 0x322   : > { %v1059_v53 = vpop.eup %1058  ;;  %v517_v54 = vmul.f32 1.442695, %v514_v52 }
 0x323   : > { %v519_v55 = vsel %vm486_vm8, %v1059_v53, 0.0 }
 0x324   : > { %1060 = vpow2.f32 %v517_v54  ;;  %520 = vadd.xlane.f32.xlu1 %v519_v55 }
 0x32a   : > { %v1061_v56 = vpop.eup %1060 }
 0x32b   : > { %v522_v57 = vsel %vm486_vm8, %v1061_v56, 0.0 }
 0x32c   : > { %523 = vadd.xlane.f32.xlu0 %v522_v57 }
 0x33d   : > { %707 = vrot.lane.b32.xlu1 %v483_v34, %s1102_s18 }
 0x340   : > { %559 = vrot.lane.b32.xlu0 %v483_v34, %s1103_s19 }
 0x345   : > { %632 = vrot.lane.b32.xlu1 %v483_v34, %s1104_s20 }
 0x348   : > { %634 = vrot.lane.b32.xlu0 %v483_v34, %s1105_s21  ;;  %v472_v34 = vld [vmem:[%s1345_s3 + $0x28] sm:$0xff] }
 0x397   : > { %v521_v58 = vpop.xlane.xlu1 %520 }
 0x398   : > { %1062 = vrcp.f32 %v521_v58 }
 0x39e   : > { %v1063_v60 = vpop.eup %1062 }
 0x39f   : > { %v524_v59 = vpop.xlane.xlu0 %523  ;;  %v527_v61 = vmul.f32 %v1063_v60, %v1059_v53 }
 0x3a0   : > { %1064 = vrcp.f32 %v524_v59 }
 0x3a1   : > { %v529_v0 = vpack.c.bf16 %v527_v61, %v527_v61 }
 0x3a3   : > { %v533_v2 = vunpack.c.l.b16 %v529_v0 }
 0x3a6   : > { %v1065_v62 = vpop.eup %1064 }
 0x3a7   : > { %v528_v63 = vmul.f32 %v1065_v62, %v1061_v56 }
 0x3a9   : > { %v530_v1 = vpack.c.bf16 %v528_v63, %v528_v63 }
 0x3ab   : > { %v534_v3 = vunpack.c.l.b16 %v530_v1 }
 0x3ad   : > { %v535_v4 = vpack.c.b16 %v534_v3, %v533_v2 }
 0x3af   : > { %974 = vmatmul.msk.bf16.vlgmr.msra.gmra.mxu3 %vm486_vm8, %v535_v4  ;;  %v708_v5 = vpop.permute.xlu1 %707 }
 0x3b0   : > { %v713_v6 = vsel %vm486_vm8, %v708_v5, 0 }
 0x3b1   : > { %722 = vmatpush.bf16.xpose.msra.mxu3 %v713_v6 }
 0x3b2   : > { %v560_v7 = vpop.permute.xlu0 %559 }
 0x3b7   : > { %v633_v10 = vpop.permute.xlu1 %632 }
 0x3ba   : > { %v635_v8 = vpop.permute.xlu0 %634 }
 0x3bb   : > { %v640_v9 = vsel %vm486_vm8, %v635_v8, 0 }
 0x3bc   : > { %649 = vmatpush.bf16.xpose.msrb.mxu0 %v640_v9 }
 0x3bf   : > { %975 = vmatmul.msk.bf16.vlgmr.msrb.gmra.mxu3 %vm486_vm8, %v560_v7 }
 0x3c3   : > { %977 = vmatmul.msk.bf16.vlgmr.msrb.gmra.mxu0 %vm486_vm8, %v633_v10 }
 0x3cf   : > { %979 = vmatmul.msk.bf16.vlgmr.msra.gmra.mxu3 %vm486_vm8, %v706_v11 }
 0x432   : > { %v1268_v12 = vpop.f32.mrf.mxu3 }
 0x43a   : > { %v1270_v13 = vpop.f32.mrf.mxu3 }
 0x440   : > { %v651_v23 = vpop.f32.mrf.mxu0 }
 0x441   : > { %v652_v25 = vadd.f32 %v651_v23, %v471_v22 }
 0x442   : > { %v578_v15 = vpop.f32.mrf.mxu3 }
 0x443   : > { %v579_v16 = vadd.f32 %v578_v15, %v469_v14  ;;  %v656_v28 = vsel %vm486_vm8, %v652_v25, -inf }
 0x445   : > { %v583_v17 = vsel %vm486_vm8, %v579_v16, -inf }
 0x446   : > { %584 = vmax.xlane.f32.xlu0 %v583_v17 }
 0x448   : > { %v653_v36 = vpop.f32.mrf.mxu0 }
 0x449   : > { %v654_v37 = vadd.f32 %v653_v36, %v472_v34 }
 0x44a   : > { %v580_v19 = vpop.f32.mrf.mxu3 }
 0x44b   : > { %v581_v20 = vadd.f32 %v580_v19, %v470_v18  ;;  %v659_v38 = vsel %vm486_vm8, %v654_v37, -inf }
 0x44d   : > { %v586_v21 = vsel %vm486_vm8, %v581_v20, -inf }
 0x44e   : > { %587 = vmax.xlane.f32.xlu1 %v586_v21 }
 0x452   : > { %v724_v26 = vpop.f32.mrf.mxu3 }
 0x453   : > { %v725_v27 = vadd.f32 %v724_v26, %v473_v24 }
 0x455   : > { %v729_v29 = vsel %vm486_vm8, %v725_v27, -inf }
 0x456   : > { %657 = vmax.xlane.f32.xlu1 %v656_v28  ;;  %730 = vmax.xlane.f32.xlu2 %v729_v29 }
 0x45a   : > { %v726_v31 = vpop.f32.mrf.mxu3 }
 0x45b   : > { %v727_v32 = vadd.f32 %v726_v31, %v474_v30 }
 0x45d   : > { %v732_v33 = vsel %vm486_vm8, %v727_v32, -inf }
 0x45e   : > { %733 = vmax.xlane.f32.xlu0 %v732_v33 }
 0x466   : > { %660 = vmax.xlane.f32.xlu0 %v659_v38 }
 0x47a   : > { %612 = vrot.lane.b32.xlu0 %v1240_v35, %s1103_s19 }
 0x482   : > { %758 = vrot.lane.b32.xlu0 %v1240_v35, %s1101_s17 }
 0x4b9   : > { %v585_v39 = vpop.xlane.xlu0 %584 }
 0x4ba   : > { %v589_v40 = vsub.f32 %v579_v16, %v585_v39 }
 0x4bc   : > { %v591_v41 = vmul.f32 1.442695, %v589_v40 }
 0x4be   : > { %1066 = vpow2.f32 %v591_v41 }
 0x4c1   : > { %v588_v42 = vpop.xlane.xlu1 %587 }
 0x4c2   : > { %v590_v43 = vsub.f32 %v581_v20, %v588_v42 }
 0x4c4   : > { %v1067_v44 = vpop.eup %1066  ;;  %v593_v45 = vmul.f32 1.442695, %v590_v43 }
 0x4c5   : > { %v595_v46 = vsel %vm486_vm8, %v1067_v44, 0.0 }
 0x4c6   : > { %1068 = vpow2.f32 %v593_v45  ;;  %596 = vadd.xlane.f32.xlu2 %v595_v46 }
 0x4c9   : > { %v658_v47 = vpop.xlane.xlu1 %657  ;;  %v731_v48 = vpop.xlane.xlu2 %730 }
 0x4ca   : > { %v662_v49 = vsub.f32 %v652_v25, %v658_v47  ;;  %v735_v52 = vsub.f32 %v725_v27, %v731_v48 }
 0x4cc   : > { %v1069_v50 = vpop.eup %1068  ;;  %v664_v51 = vmul.f32 1.442695, %v662_v49  ;;  %v737_v54 = vmul.f32 1.442695, %v735_v52  ;;  %v1013_v52 = vld [vmem:[%s1346_s4 + $0x18] sm:$0xff] }
 0x4cd   : > { %v598_v53 = vsel %vm486_vm8, %v1069_v50, 0.0  ;;  %860 = vmatpush.bf16.msra.mxu0 %v1013_v52 }
 0x4ce   : > { %1070 = vpow2.f32 %v664_v51  ;;  %599 = vadd.xlane.f32.xlu1 %v598_v53  ;;  %v1012_v53 = vld [vmem:[%s1346_s4 + $0x10] sm:$0xff] }
 0x4cf   : > { %1072 = vpow2.f32 %v737_v54  ;;  %v1011_v54 = vld [vmem:[%s1346_s4 + $0x8] sm:$0xff] }
 0x4d1   : > { %v734_v55 = vpop.xlane.xlu0 %733  ;;  %861 = vmatpush.bf16.msra.mxu0 %v1012_v53 }
 0x4d2   : > { %v736_v56 = vsub.f32 %v727_v32, %v734_v55  ;;  %v1010_v55 = vld [vmem:[%s1346_s4] sm:$0xff] }
 0x4d4   : > { %v1071_v57 = vpop.eup %1070  ;;  %v739_v58 = vmul.f32 1.442695, %v736_v56 }
 0x4d5   : > { %v668_v59 = vsel %vm486_vm8, %v1071_v57, 0.0  ;;  %v1073_v61 = vpop.eup %1072  ;;  %862 = vmatpush.bf16.msra.mxu0 %v1011_v54 }
 0x4d6   : > { %1074 = vpow2.f32 %v739_v58  ;;  %669 = vadd.xlane.f32.xlu2 %v668_v59  ;;  %v741_v2 = vsel %vm486_vm8, %v1073_v61, 0.0 }
 0x4d9   : > { %v661_v60 = vpop.xlane.xlu0 %660  ;;  %863 = vmatpush.bf16.msra.mxu0 %v1010_v55 }
 0x4da   : > { %v663_v62 = vsub.f32 %v654_v37, %v661_v60 }
 0x4dc   : > { %v1075_v63 = vpop.eup %1074  ;;  %v666_v0 = vmul.f32 1.442695, %v663_v62 }
 0x4dd   : > { %v744_v1 = vsel %vm486_vm8, %v1075_v63, 0.0 }
 0x4de   : > { %1076 = vpow2.f32 %v666_v0  ;;  %745 = vadd.xlane.f32.xlu1 %v744_v1  ;;  %742 = vadd.xlane.f32.xlu2 %v741_v2 }
 0x4e4   : > { %v1077_v3 = vpop.eup %1076 }
 0x4e5   : > { %v671_v4 = vsel %vm486_vm8, %v1077_v3, 0.0 }
 0x4e6   : > { %672 = vadd.xlane.f32.xlu1 %v671_v4 }
 0x4ec   : > { %v613_v5 = vpop.permute.xlu0 %612 }
 0x4ed   : > { %625 = vmatpush.bf16.msrb.mxu2 %v613_v5 }
 0x4f4   : > { %v759_v6 = vpop.permute.xlu0 %758 }
 0x4f5   : > { %771 = vmatpush.bf16.msra.mxu2 %v759_v6 }
 0x4f6   : > { %685 = vrot.lane.b32.xlu2 %v1240_v35, %s1104_s20 }
 0x539   : > { %v597_v7 = vpop.xlane.xlu2 %596 }
 0x53a   : > { %1078 = vrcp.f32 %v597_v7 }
 0x540   : > { %v1079_v9 = vpop.eup %1078 }
 0x541   : > { %v600_v8 = vpop.xlane.xlu1 %599  ;;  %v603_v10 = vmul.f32 %v1079_v9, %v1067_v44 }
 0x542   : > { %1080 = vrcp.f32 %v600_v8 }
 0x543   : > { %v605_v14 = vpack.c.bf16 %v603_v10, %v603_v10 }
 0x545   : > { %v609_v18 = vunpack.c.l.b16 %v605_v14 }
 0x548   : > { %v1081_v11 = vpop.eup %1080 }
 0x549   : > { %v604_v15 = vmul.f32 %v1081_v11, %v1069_v50  ;;  %v670_v16 = vpop.xlane.xlu2 %669 }
 0x54b   : > { %v606_v17 = vpack.c.bf16 %v604_v15, %v604_v15 }
 0x54d   : > { %v610_v19 = vunpack.c.l.b16 %v606_v17 }
 0x54f   : > { %v611_v20 = vpack.c.b16 %v610_v19, %v609_v18 }
 0x551   : > { %v746_v21 = vpop.xlane.xlu1 %745  ;;  %976 = vmatmul.msk.bf16.vlgmr.msrb.gmra.mxu2 %vm486_vm8, %v611_v20  ;;  %v743_v22 = vpop.xlane.xlu2 %742 }
 0x552   : > { %1082 = vrcp.f32 %v746_v21 }
 0x553   : > { %1084 = vrcp.f32 %v743_v22 }
 0x554   : > { %1086 = vrcp.f32 %v670_v16 }
 0x558   : > { %v1083_v35 = vpop.eup %1082 }
 0x559   : > { %v1085_v23 = vpop.eup %1084  ;;  %v750_v24 = vmul.f32 %v1083_v35, %v1075_v63  ;;  %v673_v25 = vpop.xlane.xlu1 %672 }
 0x55a   : > { %v686_v26 = vpop.permute.xlu2 %685  ;;  %v1087_v27 = vpop.eup %1086  ;;  %v749_v28 = vmul.f32 %v1085_v23, %v1073_v61  ;;  %1088 = vrcp.f32 %v673_v25 }
 0x55b   : > { %698 = vmatpush.bf16.msrb.mxu1 %v686_v26  ;;  %v752_v29 = vpack.c.bf16 %v750_v24, %v750_v24  ;;  %v676_v31 = vmul.f32 %v1087_v27, %v1071_v57 }
 0x55c   : > { %v751_v30 = vpack.c.bf16 %v749_v28, %v749_v28 }
 0x55d   : > { %v756_v32 = vunpack.c.l.b16 %v752_v29  ;;  %v678_v37 = vpack.c.bf16 %v676_v31, %v676_v31 }
 0x55e   : > { %v755_v33 = vunpack.c.l.b16 %v751_v30 }
 0x55f   : > { %v682_v40 = vunpack.c.l.b16 %v678_v37 }
 0x560   : > { %v1089_v34 = vpop.eup %1088  ;;  %v757_v36 = vpack.c.b16 %v756_v32, %v755_v33 }
 0x561   : > { %v677_v38 = vmul.f32 %v1089_v34, %v1077_v3 }
 0x562   : > { %980 = vmatmul.msk.bf16.vlgmr.msra.gmra.mxu2 %vm486_vm8, %v757_v36 }
 0x563   : > { %v679_v39 = vpack.c.bf16 %v677_v38, %v677_v38 }
 0x565   : > { %v683_v41 = vunpack.c.l.b16 %v679_v39 }
 0x567   : > { %v684_v42 = vpack.c.b16 %v683_v41, %v682_v40 }
 0x569   : > { %978 = vmatmul.msk.bf16.vlgmr.msrb.gmra.mxu1 %vm486_vm8, %v684_v42 }
 0x5d4   : > { %v627_v43 = vpop.f32.mrf.mxu2 }
 0x5dc   : > { %v629_v44 = vpop.f32.mrf.mxu2 }
 0x5dd   : > { %v1034_v45 = vpack.i.bf16 %v629_v44, %v627_v43 }
 0x5df   : > { %1035 = vrot.lane.b32.xlu1 %v1034_v45, %s1102_s18 }
 0x5e5   : > { %v773_v47 = vpop.f32.mrf.mxu2 }
 0x5e6   : > { %v700_v46 = vpop.f32.mrf.mxu1 }
 0x5ed   : > { %v775_v50 = vpop.f32.mrf.mxu2 }
 0x5ee   : > { %v702_v48 = vpop.f32.mrf.mxu1  ;;  %v1044_v51 = vpack.i.bf16 %v775_v50, %v773_v47 }
 0x5ef   : > { %v1039_v49 = vpack.i.bf16 %v702_v48, %v700_v46 }
 0x5f1   : > { %1040 = vrot.lane.b32.xlu0 %v1039_v49, %s1105_s21 }
 0x5f9   : > { %1045 = vrot.lane.b32.xlu0 %v1044_v51, %s1099_s11 }
 0x651   : > { %v1036_v57 = vpop.permute.xlu1 %1035 }
 0x652   : > { %v1038_v58 = vunpack.i.h.bf16 %v1036_v57  ;;  %v1037_v59 = vunpack.i.l.bf16 %v1036_v57 }
 0x654   : > { %v803_v63 = vsel %vm486_vm8, %v1270_v13, %v1038_v58  ;;  %v802_v0 = vsel %vm486_vm8, %v1268_v12, %v1037_v59  ;;  %v1051_v13 = vld [vmem:[%s1347_s5] ss:$0 sm:$0xff] }
 0x663   : > { %v1041_v56 = vpop.permute.xlu0 %1040 }
 0x664   : > { %v1043_v60 = vunpack.i.h.bf16 %v1041_v56  ;;  %v1042_v61 = vunpack.i.l.bf16 %v1041_v56 }
 0x666   : > { %v806_v3 = vsel %vm804_vm9, %v803_v63, %v1043_v60  ;;  %v805_v4 = vsel %vm804_vm9, %v802_v0, %v1042_v61 }
 0x66b   : > { %v1046_v62 = vpop.permute.xlu0 %1045 }
 0x66c   : > { %v1048_v1 = vunpack.i.h.bf16 %v1046_v62  ;;  %v1047_v2 = vunpack.i.l.bf16 %v1046_v62 }
 0x66e   : > { %v808_v5 = vsel %vm807_vm10, %v805_v4, %v1047_v2  ;;  %v809_v6 = vsel %vm807_vm10, %v806_v3, %v1048_v1 }
 0x66f   : > { %v810_v7 = vpack.c.bf16 %v808_v5, %v808_v5  ;;  %v811_v8 = vpack.c.bf16 %v809_v6, %v809_v6 }
 0x671   : > { %v826_v9 = vunpack.c.l.b16 %v810_v7  ;;  %v827_v10 = vunpack.c.l.b16 %v811_v8 }
 0x673   : > { %v828_v11 = vpack.c.b16 %v827_v10, %v826_v9 }
 0x675   : > { %997 = vmatmul.msk.bf16.vlgmr.msra.gmra.mxu0 %vm311_vm0, %v828_v11 }
 0x6f2   : > { %v865_v14 = vpop.f32.mrf.mxu0 }
 0x6f3   : > { %v866_v12 = vadd.f32 %v1051_v13, %v865_v14 }
 0x6f5   : > { %v870_v15 = vpack.c.bf16 %v866_v12, %v866_v12 }
 0x6f7   : > { %873 = vst.msk [vmem:[%s305_s30] sm:$0xf] %vm872_vm11, %v870_v15 }
 0x6fa   : > { %v867_v16 = vpop.f32.mrf.mxu0 }
 0x6fb   : > { %v868_v17 = vadd.f32 %v1051_v13, %v867_v16 }
 0x6fd   : > { %v871_v18 = vpack.c.bf16 %v868_v17, %v868_v17 }
 0x6ff   : > { %874 = vst.msk [vmem:[%s305_s30 + $0x4] sm:$0xf] %vm872_vm11, %v871_v18 }
 0x700 PF: > { %s18_s27 = sadd.s32 1, %s1096_s27  }
 0x701   : > { %p15_p4 = scmp.ge.s32.totalorder %s18_s27, 4  }
 0x703   :  { %17 = sbr.rel (!%p15_p4) target bundleno = 1 (0x1), region = 82 }

// kernel: _lambda_.36
= control target key start
LH: loop header
LB: loop body
LE: loop exit
PB: predicated region body
PF: predicated region fallthrough
CT: control target
= control target key end

     0   :  { %s416_s15 = smov 0   ;;  %s451_s0 = inlined_call_operand.vmem [shape: bf16[32,64], index: 0, kind: input, shape index: {}]   ;;  %s452_s1 = inlined_call_operand.vmem [shape: bf16[64,128], index: 1, kind: input, shape index: {}]   ;;  %s453_s2 = inlined_call_operand.vmem [shape: f32[1,128], index: 2, kind: input, shape index: {}]   ;;  %s454_s3 = inlined_call_operand.vmem [shape: f32[1,128], index: 3, kind: input, shape index: {}]   ;;  %s455_s4 = inlined_call_operand.vmem [shape: bf16[32,128], index: 4, kind: output, shape index: {}]  }
   0x1 LB: > { %s331_s16 = sadd.s32 4294967295, %s389_s15   ;;  %p335_p0 = scmp.ge.s32.totalorder %s389_s15, 1  ;;  %s389_s15 = sphi %s416_s15, %s14_s15  }
   0x2   : > { %p163_p1 = scmp.lt.s32.totalorder %s389_s15, 3 }
   0x4   : > { %p164_p2 = pnand %p335_p0, %p163_p1 }
   0x5   : > { %s336_s19 = sshll.u32 (!%p164_p2), %s331_s16, 1 }
   0x6   : > { %167 = sbr.rel (%p164_p2) target bundleno = 168 (0xa8), region = 36  ;;  %p190_p3 = scmp.lt.s32.totalorder (!%p164_p2), %s336_s19, 3 }
   0xb   : > { %v367_v0 = vld [vmem:[%s452_s1 + $0x18] sm:$0xff]  ;;  %v366_v1 = vld [vmem:[%s452_s1 + $0x10] sm:$0xff]  ;;  %s457_s19 = smov (!%p190_p3, %s336_s19), 3  ;;  %v365_v2 = vld [vmem:[%s452_s1 + $0x8] sm:$0xff]  ;;  %vm241_vm0 = vcmask 523264  }
   0xc   : > { %249 = vmatpush.bf16.msra.mxu0 %v367_v0  ;;  %s337_s24 = sshll.u32 %s457_s19, 2  ;;  %v364_v3 = vld [vmem:[%s452_s1] sm:$0xff] }
   0xd   : > { %s193_s29 = scalar_lea.vmem %s451_s0, %s337_s24  ;;  %v381_v6 = vld [vmem:[%s453_s2] ss:$0 sm:$0xff]  ;;  %s199_s10 = scalar_lea.vmem %s455_s4, %s337_s24 }
   0xe   : > { %v363_v4 = vld [vmem:[%s193_s29] sm:$0xff] }
   0xf   : > { %v382_v8 = vld [vmem:[%s454_s3] ss:$0 sm:$0xff] }
  0x10   : > { %250 = vmatpush.bf16.msra.mxu0 %v366_v1 }
  0x14   : > { %251 = vmatpush.bf16.msra.mxu0 %v365_v2 }
  0x18   : > { %252 = vmatpush.bf16.msra.mxu0 %v364_v3 }
  0x1b   : > { %360 = vmatmul.msk.bf16.vlgmr.msra.gmra.mxu0 %vm241_vm0, %v363_v4 }
  0x98   : > { %v254_v5 = vpop.f32.mrf.mxu0 }
  0x99   : > { %v263_v7 = vmul.f32 %v381_v6, %v254_v5 }
  0x9b   : > { %v269_v11 = vadd.f32 %v382_v8, %v263_v7 }
  0xa0   : > { %v256_v9 = vpop.f32.mrf.mxu0 }
  0xa1   : > { %v264_v10 = vmul.f32 %v381_v6, %v256_v9 }
  0xa3   : > { %v270_v12 = vadd.f32 %v382_v8, %v264_v10 }
  0xa5   : > { %v371_v13 = vpack.c.bf16 %v270_v12, %v269_v11 }
  0xa7   : > { %372 = vst [vmem:[%s199_s10] sm:$0xff] %v371_v13  }
  0xa8 PF: > { %s14_s15 = sadd.s32 1, %s389_s15  }
  0xa9   : > { %p11_p4 = scmp.ge.s32.totalorder %s14_s15, 4  }
  0xab   :  { %13 = sbr.rel (!%p11_p4) target bundleno = 1 (0x1), region = 66 }

// kernel: _lambda_.38
= control target key start
LH: loop header
LB: loop body
LE: loop exit
PB: predicated region body
PF: predicated region fallthrough
CT: control target
= control target key end

     0   :  { %s1235_s15 = smov 0   ;;  %s1463_s0 = inlined_call_operand.vmem [shape: bf16[128,576], index: 0, kind: input, shape index: {}]   ;;  %s1464_s1 = inlined_call_operand.vmem [shape: bf16[576,32], index: 1, kind: input, shape index: {}]   ;;  %s1465_s2 = inlined_call_operand.vmem [shape: f32[1,32], index: 2, kind: input, shape index: {}]   ;;  %s1466_s3 = inlined_call_operand.vmem [shape: f32[1,32], index: 3, kind: input, shape index: {}]   ;;  %s1467_s4 = inlined_call_operand.vmem [shape: bf16[128,32], index: 4, kind: output, shape index: {}]  }
   0x1 LB: > { %s880_s16 = sadd.s32 4294967295, %s1208_s15   ;;  %p884_p0 = scmp.ge.s32.totalorder %s1208_s15, 1  ;;  %s1208_s15 = sphi %s1235_s15, %s14_s15  }
   0x2   : > { %p164_p1 = scmp.lt.s32.totalorder %s1208_s15, 3 }
   0x4   : > { %p165_p2 = pnand %p884_p0, %p164_p1 }
   0x5   : > { %s885_s27 = sshll.u32 (!%p165_p2), %s880_s16, 3 }
   0x6   : > { %168 = sbr.rel (%p165_p2) target bundleno = 278 (0x116), region = 36  ;;  %p192_p3 = scmp.lt.s32.totalorder (!%p165_p2), %s885_s27, 15 }
   0xb   : > { %v1146_v0 = vld [vmem:[%s1464_s1 + $0x38] sm:$0xff]  ;;  %v1145_v1 = vld [vmem:[%s1464_s1 + $0x30] sm:$0xff]  ;;  %v1144_v4 = vld [vmem:[%s1464_s1 + $0x28] sm:$0xff]  ;;  %s1469_s27 = smov (!%p192_p3, %s885_s27), 15  ;;  %vm617_vm0 = vcmask 523264   ;;  %vm815_vm1 = vcmask 257024  }
   0xc   : > { %1175 = vmatpush.bf16.msra.mxu1 %v1146_v0  ;;  %1176 = vmatpush.bf16.msra.mxu2 %v1146_v0  ;;  %v1170_v2 = vld [vmem:[%s1464_s1 + $0xf8] sm:$0xff]  ;;  %v1169_v3 = vld [vmem:[%s1464_s1 + $0xf0] sm:$0xff]  ;;  %v1168_v5 = vld [vmem:[%s1464_s1 + $0xe8] sm:$0xff]  ;;  %s1191_s14 = smul.u32 20, %s1469_s27  ;;  %s888_s26 = sshll.u32 %s1469_s27, 2 }
   0xd   : > { %630 = vmatpush.bf16.msra.mxu0 %v1146_v0  ;;  %717 = vmatpush.bf16.msra.mxu3 %v1170_v2  ;;  %v1143_v6 = vld [vmem:[%s1464_s1 + $0x20] sm:$0xff]  ;;  %v1142_v8 = vld [vmem:[%s1464_s1 + $0x18] sm:$0xff]  ;;  %v1141_v10 = vld [vmem:[%s1464_s1 + $0x10] sm:$0xff]  ;;  %s1425_s30 = scalar_lea.vmem %s1467_s4, %s888_s26 }
   0xe   : > { %v1167_v7 = vld [vmem:[%s1464_s1 + $0xe0] sm:$0xff]  ;;  %v1166_v9 = vld [vmem:[%s1464_s1 + $0xd8] sm:$0xff]  ;;  %v1165_v11 = vld [vmem:[%s1464_s1 + $0xd0] sm:$0xff]  ;;  %s1288_s22 = scalar_lea.vmem %s1463_s0, %s1191_s14 }
   0xf   : > { %v1140_v12 = vld [vmem:[%s1464_s1 + $0x8] sm:$0xff]  ;;  %v1139_v14 = vld [vmem:[%s1464_s1] sm:$0xff]  ;;  %v1126_v16 = vld [vmem:[%s1288_s22 + $0x38] sm:$0xf0] }
  0x10   : > { %1177 = vmatpush.bf16.msra.mxu1 %v1145_v1  ;;  %1178 = vmatpush.bf16.msra.mxu2 %v1145_v1  ;;  %v1164_v13 = vld [vmem:[%s1464_s1 + $0xc8] sm:$0xff]  ;;  %v951_v17 = vld [vmem:[%s1288_s22 + $0x78] sm:$0xf]  ;;  %v891_v21 = vld [vmem:[%s1288_s22] sm:$0xf] }
  0x11   : > { %631 = vmatpush.bf16.msra.mxu0 %v1145_v1  ;;  %718 = vmatpush.bf16.msra.mxu3 %v1169_v3  ;;  %v911_v15 = vld [vmem:[%s1288_s22 + $0x28] sm:$0xf]  ;;  %v1136_v18 = vld [vmem:[%s1288_s22 + $0x88] sm:$0xf0]  ;;  %v1162_v19 = vld [vmem:[%s1464_s1 + $0xb8] sm:$0xff] }
  0x12   : > { %v1154_v20 = vld [vmem:[%s1464_s1 + $0x78] sm:$0xff]  ;;  %v1163_v22 = vld [vmem:[%s1464_s1 + $0xc0] sm:$0xff]  ;;  %v912_v23 = vor.u32 %v1126_v16, %v911_v15  ;;  %v952_v24 = vor.u32 %v1136_v18, %v951_v17  ;;  %v1121_v25 = vld [vmem:[%s1288_s22 + $0x10] sm:$0xf0] }
  0x13   : > { %v1120_v26 = vld [vmem:[%s1288_s22 + $0xc] sm:$0xf]  ;;  %v901_v27 = vld [vmem:[%s1288_s22 + $0x1c] sm:$0xf0]  ;;  %v1174_v28 = vld [vmem:[%s1464_s1 + $0x118] sm:$0xff]  ;;  %v892_v31 = vor.u32 %v1121_v25, %v891_v21 }
  0x14   : > { %1179 = vmatpush.bf16.msra.mxu1 %v1144_v4  ;;  %1180 = vmatpush.bf16.msra.mxu2 %v1144_v4  ;;  %v1161_v29 = vld [vmem:[%s1464_s1 + $0xb0] sm:$0xff]  ;;  %v904_v32 = vor.u32 %v1120_v26, %v901_v27  ;;  %v1160_v34 = vld [vmem:[%s1464_s1 + $0xa8] sm:$0xff]  ;;  %v1159_v37 = vld [vmem:[%s1464_s1 + $0xa0] sm:$0xff] }
  0x15   : > { %632 = vmatpush.bf16.msra.mxu0 %v1144_v4  ;;  %719 = vmatpush.bf16.msra.mxu3 %v1168_v5  ;;  %v1153_v30 = vld [vmem:[%s1464_s1 + $0x70] sm:$0xff]  ;;  %v1152_v35 = vld [vmem:[%s1464_s1 + $0x68] sm:$0xff]  ;;  %v1151_v38 = vld [vmem:[%s1464_s1 + $0x60] sm:$0xff] }
  0x16   : > { %v1173_v33 = vld [vmem:[%s1464_s1 + $0x110] sm:$0xff]  ;;  %v1172_v36 = vld [vmem:[%s1464_s1 + $0x108] sm:$0xff]  ;;  %v1131_v40 = vld [vmem:[%s1288_s22 + $0x60] sm:$0xf0] }
  0x17   : > { %v931_v39 = vld [vmem:[%s1288_s22 + $0x50] sm:$0xf]  ;;  %v1171_v41 = vld [vmem:[%s1464_s1 + $0x100] sm:$0xff]  ;;  %v1158_v42 = vld [vmem:[%s1464_s1 + $0x98] sm:$0xff] }
  0x18   : > { %1181 = vmatpush.bf16.msra.mxu1 %v1143_v6  ;;  %1182 = vmatpush.bf16.msra.mxu2 %v1143_v6  ;;  %v1150_v43 = vld [vmem:[%s1464_s1 + $0x58] sm:$0xff]  ;;  %v907_v44 = vld [vmem:[%s1288_s22 + $0x10] sm:$0xf]  ;;  %v932_v45 = vor.u32 %v1131_v40, %v931_v39  ;;  %v1123_v46 = vld [vmem:[%s1288_s22 + $0x20] sm:$0xf0] }
  0x19   : > { %633 = vmatpush.bf16.msra.mxu0 %v1143_v6  ;;  %720 = vmatpush.bf16.msra.mxu3 %v1167_v7  ;;  %v1125_v47 = vld [vmem:[%s1288_s22 + $0x34] sm:$0xf]  ;;  %v921_v48 = vld [vmem:[%s1288_s22 + $0x44] sm:$0xf0]  ;;  %v908_v51 = vor.u32 %v1123_v46, %v907_v44  ;;  %v1155_v55 = vld [vmem:[%s1464_s1 + $0x80] sm:$0xff] }
  0x1a   : > { %v1157_v49 = vld [vmem:[%s1464_s1 + $0x90] sm:$0xff]  ;;  %v924_v52 = vor.u32 %v1125_v47, %v921_v48  ;;  %v1156_v53 = vld [vmem:[%s1464_s1 + $0x88] sm:$0xff]  ;;  %v1147_v56 = vld [vmem:[%s1464_s1 + $0x40] sm:$0xff] }
  0x1b   : > { %v1149_v50 = vld [vmem:[%s1464_s1 + $0x50] sm:$0xff]  ;;  %v1148_v54 = vld [vmem:[%s1464_s1 + $0x48] sm:$0xff]  ;;  %v1122_v58 = vld [vmem:[%s1288_s22 + $0x18] sm:$0xf0] }
  0x1c   : > { %1183 = vmatpush.bf16.msra.mxu1 %v1142_v8  ;;  %1184 = vmatpush.bf16.msra.mxu2 %v1142_v8  ;;  %v899_v57 = vld [vmem:[%s1288_s22 + $0x8] sm:$0xf]  ;;  %v1119_v60 = vld [vmem:[%s1288_s22 + $0x4] sm:$0xf]  ;;  %v893_v61 = vld [vmem:[%s1288_s22 + $0x14] sm:$0xf0] }
  0x1d   : > { %634 = vmatpush.bf16.msra.mxu0 %v1142_v8  ;;  %721 = vmatpush.bf16.msra.mxu3 %v1166_v9  ;;  %v900_v59 = vor.u32 %v1122_v58, %v899_v57  ;;  %v927_v62 = vld [vmem:[%s1288_s22 + $0x38] sm:$0xf]  ;;  %v896_v63 = vor.u32 %v1119_v60, %v893_v61  ;;  %v1128_v0 = vld [vmem:[%s1288_s22 + $0x48] sm:$0xf0]  ;;  %v1130_v1 = vld [vmem:[%s1288_s22 + $0x5c] sm:$0xf] }
  0x1e   : > { %v941_v2 = vld [vmem:[%s1288_s22 + $0x6c] sm:$0xf0]  ;;  %v928_v3 = vor.u32 %v1128_v0, %v927_v62  ;;  %v1127_v6 = vld [vmem:[%s1288_s22 + $0x40] sm:$0xf0]  ;;  %v1124_v8 = vld [vmem:[%s1288_s22 + $0x2c] sm:$0xf] }
  0x1f   : > { %v944_v4 = vor.u32 %v1130_v1, %v941_v2  ;;  %v919_v5 = vld [vmem:[%s1288_s22 + $0x30] sm:$0xf]  ;;  %v913_v9 = vld [vmem:[%s1288_s22 + $0x3c] sm:$0xf0]  ;;  %v939_v17 = vld [vmem:[%s1288_s22 + $0x58] sm:$0xf] }
  0x20   : > { %1185 = vmatpush.bf16.msra.mxu1 %v1141_v10  ;;  %1186 = vmatpush.bf16.msra.mxu2 %v1141_v10  ;;  %v920_v7 = vor.u32 %v1127_v6, %v919_v5  ;;  %v1132_v18 = vld [vmem:[%s1288_s22 + $0x68] sm:$0xf0]  ;;  %v933_v21 = vld [vmem:[%s1288_s22 + $0x64] sm:$0xf0]  ;;  %v959_v26 = vld [vmem:[%s1288_s22 + $0x80] sm:$0xf] }
  0x21   : > { %635 = vmatpush.bf16.msra.mxu0 %v1141_v10  ;;  %722 = vmatpush.bf16.msra.mxu3 %v1165_v11  ;;  %v947_v10 = vld [vmem:[%s1288_s22 + $0x60] sm:$0xf]  ;;  %v916_v11 = vor.u32 %v1124_v8, %v913_v9  ;;  %v1137_v27 = vld [vmem:[%s1288_s22 + $0x90] sm:$0xf0] }
  0x24   : > { %1187 = vmatpush.bf16.msra.mxu1 %v1140_v12  ;;  %1188 = vmatpush.bf16.msra.mxu2 %v1140_v12 }
  0x25   : > { %636 = vmatpush.bf16.msra.mxu0 %v1140_v12  ;;  %723 = vmatpush.bf16.msra.mxu3 %v1164_v13  ;;  %v1133_v12 = vld [vmem:[%s1288_s22 + $0x70] sm:$0xf0]  ;;  %v1135_v13 = vld [vmem:[%s1288_s22 + $0x84] sm:$0xf] }
  0x26   : > { %v948_v15 = vor.u32 %v1133_v12, %v947_v10 }
  0x28   : > { %1189 = vmatpush.bf16.msra.mxu1 %v1139_v14  ;;  %1190 = vmatpush.bf16.msra.mxu2 %v1139_v14 }
  0x29   : > { %637 = vmatpush.bf16.msra.mxu0 %v1139_v14  ;;  %724 = vmatpush.bf16.msra.mxu3 %v1163_v22  ;;  %v961_v14 = vld [vmem:[%s1288_s22 + $0x94] sm:$0xf0] }
  0x2a   : > { %v964_v16 = vor.u32 %v1135_v13, %v961_v14 }
  0x2b   : > { %643 = vmatmul.bf16.vlgmr.msra.gmra.mxu1 %v912_v23  ;;  %653 = vmatmul.bf16.vlgmr.msra.gmra.mxu2 %v952_v24  ;;  %v967_v23 = vld [vmem:[%s1288_s22 + $0x88] sm:$0xf]  ;;  %v1138_v24 = vld [vmem:[%s1288_s22 + $0x98] sm:$0xf0] }
  0x2c   : > { %688 = vmatpush.bf16.msrb.mxu2 %v1162_v19  ;;  %659 = vmatpush.bf16.msrb.mxu1 %v1154_v20  ;;  %v940_v19 = vor.u32 %v1132_v18, %v939_v17  ;;  %v1129_v20 = vld [vmem:[%s1288_s22 + $0x54] sm:$0xf]  ;;  %v968_v25 = vor.u32 %v1138_v24, %v967_v23 }
  0x2d   : > { %750 = vmatpush.bf16.msrb.mxu0 %v1174_v28  ;;  %725 = vmatmul.bf16.vlgmr.msra.gmra.mxu3 %v904_v32  ;;  %v936_v22 = vor.u32 %v1129_v20, %v933_v21  ;;  %v960_v28 = vor.u32 %v1137_v27, %v959_v26 }
  0x2e   : > { %638 = vmatmul.bf16.vlgmr.msra.gmra.mxu0 %v892_v31 }
  0x30   : > { %689 = vmatpush.bf16.msrb.mxu2 %v1161_v29  ;;  %660 = vmatpush.bf16.msrb.mxu1 %v1153_v30  ;;  %v1134_v29 = vld [vmem:[%s1288_s22 + $0x7c] sm:$0xf]  ;;  %v953_v30 = vld [vmem:[%s1288_s22 + $0x8c] sm:$0xf0] }
  0x31   : > { %751 = vmatpush.bf16.msrb.mxu0 %v1173_v33  ;;  %v956_v31 = vor.u32 %v1134_v29, %v953_v30 }
  0x34   : > { %690 = vmatpush.bf16.msrb.mxu2 %v1160_v34  ;;  %661 = vmatpush.bf16.msrb.mxu1 %v1152_v35 }
  0x35   : > { %752 = vmatpush.bf16.msrb.mxu0 %v1172_v36 }
  0x38   : > { %691 = vmatpush.bf16.msrb.mxu2 %v1159_v37  ;;  %662 = vmatpush.bf16.msrb.mxu1 %v1151_v38 }
  0x39   : > { %753 = vmatpush.bf16.msrb.mxu0 %v1171_v41 }
  0x3b   : > { %648 = vmatmul.bf16.gmra.mxu1 %v932_v45 }
  0x3c   : > { %692 = vmatpush.bf16.msrb.mxu2 %v1158_v42  ;;  %663 = vmatpush.bf16.msrb.mxu1 %v1150_v43 }
  0x3d   : > { %730 = vmatmul.bf16.gmra.mxu3 %v924_v52 }
  0x3e   : > { %1113 = vmatmul.msk.bf16.vlgmr.msrb.gmra.mxu0 %vm617_vm0, %v908_v51  ;;  %v1417_v51 = vld [vmem:[%s1466_s3] ss:$0 sm:$0xff] }
  0x40   : > { %693 = vmatpush.bf16.msrb.mxu2 %v1157_v49  ;;  %664 = vmatpush.bf16.msrb.mxu1 %v1149_v50  ;;  %v1412_v49 = vld [vmem:[%s1465_s2] ss:$0 sm:$0xff] }
  0x44   : > { %694 = vmatpush.bf16.msrb.mxu2 %v1156_v53  ;;  %665 = vmatpush.bf16.msrb.mxu1 %v1148_v54 }
  0x48   : > { %695 = vmatpush.bf16.msrb.mxu2 %v1155_v55  ;;  %666 = vmatpush.bf16.msrb.mxu1 %v1147_v56 }
  0x4b   : > { %696 = vmatmul.bf16.vlgmr.msrb.gmra.mxu2 %v900_v59  ;;  %667 = vmatmul.bf16.vlgmr.msrb.gmra.mxu1 %v896_v63 }
  0x4d   : > { %735 = vmatmul.bf16.gmra.mxu3 %v944_v4 }
  0x4e   : > { %1114 = vmatmul.msk.bf16.gmra.mxu0 %vm617_vm0, %v928_v3 }
  0x5b   : > { %701 = vmatmul.bf16.gmra.mxu2 %v920_v7  ;;  %672 = vmatmul.bf16.gmra.mxu1 %v916_v11 }
  0x5d   : > { %740 = vmatmul.bf16.gmra.mxu3 %v964_v16 }
  0x5e   : > { %1115 = vmatmul.msk.bf16.gmra.mxu0 %vm617_vm0, %v948_v15 }
  0x6b   : > { %706 = vmatmul.bf16.gmra.mxu2 %v940_v19  ;;  %677 = vmatmul.bf16.gmra.mxu1 %v936_v22 }
  0x6e   : > { %1116 = vmatmul.msk.bf16.gmra.mxu0 %vm617_vm0, %v968_v25 }
  0x7b   : > { %711 = vmatmul.bf16.gmra.mxu2 %v960_v28  ;;  %682 = vmatmul.bf16.gmra.mxu1 %v956_v31 }
  0xa8   : > { %v644_v32 = vpop.f32.mrf.mxu1 }
  0xab   : > { %v639_v33 = vpop.f32.mrf.mxu0 }
  0xae   : > { %v1403_v37 = vpop.f32.mrf.mxu2 }
  0xb0   : > { %v646_v34 = vpop.f32.mrf.mxu1  ;;  %v726_v38 = vpop.f32.mrf.mxu3 }
  0xb3   : > { %v641_v35 = vpop.f32.mrf.mxu0 }
  0xb6   : > { %v1407_v41 = vpop.f32.mrf.mxu2 }
  0xb8   : > { %v649_v36 = vpop.f32.mrf.mxu1  ;;  %v728_v44 = vpop.f32.mrf.mxu3 }
  0xbb   : > { %v755_v40 = vpop.f32.mrf.mxu0 }
  0xc0   : > { %v1405_v39 = vpop.f32.mrf.mxu1  ;;  %v731_v56 = vpop.f32.mrf.mxu3 }
  0xc3   : > { %v757_v46 = vpop.f32.mrf.mxu0 }
  0xc8   : > { %v668_v42 = vpop.f32.mrf.mxu1  ;;  %v733_v6 = vpop.f32.mrf.mxu3 }
  0xc9   : > { %v669_v43 = vadd.f32 %v668_v42, %v639_v33 }
  0xcb   : > { %v760_v59 = vpop.f32.mrf.mxu0 }
  0xce   : > { %v697_v45 = vpop.f32.mrf.mxu2 }
  0xcf   : > { %v698_v47 = vadd.f32 %v697_v45, %v669_v43 }
  0xd0   : > { %v670_v52 = vpop.f32.mrf.mxu1  ;;  %v736_v20 = vpop.f32.mrf.mxu3 }
  0xd1   : > { %v727_v48 = vadd.f32 %v726_v38, %v698_v47  ;;  %v671_v53 = vadd.f32 %v670_v52, %v641_v35 }
  0xd3   : > { %v756_v50 = vadd.f32 %v755_v40, %v727_v48  ;;  %v762_v9 = vpop.f32.mrf.mxu0 }
  0xd5   : > { %v779_v54 = vmul.f32 %v1412_v49, %v756_v50 }
  0xd6   : > { %v699_v55 = vpop.f32.mrf.mxu2 }
  0xd7   : > { %v791_v57 = vadd.f32 %v1417_v51, %v779_v54  ;;  %v700_v58 = vadd.f32 %v699_v55, %v671_v53 }
  0xd8   : > { %v673_v0 = vpop.f32.mrf.mxu1  ;;  %v738_v35 = vpop.f32.mrf.mxu3 }
  0xd9   : > { %v799_v60 = vmax.f32 %v791_v57, 0.0  ;;  %v729_v61 = vadd.f32 %v728_v44, %v700_v58  ;;  %v674_v1 = vadd.f32 %v673_v0, %v644_v32 }
  0xdb   : > { %v807_v62 = vpack.c.bf16 %v799_v60, %v799_v60  ;;  %v758_v63 = vadd.f32 %v757_v46, %v729_v61  ;;  %v765_v24 = vpop.f32.mrf.mxu0 }
  0xdd   : > { %816 = vst.msk [vmem:[%s1425_s30] sm:$0xf] %vm815_vm1, %v807_v62  ;;  %v780_v2 = vmul.f32 %v1412_v49, %v758_v63 }
  0xde   : > { %v702_v3 = vpop.f32.mrf.mxu2 }
  0xdf   : > { %v792_v4 = vadd.f32 %v1417_v51, %v780_v2  ;;  %v703_v5 = vadd.f32 %v702_v3, %v674_v1 }
  0xe0   : > { %v675_v12 = vpop.f32.mrf.mxu1  ;;  %v741_v53 = vpop.f32.mrf.mxu3 }
  0xe1   : > { %v800_v7 = vmax.f32 %v792_v4, 0.0  ;;  %v732_v8 = vadd.f32 %v731_v56, %v703_v5  ;;  %v676_v13 = vadd.f32 %v675_v12, %v646_v34 }
  0xe3   : > { %v808_v10 = vpack.c.bf16 %v800_v7, %v800_v7  ;;  %v761_v11 = vadd.f32 %v760_v59, %v732_v8  ;;  %v767_v40 = vpop.f32.mrf.mxu0 }
  0xe5   : > { %817 = vst.msk [vmem:[%s1425_s30 + $0x4] sm:$0xf] %vm815_vm1, %v808_v10  ;;  %v781_v14 = vmul.f32 %v1412_v49, %v761_v11 }
  0xe6   : > { %v704_v15 = vpop.f32.mrf.mxu2 }
  0xe7   : > { %v793_v16 = vadd.f32 %v1417_v51, %v781_v14  ;;  %v705_v17 = vadd.f32 %v704_v15, %v676_v13 }
  0xe8   : > { %v678_v23 = vpop.f32.mrf.mxu1  ;;  %v743_v3 = vpop.f32.mrf.mxu3 }
  0xe9   : > { %v801_v18 = vmax.f32 %v793_v16, 0.0  ;;  %v734_v19 = vadd.f32 %v733_v6, %v705_v17  ;;  %v679_v25 = vadd.f32 %v678_v23, %v649_v36 }
  0xeb   : > { %v809_v21 = vpack.c.bf16 %v801_v18, %v801_v18  ;;  %v763_v22 = vadd.f32 %v762_v9, %v734_v19  ;;  %v770_v57 = vpop.f32.mrf.mxu0 }
  0xed   : > { %818 = vst.msk [vmem:[%s1425_s30 + $0x8] sm:$0xf] %vm815_vm1, %v809_v21  ;;  %v782_v26 = vmul.f32 %v1412_v49, %v763_v22 }
  0xee   : > { %v707_v27 = vpop.f32.mrf.mxu2 }
  0xef   : > { %v794_v28 = vadd.f32 %v1417_v51, %v782_v26  ;;  %v708_v29 = vadd.f32 %v707_v27, %v679_v25 }
  0xf0   : > { %v680_v34 = vpop.f32.mrf.mxu1 }
  0xf1   : > { %v802_v30 = vmax.f32 %v794_v28, 0.0  ;;  %v737_v31 = vadd.f32 %v736_v20, %v708_v29  ;;  %v681_v38 = vadd.f32 %v680_v34, %v1405_v39 }
  0xf3   : > { %v810_v32 = vpack.c.bf16 %v802_v30, %v802_v30  ;;  %v766_v33 = vadd.f32 %v765_v24, %v737_v31  ;;  %v772_v6 = vpop.f32.mrf.mxu0 }
  0xf5   : > { %819 = vst.msk [vmem:[%s1425_s30 + $0xc] sm:$0xf] %vm815_vm1, %v810_v32  ;;  %v783_v36 = vmul.f32 %v1412_v49, %v766_v33 }
  0xf6   : > { %v709_v42 = vpop.f32.mrf.mxu2 }
  0xf7   : > { %v795_v43 = vadd.f32 %v1417_v51, %v783_v36  ;;  %v710_v44 = vadd.f32 %v709_v42, %v681_v38 }
  0xf8   : > { %v683_v50 = vpop.f32.mrf.mxu1 }
  0xf9   : > { %v803_v45 = vmax.f32 %v795_v43, 0.0  ;;  %v739_v46 = vadd.f32 %v738_v35, %v710_v44  ;;  %v684_v52 = vadd.f32 %v683_v50, %v1403_v37 }
  0xfb   : > { %v811_v47 = vpack.c.bf16 %v803_v45, %v803_v45  ;;  %v768_v48 = vadd.f32 %v767_v40, %v739_v46 }
  0xfd   : > { %820 = vst.msk [vmem:[%s1425_s30 + $0x10] sm:$0xf] %vm815_vm1, %v811_v47  ;;  %v784_v39 = vmul.f32 %v1412_v49, %v768_v48 }
  0xfe   : > { %v712_v54 = vpop.f32.mrf.mxu2 }
  0xff   : > { %v796_v55 = vadd.f32 %v1417_v51, %v784_v39  ;;  %v713_v56 = vadd.f32 %v712_v54, %v684_v52 }
 0x100   : > { %v685_v62 = vpop.f32.mrf.mxu1 }
 0x101   : > { %v804_v58 = vmax.f32 %v796_v55, 0.0  ;;  %v742_v59 = vadd.f32 %v741_v53, %v713_v56  ;;  %v686_v63 = vadd.f32 %v685_v62, %v1407_v41 }
 0x103   : > { %v812_v60 = vpack.c.bf16 %v804_v58, %v804_v58  ;;  %v771_v61 = vadd.f32 %v770_v57, %v742_v59 }
 0x105   : > { %821 = vst.msk [vmem:[%s1425_s30 + $0x14] sm:$0xf] %vm815_vm1, %v812_v60  ;;  %v785_v37 = vmul.f32 %v1412_v49, %v771_v61 }
 0x106   : > { %v714_v0 = vpop.f32.mrf.mxu2 }
 0x107   : > { %v797_v1 = vadd.f32 %v1417_v51, %v785_v37  ;;  %v715_v2 = vadd.f32 %v714_v0, %v686_v63 }
 0x109   : > { %v805_v4 = vmax.f32 %v797_v1, 0.0  ;;  %v744_v5 = vadd.f32 %v743_v3, %v715_v2 }
 0x10b   : > { %v813_v7 = vpack.c.bf16 %v805_v4, %v805_v4  ;;  %v773_v8 = vadd.f32 %v772_v6, %v744_v5 }
 0x10d   : > { %822 = vst.msk [vmem:[%s1425_s30 + $0x18] sm:$0xf] %vm815_vm1, %v813_v7  ;;  %v786_v9 = vmul.f32 %v1412_v49, %v773_v8 }
 0x10f   : > { %v798_v41 = vadd.f32 %v1417_v51, %v786_v9 }
 0x111   : > { %v806_v10 = vmax.f32 %v798_v41, 0.0 }
 0x113   : > { %v814_v11 = vpack.c.bf16 %v806_v10, %v806_v10 }
 0x115   : > { %823 = vst.msk [vmem:[%s1425_s30 + $0x1c] sm:$0xf] %vm815_vm1, %v814_v11 }
 0x116 PF: > { %s14_s15 = sadd.s32 1, %s1208_s15  }
 0x117   : > { %p11_p4 = scmp.ge.s32.totalorder %s14_s15, 4  }
 0x119   :  { %13 = sbr.rel (!%p11_p4) target bundleno = 1 (0x1), region = 66 }

// kernel: _lambda_.39
= control target key start
LH: loop header
LB: loop body
LE: loop exit
PB: predicated region body
PF: predicated region fallthrough
CT: control target
= control target key end

     0   :  { %s855_s15 = smov 0   ;;  %s1008_s0 = inlined_call_operand.vmem [shape: bf16[128,288], index: 0, kind: input, shape index: {}]   ;;  %s1009_s1 = inlined_call_operand.vmem [shape: bf16[288,32], index: 1, kind: input, shape index: {}]   ;;  %s1010_s2 = inlined_call_operand.vmem [shape: f32[1,32], index: 2, kind: input, shape index: {}]   ;;  %s1011_s3 = inlined_call_operand.vmem [shape: f32[1,32], index: 3, kind: input, shape index: {}]   ;;  %s1012_s4 = inlined_call_operand.vmem [shape: bf16[128,32], index: 4, kind: output, shape index: {}]  }
   0x1 LB: > { %s630_s16 = sadd.s32 4294967295, %s828_s15   ;;  %p634_p0 = scmp.ge.s32.totalorder %s828_s15, 1  ;;  %s828_s15 = sphi %s855_s15, %s14_s15  }
   0x2   : > { %p164_p1 = scmp.lt.s32.totalorder %s828_s15, 3 }
   0x4   : > { %p165_p2 = pnand %p634_p0, %p164_p1 }
   0x5   : > { %s635_s23 = sshll.u32 (!%p165_p2), %s630_s16, 3 }
   0x6   : > { %168 = sbr.rel (%p165_p2) target bundleno = 228 (0xe4), region = 36  ;;  %p192_p3 = scmp.lt.s32.totalorder (!%p165_p2), %s635_s23, 15 }
   0xb   : > { %v784_v0 = vld [vmem:[%s1009_s1 + $0x38] sm:$0xff]  ;;  %v794_v2 = vld [vmem:[%s1009_s1 + $0x88] sm:$0xff]  ;;  %v783_v3 = vld [vmem:[%s1009_s1 + $0x30] sm:$0xff]  ;;  %s1014_s23 = smov (!%p192_p3, %s635_s23), 15  ;;  %vm425_vm0 = vcmask 261120   ;;  %vm565_vm1 = vcmask 257024  }
   0xc   : > { %v869_v1 = vld [vmem:[%s1009_s1 + $0x78] sm:$0xff]  ;;  %438 = vmatpush.bf16.msra.mxu0 %v784_v0  ;;  %795 = vmatpush.bf16.msra.mxu3 %v784_v0  ;;  %v791_v4 = vld [vmem:[%s1009_s1 + $0x70] sm:$0xff]  ;;  %v793_v5 = vld [vmem:[%s1009_s1 + $0x80] sm:$0xff]  ;;  %s811_s30 = smul.u32 12, %s1014_s23  ;;  %s638_s12 = sshll.u32 %s1014_s23, 2 }
   0xd   : > { %803 = vmatpush.bf16.msra.mxu1 %v869_v1  ;;  %502 = vmatpush.bf16.msra.mxu2 %v794_v2  ;;  %v782_v6 = vld [vmem:[%s1009_s1 + $0x28] sm:$0xff]  ;;  %v781_v11 = vld [vmem:[%s1009_s1 + $0x20] sm:$0xff]  ;;  %v780_v13 = vld [vmem:[%s1009_s1 + $0x18] sm:$0xff]  ;;  %s973_s16 = scalar_lea.vmem %s1012_s4, %s638_s12 }
   0xe   : > { %v790_v7 = vld [vmem:[%s1009_s1 + $0x68] sm:$0xff]  ;;  %s896_s11 = scalar_lea.vmem %s1008_s0, %s811_s30  ;;  %v789_v12 = vld [vmem:[%s1009_s1 + $0x60] sm:$0xff]  ;;  %v788_v14 = vld [vmem:[%s1009_s1 + $0x58] sm:$0xff] }
   0xf   : > { %v649_v8 = vld [vmem:[%s896_s11 + $0x8] sm:$0xf]  ;;  %v767_v9 = vld [vmem:[%s896_s11 + $0x10] sm:$0xf0]  ;;  %v661_v17 = vld [vmem:[%s896_s11 + $0x20] sm:$0xf] }
  0x10   : > { %439 = vmatpush.bf16.msra.mxu0 %v783_v3  ;;  %796 = vmatpush.bf16.msra.mxu3 %v783_v3  ;;  %v650_v10 = vor.u32 %v767_v9, %v649_v8  ;;  %v779_v15 = vld [vmem:[%s1009_s1 + $0x10] sm:$0xff]  ;;  %v770_v18 = vld [vmem:[%s896_s11 + $0x28] sm:$0xf0]  ;;  %v777_v22 = vld [vmem:[%s1009_s1] sm:$0xff] }
  0x11   : > { %804 = vmatpush.bf16.msra.mxu1 %v791_v4  ;;  %503 = vmatpush.bf16.msra.mxu2 %v793_v5  ;;  %v787_v16 = vld [vmem:[%s1009_s1 + $0x50] sm:$0xff]  ;;  %v778_v19 = vld [vmem:[%s1009_s1 + $0x8] sm:$0xff]  ;;  %v662_v21 = vor.u32 %v770_v18, %v661_v17  ;;  %v653_v23 = vld [vmem:[%s896_s11 + $0x18] sm:$0xf] }
  0x12   : > { %v786_v20 = vld [vmem:[%s1009_s1 + $0x48] sm:$0xff]  ;;  %v769_v24 = vld [vmem:[%s896_s11 + $0x20] sm:$0xf0]  ;;  %v641_v25 = vld [vmem:[%s896_s11] sm:$0xf] }
  0x13   : > { %v766_v26 = vld [vmem:[%s896_s11 + $0x8] sm:$0xf0]  ;;  %v785_v27 = vld [vmem:[%s1009_s1 + $0x40] sm:$0xff]  ;;  %v768_v28 = vld [vmem:[%s896_s11 + $0x1c] sm:$0xf]  ;;  %v654_v30 = vor.u32 %v769_v24, %v653_v23 }
  0x14   : > { %440 = vmatpush.bf16.msra.mxu0 %v782_v6  ;;  %797 = vmatpush.bf16.msra.mxu3 %v782_v6  ;;  %v655_v29 = vld [vmem:[%s896_s11 + $0x24] sm:$0xf0]  ;;  %v642_v31 = vor.u32 %v766_v26, %v641_v25  ;;  %v673_v33 = vld [vmem:[%s896_s11 + $0x38] sm:$0xf]  ;;  %v773_v34 = vld [vmem:[%s896_s11 + $0x40] sm:$0xf0] }
  0x15   : > { %805 = vmatpush.bf16.msra.mxu1 %v790_v7  ;;  %759 = vmatmul.msk.bf16.vlgmr.msra.gmra.mxu2 %vm425_vm0, %v650_v10  ;;  %v658_v32 = vor.u32 %v768_v28, %v655_v29  ;;  %v674_v35 = vor.u32 %v773_v34, %v673_v33  ;;  %v665_v36 = vld [vmem:[%s896_s11 + $0x30] sm:$0xf]  ;;  %v772_v37 = vld [vmem:[%s896_s11 + $0x38] sm:$0xf0]  ;;  %v771_v38 = vld [vmem:[%s896_s11 + $0x34] sm:$0xf] }
  0x16   : > { %v667_v39 = vld [vmem:[%s896_s11 + $0x3c] sm:$0xf0]  ;;  %v666_v40 = vor.u32 %v772_v37, %v665_v36  ;;  %v685_v42 = vld [vmem:[%s896_s11 + $0x50] sm:$0xf]  ;;  %v776_v43 = vld [vmem:[%s896_s11 + $0x58] sm:$0xf0] }
  0x17   : > { %v670_v41 = vor.u32 %v771_v38, %v667_v39  ;;  %v686_v44 = vor.u32 %v776_v43, %v685_v42  ;;  %v765_v45 = vld [vmem:[%s896_s11 + $0x4] sm:$0xf]  ;;  %v643_v46 = vld [vmem:[%s896_s11 + $0xc] sm:$0xf0]  ;;  %v677_v48 = vld [vmem:[%s896_s11 + $0x48] sm:$0xf] }
  0x18   : > { %441 = vmatpush.bf16.msra.mxu0 %v781_v11  ;;  %798 = vmatpush.bf16.msra.mxu3 %v781_v11  ;;  %v646_v47 = vor.u32 %v765_v45, %v643_v46  ;;  %v775_v49 = vld [vmem:[%s896_s11 + $0x50] sm:$0xf0]  ;;  %v774_v50 = vld [vmem:[%s896_s11 + $0x4c] sm:$0xf]  ;;  %v679_v51 = vld [vmem:[%s896_s11 + $0x54] sm:$0xf0] }
  0x19   : > { %806 = vmatpush.bf16.msra.mxu1 %v789_v12  ;;  %v678_v52 = vor.u32 %v775_v49, %v677_v48  ;;  %v682_v53 = vor.u32 %v774_v50, %v679_v51  ;;  %v960_v60 = vld [vmem:[%s1010_s2] ss:$0 sm:$0xff] }
  0x1a   : > { %v965_v63 = vld [vmem:[%s1011_s3] ss:$0 sm:$0xff] }
  0x1c   : > { %442 = vmatpush.bf16.msra.mxu0 %v780_v13  ;;  %799 = vmatpush.bf16.msra.mxu3 %v780_v13 }
  0x1d   : > { %807 = vmatpush.bf16.msra.mxu1 %v788_v14 }
  0x20   : > { %443 = vmatpush.bf16.msra.mxu0 %v779_v15  ;;  %800 = vmatpush.bf16.msra.mxu3 %v779_v15 }
  0x21   : > { %808 = vmatpush.bf16.msra.mxu1 %v787_v16 }
  0x24   : > { %444 = vmatpush.bf16.msra.mxu0 %v778_v19  ;;  %801 = vmatpush.bf16.msra.mxu3 %v778_v19 }
  0x25   : > { %809 = vmatpush.bf16.msra.mxu1 %v786_v20  ;;  %760 = vmatmul.msk.bf16.gmra.mxu2 %vm425_vm0, %v662_v21 }
  0x28   : > { %445 = vmatpush.bf16.msra.mxu0 %v777_v22  ;;  %802 = vmatpush.bf16.msra.mxu3 %v777_v22 }
  0x29   : > { %810 = vmatpush.bf16.msra.mxu1 %v785_v27 }
  0x2b   : > { %451 = vmatmul.bf16.vlgmr.msra.gmra.mxu3 %v654_v30  ;;  %446 = vmatmul.bf16.vlgmr.msra.gmra.mxu0 %v642_v31 }
  0x2c   : > { %467 = vmatpush.bf16.msrb.mxu0 %v869_v1  ;;  %480 = vmatmul.bf16.vlgmr.msra.gmra.mxu1 %v658_v32 }
  0x30   : > { %468 = vmatpush.bf16.msrb.mxu0 %v791_v4 }
  0x34   : > { %469 = vmatpush.bf16.msrb.mxu0 %v790_v7 }
  0x35   : > { %761 = vmatmul.msk.bf16.gmra.mxu2 %vm425_vm0, %v674_v35 }
  0x38   : > { %470 = vmatpush.bf16.msrb.mxu0 %v789_v12 }
  0x3b   : > { %456 = vmatmul.bf16.gmra.mxu3 %v666_v40 }
  0x3c   : > { %471 = vmatpush.bf16.msrb.mxu0 %v788_v14  ;;  %485 = vmatmul.bf16.gmra.mxu1 %v670_v41 }
  0x40   : > { %472 = vmatpush.bf16.msrb.mxu0 %v787_v16 }
  0x44   : > { %473 = vmatpush.bf16.msrb.mxu0 %v786_v20 }
  0x45   : > { %762 = vmatmul.msk.bf16.gmra.mxu2 %vm425_vm0, %v686_v44 }
  0x48   : > { %474 = vmatpush.bf16.msrb.mxu0 %v785_v27 }
  0x4b   : > { %475 = vmatmul.bf16.vlgmr.msrb.gmra.mxu0 %v646_v47  ;;  %461 = vmatmul.bf16.gmra.mxu3 %v678_v52 }
  0x4c   : > { %490 = vmatmul.bf16.gmra.mxu1 %v682_v53 }
  0x98   : > { %v505_v54 = vpop.f32.mrf.mxu2 }
  0xa0   : > { %v507_v55 = vpop.f32.mrf.mxu2 }
  0xa8   : > { %v510_v56 = vpop.f32.mrf.mxu2  ;;  %v447_v1 = vpop.f32.mrf.mxu0 }
  0xa9   : > { %v481_v57 = vpop.f32.mrf.mxu1 }
  0xae   : > { %v452_v58 = vpop.f32.mrf.mxu3 }
  0xaf   : > { %v482_v59 = vadd.f32 %v481_v57, %v452_v58 }
  0xb0   : > { %v512_v61 = vpop.f32.mrf.mxu2  ;;  %v449_v12 = vpop.f32.mrf.mxu0 }
  0xb1   : > { %v511_v62 = vadd.f32 %v510_v56, %v482_v59  ;;  %v483_v0 = vpop.f32.mrf.mxu1 }
  0xb3   : > { %v531_v2 = vmul.f32 %v960_v60, %v511_v62 }
  0xb5   : > { %v543_v3 = vadd.f32 %v965_v63, %v531_v2 }
  0xb6   : > { %v454_v4 = vpop.f32.mrf.mxu3 }
  0xb7   : > { %v551_v5 = vmax.f32 %v543_v3, 0.0  ;;  %v484_v6 = vadd.f32 %v483_v0, %v454_v4 }
  0xb8   : > { %v515_v10 = vpop.f32.mrf.mxu2 }
  0xb9   : > { %v559_v7 = vpack.c.bf16 %v551_v5, %v551_v5  ;;  %v513_v8 = vadd.f32 %v512_v61, %v484_v6  ;;  %v486_v9 = vpop.f32.mrf.mxu1 }
  0xbb   : > { %568 = vst.msk [vmem:[%s973_s16 + $0x8] sm:$0xf] %vm565_vm1, %v559_v7  ;;  %v532_v11 = vmul.f32 %v960_v60, %v513_v8 }
  0xbd   : > { %v544_v13 = vadd.f32 %v965_v63, %v532_v11 }
  0xbe   : > { %v457_v14 = vpop.f32.mrf.mxu3 }
  0xbf   : > { %v552_v15 = vmax.f32 %v544_v13, 0.0  ;;  %v487_v16 = vadd.f32 %v486_v9, %v457_v14 }
  0xc0   : > { %v517_v21 = vpop.f32.mrf.mxu2 }
  0xc1   : > { %v560_v17 = vpack.c.bf16 %v552_v15, %v552_v15  ;;  %v516_v18 = vadd.f32 %v515_v10, %v487_v16  ;;  %v488_v19 = vpop.f32.mrf.mxu1 }
  0xc3   : > { %569 = vst.msk [vmem:[%s973_s16 + $0xc] sm:$0xf] %vm565_vm1, %v560_v17  ;;  %v533_v20 = vmul.f32 %v960_v60, %v516_v18 }
  0xc5   : > { %v545_v22 = vadd.f32 %v965_v63, %v533_v20 }
  0xc6   : > { %v459_v25 = vpop.f32.mrf.mxu3 }
  0xc7   : > { %v553_v26 = vmax.f32 %v545_v22, 0.0  ;;  %v489_v27 = vadd.f32 %v488_v19, %v459_v25 }
  0xc8   : > { %v476_v23 = vpop.f32.mrf.mxu0  ;;  %v520_v38 = vpop.f32.mrf.mxu2 }
  0xc9   : > { %v477_v24 = vadd.f32 %v476_v23, %v447_v1  ;;  %v561_v29 = vpack.c.bf16 %v553_v26, %v553_v26  ;;  %v518_v30 = vadd.f32 %v517_v21, %v489_v27  ;;  %v491_v34 = vpop.f32.mrf.mxu1 }
  0xcb   : > { %v506_v28 = vadd.f32 %v505_v54, %v477_v24  ;;  %570 = vst.msk [vmem:[%s973_s16 + $0x10] sm:$0xf] %vm565_vm1, %v561_v29  ;;  %v534_v32 = vmul.f32 %v960_v60, %v518_v30 }
  0xcd   : > { %v529_v31 = vmul.f32 %v960_v60, %v506_v28  ;;  %v546_v35 = vadd.f32 %v965_v63, %v534_v32 }
  0xce   : > { %v462_v40 = vpop.f32.mrf.mxu3 }
  0xcf   : > { %v541_v33 = vadd.f32 %v965_v63, %v529_v31  ;;  %v554_v41 = vmax.f32 %v546_v35, 0.0  ;;  %v492_v42 = vadd.f32 %v491_v34, %v462_v40 }
  0xd0   : > { %v478_v36 = vpop.f32.mrf.mxu0  ;;  %v522_v57 = vpop.f32.mrf.mxu2 }
  0xd1   : > { %v549_v37 = vmax.f32 %v541_v33, 0.0  ;;  %v479_v39 = vadd.f32 %v478_v36, %v449_v12  ;;  %v562_v45 = vpack.c.bf16 %v554_v41, %v554_v41  ;;  %v521_v46 = vadd.f32 %v520_v38, %v492_v42  ;;  %v493_v52 = vpop.f32.mrf.mxu1 }
  0xd3   : > { %v557_v43 = vpack.c.bf16 %v549_v37, %v549_v37  ;;  %v508_v44 = vadd.f32 %v507_v55, %v479_v39  ;;  %571 = vst.msk [vmem:[%s973_s16 + $0x14] sm:$0xf] %vm565_vm1, %v562_v45  ;;  %v535_v48 = vmul.f32 %v960_v60, %v521_v46 }
  0xd5   : > { %566 = vst.msk [vmem:[%s973_s16] sm:$0xf] %vm565_vm1, %v557_v43  ;;  %v530_v47 = vmul.f32 %v960_v60, %v508_v44  ;;  %v547_v50 = vadd.f32 %v965_v63, %v535_v48 }
  0xd6   : > { %v464_v53 = vpop.f32.mrf.mxu3 }
  0xd7   : > { %v542_v49 = vadd.f32 %v965_v63, %v530_v47  ;;  %v555_v54 = vmax.f32 %v547_v50, 0.0  ;;  %v494_v55 = vadd.f32 %v493_v52, %v464_v53 }
  0xd9   : > { %v550_v51 = vmax.f32 %v542_v49, 0.0  ;;  %v563_v58 = vpack.c.bf16 %v555_v54, %v555_v54  ;;  %v523_v59 = vadd.f32 %v522_v57, %v494_v55 }
  0xdb   : > { %v558_v56 = vpack.c.bf16 %v550_v51, %v550_v51  ;;  %572 = vst.msk [vmem:[%s973_s16 + $0x18] sm:$0xf] %vm565_vm1, %v563_v58  ;;  %v536_v61 = vmul.f32 %v960_v60, %v523_v59 }
  0xdd   : > { %567 = vst.msk [vmem:[%s973_s16 + $0x4] sm:$0xf] %vm565_vm1, %v558_v56  ;;  %v548_v62 = vadd.f32 %v965_v63, %v536_v61 }
  0xdf   : > { %v556_v0 = vmax.f32 %v548_v62, 0.0 }
  0xe1   : > { %v564_v1 = vpack.c.bf16 %v556_v0, %v556_v0 }
  0xe3   : > { %573 = vst.msk [vmem:[%s973_s16 + $0x1c] sm:$0xf] %vm565_vm1, %v564_v1 }
  0xe4 PF: > { %s14_s15 = sadd.s32 1, %s828_s15  }
  0xe5   : > { %p11_p4 = scmp.ge.s32.totalorder %s14_s15, 4  }
  0xe7   :  { %13 = sbr.rel (!%p11_p4) target bundleno = 1 (0x1), region = 66 }

// kernel: _lambda_.40
= control target key start
LH: loop header
LB: loop body
LE: loop exit
PB: predicated region body
PF: predicated region fallthrough
CT: control target
= control target key end

     0   :  { %s479_s15 = smov 0   ;;  %s526_s0 = inlined_call_operand.vmem [shape: bf16[128,32], index: 0, kind: input, shape index: {}]   ;;  %s527_s1 = inlined_call_operand.vmem [shape: bf16[32,64], index: 1, kind: input, shape index: {}]   ;;  %s528_s2 = inlined_call_operand.vmem [shape: f32[1,64], index: 2, kind: input, shape index: {}]   ;;  %s529_s3 = inlined_call_operand.vmem [shape: f32[1,64], index: 3, kind: input, shape index: {}]   ;;  %s530_s4 = inlined_call_operand.vmem [shape: bf16[128,64], index: 4, kind: output, shape index: {}]  }
   0x1 LB: > { %s385_s16 = sadd.s32 4294967295, %s452_s15   ;;  %p389_p0 = scmp.ge.s32.totalorder %s452_s15, 1  ;;  %s452_s15 = sphi %s479_s15, %s14_s15  }
   0x2   : > { %p163_p1 = scmp.lt.s32.totalorder %s452_s15, 3 }
   0x4   : > { %p164_p2 = pnand %p389_p0, %p163_p1 }
   0x5   : > { %s390_s19 = sshll.u32 (!%p164_p2), %s385_s16, 3 }
   0x6   : > { %167 = sbr.rel (%p164_p2) target bundleno = 168 (0xa8), region = 36  ;;  %p190_p3 = scmp.lt.s32.totalorder (!%p164_p2), %s390_s19, 15 }
   0xb   : > { %v429_v0 = vld [vmem:[%s527_s1 + $0x8] sm:$0xff]  ;;  %v428_v1 = vld [vmem:[%s527_s1] sm:$0xff]  ;;  %s532_s19 = smov (!%p190_p3, %s390_s19), 15  ;;  %vm246_vm0 = vcmask 261120   ;;  %vm320_vm1 = vcmask 519168  }
   0xc   : > { %265 = vmatpush.bf16.msra.mxu0 %v429_v0  ;;  %430 = vmatpush.bf16.msra.mxu1 %v429_v0  ;;  %s391_s22 = sshll.u32 %s532_s19, 2  ;;  %v444_v6 = vld [vmem:[%s528_s2] ss:$0 sm:$0xff] }
   0xd   : > { %431 = vmatpush.bf16.msra.mxu2 %v429_v0  ;;  %432 = vmatpush.bf16.msra.mxu3 %v429_v0  ;;  %s193_s25 = scalar_lea.vmem %s526_s0, %s391_s22  ;;  %v445_v7 = vld [vmem:[%s529_s3] ss:$0 sm:$0xff]  ;;  %s505_s6 = scalar_lea.vmem %s530_s4, %s391_s22 }
   0xe   : > { %v424_v2 = vld [vmem:[%s193_s25] sm:$0xff]  ;;  %v425_v3 = vld [vmem:[%s193_s25 + $0x8] sm:$0xff]  ;;  %v426_v4 = vld [vmem:[%s193_s25 + $0x10] sm:$0xff] }
   0xf   : > { %v427_v5 = vld [vmem:[%s193_s25 + $0x18] sm:$0xff] }
  0x10   : > { %266 = vmatpush.bf16.msra.mxu0 %v428_v1  ;;  %433 = vmatpush.bf16.msra.mxu1 %v428_v1 }
  0x11   : > { %434 = vmatpush.bf16.msra.mxu2 %v428_v1  ;;  %435 = vmatpush.bf16.msra.mxu3 %v428_v1 }
  0x13   : > { %418 = vmatmul.msk.bf16.vlgmr.msra.gmra.mxu0 %vm246_vm0, %v424_v2  ;;  %419 = vmatmul.msk.bf16.vlgmr.msra.gmra.mxu1 %vm246_vm0, %v425_v3 }
  0x14   : > { %420 = vmatmul.msk.bf16.vlgmr.msra.gmra.mxu2 %vm246_vm0, %v426_v4  ;;  %421 = vmatmul.msk.bf16.vlgmr.msra.gmra.mxu3 %vm246_vm0, %v427_v5 }
  0x90   : > { %v268_v8 = vpop.f32.mrf.mxu0  ;;  %v273_v9 = vpop.f32.mrf.mxu1 }
  0x91   : > { %v292_v10 = vmul.f32 %v444_v6, %v268_v8  ;;  %v294_v11 = vmul.f32 %v444_v6, %v273_v9 }
  0x93   : > { %v304_v12 = vadd.f32 %v445_v7, %v292_v10  ;;  %v306_v13 = vadd.f32 %v445_v7, %v294_v11 }
  0x95   : > { %v312_v14 = vpack.c.bf16 %v304_v12, %v304_v12  ;;  %v314_v15 = vpack.c.bf16 %v306_v13, %v306_v13 }
  0x97   : > { %321 = vst.msk [vmem:[%s505_s6] sm:$0xf] %vm320_vm1, %v312_v14  ;;  %v278_v16 = vpop.f32.mrf.mxu2  ;;  %v283_v17 = vpop.f32.mrf.mxu3 }
  0x98   : > { %323 = vst.msk [vmem:[%s505_s6 + $0x8] sm:$0xf] %vm320_vm1, %v314_v15  ;;  %v296_v18 = vmul.f32 %v444_v6, %v278_v16  ;;  %v298_v19 = vmul.f32 %v444_v6, %v283_v17  ;;  %v270_v20 = vpop.f32.mrf.mxu0  ;;  %v275_v21 = vpop.f32.mrf.mxu1 }
  0x99   : > { %v293_v22 = vmul.f32 %v444_v6, %v270_v20  ;;  %v295_v23 = vmul.f32 %v444_v6, %v275_v21 }
  0x9a   : > { %v308_v24 = vadd.f32 %v445_v7, %v296_v18  ;;  %v310_v25 = vadd.f32 %v445_v7, %v298_v19 }
  0x9b   : > { %v305_v26 = vadd.f32 %v445_v7, %v293_v22  ;;  %v307_v27 = vadd.f32 %v445_v7, %v295_v23 }
  0x9c   : > { %v316_v28 = vpack.c.bf16 %v308_v24, %v308_v24  ;;  %v318_v29 = vpack.c.bf16 %v310_v25, %v310_v25 }
  0x9d   : > { %v313_v30 = vpack.c.bf16 %v305_v26, %v305_v26  ;;  %v315_v31 = vpack.c.bf16 %v307_v27, %v307_v27 }
  0x9e   : > { %325 = vst.msk [vmem:[%s505_s6 + $0x10] sm:$0xf] %vm320_vm1, %v316_v28 }
  0x9f   : > { %327 = vst.msk [vmem:[%s505_s6 + $0x18] sm:$0xf] %vm320_vm1, %v318_v29  ;;  %v280_v32 = vpop.f32.mrf.mxu2  ;;  %v285_v33 = vpop.f32.mrf.mxu3 }
  0xa0   : > { %322 = vst.msk [vmem:[%s505_s6 + $0x4] sm:$0xf] %vm320_vm1, %v313_v30  ;;  %v297_v34 = vmul.f32 %v444_v6, %v280_v32  ;;  %v299_v35 = vmul.f32 %v444_v6, %v285_v33 }
  0xa1   : > { %324 = vst.msk [vmem:[%s505_s6 + $0xc] sm:$0xf] %vm320_vm1, %v315_v31 }
  0xa2   : > { %v309_v36 = vadd.f32 %v445_v7, %v297_v34  ;;  %v311_v37 = vadd.f32 %v445_v7, %v299_v35 }
  0xa4   : > { %v317_v38 = vpack.c.bf16 %v309_v36, %v309_v36  ;;  %v319_v39 = vpack.c.bf16 %v311_v37, %v311_v37 }
  0xa6   : > { %326 = vst.msk [vmem:[%s505_s6 + $0x14] sm:$0xf] %vm320_vm1, %v317_v38 }
  0xa7   : > { %328 = vst.msk [vmem:[%s505_s6 + $0x1c] sm:$0xf] %vm320_vm1, %v319_v39 }
  0xa8 PF: > { %s14_s15 = sadd.s32 1, %s452_s15  }
  0xa9   : > { %p11_p4 = scmp.ge.s32.totalorder %s14_s15, 4  }
  0xab   :  { %13 = sbr.rel (!%p11_p4) target bundleno = 1 (0x1), region = 66 }

// kernel: _lambda_.41
= control target key start
LH: loop header
LB: loop body
LE: loop exit
PB: predicated region body
PF: predicated region fallthrough
CT: control target
= control target key end

     0   :  { %s1191_s15 = smov 0   ;;  %s1467_s0 = inlined_call_operand.vmem [shape: bf16[512,144], index: 0, kind: input, shape index: {}]   ;;  %s1468_s1 = inlined_call_operand.vmem [shape: bf16[144,16], index: 1, kind: input, shape index: {}]   ;;  %s1469_s2 = inlined_call_operand.vmem [shape: f32[1,16], index: 2, kind: input, shape index: {}]   ;;  %s1470_s3 = inlined_call_operand.vmem [shape: f32[1,16], index: 3, kind: input, shape index: {}]   ;;  %s1471_s4 = inlined_call_operand.vmem [shape: bf16[512,16], index: 4, kind: output, shape index: {}]  }
   0x1 LB: > { %s905_s16 = sadd.s32 4294967295, %s1164_s15   ;;  %p909_p0 = scmp.ge.s32.totalorder %s1164_s15, 1  ;;  %s1164_s15 = sphi %s1191_s15, %s14_s15  }
   0x2   : > { %p164_p1 = scmp.lt.s32.totalorder %s1164_s15, 3 }
   0x4   : > { %p165_p2 = pnand %p909_p0, %p164_p1 }
   0x5   : > { %s910_s21 = sshll.u32 (!%p165_p2), %s905_s16, 5 }
   0x6   : > { %168 = sbr.rel (%p165_p2) target bundleno = 306 (0x132), region = 36  ;;  %p192_p3 = scmp.lt.s32.totalorder (!%p165_p2), %s910_s21, 63 }
   0xb   : > { %v1137_v0 = vld [vmem:[%s1468_s1 + $0x38] sm:$0xff]  ;;  %v1138_v1 = vld [vmem:[%s1468_s1 + $0x40] sm:$0xff]  ;;  %v1136_v2 = vld [vmem:[%s1468_s1 + $0x30] sm:$0xff]  ;;  %s1473_s21 = smov (!%p192_p3, %s910_s21), 63  ;;  %vm453_vm0 = vcmask 130048   ;;  %vm816_vm1 = vcmask 125952  }
   0xc   : > { %502 = vmatpush.bf16.msra.mxu0 %v1137_v0  ;;  %1139 = vmatpush.bf16.msra.mxu2 %v1137_v0  ;;  %s1097_s24 = sshll.u32 %s1473_s21, 3  ;;  %v1135_v3 = vld [vmem:[%s1468_s1 + $0x28] sm:$0xff]  ;;  %v1134_v7 = vld [vmem:[%s1468_s1 + $0x20] sm:$0xff]  ;;  %v1133_v11 = vld [vmem:[%s1468_s1 + $0x18] sm:$0xff]  ;;  %s914_s19 = sshll.u32 %s1473_s21, 2 }
   0xd   : > { %598 = vmatpush.bf16.msra.mxu1 %v1138_v1  ;;  %1147 = vmatpush.bf16.msra.mxu3 %v1138_v1  ;;  %s1214_s27 = scalar_lea.vmem %s1467_s0, %s1097_s24  ;;  %v1132_v12 = vld [vmem:[%s1468_s1 + $0x10] sm:$0xff]  ;;  %v1131_v16 = vld [vmem:[%s1468_s1 + $0x8] sm:$0xff]  ;;  %v1130_v20 = vld [vmem:[%s1468_s1] sm:$0xff]  ;;  %s1332_s23 = scalar_lea.vmem %s1471_s4, %s914_s19 }
   0xe   : > { %v1098_v4 = vld [vmem:[%s1214_s27 + $0x4] sm:$0xf]  ;;  %v919_v5 = vld [vmem:[%s1214_s27 + $0x8] sm:$0xf0]  ;;  %v1116_v8 = vld [vmem:[%s1214_s27 + $0x94] sm:$0xf] }
   0xf   : > { %v922_v6 = vor.u32 %v1098_v4, %v919_v5  ;;  %v991_v9 = vld [vmem:[%s1214_s27 + $0x98] sm:$0xf0]  ;;  %v1100_v13 = vld [vmem:[%s1214_s27 + $0x14] sm:$0xf]  ;;  %v1118_v17 = vld [vmem:[%s1214_s27 + $0xa4] sm:$0xf] }
  0x10   : > { %503 = vmatpush.bf16.msra.mxu0 %v1136_v2  ;;  %1140 = vmatpush.bf16.msra.mxu2 %v1136_v2  ;;  %v994_v10 = vor.u32 %v1116_v8, %v991_v9  ;;  %v927_v14 = vld [vmem:[%s1214_s27 + $0x18] sm:$0xf0]  ;;  %v999_v18 = vld [vmem:[%s1214_s27 + $0xa8] sm:$0xf0]  ;;  %v917_v21 = vld [vmem:[%s1214_s27] sm:$0xf] }
  0x11   : > { %1079 = vmatmul.msk.bf16.vlgmr.msra.gmra.mxu1 %vm453_vm0, %v922_v6  ;;  %v930_v15 = vor.u32 %v1100_v13, %v927_v14  ;;  %v1002_v19 = vor.u32 %v1118_v17, %v999_v18  ;;  %v1099_v22 = vld [vmem:[%s1214_s27 + $0x4] sm:$0xf0]  ;;  %v981_v23 = vld [vmem:[%s1214_s27 + $0x80] sm:$0xf]  ;;  %v1102_v27 = vld [vmem:[%s1214_s27 + $0x24] sm:$0xf] }
  0x12   : > { %1088 = vmatmul.msk.bf16.vlgmr.msra.gmra.mxu3 %vm453_vm0, %v994_v10  ;;  %v1115_v24 = vld [vmem:[%s1214_s27 + $0x84] sm:$0xf0]  ;;  %v918_v25 = vor.u32 %v1099_v22, %v917_v21  ;;  %v935_v28 = vld [vmem:[%s1214_s27 + $0x28] sm:$0xf0]  ;;  %v1120_v30 = vld [vmem:[%s1214_s27 + $0xb4] sm:$0xf] }
  0x13   : > { %v982_v26 = vor.u32 %v1115_v24, %v981_v23  ;;  %v938_v29 = vor.u32 %v1102_v27, %v935_v28  ;;  %v1007_v31 = vld [vmem:[%s1214_s27 + $0xb8] sm:$0xf0]  ;;  %v925_v33 = vld [vmem:[%s1214_s27 + $0x10] sm:$0xf]  ;;  %v1101_v34 = vld [vmem:[%s1214_s27 + $0x14] sm:$0xf0] }
  0x14   : > { %504 = vmatpush.bf16.msra.mxu0 %v1135_v3  ;;  %1141 = vmatpush.bf16.msra.mxu2 %v1135_v3  ;;  %v1010_v32 = vor.u32 %v1120_v30, %v1007_v31  ;;  %v989_v35 = vld [vmem:[%s1214_s27 + $0x90] sm:$0xf]  ;;  %v1117_v36 = vld [vmem:[%s1214_s27 + $0x94] sm:$0xf0]  ;;  %v926_v37 = vor.u32 %v1101_v34, %v925_v33  ;;  %v1104_v39 = vld [vmem:[%s1214_s27 + $0x34] sm:$0xf] }
  0x15   : > { %v990_v38 = vor.u32 %v1117_v36, %v989_v35  ;;  %v943_v40 = vld [vmem:[%s1214_s27 + $0x38] sm:$0xf0]  ;;  %v1122_v42 = vld [vmem:[%s1214_s27 + $0xc4] sm:$0xf]  ;;  %v1015_v43 = vld [vmem:[%s1214_s27 + $0xc8] sm:$0xf0] }
  0x16   : > { %v946_v41 = vor.u32 %v1104_v39, %v943_v40  ;;  %v1018_v44 = vor.u32 %v1122_v42, %v1015_v43  ;;  %v933_v45 = vld [vmem:[%s1214_s27 + $0x20] sm:$0xf]  ;;  %v1103_v46 = vld [vmem:[%s1214_s27 + $0x24] sm:$0xf0]  ;;  %v1106_v51 = vld [vmem:[%s1214_s27 + $0x44] sm:$0xf] }
  0x17   : > { %v997_v47 = vld [vmem:[%s1214_s27 + $0xa0] sm:$0xf]  ;;  %v1119_v48 = vld [vmem:[%s1214_s27 + $0xa4] sm:$0xf0]  ;;  %v934_v49 = vor.u32 %v1103_v46, %v933_v45  ;;  %v951_v52 = vld [vmem:[%s1214_s27 + $0x48] sm:$0xf0] }
  0x18   : > { %505 = vmatpush.bf16.msra.mxu0 %v1134_v7  ;;  %1142 = vmatpush.bf16.msra.mxu2 %v1134_v7  ;;  %v998_v50 = vor.u32 %v1119_v48, %v997_v47  ;;  %v954_v53 = vor.u32 %v1106_v51, %v951_v52  ;;  %v1124_v54 = vld [vmem:[%s1214_s27 + $0xd4] sm:$0xf]  ;;  %v1023_v55 = vld [vmem:[%s1214_s27 + $0xd8] sm:$0xf0]  ;;  %v941_v57 = vld [vmem:[%s1214_s27 + $0x30] sm:$0xf] }
  0x19   : > { %v1026_v56 = vor.u32 %v1124_v54, %v1023_v55  ;;  %v1105_v58 = vld [vmem:[%s1214_s27 + $0x34] sm:$0xf0]  ;;  %v1005_v59 = vld [vmem:[%s1214_s27 + $0xb0] sm:$0xf]  ;;  %v1108_v63 = vld [vmem:[%s1214_s27 + $0x54] sm:$0xf] }
  0x1a   : > { %v1121_v60 = vld [vmem:[%s1214_s27 + $0xb4] sm:$0xf0]  ;;  %v942_v61 = vor.u32 %v1105_v58, %v941_v57  ;;  %v959_v0 = vld [vmem:[%s1214_s27 + $0x58] sm:$0xf0]  ;;  %v1126_v2 = vld [vmem:[%s1214_s27 + $0xe4] sm:$0xf] }
  0x1b   : > { %v1006_v62 = vor.u32 %v1121_v60, %v1005_v59  ;;  %v962_v1 = vor.u32 %v1108_v63, %v959_v0  ;;  %v1031_v3 = vld [vmem:[%s1214_s27 + $0xe8] sm:$0xf0]  ;;  %v949_v5 = vld [vmem:[%s1214_s27 + $0x40] sm:$0xf]  ;;  %v1107_v6 = vld [vmem:[%s1214_s27 + $0x44] sm:$0xf0] }
  0x1c   : > { %506 = vmatpush.bf16.msra.mxu0 %v1133_v11  ;;  %1143 = vmatpush.bf16.msra.mxu2 %v1133_v11  ;;  %v1034_v4 = vor.u32 %v1126_v2, %v1031_v3  ;;  %v1013_v7 = vld [vmem:[%s1214_s27 + $0xc0] sm:$0xf]  ;;  %v1123_v8 = vld [vmem:[%s1214_s27 + $0xc4] sm:$0xf0]  ;;  %v950_v9 = vor.u32 %v1107_v6, %v949_v5  ;;  %v1110_v11 = vld [vmem:[%s1214_s27 + $0x64] sm:$0xf] }
  0x1d   : > { %v1014_v10 = vor.u32 %v1123_v8, %v1013_v7  ;;  %v1128_v14 = vld [vmem:[%s1214_s27 + $0xf4] sm:$0xf]  ;;  %v957_v17 = vld [vmem:[%s1214_s27 + $0x50] sm:$0xf]  ;;  %v1109_v18 = vld [vmem:[%s1214_s27 + $0x54] sm:$0xf0] }
  0x1e   : > { %v958_v21 = vor.u32 %v1109_v18, %v957_v17  ;;  %v1112_v23 = vld [vmem:[%s1214_s27 + $0x74] sm:$0xf]  ;;  %v975_v24 = vld [vmem:[%s1214_s27 + $0x78] sm:$0xf0]  ;;  %v1111_v27 = vld [vmem:[%s1214_s27 + $0x64] sm:$0xf0] }
  0x1f   : > { %v1029_v28 = vld [vmem:[%s1214_s27 + $0xe0] sm:$0xf]  ;;  %v983_v33 = vld [vmem:[%s1214_s27 + $0x88] sm:$0xf0]  ;;  %v973_v36 = vld [vmem:[%s1214_s27 + $0x70] sm:$0xf] }
  0x20   : > { %507 = vmatpush.bf16.msra.mxu0 %v1132_v12  ;;  %1144 = vmatpush.bf16.msra.mxu2 %v1132_v12  ;;  %v967_v12 = vld [vmem:[%s1214_s27 + $0x68] sm:$0xf0]  ;;  %v1129_v39 = vld [vmem:[%s1214_s27 + $0xf4] sm:$0xf0]  ;;  %v1317_v45 = vld [vmem:[%s1469_s2] ss:$0 sm:$0xff] }
  0x21   : > { %1080 = vmatmul.msk.bf16.gmra.mxu1 %vm453_vm0, %v930_v15  ;;  %v970_v13 = vor.u32 %v1110_v11, %v967_v12  ;;  %v1039_v15 = vld [vmem:[%s1214_s27 + $0xf8] sm:$0xf0]  ;;  %v1322_v48 = vld [vmem:[%s1470_s3] ss:$0 sm:$0xff] }
  0x22   : > { %1089 = vmatmul.msk.bf16.gmra.mxu3 %vm453_vm0, %v1002_v19  ;;  %v1021_v19 = vld [vmem:[%s1214_s27 + $0xd0] sm:$0xf] }
  0x24   : > { %508 = vmatpush.bf16.msra.mxu0 %v1131_v16  ;;  %1145 = vmatpush.bf16.msra.mxu2 %v1131_v16  ;;  %v1042_v16 = vor.u32 %v1128_v14, %v1039_v15 }
  0x28   : > { %509 = vmatpush.bf16.msra.mxu0 %v1130_v20  ;;  %1146 = vmatpush.bf16.msra.mxu2 %v1130_v20  ;;  %v1125_v20 = vld [vmem:[%s1214_s27 + $0xd4] sm:$0xf0] }
  0x29   : > { %v1022_v22 = vor.u32 %v1125_v20, %v1021_v19 }
  0x2b   : > { %510 = vmatmul.bf16.vlgmr.msra.gmra.mxu0 %v918_v25  ;;  %550 = vmatmul.bf16.vlgmr.msra.gmra.mxu2 %v982_v26  ;;  %v978_v25 = vor.u32 %v1112_v23, %v975_v24  ;;  %v965_v26 = vld [vmem:[%s1214_s27 + $0x60] sm:$0xf] }
  0x2c   : > { %v966_v30 = vor.u32 %v1111_v27, %v965_v26 }
  0x31   : > { %1081 = vmatmul.msk.bf16.gmra.mxu1 %vm453_vm0, %v938_v29  ;;  %v1127_v29 = vld [vmem:[%s1214_s27 + $0xe4] sm:$0xf0] }
  0x32   : > { %1090 = vmatmul.msk.bf16.gmra.mxu3 %vm453_vm0, %v1010_v32  ;;  %v1030_v31 = vor.u32 %v1127_v29, %v1029_v28  ;;  %v1114_v32 = vld [vmem:[%s1214_s27 + $0x84] sm:$0xf] }
  0x33   : > { %v986_v34 = vor.u32 %v1114_v32, %v983_v33 }
  0x3b   : > { %515 = vmatmul.bf16.gmra.mxu0 %v926_v37  ;;  %555 = vmatmul.bf16.gmra.mxu2 %v990_v38  ;;  %v1113_v37 = vld [vmem:[%s1214_s27 + $0x74] sm:$0xf0]  ;;  %v1037_v38 = vld [vmem:[%s1214_s27 + $0xf0] sm:$0xf] }
  0x3c   : > { %v974_v40 = vor.u32 %v1113_v37, %v973_v36 }
  0x41   : > { %1082 = vmatmul.msk.bf16.gmra.mxu1 %vm453_vm0, %v946_v41  ;;  %v1038_v41 = vor.u32 %v1129_v39, %v1037_v38 }
  0x42   : > { %1091 = vmatmul.msk.bf16.gmra.mxu3 %vm453_vm0, %v1018_v44 }
  0x4b   : > { %520 = vmatmul.bf16.gmra.mxu0 %v934_v49  ;;  %560 = vmatmul.bf16.gmra.mxu2 %v998_v50 }
  0x51   : > { %1083 = vmatmul.msk.bf16.gmra.mxu1 %vm453_vm0, %v954_v53 }
  0x52   : > { %1092 = vmatmul.msk.bf16.gmra.mxu3 %vm453_vm0, %v1026_v56 }
  0x5b   : > { %525 = vmatmul.bf16.gmra.mxu0 %v942_v61  ;;  %565 = vmatmul.bf16.gmra.mxu2 %v1006_v62 }
  0x61   : > { %1084 = vmatmul.msk.bf16.gmra.mxu1 %vm453_vm0, %v962_v1 }
  0x62   : > { %1093 = vmatmul.msk.bf16.gmra.mxu3 %vm453_vm0, %v1034_v4 }
  0x6b   : > { %530 = vmatmul.bf16.gmra.mxu0 %v950_v9  ;;  %570 = vmatmul.bf16.gmra.mxu2 %v1014_v10 }
  0x71   : > { %1085 = vmatmul.msk.bf16.gmra.mxu1 %vm453_vm0, %v970_v13 }
  0x72   : > { %1094 = vmatmul.msk.bf16.gmra.mxu3 %vm453_vm0, %v1042_v16 }
  0x7b   : > { %535 = vmatmul.bf16.gmra.mxu0 %v958_v21  ;;  %575 = vmatmul.bf16.gmra.mxu2 %v1022_v22 }
  0x81   : > { %1086 = vmatmul.msk.bf16.gmra.mxu1 %vm453_vm0, %v978_v25 }
  0x8b   : > { %540 = vmatmul.bf16.gmra.mxu0 %v966_v30  ;;  %580 = vmatmul.bf16.gmra.mxu2 %v1030_v31 }
  0x8e   : > { %v600_v35 = vpop.f32.mrf.mxu1 }
  0x91   : > { %1087 = vmatmul.msk.bf16.gmra.mxu1 %vm453_vm0, %v986_v34 }
  0x95   : > { %v645_v44 = vpop.f32.mrf.mxu3 }
  0x96   : > { %v602_v42 = vpop.f32.mrf.mxu1 }
  0x9b   : > { %545 = vmatmul.bf16.gmra.mxu0 %v974_v40  ;;  %585 = vmatmul.bf16.gmra.mxu2 %v1038_v41 }
  0x9d   : > { %v647_v54 = vpop.f32.mrf.mxu3 }
  0x9e   : > { %v605_v43 = vpop.f32.mrf.mxu1 }
  0xa5   : > { %v650_v3 = vpop.f32.mrf.mxu3 }
  0xa6   : > { %v607_v49 = vpop.f32.mrf.mxu1 }
  0xa8   : > { %v511_v46 = vpop.f32.mrf.mxu0 }
  0xa9   : > { %v601_v47 = vadd.f32 %v600_v35, %v511_v46 }
  0xab   : > { %v684_v50 = vmul.f32 %v1317_v45, %v601_v47 }
  0xad   : > { %v720_v51 = vadd.f32 %v1322_v48, %v684_v50  ;;  %v652_v15 = vpop.f32.mrf.mxu3 }
  0xae   : > { %v1327_v53 = vpop.f32.mrf.mxu2  ;;  %v610_v58 = vpop.f32.mrf.mxu1 }
  0xaf   : > { %v752_v52 = vmax.f32 %v720_v51, 0.0 }
  0xb0   : > { %v513_v55 = vpop.f32.mrf.mxu0 }
  0xb1   : > { %v784_v56 = vpack.c.bf16 %v752_v52, %v752_v52  ;;  %v603_v57 = vadd.f32 %v602_v42, %v513_v55 }
  0xb3   : > { %817 = vst.msk [vmem:[%s1332_s23] sm:$0xf] %vm816_vm1, %v784_v56  ;;  %v685_v59 = vmul.f32 %v1317_v45, %v603_v57 }
  0xb5   : > { %v721_v60 = vadd.f32 %v1322_v48, %v685_v59  ;;  %v655_v31 = vpop.f32.mrf.mxu3 }
  0xb6   : > { %v1338_v62 = vpop.f32.mrf.mxu2  ;;  %v612_v2 = vpop.f32.mrf.mxu1 }
  0xb7   : > { %v753_v61 = vmax.f32 %v721_v60, 0.0 }
  0xb8   : > { %v516_v63 = vpop.f32.mrf.mxu0 }
  0xb9   : > { %v785_v0 = vpack.c.bf16 %v753_v61, %v753_v61  ;;  %v606_v1 = vadd.f32 %v605_v43, %v516_v63 }
  0xbb   : > { %818 = vst.msk [vmem:[%s1332_s23 + $0x4] sm:$0xf] %vm816_vm1, %v785_v0  ;;  %v686_v4 = vmul.f32 %v1317_v45, %v606_v1 }
  0xbd   : > { %v722_v5 = vadd.f32 %v1322_v48, %v686_v4  ;;  %v657_v50 = vpop.f32.mrf.mxu3 }
  0xbe   : > { %v556_v7 = vpop.f32.mrf.mxu2  ;;  %v615_v12 = vpop.f32.mrf.mxu1 }
  0xbf   : > { %v754_v6 = vmax.f32 %v722_v5, 0.0  ;;  %v646_v8 = vadd.f32 %v645_v44, %v556_v7 }
  0xc0   : > { %v518_v9 = vpop.f32.mrf.mxu0 }
  0xc1   : > { %v786_v10 = vpack.c.bf16 %v754_v6, %v754_v6  ;;  %v608_v11 = vadd.f32 %v607_v49, %v518_v9  ;;  %v702_v13 = vmul.f32 %v1317_v45, %v646_v8 }
  0xc3   : > { %819 = vst.msk [vmem:[%s1332_s23 + $0x8] sm:$0xf] %vm816_vm1, %v786_v10  ;;  %v687_v14 = vmul.f32 %v1317_v45, %v608_v11  ;;  %v738_v16 = vadd.f32 %v1322_v48, %v702_v13 }
  0xc5   : > { %v723_v17 = vadd.f32 %v1322_v48, %v687_v14  ;;  %v770_v18 = vmax.f32 %v738_v16, 0.0  ;;  %v660_v8 = vpop.f32.mrf.mxu3 }
  0xc6   : > { %v558_v20 = vpop.f32.mrf.mxu2  ;;  %v617_v26 = vpop.f32.mrf.mxu1 }
  0xc7   : > { %v755_v19 = vmax.f32 %v723_v17, 0.0  ;;  %v802_v21 = vpack.c.bf16 %v770_v18, %v770_v18  ;;  %v648_v22 = vadd.f32 %v647_v54, %v558_v20 }
  0xc8   : > { %v521_v23 = vpop.f32.mrf.mxu0 }
  0xc9   : > { %v787_v24 = vpack.c.bf16 %v755_v19, %v755_v19  ;;  %v611_v25 = vadd.f32 %v610_v58, %v521_v23  ;;  %835 = vst.msk [vmem:[%s1332_s23 + $0x48] sm:$0xf] %vm816_vm1, %v802_v21  ;;  %v703_v27 = vmul.f32 %v1317_v45, %v648_v22 }
  0xcb   : > { %820 = vst.msk [vmem:[%s1332_s23 + $0xc] sm:$0xf] %vm816_vm1, %v787_v24  ;;  %v688_v28 = vmul.f32 %v1317_v45, %v611_v25  ;;  %v739_v29 = vadd.f32 %v1322_v48, %v703_v27 }
  0xcd   : > { %v724_v30 = vadd.f32 %v1322_v48, %v688_v28  ;;  %v771_v32 = vmax.f32 %v739_v29, 0.0  ;;  %v662_v24 = vpop.f32.mrf.mxu3 }
  0xce   : > { %v561_v34 = vpop.f32.mrf.mxu2  ;;  %v620_v40 = vpop.f32.mrf.mxu1 }
  0xcf   : > { %v756_v33 = vmax.f32 %v724_v30, 0.0  ;;  %v803_v35 = vpack.c.bf16 %v771_v32, %v771_v32  ;;  %v651_v36 = vadd.f32 %v650_v3, %v561_v34 }
  0xd0   : > { %v523_v37 = vpop.f32.mrf.mxu0 }
  0xd1   : > { %v788_v38 = vpack.c.bf16 %v756_v33, %v756_v33  ;;  %v613_v39 = vadd.f32 %v612_v2, %v523_v37  ;;  %836 = vst.msk [vmem:[%s1332_s23 + $0x4c] sm:$0xf] %vm816_vm1, %v803_v35  ;;  %v704_v41 = vmul.f32 %v1317_v45, %v651_v36 }
  0xd3   : > { %821 = vst.msk [vmem:[%s1332_s23 + $0x10] sm:$0xf] %vm816_vm1, %v788_v38  ;;  %v689_v42 = vmul.f32 %v1317_v45, %v613_v39  ;;  %v740_v43 = vadd.f32 %v1322_v48, %v704_v41 }
  0xd5   : > { %v725_v44 = vadd.f32 %v1322_v48, %v689_v42  ;;  %v772_v46 = vmax.f32 %v740_v43, 0.0 }
  0xd6   : > { %v563_v49 = vpop.f32.mrf.mxu2  ;;  %v622_v57 = vpop.f32.mrf.mxu1 }
  0xd7   : > { %v757_v47 = vmax.f32 %v725_v44, 0.0  ;;  %v804_v51 = vpack.c.bf16 %v772_v46, %v772_v46  ;;  %v653_v52 = vadd.f32 %v652_v15, %v563_v49 }
  0xd8   : > { %v526_v54 = vpop.f32.mrf.mxu0 }
  0xd9   : > { %v789_v55 = vpack.c.bf16 %v757_v47, %v757_v47  ;;  %v616_v56 = vadd.f32 %v615_v12, %v526_v54  ;;  %837 = vst.msk [vmem:[%s1332_s23 + $0x50] sm:$0xf] %vm816_vm1, %v804_v51  ;;  %v705_v58 = vmul.f32 %v1317_v45, %v653_v52 }
  0xdb   : > { %822 = vst.msk [vmem:[%s1332_s23 + $0x14] sm:$0xf] %vm816_vm1, %v789_v55  ;;  %v690_v59 = vmul.f32 %v1317_v45, %v616_v56  ;;  %v741_v60 = vadd.f32 %v1322_v48, %v705_v58 }
  0xdd   : > { %v726_v61 = vadd.f32 %v1322_v48, %v690_v59  ;;  %v773_v63 = vmax.f32 %v741_v60, 0.0 }
  0xde   : > { %v566_v1 = vpop.f32.mrf.mxu2  ;;  %v625_v7 = vpop.f32.mrf.mxu1 }
  0xdf   : > { %v758_v0 = vmax.f32 %v726_v61, 0.0  ;;  %v805_v2 = vpack.c.bf16 %v773_v63, %v773_v63  ;;  %v656_v3 = vadd.f32 %v655_v31, %v566_v1 }
  0xe0   : > { %v528_v4 = vpop.f32.mrf.mxu0 }
  0xe1   : > { %v790_v5 = vpack.c.bf16 %v758_v0, %v758_v0  ;;  %v618_v6 = vadd.f32 %v617_v26, %v528_v4  ;;  %838 = vst.msk [vmem:[%s1332_s23 + $0x54] sm:$0xf] %vm816_vm1, %v805_v2  ;;  %v706_v9 = vmul.f32 %v1317_v45, %v656_v3 }
  0xe3   : > { %823 = vst.msk [vmem:[%s1332_s23 + $0x18] sm:$0xf] %vm816_vm1, %v790_v5  ;;  %v691_v10 = vmul.f32 %v1317_v45, %v618_v6  ;;  %v742_v11 = vadd.f32 %v1322_v48, %v706_v9 }
  0xe5   : > { %v727_v12 = vadd.f32 %v1322_v48, %v691_v10  ;;  %v774_v13 = vmax.f32 %v742_v11, 0.0 }
  0xe6   : > { %v568_v15 = vpop.f32.mrf.mxu2  ;;  %v627_v21 = vpop.f32.mrf.mxu1 }
  0xe7   : > { %v759_v14 = vmax.f32 %v727_v12, 0.0  ;;  %v806_v16 = vpack.c.bf16 %v774_v13, %v774_v13  ;;  %v658_v17 = vadd.f32 %v657_v50, %v568_v15 }
  0xe8   : > { %v531_v18 = vpop.f32.mrf.mxu0 }
  0xe9   : > { %v791_v19 = vpack.c.bf16 %v759_v14, %v759_v14  ;;  %v621_v20 = vadd.f32 %v620_v40, %v531_v18  ;;  %839 = vst.msk [vmem:[%s1332_s23 + $0x58] sm:$0xf] %vm816_vm1, %v806_v16  ;;  %v707_v22 = vmul.f32 %v1317_v45, %v658_v17  ;;  %v665_v40 = vpop.f32.mrf.mxu3 }
  0xeb   : > { %824 = vst.msk [vmem:[%s1332_s23 + $0x1c] sm:$0xf] %vm816_vm1, %v791_v19  ;;  %v692_v23 = vmul.f32 %v1317_v45, %v621_v20  ;;  %v743_v25 = vadd.f32 %v1322_v48, %v707_v22 }
  0xed   : > { %v728_v26 = vadd.f32 %v1322_v48, %v692_v23  ;;  %v775_v27 = vmax.f32 %v743_v25, 0.0 }
  0xee   : > { %v571_v29 = vpop.f32.mrf.mxu2  ;;  %v630_v35 = vpop.f32.mrf.mxu1 }
  0xef   : > { %v760_v28 = vmax.f32 %v728_v26, 0.0  ;;  %v807_v30 = vpack.c.bf16 %v775_v27, %v775_v27  ;;  %v661_v31 = vadd.f32 %v660_v8, %v571_v29 }
  0xf0   : > { %v533_v32 = vpop.f32.mrf.mxu0 }
  0xf1   : > { %v792_v33 = vpack.c.bf16 %v760_v28, %v760_v28  ;;  %v623_v34 = vadd.f32 %v622_v57, %v533_v32  ;;  %840 = vst.msk [vmem:[%s1332_s23 + $0x5c] sm:$0xf] %vm816_vm1, %v807_v30  ;;  %v708_v36 = vmul.f32 %v1317_v45, %v661_v31  ;;  %v667_v60 = vpop.f32.mrf.mxu3 }
  0xf3   : > { %825 = vst.msk [vmem:[%s1332_s23 + $0x20] sm:$0xf] %vm816_vm1, %v792_v33  ;;  %v693_v37 = vmul.f32 %v1317_v45, %v623_v34  ;;  %v744_v38 = vadd.f32 %v1322_v48, %v708_v36 }
  0xf5   : > { %v729_v39 = vadd.f32 %v1322_v48, %v693_v37  ;;  %v776_v41 = vmax.f32 %v744_v38, 0.0 }
  0xf6   : > { %v573_v43 = vpop.f32.mrf.mxu2  ;;  %v632_v51 = vpop.f32.mrf.mxu1 }
  0xf7   : > { %v761_v42 = vmax.f32 %v729_v39, 0.0  ;;  %v808_v44 = vpack.c.bf16 %v776_v41, %v776_v41  ;;  %v663_v46 = vadd.f32 %v662_v24, %v573_v43 }
  0xf8   : > { %v536_v47 = vpop.f32.mrf.mxu0 }
  0xf9   : > { %v793_v49 = vpack.c.bf16 %v761_v42, %v761_v42  ;;  %v626_v50 = vadd.f32 %v625_v7, %v536_v47  ;;  %841 = vst.msk [vmem:[%s1332_s23 + $0x60] sm:$0xf] %vm816_vm1, %v808_v44  ;;  %v709_v52 = vmul.f32 %v1317_v45, %v663_v46  ;;  %v670_v15 = vpop.f32.mrf.mxu3 }
  0xfb   : > { %826 = vst.msk [vmem:[%s1332_s23 + $0x24] sm:$0xf] %vm816_vm1, %v793_v49  ;;  %v694_v54 = vmul.f32 %v1317_v45, %v626_v50  ;;  %v745_v55 = vadd.f32 %v1322_v48, %v709_v52 }
  0xfd   : > { %v730_v56 = vadd.f32 %v1322_v48, %v694_v54  ;;  %v777_v57 = vmax.f32 %v745_v55, 0.0 }
  0xfe   : > { %v576_v59 = vpop.f32.mrf.mxu2  ;;  %v635_v3 = vpop.f32.mrf.mxu1 }
  0xff   : > { %v762_v58 = vmax.f32 %v730_v56, 0.0  ;;  %v809_v61 = vpack.c.bf16 %v777_v57, %v777_v57  ;;  %v666_v63 = vadd.f32 %v665_v40, %v576_v59 }
 0x100   : > { %v538_v0 = vpop.f32.mrf.mxu0 }
 0x101   : > { %v794_v1 = vpack.c.bf16 %v762_v58, %v762_v58  ;;  %v628_v2 = vadd.f32 %v627_v21, %v538_v0  ;;  %842 = vst.msk [vmem:[%s1332_s23 + $0x64] sm:$0xf] %vm816_vm1, %v809_v61  ;;  %v710_v4 = vmul.f32 %v1317_v45, %v666_v63  ;;  %v672_v33 = vpop.f32.mrf.mxu3 }
 0x103   : > { %827 = vst.msk [vmem:[%s1332_s23 + $0x28] sm:$0xf] %vm816_vm1, %v794_v1  ;;  %v695_v5 = vmul.f32 %v1317_v45, %v628_v2  ;;  %v746_v6 = vadd.f32 %v1322_v48, %v710_v4 }
 0x105   : > { %v731_v7 = vadd.f32 %v1322_v48, %v695_v5  ;;  %v778_v8 = vmax.f32 %v746_v6, 0.0 }
 0x106   : > { %v578_v10 = vpop.f32.mrf.mxu2  ;;  %v637_v17 = vpop.f32.mrf.mxu1 }
 0x107   : > { %v763_v9 = vmax.f32 %v731_v7, 0.0  ;;  %v810_v11 = vpack.c.bf16 %v778_v8, %v778_v8  ;;  %v668_v12 = vadd.f32 %v667_v60, %v578_v10 }
 0x108   : > { %v541_v13 = vpop.f32.mrf.mxu0 }
 0x109   : > { %v795_v14 = vpack.c.bf16 %v763_v9, %v763_v9  ;;  %v631_v16 = vadd.f32 %v630_v35, %v541_v13  ;;  %843 = vst.msk [vmem:[%s1332_s23 + $0x68] sm:$0xf] %vm816_vm1, %v810_v11  ;;  %v711_v18 = vmul.f32 %v1317_v45, %v668_v12  ;;  %v675_v57 = vpop.f32.mrf.mxu3 }
 0x10b   : > { %828 = vst.msk [vmem:[%s1332_s23 + $0x2c] sm:$0xf] %vm816_vm1, %v795_v14  ;;  %v696_v19 = vmul.f32 %v1317_v45, %v631_v16  ;;  %v747_v20 = vadd.f32 %v1322_v48, %v711_v18 }
 0x10d   : > { %v732_v21 = vadd.f32 %v1322_v48, %v696_v19  ;;  %v779_v22 = vmax.f32 %v747_v20, 0.0 }
 0x10e   : > { %v581_v24 = vpop.f32.mrf.mxu2  ;;  %v640_v30 = vpop.f32.mrf.mxu1 }
 0x10f   : > { %v764_v23 = vmax.f32 %v732_v21, 0.0  ;;  %v811_v25 = vpack.c.bf16 %v779_v22, %v779_v22  ;;  %v671_v26 = vadd.f32 %v670_v15, %v581_v24  ;;  %v641_v32 = vadd.f32 %v640_v30, %v1327_v53 }
 0x110   : > { %v543_v27 = vpop.f32.mrf.mxu0 }
 0x111   : > { %v796_v28 = vpack.c.bf16 %v764_v23, %v764_v23  ;;  %v633_v29 = vadd.f32 %v632_v51, %v543_v27  ;;  %844 = vst.msk [vmem:[%s1332_s23 + $0x6c] sm:$0xf] %vm816_vm1, %v811_v25  ;;  %v712_v31 = vmul.f32 %v1317_v45, %v671_v26  ;;  %v700_v36 = vmul.f32 %v1317_v45, %v641_v32  ;;  %v677_v11 = vpop.f32.mrf.mxu3 }
 0x113   : > { %829 = vst.msk [vmem:[%s1332_s23 + $0x30] sm:$0xf] %vm816_vm1, %v796_v28  ;;  %v697_v34 = vmul.f32 %v1317_v45, %v633_v29  ;;  %v748_v35 = vadd.f32 %v1322_v48, %v712_v31  ;;  %v736_v39 = vadd.f32 %v1322_v48, %v700_v36 }
 0x115   : > { %v733_v37 = vadd.f32 %v1322_v48, %v697_v34  ;;  %v780_v38 = vmax.f32 %v748_v35, 0.0  ;;  %v768_v42 = vmax.f32 %v736_v39, 0.0 }
 0x116   : > { %v583_v41 = vpop.f32.mrf.mxu2  ;;  %v642_v49 = vpop.f32.mrf.mxu1 }
 0x117   : > { %v765_v40 = vmax.f32 %v733_v37, 0.0  ;;  %v812_v53 = vpack.c.bf16 %v780_v38, %v780_v38  ;;  %v673_v43 = vadd.f32 %v672_v33, %v583_v41  ;;  %v800_v50 = vpack.c.bf16 %v768_v42, %v768_v42 }
 0x118   : > { %v546_v44 = vpop.f32.mrf.mxu0  ;;  %v643_v52 = vadd.f32 %v642_v49, %v1338_v62 }
 0x119   : > { %v797_v46 = vpack.c.bf16 %v765_v40, %v765_v40  ;;  %v636_v47 = vadd.f32 %v635_v3, %v546_v44  ;;  %845 = vst.msk [vmem:[%s1332_s23 + $0x70] sm:$0xf] %vm816_vm1, %v812_v53  ;;  %v713_v51 = vmul.f32 %v1317_v45, %v673_v43 }
 0x11a   : > { %833 = vst.msk [vmem:[%s1332_s23 + $0x40] sm:$0xf] %vm816_vm1, %v800_v50  ;;  %v701_v56 = vmul.f32 %v1317_v45, %v643_v52 }
 0x11b   : > { %830 = vst.msk [vmem:[%s1332_s23 + $0x34] sm:$0xf] %vm816_vm1, %v797_v46  ;;  %v698_v54 = vmul.f32 %v1317_v45, %v636_v47  ;;  %v749_v55 = vadd.f32 %v1322_v48, %v713_v51 }
 0x11c   : > { %v737_v60 = vadd.f32 %v1322_v48, %v701_v56 }
 0x11d   : > { %v734_v58 = vadd.f32 %v1322_v48, %v698_v54  ;;  %v781_v59 = vmax.f32 %v749_v55, 0.0 }
 0x11e   : > { %v586_v61 = vpop.f32.mrf.mxu2  ;;  %v769_v0 = vmax.f32 %v737_v60, 0.0 }
 0x11f   : > { %v766_v62 = vmax.f32 %v734_v58, 0.0  ;;  %v813_v63 = vpack.c.bf16 %v781_v59, %v781_v59  ;;  %v676_v1 = vadd.f32 %v675_v57, %v586_v61 }
 0x120   : > { %v548_v2 = vpop.f32.mrf.mxu0  ;;  %v801_v5 = vpack.c.bf16 %v769_v0, %v769_v0 }
 0x121   : > { %v798_v3 = vpack.c.bf16 %v766_v62, %v766_v62  ;;  %v638_v4 = vadd.f32 %v637_v17, %v548_v2  ;;  %846 = vst.msk [vmem:[%s1332_s23 + $0x74] sm:$0xf] %vm816_vm1, %v813_v63  ;;  %v714_v6 = vmul.f32 %v1317_v45, %v676_v1 }
 0x122   : > { %834 = vst.msk [vmem:[%s1332_s23 + $0x44] sm:$0xf] %vm816_vm1, %v801_v5 }
 0x123   : > { %831 = vst.msk [vmem:[%s1332_s23 + $0x38] sm:$0xf] %vm816_vm1, %v798_v3  ;;  %v699_v7 = vmul.f32 %v1317_v45, %v638_v4  ;;  %v750_v8 = vadd.f32 %v1322_v48, %v714_v6 }
 0x125   : > { %v735_v9 = vadd.f32 %v1322_v48, %v699_v7  ;;  %v782_v10 = vmax.f32 %v750_v8, 0.0 }
 0x126   : > { %v588_v13 = vpop.f32.mrf.mxu2 }
 0x127   : > { %v767_v12 = vmax.f32 %v735_v9, 0.0  ;;  %v814_v14 = vpack.c.bf16 %v782_v10, %v782_v10  ;;  %v678_v15 = vadd.f32 %v677_v11, %v588_v13 }
 0x129   : > { %v799_v16 = vpack.c.bf16 %v767_v12, %v767_v12  ;;  %847 = vst.msk [vmem:[%s1332_s23 + $0x78] sm:$0xf] %vm816_vm1, %v814_v14  ;;  %v715_v17 = vmul.f32 %v1317_v45, %v678_v15 }
 0x12b   : > { %832 = vst.msk [vmem:[%s1332_s23 + $0x3c] sm:$0xf] %vm816_vm1, %v799_v16  ;;  %v751_v18 = vadd.f32 %v1322_v48, %v715_v17 }
 0x12d   : > { %v783_v19 = vmax.f32 %v751_v18, 0.0 }
 0x12f   : > { %v815_v20 = vpack.c.bf16 %v783_v19, %v783_v19 }
 0x131   : > { %848 = vst.msk [vmem:[%s1332_s23 + $0x7c] sm:$0xf] %vm816_vm1, %v815_v20 }
 0x132 PF: > { %s14_s15 = sadd.s32 1, %s1164_s15  }
 0x133   : > { %p11_p4 = scmp.ge.s32.totalorder %s14_s15, 4  }
 0x135   :  { %13 = sbr.rel (!%p11_p4) target bundleno = 1 (0x1), region = 66 }

// kernel: _lambda_.43
= control target key start
LH: loop header
LB: loop body
LE: loop exit
PB: predicated region body
PF: predicated region fallthrough
CT: control target
= control target key end

     0   :  { %s1431_s23 = smov 0   ;;  %s1781_s0 = inlined_call_operand.vmem [shape: bf16[512,144], index: 0, kind: input, shape index: {}]   ;;  %s1782_s1 = inlined_call_operand.vmem [shape: bf16[144,32], index: 1, kind: input, shape index: {}]   ;;  %s1783_s2 = inlined_call_operand.vmem [shape: f32[1,32], index: 2, kind: input, shape index: {}]   ;;  %s1784_s3 = inlined_call_operand.vmem [shape: f32[1,32], index: 3, kind: input, shape index: {}]   ;;  %s1785_s4 = inlined_call_operand.vmem [shape: bf16[32,1], index: 4, kind: input, shape index: {}]   ;;  %s1786_s5 = inlined_call_operand.<no memory space> [shape: f32[1,1], index: 5, kind: input, shape index: {}]   ;;  %s1787_s6 = inlined_call_operand.vmem [shape: f32[512,1], index: 6, kind: output, shape index: {}]  }
   0x1   :  { %v11_v0 = vstv %s1786_s5 }
   0x2   :  { %12 = vst [vmem:[#allocation2] sm:$0x1] %v11_v0 }
   0x3 LB: > { %s1103_s24 = sadd.s32 4294967295, %s1391_s23   ;;  %p1107_p0 = scmp.ge.s32.totalorder %s1391_s23, 1  ;;  %s1391_s23 = sphi %s1431_s23, %s18_s23  }
   0x4   : > { %p216_p1 = scmp.lt.s32.totalorder %s1391_s23, 3 }
   0x6   : > { %p217_p2 = pnand %p1107_p0, %p216_p1 }
   0x7   : > { %s1108_s28 = sshll.u32 (!%p217_p2), %s1103_s24, 5 }
   0x8   : > { %220 = sbr.rel (%p217_p2) target bundleno = 524 (0x20c), region = 44  ;;  %p248_p3 = scmp.lt.s32.totalorder (!%p217_p2), %s1108_s28, 63 }
   0xd   : > { %v1359_v1 = vld [vmem:[%s1782_s1 + $0x38] sm:$0xff]  ;;  %v1360_v2 = vld [vmem:[%s1782_s1 + $0x40] sm:$0xff]  ;;  %v1358_v3 = vld [vmem:[%s1782_s1 + $0x30] sm:$0xff]  ;;  %s1789_s28 = smov (!%p248_p3, %s1108_s28), 63  ;;  %vm509_vm0 = vcmask 130048   ;;  %vm876_vm1 = vcmask 261120  }
   0xe   : > { %558 = vmatpush.bf16.msra.mxu0 %v1359_v1  ;;  %654 = vmatpush.bf16.msra.mxu1 %v1360_v2  ;;  %s1319_s7 = sshll.u32 %s1789_s28, 3  ;;  %v1357_v4 = vld [vmem:[%s1782_s1 + $0x28] sm:$0xff]  ;;  %v1356_v8 = vld [vmem:[%s1782_s1 + $0x20] sm:$0xff]  ;;  %v1355_v9 = vld [vmem:[%s1782_s1 + $0x18] sm:$0xff]  ;;  %vm1014_vm2 = vcmask 7168  }
   0xf   : > { %1363 = vmatpush.bf16.msra.mxu3 %v1359_v1  ;;  %s1456_s10 = scalar_lea.vmem %s1781_s0, %s1319_s7  ;;  %v1354_v10 = vld [vmem:[%s1782_s1 + $0x10] sm:$0xff]  ;;  %v1353_v14 = vld [vmem:[%s1782_s1 + $0x8] sm:$0xff]  ;;  %v1352_v15 = vld [vmem:[%s1782_s1] sm:$0xff]  ;;  %s1658_s11 = scalar_lea.vmem %s1787_s6, %s1319_s7 }
  0x10   : > { %v1320_v5 = vld [vmem:[%s1456_s10 + $0x4] sm:$0xf]  ;;  %v1117_v6 = vld [vmem:[%s1456_s10 + $0x8] sm:$0xf0]  ;;  %v1322_v11 = vld [vmem:[%s1456_s10 + $0x14] sm:$0xf] }
  0x11   : > { %v1120_v7 = vor.u32 %v1320_v5, %v1117_v6  ;;  %v1125_v12 = vld [vmem:[%s1456_s10 + $0x18] sm:$0xf0]  ;;  %v1115_v16 = vld [vmem:[%s1456_s10] sm:$0xf]  ;;  %v1321_v17 = vld [vmem:[%s1456_s10 + $0x4] sm:$0xf0] }
  0x12   : > { %559 = vmatpush.bf16.msra.mxu0 %v1358_v3  ;;  %v1128_v13 = vor.u32 %v1322_v11, %v1125_v12  ;;  %v1211_v18 = vld [vmem:[%s1456_s10 + $0xc0] sm:$0xf]  ;;  %v1345_v19 = vld [vmem:[%s1456_s10 + $0xc4] sm:$0xf0]  ;;  %v1116_v20 = vor.u32 %v1321_v17, %v1115_v16  ;;  %v1324_v22 = vld [vmem:[%s1456_s10 + $0x24] sm:$0xf] }
  0x13   : > { %1364 = vmatpush.bf16.msra.mxu3 %v1358_v3  ;;  %1277 = vmatmul.msk.bf16.vlgmr.msra.gmra.mxu1 %vm509_vm0, %v1120_v7  ;;  %v1212_v21 = vor.u32 %v1345_v19, %v1211_v18  ;;  %v1133_v23 = vld [vmem:[%s1456_s10 + $0x28] sm:$0xf0]  ;;  %v1123_v25 = vld [vmem:[%s1456_s10 + $0x10] sm:$0xf]  ;;  %v1323_v26 = vld [vmem:[%s1456_s10 + $0x14] sm:$0xf0] }
  0x14   : > { %v1136_v24 = vor.u32 %v1324_v22, %v1133_v23  ;;  %v1219_v27 = vld [vmem:[%s1456_s10 + $0xd0] sm:$0xf]  ;;  %v1347_v28 = vld [vmem:[%s1456_s10 + $0xd4] sm:$0xf0]  ;;  %v1124_v29 = vor.u32 %v1323_v26, %v1123_v25  ;;  %v1326_v31 = vld [vmem:[%s1456_s10 + $0x34] sm:$0xf] }
  0x15   : > { %v1220_v30 = vor.u32 %v1347_v28, %v1219_v27  ;;  %v1141_v32 = vld [vmem:[%s1456_s10 + $0x38] sm:$0xf0]  ;;  %v1131_v34 = vld [vmem:[%s1456_s10 + $0x20] sm:$0xf]  ;;  %v1325_v35 = vld [vmem:[%s1456_s10 + $0x24] sm:$0xf0] }
  0x16   : > { %560 = vmatpush.bf16.msra.mxu0 %v1357_v4  ;;  %v1144_v33 = vor.u32 %v1326_v31, %v1141_v32  ;;  %v1227_v36 = vld [vmem:[%s1456_s10 + $0xe0] sm:$0xf]  ;;  %v1349_v37 = vld [vmem:[%s1456_s10 + $0xe4] sm:$0xf0]  ;;  %v1132_v38 = vor.u32 %v1325_v35, %v1131_v34  ;;  %v1328_v40 = vld [vmem:[%s1456_s10 + $0x44] sm:$0xf] }
  0x17   : > { %1365 = vmatpush.bf16.msra.mxu3 %v1357_v4  ;;  %v1228_v39 = vor.u32 %v1349_v37, %v1227_v36  ;;  %v1149_v41 = vld [vmem:[%s1456_s10 + $0x48] sm:$0xf0]  ;;  %v1139_v43 = vld [vmem:[%s1456_s10 + $0x30] sm:$0xf]  ;;  %v1327_v44 = vld [vmem:[%s1456_s10 + $0x34] sm:$0xf0] }
  0x18   : > { %v1152_v42 = vor.u32 %v1328_v40, %v1149_v41  ;;  %v1235_v45 = vld [vmem:[%s1456_s10 + $0xf0] sm:$0xf]  ;;  %v1351_v46 = vld [vmem:[%s1456_s10 + $0xf4] sm:$0xf0]  ;;  %v1140_v47 = vor.u32 %v1327_v44, %v1139_v43  ;;  %v1330_v49 = vld [vmem:[%s1456_s10 + $0x54] sm:$0xf] }
  0x19   : > { %v1236_v48 = vor.u32 %v1351_v46, %v1235_v45  ;;  %v1157_v50 = vld [vmem:[%s1456_s10 + $0x58] sm:$0xf0]  ;;  %v1147_v52 = vld [vmem:[%s1456_s10 + $0x40] sm:$0xf]  ;;  %v1329_v53 = vld [vmem:[%s1456_s10 + $0x44] sm:$0xf0] }
  0x1a   : > { %561 = vmatpush.bf16.msra.mxu0 %v1356_v8  ;;  %v1160_v51 = vor.u32 %v1330_v49, %v1157_v50  ;;  %v1346_v54 = vld [vmem:[%s1456_s10 + $0xd4] sm:$0xf]  ;;  %v1221_v55 = vld [vmem:[%s1456_s10 + $0xd8] sm:$0xf0]  ;;  %v1148_v56 = vor.u32 %v1329_v53, %v1147_v52  ;;  %v1332_v58 = vld [vmem:[%s1456_s10 + $0x64] sm:$0xf] }
  0x1b   : > { %1366 = vmatpush.bf16.msra.mxu3 %v1356_v8  ;;  %v1224_v57 = vor.u32 %v1346_v54, %v1221_v55  ;;  %v1165_v59 = vld [vmem:[%s1456_s10 + $0x68] sm:$0xf0]  ;;  %v1155_v61 = vld [vmem:[%s1456_s10 + $0x50] sm:$0xf]  ;;  %v1331_v62 = vld [vmem:[%s1456_s10 + $0x54] sm:$0xf0] }
  0x1c   : > { %v1168_v60 = vor.u32 %v1332_v58, %v1165_v59  ;;  %v1348_v63 = vld [vmem:[%s1456_s10 + $0xe4] sm:$0xf]  ;;  %v1229_v0 = vld [vmem:[%s1456_s10 + $0xe8] sm:$0xf0]  ;;  %v1156_v1 = vor.u32 %v1331_v62, %v1155_v61  ;;  %v1334_v3 = vld [vmem:[%s1456_s10 + $0x74] sm:$0xf] }
  0x1d   : > { %v1173_v4 = vld [vmem:[%s1456_s10 + $0x78] sm:$0xf0]  ;;  %v1163_v6 = vld [vmem:[%s1456_s10 + $0x60] sm:$0xf]  ;;  %v1333_v7 = vld [vmem:[%s1456_s10 + $0x64] sm:$0xf0] }
  0x1e   : > { %562 = vmatpush.bf16.msra.mxu0 %v1355_v9  ;;  %v1176_v5 = vor.u32 %v1334_v3, %v1173_v4  ;;  %v1350_v8 = vld [vmem:[%s1456_s10 + $0xf4] sm:$0xf]  ;;  %v1336_v12 = vld [vmem:[%s1456_s10 + $0x84] sm:$0xf]  ;;  %v1362_v16 = vld [vmem:[%s1785_s4 + $0x8] sm:$0xff] }
  0x1f   : > { %1367 = vmatpush.bf16.msra.mxu3 %v1355_v9  ;;  %v1237_v9 = vld [vmem:[%s1456_s10 + $0xf8] sm:$0xf0]  ;;  %v1171_v17 = vld [vmem:[%s1456_s10 + $0x70] sm:$0xf]  ;;  %v1335_v18 = vld [vmem:[%s1456_s10 + $0x74] sm:$0xf0]  ;;  %931 = vmatpush.bf16.msra.mxu2 %v1362_v16 }
  0x20   : > { %v1240_v11 = vor.u32 %v1350_v8, %v1237_v9  ;;  %v1361_v19 = vld [vmem:[%s1785_s4] sm:$0xff]  ;;  %v1338_v22 = vld [vmem:[%s1456_s10 + $0x94] sm:$0xf]  ;;  %v1189_v23 = vld [vmem:[%s1456_s10 + $0x98] sm:$0xf0] }
  0x21   : > { %v1179_v26 = vld [vmem:[%s1456_s10 + $0x80] sm:$0xf]  ;;  %v1337_v27 = vld [vmem:[%s1456_s10 + $0x84] sm:$0xf0]  ;;  %v1197_v34 = vld [vmem:[%s1456_s10 + $0xa8] sm:$0xf0] }
  0x22   : > { %563 = vmatpush.bf16.msra.mxu0 %v1354_v10  ;;  %v1180_v28 = vor.u32 %v1337_v27, %v1179_v26  ;;  %v1550_v32 = vld [vmem:[%s1783_s2] ss:$0 sm:$0xff]  ;;  %v1187_v44 = vld [vmem:[%s1456_s10 + $0x90] sm:$0xf]  ;;  %v1339_v45 = vld [vmem:[%s1456_s10 + $0x94] sm:$0xf0] }
  0x23   : > { %1368 = vmatpush.bf16.msra.mxu3 %v1354_v10  ;;  %1278 = vmatmul.msk.bf16.gmra.mxu1 %vm509_vm0, %v1128_v13  ;;  %v1164_v10 = vor.u32 %v1333_v7, %v1163_v6  ;;  %v1181_v13 = vld [vmem:[%s1456_s10 + $0x88] sm:$0xf0]  ;;  %v1558_v36 = vld [vmem:[%s1784_s3] ss:$0 sm:$0xff]  ;;  %v1188_v49 = vor.u32 %v1339_v45, %v1187_v44  ;;  %v1342_v55 = vld [vmem:[%s1456_s10 + $0xb4] sm:$0xf] }
  0x24   : > { %932 = vmatpush.bf16.msra.mxu2 %v1361_v19 }
  0x26   : > { %564 = vmatpush.bf16.msra.mxu0 %v1353_v14 }
  0x27   : > { %1369 = vmatpush.bf16.msra.mxu3 %v1353_v14  ;;  %v1184_v14 = vor.u32 %v1336_v12, %v1181_v13  ;;  %v1344_v12 = vld [vmem:[%s1456_s10 + $0xc4] sm:$0xf]  ;;  %v1213_v13 = vld [vmem:[%s1456_s10 + $0xc8] sm:$0xf0] }
  0x2a   : > { %565 = vmatpush.bf16.msra.mxu0 %v1352_v15 }
  0x2b   : > { %1370 = vmatpush.bf16.msra.mxu3 %v1352_v15 }
  0x2d   : > { %566 = vmatmul.bf16.vlgmr.msra.gmra.mxu0 %v1116_v20  ;;  %v1172_v20 = vor.u32 %v1335_v18, %v1171_v17  ;;  %v1216_v17 = vor.u32 %v1344_v12, %v1213_v13 }
  0x2e   : > { %626 = vmatmul.bf16.vlgmr.msra.gmra.mxu3 %v1212_v21 }
  0x2f   : > { %1371 = vmatpush.bf16.msrb.mxu3 %v1360_v2  ;;  %v1232_v2 = vor.u32 %v1348_v63, %v1229_v0 }
  0x33   : > { %1279 = vmatmul.msk.bf16.gmra.mxu1 %vm509_vm0, %v1136_v24  ;;  %1372 = vmatpush.bf16.msra.mxu3 %v1362_v16  ;;  %v1192_v24 = vor.u32 %v1338_v22, %v1189_v23  ;;  %v1203_v22 = vld [vmem:[%s1456_s10 + $0xb0] sm:$0xf]  ;;  %v1343_v23 = vld [vmem:[%s1456_s10 + $0xb4] sm:$0xf0] }
  0x34   : > { %v1204_v27 = vor.u32 %v1343_v23, %v1203_v22 }
  0x37   : > { %1373 = vmatpush.bf16.msra.mxu3 %v1361_v19 }
  0x3d   : > { %571 = vmatmul.bf16.gmra.mxu0 %v1124_v29 }
  0x3e   : > { %631 = vmatmul.bf16.gmra.mxu3 %v1220_v30 }
  0x43   : > { %1280 = vmatmul.msk.bf16.gmra.mxu1 %vm509_vm0, %v1144_v33  ;;  %v1340_v33 = vld [vmem:[%s1456_s10 + $0xa4] sm:$0xf] }
  0x4d   : > { %576 = vmatmul.bf16.gmra.mxu0 %v1132_v38 }
  0x4e   : > { %636 = vmatmul.bf16.gmra.mxu3 %v1228_v39  ;;  %v1200_v39 = vor.u32 %v1340_v33, %v1197_v34 }
  0x53   : > { %1281 = vmatmul.msk.bf16.gmra.mxu1 %vm509_vm0, %v1152_v42 }
  0x5d   : > { %581 = vmatmul.bf16.gmra.mxu0 %v1140_v47 }
  0x5e   : > { %641 = vmatmul.bf16.gmra.mxu3 %v1236_v48 }
  0x63   : > { %1282 = vmatmul.msk.bf16.gmra.mxu1 %vm509_vm0, %v1160_v51 }
  0x6d   : > { %586 = vmatmul.bf16.gmra.mxu0 %v1148_v56  ;;  %v1205_v56 = vld [vmem:[%s1456_s10 + $0xb8] sm:$0xf0] }
  0x6e   : > { %1290 = vmatmul.msk.bf16.vlgmr.msrb.gmra.mxu3 %vm509_vm0, %v1224_v57 }
  0x73   : > { %1283 = vmatmul.msk.bf16.gmra.mxu1 %vm509_vm0, %v1168_v60  ;;  %v1208_v60 = vor.u32 %v1342_v55, %v1205_v56 }
  0x7d   : > { %591 = vmatmul.bf16.gmra.mxu0 %v1156_v1  ;;  %v1195_v1 = vld [vmem:[%s1456_s10 + $0xa0] sm:$0xf] }
  0x7e   : > { %1291 = vmatmul.msk.bf16.gmra.mxu3 %vm509_vm0, %v1232_v2  ;;  %v1341_v2 = vld [vmem:[%s1456_s10 + $0xa4] sm:$0xf0] }
  0x7f   : > { %v1196_v6 = vor.u32 %v1341_v2, %v1195_v1 }
  0x83   : > { %1284 = vmatmul.msk.bf16.gmra.mxu1 %vm509_vm0, %v1176_v5 }
  0x8d   : > { %596 = vmatmul.bf16.gmra.mxu0 %v1164_v10 }
  0x8e   : > { %1292 = vmatmul.msk.bf16.gmra.mxu3 %vm509_vm0, %v1240_v11 }
  0x90   : > { %v656_v15 = vpop.f32.mrf.mxu1 }
  0x93   : > { %1285 = vmatmul.msk.bf16.gmra.mxu1 %vm509_vm0, %v1184_v14 }
  0x98   : > { %v658_v21 = vpop.f32.mrf.mxu1 }
  0x9d   : > { %601 = vmatmul.bf16.gmra.mxu0 %v1172_v20 }
  0xa0   : > { %v661_v25 = vpop.f32.mrf.mxu1 }
  0xa3   : > { %1286 = vmatmul.msk.bf16.gmra.mxu1 %vm509_vm0, %v1192_v24 }
  0xa8   : > { %v663_v30 = vpop.f32.mrf.mxu1 }
  0xaa   : > { %v567_v29 = vpop.f32.mrf.mxu0 }
  0xab   : > { %v657_v31 = vadd.f32 %v656_v15, %v567_v29 }
  0xad   : > { %606 = vmatmul.bf16.gmra.mxu0 %v1180_v28  ;;  %v740_v35 = vmul.f32 %v1550_v32, %v657_v31 }
  0xaf   : > { %v776_v42 = vadd.f32 %v1558_v36, %v740_v35 }
  0xb0   : > { %v666_v41 = vpop.f32.mrf.mxu1 }
  0xb1   : > { %v1560_v37 = vpop.f32.mrf.mxu3  ;;  %v808_v47 = vmax.f32 %v776_v42, 0.0 }
  0xb2   : > { %v569_v38 = vpop.f32.mrf.mxu0 }
  0xb3   : > { %v659_v40 = vadd.f32 %v658_v21, %v569_v38  ;;  %1287 = vmatmul.msk.bf16.gmra.mxu1 %vm509_vm0, %v1200_v39 }
  0xb5   : > { %v741_v43 = vmul.f32 %v1550_v32, %v659_v40 }
  0xb7   : > { %v777_v46 = vadd.f32 %v1558_v36, %v741_v43 }
  0xb8   : > { %v668_v52 = vpop.f32.mrf.mxu1 }
  0xb9   : > { %v809_v48 = vmax.f32 %v777_v46, 0.0  ;;  %v1568_v50 = vpop.f32.mrf.mxu3 }
  0xba   : > { %v572_v51 = vpop.f32.mrf.mxu0 }
  0xbb   : > { %v840_v53 = vpack.c.bf16 %v809_v48, %v808_v47  ;;  %v662_v54 = vadd.f32 %v661_v25, %v572_v51 }
  0xbd   : > { %611 = vmatmul.bf16.gmra.mxu0 %v1188_v49  ;;  %1301 = vmatmul.msk.bf16.vlgmr.msra.gmra.mxu2 %vm876_vm1, %v840_v53  ;;  %v742_v57 = vmul.f32 %v1550_v32, %v662_v54 }
  0xbf   : > { %v778_v63 = vadd.f32 %v1558_v36, %v742_v57 }
  0xc0   : > { %v671_v62 = vpop.f32.mrf.mxu1 }
  0xc1   : > { %v1574_v58 = vpop.f32.mrf.mxu3  ;;  %v810_v4 = vmax.f32 %v778_v63, 0.0 }
  0xc2   : > { %v574_v59 = vpop.f32.mrf.mxu0 }
  0xc3   : > { %v664_v61 = vadd.f32 %v663_v30, %v574_v59  ;;  %1288 = vmatmul.msk.bf16.gmra.mxu1 %vm509_vm0, %v1208_v60 }
  0xc5   : > { %v743_v0 = vmul.f32 %v1550_v32, %v664_v61 }
  0xc7   : > { %v779_v3 = vadd.f32 %v1558_v36, %v743_v0 }
  0xc8   : > { %v673_v9 = vpop.f32.mrf.mxu1 }
  0xc9   : > { %v811_v5 = vmax.f32 %v779_v3, 0.0  ;;  %v634_v7 = vpop.f32.mrf.mxu3 }
  0xca   : > { %v577_v8 = vpop.f32.mrf.mxu0 }
  0xcb   : > { %v841_v10 = vpack.c.bf16 %v811_v5, %v810_v4  ;;  %v667_v11 = vadd.f32 %v666_v41, %v577_v8 }
  0xcd   : > { %616 = vmatmul.bf16.gmra.mxu0 %v1196_v6  ;;  %1302 = vmatmul.msk.bf16.gmra.mxu2 %vm876_vm1, %v841_v10  ;;  %v744_v14 = vmul.f32 %v1550_v32, %v667_v11 }
  0xcf   : > { %v780_v20 = vadd.f32 %v1558_v36, %v744_v14 }
  0xd0   : > { %v676_v19 = vpop.f32.mrf.mxu1 }
  0xd1   : > { %v1586_v15 = vpop.f32.mrf.mxu3  ;;  %v812_v25 = vmax.f32 %v780_v20, 0.0 }
  0xd2   : > { %v579_v16 = vpop.f32.mrf.mxu0 }
  0xd3   : > { %v669_v18 = vadd.f32 %v668_v52, %v579_v16  ;;  %1289 = vmatmul.msk.bf16.gmra.mxu1 %vm509_vm0, %v1216_v17 }
  0xd5   : > { %v745_v21 = vmul.f32 %v1550_v32, %v669_v18 }
  0xd7   : > { %v781_v24 = vadd.f32 %v1558_v36, %v745_v21 }
  0xd8   : > { %v678_v30 = vpop.f32.mrf.mxu1 }
  0xd9   : > { %v813_v26 = vmax.f32 %v781_v24, 0.0  ;;  %v1594_v28 = vpop.f32.mrf.mxu3 }
  0xda   : > { %v582_v29 = vpop.f32.mrf.mxu0 }
  0xdb   : > { %v842_v31 = vpack.c.bf16 %v813_v26, %v812_v25  ;;  %v672_v33 = vadd.f32 %v671_v62, %v582_v29 }
  0xdd   : > { %621 = vmatmul.bf16.gmra.mxu0 %v1204_v27  ;;  %1303 = vmatmul.msk.bf16.gmra.mxu2 %vm876_vm1, %v842_v31  ;;  %v746_v34 = vmul.f32 %v1550_v32, %v672_v33 }
  0xdf   : > { %v782_v41 = vadd.f32 %v1558_v36, %v746_v34 }
  0xe0   : > { %v681_v40 = vpop.f32.mrf.mxu1 }
  0xe1   : > { %v1598_v35 = vpop.f32.mrf.mxu3  ;;  %v814_v44 = vmax.f32 %v782_v41, 0.0 }
  0xe2   : > { %v584_v38 = vpop.f32.mrf.mxu0 }
  0xe3   : > { %v674_v39 = vadd.f32 %v673_v9, %v584_v38 }
  0xe5   : > { %v747_v42 = vmul.f32 %v1550_v32, %v674_v39 }
  0xe7   : > { %v783_v43 = vadd.f32 %v1558_v36, %v747_v42 }
  0xe8   : > { %v683_v48 = vpop.f32.mrf.mxu1 }
  0xe9   : > { %v815_v45 = vmax.f32 %v783_v43, 0.0  ;;  %v1603_v46 = vpop.f32.mrf.mxu3 }
  0xea   : > { %v587_v47 = vpop.f32.mrf.mxu0 }
  0xeb   : > { %v843_v49 = vpack.c.bf16 %v815_v45, %v814_v44  ;;  %v677_v51 = vadd.f32 %v676_v19, %v587_v47 }
  0xed   : > { %1304 = vmatmul.msk.bf16.gmra.mxu2 %vm876_vm1, %v843_v49  ;;  %v748_v52 = vmul.f32 %v1550_v32, %v677_v51 }
  0xef   : > { %v784_v59 = vadd.f32 %v1558_v36, %v748_v52 }
  0xf0   : > { %v686_v57 = vpop.f32.mrf.mxu1 }
  0xf1   : > { %v721_v53 = vpop.f32.mrf.mxu3  ;;  %v816_v63 = vmax.f32 %v784_v59, 0.0 }
  0xf2   : > { %v589_v54 = vpop.f32.mrf.mxu0  ;;  %v722_v55 = vadd.f32 %v721_v53, %v1574_v58 }
  0xf3   : > { %v679_v56 = vadd.f32 %v678_v30, %v589_v54 }
  0xf4   : > { %v766_v61 = vmul.f32 %v1550_v32, %v722_v55 }
  0xf5   : > { %v749_v60 = vmul.f32 %v1550_v32, %v679_v56 }
  0xf6   : > { %v802_v3 = vadd.f32 %v1558_v36, %v766_v61 }
  0xf7   : > { %v785_v62 = vadd.f32 %v1558_v36, %v749_v60 }
  0xf8   : > { %v688_v5 = vpop.f32.mrf.mxu1  ;;  %v834_v9 = vmax.f32 %v802_v3, 0.0 }
  0xf9   : > { %v817_v0 = vmax.f32 %v785_v62, 0.0  ;;  %v723_v1 = vpop.f32.mrf.mxu3 }
  0xfa   : > { %v592_v2 = vpop.f32.mrf.mxu0  ;;  %v724_v4 = vadd.f32 %v723_v1, %v634_v7 }
  0xfb   : > { %v844_v6 = vpack.c.bf16 %v817_v0, %v816_v63  ;;  %v682_v8 = vadd.f32 %v681_v40, %v592_v2 }
  0xfc   : > { %v767_v58 = vmul.f32 %v1550_v32, %v724_v4 }
  0xfd   : > { %1305 = vmatmul.msk.bf16.gmra.mxu2 %vm876_vm1, %v844_v6  ;;  %v750_v12 = vmul.f32 %v1550_v32, %v682_v8 }
  0xfe   : > { %v803_v10 = vadd.f32 %v1558_v36, %v767_v58 }
  0xff   : > { %v786_v19 = vadd.f32 %v1558_v36, %v750_v12 }
 0x100   : > { %v835_v11 = vmax.f32 %v803_v10, 0.0  ;;  %v691_v7 = vpop.f32.mrf.mxu1 }
 0x101   : > { %v726_v13 = vpop.f32.mrf.mxu3  ;;  %v818_v23 = vmax.f32 %v786_v19, 0.0 }
 0x102   : > { %v594_v14 = vpop.f32.mrf.mxu0  ;;  %v853_v16 = vpack.c.bf16 %v835_v11, %v834_v9  ;;  %v727_v17 = vadd.f32 %v726_v13, %v1586_v15 }
 0x103   : > { %v684_v18 = vadd.f32 %v683_v48, %v594_v14 }
 0x104   : > { %1314 = vmatmul.msk.bf16.vlgmr.msra.gmra.mxu3 %vm876_vm1, %v853_v16  ;;  %v768_v21 = vmul.f32 %v1550_v32, %v727_v17 }
 0x105   : > { %v751_v20 = vmul.f32 %v1550_v32, %v684_v18 }
 0x106   : > { %v804_v27 = vadd.f32 %v1558_v36, %v768_v21 }
 0x107   : > { %v787_v22 = vadd.f32 %v1558_v36, %v751_v20 }
 0x108   : > { %v693_v29 = vpop.f32.mrf.mxu1  ;;  %v836_v34 = vmax.f32 %v804_v27, 0.0 }
 0x109   : > { %v819_v24 = vmax.f32 %v787_v22, 0.0  ;;  %v728_v25 = vpop.f32.mrf.mxu3 }
 0x10a   : > { %v597_v26 = vpop.f32.mrf.mxu0  ;;  %v729_v15 = vadd.f32 %v728_v25, %v1594_v28 }
 0x10b   : > { %v845_v30 = vpack.c.bf16 %v819_v24, %v818_v23  ;;  %v687_v33 = vadd.f32 %v686_v57, %v597_v26  ;;  %v1651_v26 = vld [vmem:[#allocation2] ss:$0 sm:$0xff] }
 0x10c   : > { %v769_v31 = vmul.f32 %v1550_v32, %v729_v15 }
 0x10d   : > { %1306 = vmatmul.msk.bf16.gmra.mxu2 %vm876_vm1, %v845_v30  ;;  %v752_v40 = vmul.f32 %v1550_v32, %v687_v33 }
 0x10e   : > { %v805_v38 = vadd.f32 %v1558_v36, %v769_v31 }
 0x10f   : > { %v788_v47 = vadd.f32 %v1558_v36, %v752_v40 }
 0x110   : > { %v837_v39 = vmax.f32 %v805_v38, 0.0  ;;  %v696_v28 = vpop.f32.mrf.mxu1 }
 0x111   : > { %v731_v41 = vpop.f32.mrf.mxu3  ;;  %v820_v52 = vmax.f32 %v788_v47, 0.0 }
 0x112   : > { %v599_v42 = vpop.f32.mrf.mxu0  ;;  %v732_v43 = vadd.f32 %v731_v41, %v1598_v35  ;;  %v854_v44 = vpack.c.bf16 %v837_v39, %v836_v34 }
 0x113   : > { %v689_v45 = vadd.f32 %v688_v5, %v599_v42 }
 0x114   : > { %1315 = vmatmul.msk.bf16.gmra.mxu3 %vm876_vm1, %v854_v44  ;;  %v770_v49 = vmul.f32 %v1550_v32, %v732_v43 }
 0x115   : > { %v753_v48 = vmul.f32 %v1550_v32, %v689_v45 }
 0x116   : > { %v806_v56 = vadd.f32 %v1558_v36, %v770_v49 }
 0x117   : > { %v789_v51 = vadd.f32 %v1558_v36, %v753_v48 }
 0x118   : > { %v698_v57 = vpop.f32.mrf.mxu1  ;;  %v838_v62 = vmax.f32 %v806_v56, 0.0 }
 0x119   : > { %v821_v53 = vmax.f32 %v789_v51, 0.0  ;;  %v733_v54 = vpop.f32.mrf.mxu3 }
 0x11a   : > { %v602_v55 = vpop.f32.mrf.mxu0  ;;  %v734_v35 = vadd.f32 %v733_v54, %v1603_v46 }
 0x11b   : > { %v846_v59 = vpack.c.bf16 %v821_v53, %v820_v52  ;;  %v692_v61 = vadd.f32 %v691_v7, %v602_v55 }
 0x11c   : > { %v771_v60 = vmul.f32 %v1550_v32, %v734_v35 }
 0x11d   : > { %1307 = vmatmul.msk.bf16.gmra.mxu2 %vm876_vm1, %v846_v59  ;;  %v754_v1 = vmul.f32 %v1550_v32, %v692_v61 }
 0x11e   : > { %v807_v63 = vadd.f32 %v1558_v36, %v771_v60 }
 0x11f   : > { %v790_v46 = vadd.f32 %v1558_v36, %v754_v1 }
 0x120   : > { %v839_v0 = vmax.f32 %v807_v63, 0.0  ;;  %v701_v5 = vpop.f32.mrf.mxu1 }
 0x121   : > { %v822_v8 = vmax.f32 %v790_v46, 0.0 }
 0x122   : > { %v604_v2 = vpop.f32.mrf.mxu0  ;;  %v855_v3 = vpack.c.bf16 %v839_v0, %v838_v62 }
 0x123   : > { %v694_v4 = vadd.f32 %v693_v29, %v604_v2 }
 0x124   : > { %1316 = vmatmul.msk.bf16.gmra.mxu3 %vm876_vm1, %v855_v3 }
 0x125   : > { %v755_v6 = vmul.f32 %v1550_v32, %v694_v4 }
 0x127   : > { %v791_v58 = vadd.f32 %v1558_v36, %v755_v6 }
 0x128   : > { %v703_v12 = vpop.f32.mrf.mxu1 }
 0x129   : > { %v823_v9 = vmax.f32 %v791_v58, 0.0 }
 0x12a   : > { %v607_v10 = vpop.f32.mrf.mxu0 }
 0x12b   : > { %v847_v11 = vpack.c.bf16 %v823_v9, %v822_v8  ;;  %v697_v13 = vadd.f32 %v696_v28, %v607_v10 }
 0x12d   : > { %1308 = vmatmul.msk.bf16.gmra.mxu2 %vm876_vm1, %v847_v11  ;;  %v756_v14 = vmul.f32 %v1550_v32, %v697_v13 }
 0x12f   : > { %v792_v18 = vadd.f32 %v1558_v36, %v756_v14 }
 0x130   : > { %v706_v19 = vpop.f32.mrf.mxu1 }
 0x131   : > { %v824_v21 = vmax.f32 %v792_v18, 0.0 }
 0x132   : > { %v609_v16 = vpop.f32.mrf.mxu0 }
 0x133   : > { %v699_v17 = vadd.f32 %v698_v57, %v609_v16 }
 0x135   : > { %v757_v7 = vmul.f32 %v1550_v32, %v699_v17 }
 0x137   : > { %v793_v20 = vadd.f32 %v1558_v36, %v757_v7 }
 0x138   : > { %v708_v27 = vpop.f32.mrf.mxu1 }
 0x139   : > { %v825_v22 = vmax.f32 %v793_v20, 0.0 }
 0x13a   : > { %v612_v23 = vpop.f32.mrf.mxu0 }
 0x13b   : > { %v848_v24 = vpack.c.bf16 %v825_v22, %v824_v21  ;;  %v702_v25 = vadd.f32 %v701_v5, %v612_v23 }
 0x13d   : > { %1309 = vmatmul.msk.bf16.gmra.mxu2 %vm876_vm1, %v848_v24  ;;  %v758_v29 = vmul.f32 %v1550_v32, %v702_v25 }
 0x13f   : > { %v794_v34 = vadd.f32 %v1558_v36, %v758_v29 }
 0x140   : > { %v934_v15 = vpop.f32.mrf.mxu2  ;;  %v711_v44 = vpop.f32.mrf.mxu1 }
 0x141   : > { %v935_v30 = vadd.f32 %v1651_v26, %v934_v15  ;;  %v826_v41 = vmax.f32 %v794_v34, 0.0 }
 0x142   : > { %v614_v31 = vpop.f32.mrf.mxu0 }
 0x143   : > { %1015 = vst.msk [vmem:[%s1658_s11] sm:$0xff] %vm1014_vm2, %v935_v30  ;;  %v704_v33 = vadd.f32 %v703_v12, %v614_v31 }
 0x145   : > { %v759_v38 = vmul.f32 %v1550_v32, %v704_v33 }
 0x147   : > { %v795_v39 = vadd.f32 %v1558_v36, %v759_v38 }
 0x148   : > { %v936_v40 = vpop.f32.mrf.mxu2  ;;  %v713_v54 = vpop.f32.mrf.mxu1 }
 0x149   : > { %v827_v42 = vmax.f32 %v795_v39, 0.0  ;;  %v937_v43 = vadd.f32 %v1651_v26, %v936_v40 }
 0x14a   : > { %v617_v45 = vpop.f32.mrf.mxu0 }
 0x14b   : > { %1016 = vst.msk [vmem:[%s1658_s11 + $0x8] sm:$0xff] %vm1014_vm2, %v937_v43  ;;  %v849_v28 = vpack.c.bf16 %v827_v42, %v826_v41  ;;  %v707_v47 = vadd.f32 %v706_v19, %v617_v45 }
 0x14d   : > { %1310 = vmatmul.msk.bf16.gmra.mxu2 %vm876_vm1, %v849_v28  ;;  %v760_v49 = vmul.f32 %v1550_v32, %v707_v47 }
 0x14f   : > { %v796_v55 = vadd.f32 %v1558_v36, %v760_v49 }
 0x150   : > { %v939_v48 = vpop.f32.mrf.mxu2  ;;  %v716_v1 = vpop.f32.mrf.mxu1 }
 0x151   : > { %v940_v51 = vadd.f32 %v1651_v26, %v939_v48  ;;  %v828_v59 = vmax.f32 %v796_v55, 0.0  ;;  %v717_v17 = vadd.f32 %v716_v1, %v1560_v37 }
 0x152   : > { %v619_v52 = vpop.f32.mrf.mxu0 }
 0x153   : > { %1017 = vst.msk [vmem:[%s1658_s11 + $0x10] sm:$0xff] %vm1014_vm2, %v940_v51  ;;  %v709_v53 = vadd.f32 %v708_v27, %v619_v52  ;;  %v764_v19 = vmul.f32 %v1550_v32, %v717_v17 }
 0x155   : > { %v761_v56 = vmul.f32 %v1550_v32, %v709_v53 }
 0x157   : > { %v797_v35 = vadd.f32 %v1558_v36, %v761_v56 }
 0x158   : > { %v941_v57 = vpop.f32.mrf.mxu2  ;;  %v718_v9 = vpop.f32.mrf.mxu1 }
 0x159   : > { %v829_v60 = vmax.f32 %v797_v35, 0.0  ;;  %v942_v61 = vadd.f32 %v1651_v26, %v941_v57  ;;  %v719_v14 = vadd.f32 %v718_v9, %v1568_v50  ;;  %v800_v50 = vadd.f32 %v1558_v36, %v764_v19 }
 0x15a   : > { %v622_v62 = vpop.f32.mrf.mxu0 }
 0x15b   : > { %1018 = vst.msk [vmem:[%s1658_s11 + $0x18] sm:$0xff] %vm1014_vm2, %v942_v61  ;;  %v850_v63 = vpack.c.bf16 %v829_v60, %v828_v59  ;;  %v712_v0 = vadd.f32 %v711_v44, %v622_v62  ;;  %v765_v18 = vmul.f32 %v1550_v32, %v719_v14  ;;  %v832_v23 = vmax.f32 %v800_v50, 0.0 }
 0x15d   : > { %1311 = vmatmul.msk.bf16.gmra.mxu2 %vm876_vm1, %v850_v63  ;;  %v762_v3 = vmul.f32 %v1550_v32, %v712_v0  ;;  %v801_v21 = vadd.f32 %v1558_v36, %v765_v18 }
 0x15f   : > { %v798_v6 = vadd.f32 %v1558_v36, %v762_v3  ;;  %v833_v22 = vmax.f32 %v801_v21, 0.0 }
 0x160   : > { %v944_v2 = vpop.f32.mrf.mxu2 }
 0x161   : > { %v945_v4 = vadd.f32 %v1651_v26, %v944_v2  ;;  %v830_v11 = vmax.f32 %v798_v6, 0.0  ;;  %v852_v25 = vpack.c.bf16 %v833_v22, %v832_v23 }
 0x162   : > { %v624_v5 = vpop.f32.mrf.mxu0 }
 0x163   : > { %1019 = vst.msk [vmem:[%s1658_s11 + $0x20] sm:$0xff] %vm1014_vm2, %v945_v4  ;;  %v714_v46 = vadd.f32 %v713_v54, %v624_v5 }
 0x165   : > { %v763_v58 = vmul.f32 %v1550_v32, %v714_v46 }
 0x167   : > { %v799_v8 = vadd.f32 %v1558_v36, %v763_v58 }
 0x168   : > { %v946_v10 = vpop.f32.mrf.mxu2 }
 0x169   : > { %v831_v12 = vmax.f32 %v799_v8, 0.0  ;;  %v947_v13 = vadd.f32 %v1651_v26, %v946_v10 }
 0x16b   : > { %1020 = vst.msk [vmem:[%s1658_s11 + $0x28] sm:$0xff] %vm1014_vm2, %v947_v13  ;;  %v851_v16 = vpack.c.bf16 %v831_v12, %v830_v11 }
 0x16d   : > { %1312 = vmatmul.msk.bf16.gmra.mxu2 %vm876_vm1, %v851_v16 }
 0x170   : > { %v949_v7 = vpop.f32.mrf.mxu2 }
 0x171   : > { %v950_v20 = vadd.f32 %v1651_v26, %v949_v7 }
 0x173   : > { %1021 = vst.msk [vmem:[%s1658_s11 + $0x30] sm:$0xff] %vm1014_vm2, %v950_v20 }
 0x178   : > { %v951_v37 = vpop.f32.mrf.mxu2 }
 0x179   : > { %v952_v24 = vadd.f32 %v1651_v26, %v951_v37 }
 0x17b   : > { %1022 = vst.msk [vmem:[%s1658_s11 + $0x38] sm:$0xff] %vm1014_vm2, %v952_v24 }
 0x17d   : > { %1313 = vmatmul.msk.bf16.gmra.mxu2 %vm876_vm1, %v852_v25 }
 0x180   : > { %v954_v32 = vpop.f32.mrf.mxu2 }
 0x181   : > { %v955_v27 = vadd.f32 %v1651_v26, %v954_v32 }
 0x183   : > { %1023 = vst.msk [vmem:[%s1658_s11 + $0x40] sm:$0xff] %vm1014_vm2, %v955_v27 }
 0x187   : > { %v999_v15 = vpop.f32.mrf.mxu3 }
 0x188   : > { %v956_v36 = vpop.f32.mrf.mxu2  ;;  %v1000_v29 = vadd.f32 %v1651_v26, %v999_v15 }
 0x189   : > { %v957_v30 = vadd.f32 %v1651_v26, %v956_v36 }
 0x18a   : > { %1041 = vst.msk [vmem:[%s1658_s11 + $0xd0] sm:$0xff] %vm1014_vm2, %v1000_v29 }
 0x18b   : > { %1024 = vst.msk [vmem:[%s1658_s11 + $0x48] sm:$0xff] %vm1014_vm2, %v957_v30 }
 0x18f   : > { %v1001_v31 = vpop.f32.mrf.mxu3 }
 0x190   : > { %v959_v33 = vpop.f32.mrf.mxu2  ;;  %v1002_v34 = vadd.f32 %v1651_v26, %v1001_v31 }
 0x191   : > { %v960_v38 = vadd.f32 %v1651_v26, %v959_v33 }
 0x192   : > { %1042 = vst.msk [vmem:[%s1658_s11 + $0xd8] sm:$0xff] %vm1014_vm2, %v1002_v34 }
 0x193   : > { %1025 = vst.msk [vmem:[%s1658_s11 + $0x50] sm:$0xff] %vm1014_vm2, %v960_v38 }
 0x197   : > { %v1004_v39 = vpop.f32.mrf.mxu3 }
 0x198   : > { %v961_v40 = vpop.f32.mrf.mxu2  ;;  %v1005_v41 = vadd.f32 %v1651_v26, %v1004_v39 }
 0x199   : > { %v962_v42 = vadd.f32 %v1651_v26, %v961_v40 }
 0x19a   : > { %1043 = vst.msk [vmem:[%s1658_s11 + $0xe0] sm:$0xff] %vm1014_vm2, %v1005_v41 }
 0x19b   : > { %1026 = vst.msk [vmem:[%s1658_s11 + $0x58] sm:$0xff] %vm1014_vm2, %v962_v42 }
 0x19f   : > { %v1006_v43 = vpop.f32.mrf.mxu3 }
 0x1a0   : > { %v964_v44 = vpop.f32.mrf.mxu2  ;;  %v1007_v45 = vadd.f32 %v1651_v26, %v1006_v43 }
 0x1a1   : > { %v965_v28 = vadd.f32 %v1651_v26, %v964_v44 }
 0x1a2   : > { %1044 = vst.msk [vmem:[%s1658_s11 + $0xe8] sm:$0xff] %vm1014_vm2, %v1007_v45 }
 0x1a3   : > { %1027 = vst.msk [vmem:[%s1658_s11 + $0x60] sm:$0xff] %vm1014_vm2, %v965_v28 }
 0x1a7   : > { %v1009_v47 = vpop.f32.mrf.mxu3 }
 0x1a8   : > { %v966_v48 = vpop.f32.mrf.mxu2  ;;  %v1010_v49 = vadd.f32 %v1651_v26, %v1009_v47 }
 0x1a9   : > { %v967_v51 = vadd.f32 %v1651_v26, %v966_v48 }
 0x1aa   : > { %1045 = vst.msk [vmem:[%s1658_s11 + $0xf0] sm:$0xff] %vm1014_vm2, %v1010_v49 }
 0x1ab   : > { %1028 = vst.msk [vmem:[%s1658_s11 + $0x68] sm:$0xff] %vm1014_vm2, %v967_v51 }
 0x1af   : > { %v1011_v52 = vpop.f32.mrf.mxu3 }
 0x1b0   : > { %v969_v53 = vpop.f32.mrf.mxu2  ;;  %v1012_v54 = vadd.f32 %v1651_v26, %v1011_v52 }
 0x1b1   : > { %v970_v55 = vadd.f32 %v1651_v26, %v969_v53 }
 0x1b2   : > { %1046 = vst.msk [vmem:[%s1658_s11 + $0xf8] sm:$0xff] %vm1014_vm2, %v1012_v54 }
 0x1b3   : > { %1029 = vst.msk [vmem:[%s1658_s11 + $0x70] sm:$0xff] %vm1014_vm2, %v970_v55 }
 0x1b8   : > { %v971_v56 = vpop.f32.mrf.mxu2 }
 0x1b9   : > { %v972_v35 = vadd.f32 %v1651_v26, %v971_v56 }
 0x1bb   : > { %1030 = vst.msk [vmem:[%s1658_s11 + $0x78] sm:$0xff] %vm1014_vm2, %v972_v35 }
 0x1c0   : > { %v974_v57 = vpop.f32.mrf.mxu2 }
 0x1c1   : > { %v975_v59 = vadd.f32 %v1651_v26, %v974_v57 }
 0x1c3   : > { %1031 = vst.msk [vmem:[%s1658_s11 + $0x80] sm:$0xff] %vm1014_vm2, %v975_v59 }
 0x1c8   : > { %v976_v60 = vpop.f32.mrf.mxu2 }
 0x1c9   : > { %v977_v61 = vadd.f32 %v1651_v26, %v976_v60 }
 0x1cb   : > { %1032 = vst.msk [vmem:[%s1658_s11 + $0x88] sm:$0xff] %vm1014_vm2, %v977_v61 }
 0x1d0   : > { %v979_v62 = vpop.f32.mrf.mxu2 }
 0x1d1   : > { %v980_v63 = vadd.f32 %v1651_v26, %v979_v62 }
 0x1d3   : > { %1033 = vst.msk [vmem:[%s1658_s11 + $0x90] sm:$0xff] %vm1014_vm2, %v980_v63 }
 0x1d8   : > { %v981_v0 = vpop.f32.mrf.mxu2 }
 0x1d9   : > { %v982_v1 = vadd.f32 %v1651_v26, %v981_v0 }
 0x1db   : > { %1034 = vst.msk [vmem:[%s1658_s11 + $0x98] sm:$0xff] %vm1014_vm2, %v982_v1 }
 0x1e0   : > { %v984_v2 = vpop.f32.mrf.mxu2 }
 0x1e1   : > { %v985_v3 = vadd.f32 %v1651_v26, %v984_v2 }
 0x1e3   : > { %1035 = vst.msk [vmem:[%s1658_s11 + $0xa0] sm:$0xff] %vm1014_vm2, %v985_v3 }
 0x1e8   : > { %v986_v4 = vpop.f32.mrf.mxu2 }
 0x1e9   : > { %v987_v5 = vadd.f32 %v1651_v26, %v986_v4 }
 0x1eb   : > { %1036 = vst.msk [vmem:[%s1658_s11 + $0xa8] sm:$0xff] %vm1014_vm2, %v987_v5 }
 0x1f0   : > { %v989_v46 = vpop.f32.mrf.mxu2 }
 0x1f1   : > { %v990_v6 = vadd.f32 %v1651_v26, %v989_v46 }
 0x1f3   : > { %1037 = vst.msk [vmem:[%s1658_s11 + $0xb0] sm:$0xff] %vm1014_vm2, %v990_v6 }
 0x1f8   : > { %v991_v58 = vpop.f32.mrf.mxu2 }
 0x1f9   : > { %v992_v8 = vadd.f32 %v1651_v26, %v991_v58 }
 0x1fb   : > { %1038 = vst.msk [vmem:[%s1658_s11 + $0xb8] sm:$0xff] %vm1014_vm2, %v992_v8 }
 0x200   : > { %v994_v9 = vpop.f32.mrf.mxu2 }
 0x201   : > { %v995_v10 = vadd.f32 %v1651_v26, %v994_v9 }
 0x203   : > { %1039 = vst.msk [vmem:[%s1658_s11 + $0xc0] sm:$0xff] %vm1014_vm2, %v995_v10 }
 0x208   : > { %v996_v11 = vpop.f32.mrf.mxu2 }
 0x209   : > { %v997_v12 = vadd.f32 %v1651_v26, %v996_v11 }
 0x20b   : > { %1040 = vst.msk [vmem:[%s1658_s11 + $0xc8] sm:$0xff] %vm1014_vm2, %v997_v12 }
 0x20c PF: > { %s18_s23 = sadd.s32 1, %s1391_s23  }
 0x20d   : > { %p15_p4 = scmp.ge.s32.totalorder %s18_s23, 4  }
 0x20f   :  { %17 = sbr.rel (!%p15_p4) target bundleno = 3 (0x3), region = 74 }

</bundles_post_ra>
